<compile_context>
chip_gen: v7x
topology: tpu7x:2x2x1
jax: 0.10.0
libtpu: 0.0.40
codegen_flags: <defaults>
</compile_context>

<pallas_src>
import functools
import math

import jax
import jax.numpy as jnp
from jax import lax
from jax.experimental import pallas as pl
from jax.experimental.pallas import tpu as pltpu

F32 = jnp.float32
BF16 = jnp.bfloat16
EPS = 1e-5

# ----------------------- small model hyper-parameters -----------------------
B = 2
T_WAVE = 3200
C_FEAT = 128                     # conv feature channels  (512 in real WavLM)
D_ENC = 128                      # encoder embed dim      (1024 in real WavLM)
N_HEADS = 4                      # (16 in real WavLM)
FFN_DIM = 256                    # (4096 in real WavLM)
N_LAYERS = 2                     # (12/24 in real WavLM)
K_POS = 8                        # pos_conv kernel        (128 in real WavLM)
POS_GROUPS = 4                   # pos_conv groups        (16  in real WavLM)

CONV_LAYERS = [(1, C_FEAT, 10, 5)] + [(C_FEAT, C_FEAT, 3, 2)] * 4 + \
              [(C_FEAT, C_FEAT, 2, 2)] * 2

ROW_TILE_MAX = 256               # row tile for the flattened (rows, C) kernels


# ------------------------------ kernel helpers -------------------------------
def _layernorm(x, gamma, beta):
    m = jnp.mean(x, axis=-1, keepdims=True)
    c = x - m
    v = jnp.mean(c * c, axis=-1, keepdims=True)
    return c * lax.rsqrt(v + EPS) * gamma + beta


_SQRT_2_OVER_PI = math.sqrt(2.0 / math.pi)


def _gelu(x):
    # TODO(synk): tanh-approx GELU (runs on the EUP slot); nn.GELU default is
    # exact erf, so this is ~1e-3-accurate rather than bit-identical.
    return 0.5 * x * (1.0 + jnp.tanh(_SQRT_2_OVER_PI * (x + 0.044715 * x * x * x)))


# --------------------------------- kernels -----------------------------------
def conv_block_kernel(p_ref, w_ref, g_ref, b_ref, o_ref):
    """Conv1d (im2col matmul, no bias, bf16 operands) -> fp32 LN(ch) -> GELU."""
    y = jnp.dot(p_ref[...], w_ref[...], preferred_element_type=jnp.float32)
    y = _layernorm(y, g_ref[...], b_ref[...])
    o_ref[...] = _gelu(y)


def conv_block_proj_kernel(p_ref, w_ref, g_ref, b_ref,
                           pg_ref, pb_ref, pw_ref, pbias_ref, o_ref):
    """Last conv block fused with WavLM.layer_norm + post_extract_proj."""
    y = jnp.dot(p_ref[...], w_ref[...], preferred_element_type=jnp.float32)
    y = _gelu(_layernorm(y, g_ref[...], b_ref[...]))
    y = _layernorm(y, pg_ref[...], pb_ref[...])
    o_ref[...] = jnp.dot(y.astype(BF16), pw_ref[...],
                         preferred_element_type=jnp.float32) + pbias_ref[...]


def posconv_add_ln_kernel(xpad_ref, x_ref, w_ref, b_ref, g_ref, beta_ref, o_ref,
                          *, K, T, G):
    """Grouped pos_conv (+bias) + SamePad + GELU, then LN(x + conv)  (per batch).

    Weights arrive compact as (K, G, D/G, D/G); no block-diagonal expansion.
    """
    xp = xpad_ref[0]                                      # (T + 2*pad, D) f32
    D = xp.shape[-1]
    dg = D // G
    # group-major layout (G, T+2p, dg) built from lane slices (no transposes)
    xg = jnp.stack([xp[:, g * dg:(g + 1) * dg] for g in range(G)], axis=0)
    acc = jnp.zeros((G, T, dg), jnp.float32)
    # TODO(synk): at real K=128 make K a grid reduction axis (VMEM accumulator)
    # or an in-kernel im2col (single matmul, contraction K*D/G) instead of a
    # static unrolled loop.
    for k in range(K):
        acc = acc + lax.dot_general(
            xg[:, k:k + T, :].astype(BF16), w_ref[k],
            (((2,), (1,)), ((0,), (0,))),
            preferred_element_type=jnp.float32)           # (G, T, dg)
    conv = jnp.concatenate([acc[g] for g in range(G)], axis=-1)     # (T, D)
    y = _gelu(conv + b_ref[...])
    o_ref[0] = _layernorm(x_ref[0] + y, g_ref[...], beta_ref[...])


def encoder_layer_kernel(x_ref, wq, bq, wk, bk, wv, bv, wo, bo, ag, ab,
                         w1, b1, w2, b2, fg, fb, o_ref, *, H, scale):
    """Fused post-LN transformer layer (per batch):
       y = LN(x + out_proj(MHA(x)));  out = LN(y + fc2(gelu(fc1(y))))."""
    xs = x_ref[0]                                         # (T, D) f32
    T, D = xs.shape
    hd = D // H
    xb = xs.astype(BF16)

    q = jnp.dot(xb, wq[...], preferred_element_type=jnp.float32) + bq[...]
    k = jnp.dot(xb, wk[...], preferred_element_type=jnp.float32) + bk[...]
    v = jnp.dot(xb, wv[...], preferred_element_type=jnp.float32) + bv[...]
    q = q * scale

    # head-major (H, T, hd) via lane slices stacked on the leading axis
    qh = jnp.stack([q[:, h * hd:(h + 1) * hd] for h in range(H)], axis=0).astype(BF16)
    kh = jnp.stack([k[:, h * hd:(h + 1) * hd] for h in range(H)], axis=0).astype(BF16)
    vh = jnp.stack([v[:, h * hd:(h + 1) * hd] for h in range(H)], axis=0).astype(BF16)

    # batched-over-heads attention (no per-head matmul loop)
    s = lax.dot_general(qh, kh, (((2,), (2,)), ((0,), (0,))),
                        preferred_element_type=jnp.float32)          # (H, T, T)
    s = s - jnp.max(s, axis=-1, keepdims=True)
    p = jnp.exp(s)
    p = p * pl.reciprocal(jnp.sum(p, axis=-1, keepdims=True), approx=True)
    ctx = lax.dot_general(p.astype(BF16), vh, (((2,), (1,)), ((0,), (0,))),
                          preferred_element_type=jnp.float32)        # (H, T, hd)

    # out-proj without lane re-concatenation: head-batched dots summed over H
    proj = lax.dot_general(ctx.astype(BF16), wo[...],
                           (((2,), (1,)), ((0,), (0,))),
                           preferred_element_type=jnp.float32)       # (H, T, D)
    attn_out = jnp.sum(proj, axis=0) + bo[...]

    y = _layernorm(xs + attn_out, ag[...], ab[...])                  # post-LN attn

    h1 = _gelu(jnp.dot(y.astype(BF16), w1[...],
                       preferred_element_type=jnp.float32) + b1[...])
    z = jnp.dot(h1.astype(BF16), w2[...],
                preferred_element_type=jnp.float32) + b2[...]
    o_ref[0] = _layernorm(y + z, fg[...], fb[...])                   # post-LN FFN


# ------------------------------ glue / wrappers -------------------------------
def _rep_spec(arr):
    """Full-array BlockSpec replicated across a 1-D grid."""
    nd = arr.ndim
    return pl.BlockSpec(arr.shape, lambda i, _nd=nd: (0,) * _nd)


def _row_tile(n):
    if n >= ROW_TILE_MAX:
        return ROW_TILE_MAX
    return ((n + 15) // 16) * 16


_PARALLEL = pltpu.CompilerParams(dimension_semantics=("parallel",))


def prepare_params(params):
    """PyTorch-layout weights -> kernel-ready layouts (transposed, bf16 MXU operands)."""
    conv = []
    for p in params["conv"]:
        cout, cin, kern = p["w"].shape
        conv.append(dict(w_t=p["w"].reshape(cout, cin * kern).T.astype(BF16),
                         ln_g=p["ln_g"], ln_b=p["ln_b"]))
    enc = params["enc"]
    dg = D_ENC // POS_GROUPS
    hd = D_ENC // N_HEADS
    # grouped pos_conv weight (D, D/G, K) -> (K, G, D/G_in, D/G_out), compact
    pos_w = enc["pos_w"].reshape(POS_GROUPS, dg, dg, K_POS)          # (g, out, in, K)
    pos_w_g = jnp.transpose(pos_w, (3, 0, 2, 1)).astype(BF16)        # (K, g, in, out)
    layers = []
    for lp in enc["layers"]:
        layers.append(dict(
            wq_t=lp["wq"].T.astype(BF16), bq=lp["bq"],
            wk_t=lp["wk"].T.astype(BF16), bk=lp["bk"],
            wv_t=lp["wv"].T.astype(BF16), bv=lp["bv"],
            wo_h=lp["wo"].T.reshape(N_HEADS, hd, D_ENC).astype(BF16), bo=lp["bo"],
            attn_ln_g=lp["attn_ln_g"], attn_ln_b=lp["attn_ln_b"],
            w1_t=lp["w1"].T.astype(BF16), b1=lp["b1"],
            w2_t=lp["w2"].T.astype(BF16), b2=lp["b2"],
            final_ln_g=lp["final_ln_g"], final_ln_b=lp["final_ln_b"]))
    return dict(conv=conv,
                post_ln_g=params["post_ln_g"], post_ln_b=params["post_ln_b"],
                proj_w_t=params["proj_w"].T.astype(BF16), proj_b=params["proj_b"],
                enc=dict(pos_w_g=pos_w_g, pos_b=enc["pos_b"],
                         ln_g=enc["ln_g"], ln_b=enc["ln_b"], layers=layers))


def conv_feature_extractor(source, kp):
    """7 conv blocks; last block fused with LayerNorm + post_extract_proj."""
    feat = source[:, :, None].astype(F32)                 # (B, T, 1)
    n_layers = len(CONV_LAYERS)
    for li, ((cin, cout, kern, stride), p) in enumerate(zip(CONV_LAYERS, kp["conv"])):
        b, tcur, _ = feat.shape
        fout = (tcur - kern) // stride + 1
        # TODO(synk): host-side im2col; an in-kernel strided gather would avoid
        # materializing `kern` shifted copies of the feature map in HBM.
        patches = jnp.stack([feat[:, k:k + stride * fout:stride, :]
                             for k in range(kern)], axis=-1)         # (B,fout,cin,k)
        patches = patches.reshape(b * fout, cin * kern).astype(BF16)
        rows = b * fout
        tile = _row_tile(rows)
        rows_pad = pl.cdiv(rows, tile) * tile
        if rows_pad != rows:
            patches = jnp.pad(patches, ((0, rows_pad - rows), (0, 0)))
        grid = (rows_pad // tile,)
        patch_spec = pl.BlockSpec((tile, cin * kern), lambda i: (i, 0))
        if li < n_layers - 1:
            out = pl.pallas_call(
                conv_block_kernel,
                grid=grid,
                in_specs=[patch_spec, _rep_spec(p["w_t"]),
                          _rep_spec(p["ln_g"]), _rep_spec(p["ln_b"])],
                out_specs=pl.BlockSpec((tile, cout), lambda i: (i, 0)),
                out_shape=jax.ShapeDtypeStruct((rows_pad, cout), F32),
                compiler_params=_PARALLEL,
            )(patches, p["w_t"], p["ln_g"], p["ln_b"])
            feat = out[:rows].reshape(b, fout, cout)
        else:
            out = pl.pallas_call(
                conv_block_proj_kernel,
                grid=grid,
                in_specs=[patch_spec, _rep_spec(p["w_t"]),
                          _rep_spec(p["ln_g"]), _rep_spec(p["ln_b"]),
                          _rep_spec(kp["post_ln_g"]), _rep_spec(kp["post_ln_b"]),
                          _rep_spec(kp["proj_w_t"]), _rep_spec(kp["proj_b"])],
                out_specs=pl.BlockSpec((tile, D_ENC), lambda i: (i, 0)),
                out_shape=jax.ShapeDtypeStruct((rows_pad, D_ENC), F32),
                compiler_params=_PARALLEL,
            )(patches, p["w_t"], p["ln_g"], p["ln_b"],
              kp["post_ln_g"], kp["post_ln_b"], kp["proj_w_t"], kp["proj_b"])
            feat = out[:rows].reshape(b, fout, D_ENC)
    return feat                                            # (B, Frame, D_ENC)


def transformer_layer(x, lp):
    b, t, d = x.shape
    hd = d // N_HEADS
    args = [lp["wq_t"], lp["bq"], lp["wk_t"], lp["bk"], lp["wv_t"], lp["bv"],
            lp["wo_h"], lp["bo"], lp["attn_ln_g"], lp["attn_ln_b"],
            lp["w1_t"], lp["b1"], lp["w2_t"], lp["b2"],
            lp["final_ln_g"], lp["final_ln_b"]]
    return pl.pallas_call(
        functools.partial(encoder_layer_kernel, H=N_HEADS, scale=hd ** -0.5),
        grid=(b,),
        in_specs=[pl.BlockSpec((1, t, d), lambda i: (i, 0, 0))] +
                 [_rep_spec(a) for a in args],
        out_specs=pl.BlockSpec((1, t, d), lambda i: (i, 0, 0)),
        out_shape=jax.ShapeDtypeStruct((b, t, d), F32),
        compiler_params=_PARALLEL,
    )(x, *args)


def encoder_forward(x, p):
    b, t, d = x.shape
    pad = K_POS // 2
    xpad = jnp.pad(x, ((0, 0), (pad, pad), (0, 0)))
    rep_args = [p["pos_w_g"], p["pos_b"], p["ln_g"], p["ln_b"]]
    # fused: x = LayerNorm(x + GELU(pos_conv(x) + bias))   (layer_norm_first=False)
    y = pl.pallas_call(
        functools.partial(posconv_add_ln_kernel, K=K_POS, T=t, G=POS_GROUPS),
        grid=(b,),
        in_specs=[pl.BlockSpec((1, t + 2 * pad, d), lambda i: (i, 0, 0)),
                  pl.BlockSpec((1, t, d), lambda i: (i, 0, 0))] +
                 [_rep_spec(a) for a in rep_args],
        out_specs=pl.BlockSpec((1, t, d), lambda i: (i, 0, 0)),
        out_shape=jax.ShapeDtypeStruct((b, t, d), F32),
        compiler_params=_PARALLEL,
    )(xpad, x, *rep_args)
    for lp in p["layers"]:
        y = transformer_layer(y, lp)
    return y


def wavlm_extract_features(source, params):
    kp = prepare_params(params)
    # conv extractor -> fp32 LN -> GELU ... -> LayerNorm -> post_extract_proj
    features = conv_feature_extractor(source, kp)          # (B, Frame, D_ENC)
    x = encoder_forward(features, kp["enc"])
    # layer_results is [] for tgt_layer=None (mirrors the PyTorch module)
    return features, x, []


# ----------------------------- parameter init --------------------------------
def _normal(key, shape, scale=0.02):
    return (scale * jax.random.normal(key, shape)).astype(F32)


def init_params(key):
    ks = iter(jax.random.split(key, 256))
    nk = lambda: next(ks)
    conv = []
    for cin, cout, kern, _ in CONV_LAYERS:
        conv.append(dict(w=_normal(nk(), (cout, cin, kern)),
                         ln_g=jnp.ones((1, cout), F32),
                         ln_b=jnp.zeros((1, cout), F32)))
    layers = []
    for _ in range(N_LAYERS):
        layers.append(dict(
            wq=_normal(nk(), (D_ENC, D_ENC)), bq=_normal(nk(), (1, D_ENC)),
            wk=_normal(nk(), (D_ENC, D_ENC)), bk=jnp.zeros((1, D_ENC), F32),
            wv=_normal(nk(), (D_ENC, D_ENC)), bv=_normal(nk(), (1, D_ENC)),
            wo=_normal(nk(), (D_ENC, D_ENC)), bo=_normal(nk(), (1, D_ENC)),
            attn_ln_g=jnp.ones((1, D_ENC), F32), attn_ln_b=jnp.zeros((1, D_ENC), F32),
            w1=_normal(nk(), (FFN_DIM, D_ENC)), b1=_normal(nk(), (1, FFN_DIM)),
            w2=_normal(nk(), (D_ENC, FFN_DIM)), b2=_normal(nk(), (1, D_ENC)),
            final_ln_g=jnp.ones((1, D_ENC), F32), final_ln_b=jnp.zeros((1, D_ENC), F32),
        ))
    # TODO(synk): weight_norm(pos_conv) is a reparametrization; at init the
    # effective weight equals the underlying weight, so we materialize it
    # directly (loading trained weights requires g*v/||v||).
    pos_std = math.sqrt(4.0 / (K_POS * D_ENC))
    return dict(
        conv=conv,
        post_ln_g=jnp.ones((1, C_FEAT), F32),
        post_ln_b=jnp.zeros((1, C_FEAT), F32),
        proj_w=_normal(nk(), (D_ENC, C_FEAT)),
        proj_b=_normal(nk(), (1, D_ENC)),
        enc=dict(
            pos_w=_normal(nk(), (D_ENC, D_ENC // POS_GROUPS, K_POS), scale=pos_std),
            pos_b=jnp.zeros((1, D_ENC), F32),
            ln_g=jnp.ones((1, D_ENC), F32),
            ln_b=jnp.zeros((1, D_ENC), F32),
            layers=layers,
        ),
    )


# ----------------------------------- main -------------------------------------
if __name__ == "__main__":
    key = jax.random.PRNGKey(0)
    pkey, dkey = jax.random.split(key)
    params = init_params(pkey)
    source = jax.random.normal(dkey, (B, T_WAVE), dtype=F32)

    extract = jax.jit(wavlm_extract_features)
    features, x, layer_results = extract(source, params)
    jax.block_until_ready((features, x))

    n_frames = 9  # 3200 wave samples through strides 5,2,2,2,2,2,2
    assert features.shape == (B, n_frames, D_ENC), features.shape
    assert x.shape == (B, n_frames, D_ENC), x.shape
    assert layer_results == []
    assert bool(jnp.all(jnp.isfinite(features))) and bool(jnp.all(jnp.isfinite(x)))
    print("KERNEL_OK")
</pallas_src>

<mosaic_0001>
module attributes {stable_mosaic.version = 11 : i64} {
  func.func @conv_block_kernel(%arg0: i32, %arg1: memref<256x10xbf16, #tpu.memory_space<vmem>>, %arg2: memref<10x128xbf16, #tpu.memory_space<vmem>>, %arg3: memref<1x128xf32, #tpu.memory_space<vmem>>, %arg4: memref<1x128xf32, #tpu.memory_space<vmem>>, %arg5: memref<256x128xf32, #tpu.memory_space<vmem>>) attributes {dimension_semantics = [#tpu.dimension_semantics<parallel>], iteration_bounds = array<i64: 5>, scalar_prefetch = 0 : i64, scratch_operands = 0 : i64, tpu.core_type = #tpu.core_type<tc>, window_params = [{transform_indices = @transform_0, window_bounds = array<i64: 256, 10>}, {pipeline_mode = #tpu.pipeline_mode<synchronous>, transform_indices = @transform_1, window_bounds = array<i64: 10, 128>}, {pipeline_mode = #tpu.pipeline_mode<synchronous>, transform_indices = @transform_2, window_bounds = array<i64: 1, 128>}, {pipeline_mode = #tpu.pipeline_mode<synchronous>, transform_indices = @transform_3, window_bounds = array<i64: 1, 128>}, {transform_indices = @transform_4, window_bounds = array<i64: 256, 128>}]} {
    %c0 = arith.constant 0 : index
    %c0_0 = arith.constant 0 : index
    %0 = vector.load %arg1[%c0, %c0_0] : memref<256x10xbf16, #tpu.memory_space<vmem>>, vector<256x10xbf16>
    %c0_1 = arith.constant 0 : index
    %c0_2 = arith.constant 0 : index
    %1 = vector.load %arg2[%c0_1, %c0_2] : memref<10x128xbf16, #tpu.memory_space<vmem>>, vector<10x128xbf16>
    %cst = arith.constant dense<0.000000e+00> : vector<256x128xf32>
    %2 = tpu.matmul %0, %1, %cst {dimension_numbers = #tpu.dot_dimension_numbers<[1], [0], [0], [1], [0, 0, 1, 1], [], []>} : vector<256x10xbf16>, vector<10x128xbf16>, vector<256x128xf32> -> vector<256x128xf32>
    %c0_3 = arith.constant 0 : index
    %c0_4 = arith.constant 0 : index
    %3 = vector.load %arg3[%c0_3, %c0_4] : memref<1x128xf32, #tpu.memory_space<vmem>>, vector<1x128xf32>
    %c0_5 = arith.constant 0 : index
    %c0_6 = arith.constant 0 : index
    %4 = vector.load %arg4[%c0_5, %c0_6] : memref<1x128xf32, #tpu.memory_space<vmem>>, vector<1x128xf32>
    %cst_7 = arith.constant dense<0.000000e+00> : vector<256xf32>
    %5 = vector.multi_reduction <add>, %2, %cst_7 [1] : vector<256x128xf32> to vector<256xf32>
    %6 = vector.shape_cast %5 : vector<256xf32> to vector<256x1xf32>
    %cst_8 = arith.constant 1.280000e+02 : f32
    %7 = vector.broadcast %cst_8 : f32 to vector<256x1xf32>
    %8 = arith.divf %6, %7 : vector<256x1xf32>
    %9 = vector.broadcast %8 : vector<256x1xf32> to vector<256x128xf32>
    %10 = arith.subf %2, %9 : vector<256x128xf32>
    %11 = arith.mulf %10, %10 : vector<256x128xf32>
    %cst_9 = arith.constant dense<0.000000e+00> : vector<256xf32>
    %12 = vector.multi_reduction <add>, %11, %cst_9 [1] : vector<256x128xf32> to vector<256xf32>
    %13 = vector.shape_cast %12 : vector<256xf32> to vector<256x1xf32>
    %cst_10 = arith.constant 1.280000e+02 : f32
    %14 = vector.broadcast %cst_10 : f32 to vector<256x1xf32>
    %15 = arith.divf %13, %14 : vector<256x1xf32>
    %cst_11 = arith.constant 9.99999974E-6 : f32
    %16 = vector.broadcast %cst_11 : f32 to vector<256x1xf32>
    %17 = arith.addf %15, %16 : vector<256x1xf32>
    %18 = math.rsqrt %17 : vector<256x1xf32>
    %19 = vector.broadcast %18 : vector<256x1xf32> to vector<256x128xf32>
    %20 = arith.mulf %10, %19 : vector<256x128xf32>
    %21 = vector.broadcast %3 : vector<1x128xf32> to vector<256x128xf32>
    %22 = arith.mulf %20, %21 : vector<256x128xf32>
    %23 = vector.broadcast %4 : vector<1x128xf32> to vector<256x128xf32>
    %24 = arith.addf %22, %23 : vector<256x128xf32>
    %cst_12 = arith.constant 5.000000e-01 : f32
    %25 = vector.broadcast %cst_12 : f32 to vector<256x128xf32>
    %26 = arith.mulf %25, %24 : vector<256x128xf32>
    %cst_13 = arith.constant 4.471500e-02 : f32
    %27 = vector.broadcast %cst_13 : f32 to vector<256x128xf32>
    %28 = arith.mulf %27, %24 : vector<256x128xf32>
    %29 = arith.mulf %28, %24 : vector<256x128xf32>
    %30 = arith.mulf %29, %24 : vector<256x128xf32>
    %31 = arith.addf %24, %30 : vector<256x128xf32>
    %cst_14 = arith.constant 0.797884583 : f32
    %32 = vector.broadcast %cst_14 : f32 to vector<256x128xf32>
    %33 = arith.mulf %32, %31 : vector<256x128xf32>
    %34 = math.tanh %33 : vector<256x128xf32>
    %cst_15 = arith.constant 1.000000e+00 : f32
    %35 = vector.broadcast %cst_15 : f32 to vector<256x128xf32>
    %36 = arith.addf %35, %34 : vector<256x128xf32>
    %37 = arith.mulf %26, %36 : vector<256x128xf32>
    %c0_16 = arith.constant 0 : index
    %c0_17 = arith.constant 0 : index
    %38 = vector.load %arg5[%c0_16, %c0_17] : memref<256x128xf32, #tpu.memory_space<vmem>>, vector<256x128xf32>
    tpu.vector_store %arg5[%c0_16, %c0_17], %37 {strides = array<i32>} : memref<256x128xf32, #tpu.memory_space<vmem>>, vector<256x128xf32>,
    return
  }
  func.func @transform_0(%arg0: i32) -> (i32, i32) {
    %c0_i32 = arith.constant 0 : i32
    %c0_i32_0 = arith.constant 0 : i32
    return %arg0, %c0_i32 : i32, i32
  }
  func.func @transform_1(%arg0: i32) -> (i32, i32) {
    %c0_i32 = arith.constant 0 : i32
    %c0_i32_0 = arith.constant 0 : i32
    %c0_i32_1 = arith.constant 0 : i32
    return %c0_i32, %c0_i32_0 : i32, i32
  }
  func.func @transform_2(%arg0: i32) -> (i32, i32) {
    %c0_i32 = arith.constant 0 : i32
    %c0_i32_0 = arith.constant 0 : i32
    %c0_i32_1 = arith.constant 0 : i32
    return %c0_i32, %c0_i32_0 : i32, i32
  }
  func.func @transform_3(%arg0: i32) -> (i32, i32) {
    %c0_i32 = arith.constant 0 : i32
    %c0_i32_0 = arith.constant 0 : i32
    %c0_i32_1 = arith.constant 0 : i32
    return %c0_i32, %c0_i32_0 : i32, i32
  }
  func.func @transform_4(%arg0: i32) -> (i32, i32) {
    %c0_i32 = arith.constant 0 : i32
    %c0_i32_0 = arith.constant 0 : i32
    return %arg0, %c0_i32 : i32, i32
  }
}

module attributes {stable_mosaic.version = 11 : i64} {
  func.func @conv_block_kernel(%arg0: i32, %arg1: memref<256x384xbf16, #tpu.memory_space<vmem>>, %arg2: memref<384x128xbf16, #tpu.memory_space<vmem>>, %arg3: memref<1x128xf32, #tpu.memory_space<vmem>>, %arg4: memref<1x128xf32, #tpu.memory_space<vmem>>, %arg5: memref<256x128xf32, #tpu.memory_space<vmem>>) attributes {dimension_semantics = [#tpu.dimension_semantics<parallel>], iteration_bounds = array<i64: 3>, scalar_prefetch = 0 : i64, scratch_operands = 0 : i64, tpu.core_type = #tpu.core_type<tc>, window_params = [{transform_indices = @transform_0, window_bounds = array<i64: 256, 384>}, {pipeline_mode = #tpu.pipeline_mode<synchronous>, transform_indices = @transform_1, window_bounds = array<i64: 384, 128>}, {pipeline_mode = #tpu.pipeline_mode<synchronous>, transform_indices = @transform_2, window_bounds = array<i64: 1, 128>}, {pipeline_mode = #tpu.pipeline_mode<synchronous>, transform_indices = @transform_3, window_bounds = array<i64: 1, 128>}, {transform_indices = @transform_4, window_bounds = array<i64: 256, 128>}]} {
    %c0 = arith.constant 0 : index
    %c0_0 = arith.constant 0 : index
    %0 = vector.load %arg1[%c0, %c0_0] : memref<256x384xbf16, #tpu.memory_space<vmem>>, vector<256x384xbf16>
    %c0_1 = arith.constant 0 : index
    %c0_2 = arith.constant 0 : index
    %1 = vector.load %arg2[%c0_1, %c0_2] : memref<384x128xbf16, #tpu.memory_space<vmem>>, vector<384x128xbf16>
    %cst = arith.constant dense<0.000000e+00> : vector<256x128xf32>
    %2 = tpu.matmul %0, %1, %cst {dimension_numbers = #tpu.dot_dimension_numbers<[1], [0], [0], [1], [0, 0, 1, 1], [], []>} : vector<256x384xbf16>, vector<384x128xbf16>, vector<256x128xf32> -> vector<256x128xf32>
    %c0_3 = arith.constant 0 : index
    %c0_4 = arith.constant 0 : index
    %3 = vector.load %arg3[%c0_3, %c0_4] : memref<1x128xf32, #tpu.memory_space<vmem>>, vector<1x128xf32>
    %c0_5 = arith.constant 0 : index
    %c0_6 = arith.constant 0 : index
    %4 = vector.load %arg4[%c0_5, %c0_6] : memref<1x128xf32, #tpu.memory_space<vmem>>, vector<1x128xf32>
    %cst_7 = arith.constant dense<0.000000e+00> : vector<256xf32>
    %5 = vector.multi_reduction <add>, %2, %cst_7 [1] : vector<256x128xf32> to vector<256xf32>
    %6 = vector.shape_cast %5 : vector<256xf32> to vector<256x1xf32>
    %cst_8 = arith.constant 1.280000e+02 : f32
    %7 = vector.broadcast %cst_8 : f32 to vector<256x1xf32>
    %8 = arith.divf %6, %7 : vector<256x1xf32>
    %9 = vector.broadcast %8 : vector<256x1xf32> to vector<256x128xf32>
    %10 = arith.subf %2, %9 : vector<256x128xf32>
    %11 = arith.mulf %10, %10 : vector<256x128xf32>
    %cst_9 = arith.constant dense<0.000000e+00> : vector<256xf32>
    %12 = vector.multi_reduction <add>, %11, %cst_9 [1] : vector<256x128xf32> to vector<256xf32>
    %13 = vector.shape_cast %12 : vector<256xf32> to vector<256x1xf32>
    %cst_10 = arith.constant 1.280000e+02 : f32
    %14 = vector.broadcast %cst_10 : f32 to vector<256x1xf32>
    %15 = arith.divf %13, %14 : vector<256x1xf32>
    %cst_11 = arith.constant 9.99999974E-6 : f32
    %16 = vector.broadcast %cst_11 : f32 to vector<256x1xf32>
    %17 = arith.addf %15, %16 : vector<256x1xf32>
    %18 = math.rsqrt %17 : vector<256x1xf32>
    %19 = vector.broadcast %18 : vector<256x1xf32> to vector<256x128xf32>
    %20 = arith.mulf %10, %19 : vector<256x128xf32>
    %21 = vector.broadcast %3 : vector<1x128xf32> to vector<256x128xf32>
    %22 = arith.mulf %20, %21 : vector<256x128xf32>
    %23 = vector.broadcast %4 : vector<1x128xf32> to vector<256x128xf32>
    %24 = arith.addf %22, %23 : vector<256x128xf32>
    %cst_12 = arith.constant 5.000000e-01 : f32
    %25 = vector.broadcast %cst_12 : f32 to vector<256x128xf32>
    %26 = arith.mulf %25, %24 : vector<256x128xf32>
    %cst_13 = arith.constant 4.471500e-02 : f32
    %27 = vector.broadcast %cst_13 : f32 to vector<256x128xf32>
    %28 = arith.mulf %27, %24 : vector<256x128xf32>
    %29 = arith.mulf %28, %24 : vector<256x128xf32>
    %30 = arith.mulf %29, %24 : vector<256x128xf32>
    %31 = arith.addf %24, %30 : vector<256x128xf32>
    %cst_14 = arith.constant 0.797884583 : f32
    %32 = vector.broadcast %cst_14 : f32 to vector<256x128xf32>
    %33 = arith.mulf %32, %31 : vector<256x128xf32>
    %34 = math.tanh %33 : vector<256x128xf32>
    %cst_15 = arith.constant 1.000000e+00 : f32
    %35 = vector.broadcast %cst_15 : f32 to vector<256x128xf32>
    %36 = arith.addf %35, %34 : vector<256x128xf32>
    %37 = arith.mulf %26, %36 : vector<256x128xf32>
    %c0_16 = arith.constant 0 : index
    %c0_17 = arith.constant 0 : index
    %38 = vector.load %arg5[%c0_16, %c0_17] : memref<256x128xf32, #tpu.memory_space<vmem>>, vector<256x128xf32>
    tpu.vector_store %arg5[%c0_16, %c0_17], %37 {strides = array<i32>} : memref<256x128xf32, #tpu.memory_space<vmem>>, vector<256x128xf32>,
    return
  }
  func.func @transform_0(%arg0: i32) -> (i32, i32) {
    %c0_i32 = arith.constant 0 : i32
    %c0_i32_0 = arith.constant 0 : i32
    return %arg0, %c0_i32 : i32, i32
  }
  func.func @transform_1(%arg0: i32) -> (i32, i32) {
    %c0_i32 = arith.constant 0 : i32
    %c0_i32_0 = arith.constant 0 : i32
    %c0_i32_1 = arith.constant 0 : i32
    return %c0_i32, %c0_i32_0 : i32, i32
  }
  func.func @transform_2(%arg0: i32) -> (i32, i32) {
    %c0_i32 = arith.constant 0 : i32
    %c0_i32_0 = arith.constant 0 : i32
    %c0_i32_1 = arith.constant 0 : i32
    return %c0_i32, %c0_i32_0 : i32, i32
  }
  func.func @transform_3(%arg0: i32) -> (i32, i32) {
    %c0_i32 = arith.constant 0 : i32
    %c0_i32_0 = arith.constant 0 : i32
    %c0_i32_1 = arith.constant 0 : i32
    return %c0_i32, %c0_i32_0 : i32, i32
  }
  func.func @transform_4(%arg0: i32) -> (i32, i32) {
    %c0_i32 = arith.constant 0 : i32
    %c0_i32_0 = arith.constant 0 : i32
    return %arg0, %c0_i32 : i32, i32
  }
}

module attributes {stable_mosaic.version = 11 : i64} {
  func.func @conv_block_kernel(%arg0: i32, %arg1: memref<256x384xbf16, #tpu.memory_space<vmem>>, %arg2: memref<384x128xbf16, #tpu.memory_space<vmem>>, %arg3: memref<1x128xf32, #tpu.memory_space<vmem>>, %arg4: memref<1x128xf32, #tpu.memory_space<vmem>>, %arg5: memref<256x128xf32, #tpu.memory_space<vmem>>) attributes {dimension_semantics = [#tpu.dimension_semantics<parallel>], iteration_bounds = array<i64: 2>, scalar_prefetch = 0 : i64, scratch_operands = 0 : i64, tpu.core_type = #tpu.core_type<tc>, window_params = [{transform_indices = @transform_0, window_bounds = array<i64: 256, 384>}, {pipeline_mode = #tpu.pipeline_mode<synchronous>, transform_indices = @transform_1, window_bounds = array<i64: 384, 128>}, {pipeline_mode = #tpu.pipeline_mode<synchronous>, transform_indices = @transform_2, window_bounds = array<i64: 1, 128>}, {pipeline_mode = #tpu.pipeline_mode<synchronous>, transform_indices = @transform_3, window_bounds = array<i64: 1, 128>}, {transform_indices = @transform_4, window_bounds = array<i64: 256, 128>}]} {
    %c0 = arith.constant 0 : index
    %c0_0 = arith.constant 0 : index
    %0 = vector.load %arg1[%c0, %c0_0] : memref<256x384xbf16, #tpu.memory_space<vmem>>, vector<256x384xbf16>
    %c0_1 = arith.constant 0 : index
    %c0_2 = arith.constant 0 : index
    %1 = vector.load %arg2[%c0_1, %c0_2] : memref<384x128xbf16, #tpu.memory_space<vmem>>, vector<384x128xbf16>
    %cst = arith.constant dense<0.000000e+00> : vector<256x128xf32>
    %2 = tpu.matmul %0, %1, %cst {dimension_numbers = #tpu.dot_dimension_numbers<[1], [0], [0], [1], [0, 0, 1, 1], [], []>} : vector<256x384xbf16>, vector<384x128xbf16>, vector<256x128xf32> -> vector<256x128xf32>
    %c0_3 = arith.constant 0 : index
    %c0_4 = arith.constant 0 : index
    %3 = vector.load %arg3[%c0_3, %c0_4] : memref<1x128xf32, #tpu.memory_space<vmem>>, vector<1x128xf32>
    %c0_5 = arith.constant 0 : index
    %c0_6 = arith.constant 0 : index
    %4 = vector.load %arg4[%c0_5, %c0_6] : memref<1x128xf32, #tpu.memory_space<vmem>>, vector<1x128xf32>
    %cst_7 = arith.constant dense<0.000000e+00> : vector<256xf32>
    %5 = vector.multi_reduction <add>, %2, %cst_7 [1] : vector<256x128xf32> to vector<256xf32>
    %6 = vector.shape_cast %5 : vector<256xf32> to vector<256x1xf32>
    %cst_8 = arith.constant 1.280000e+02 : f32
    %7 = vector.broadcast %cst_8 : f32 to vector<256x1xf32>
    %8 = arith.divf %6, %7 : vector<256x1xf32>
    %9 = vector.broadcast %8 : vector<256x1xf32> to vector<256x128xf32>
    %10 = arith.subf %2, %9 : vector<256x128xf32>
    %11 = arith.mulf %10, %10 : vector<256x128xf32>
    %cst_9 = arith.constant dense<0.000000e+00> : vector<256xf32>
    %12 = vector.multi_reduction <add>, %11, %cst_9 [1] : vector<256x128xf32> to vector<256xf32>
    %13 = vector.shape_cast %12 : vector<256xf32> to vector<256x1xf32>
    %cst_10 = arith.constant 1.280000e+02 : f32
    %14 = vector.broadcast %cst_10 : f32 to vector<256x1xf32>
    %15 = arith.divf %13, %14 : vector<256x1xf32>
    %cst_11 = arith.constant 9.99999974E-6 : f32
    %16 = vector.broadcast %cst_11 : f32 to vector<256x1xf32>
    %17 = arith.addf %15, %16 : vector<256x1xf32>
    %18 = math.rsqrt %17 : vector<256x1xf32>
    %19 = vector.broadcast %18 : vector<256x1xf32> to vector<256x128xf32>
    %20 = arith.mulf %10, %19 : vector<256x128xf32>
    %21 = vector.broadcast %3 : vector<1x128xf32> to vector<256x128xf32>
    %22 = arith.mulf %20, %21 : vector<256x128xf32>
    %23 = vector.broadcast %4 : vector<1x128xf32> to vector<256x128xf32>
    %24 = arith.addf %22, %23 : vector<256x128xf32>
    %cst_12 = arith.constant 5.000000e-01 : f32
    %25 = vector.broadcast %cst_12 : f32 to vector<256x128xf32>
    %26 = arith.mulf %25, %24 : vector<256x128xf32>
    %cst_13 = arith.constant 4.471500e-02 : f32
    %27 = vector.broadcast %cst_13 : f32 to vector<256x128xf32>
    %28 = arith.mulf %27, %24 : vector<256x128xf32>
    %29 = arith.mulf %28, %24 : vector<256x128xf32>
    %30 = arith.mulf %29, %24 : vector<256x128xf32>
    %31 = arith.addf %24, %30 : vector<256x128xf32>
    %cst_14 = arith.constant 0.797884583 : f32
    %32 = vector.broadcast %cst_14 : f32 to vector<256x128xf32>
    %33 = arith.mulf %32, %31 : vector<256x128xf32>
    %34 = math.tanh %33 : vector<256x128xf32>
    %cst_15 = arith.constant 1.000000e+00 : f32
    %35 = vector.broadcast %cst_15 : f32 to vector<256x128xf32>
    %36 = arith.addf %35, %34 : vector<256x128xf32>
    %37 = arith.mulf %26, %36 : vector<256x128xf32>
    %c0_16 = arith.constant 0 : index
    %c0_17 = arith.constant 0 : index
    %38 = vector.load %arg5[%c0_16, %c0_17] : memref<256x128xf32, #tpu.memory_space<vmem>>, vector<256x128xf32>
    tpu.vector_store %arg5[%c0_16, %c0_17], %37 {strides = array<i32>} : memref<256x128xf32, #tpu.memory_space<vmem>>, vector<256x128xf32>,
    return
  }
  func.func @transform_0(%arg0: i32) -> (i32, i32) {
    %c0_i32 = arith.constant 0 : i32
    %c0_i32_0 = arith.constant 0 : i32
    return %arg0, %c0_i32 : i32, i32
  }
  func.func @transform_1(%arg0: i32) -> (i32, i32) {
    %c0_i32 = arith.constant 0 : i32
    %c0_i32_0 = arith.constant 0 : i32
    %c0_i32_1 = arith.constant 0 : i32
    return %c0_i32, %c0_i32_0 : i32, i32
  }
  func.func @transform_2(%arg0: i32) -> (i32, i32) {
    %c0_i32 = arith.constant 0 : i32
    %c0_i32_0 = arith.constant 0 : i32
    %c0_i32_1 = arith.constant 0 : i32
    return %c0_i32, %c0_i32_0 : i32, i32
  }
  func.func @transform_3(%arg0: i32) -> (i32, i32) {
    %c0_i32 = arith.constant 0 : i32
    %c0_i32_0 = arith.constant 0 : i32
    %c0_i32_1 = arith.constant 0 : i32
    return %c0_i32, %c0_i32_0 : i32, i32
  }
  func.func @transform_4(%arg0: i32) -> (i32, i32) {
    %c0_i32 = arith.constant 0 : i32
    %c0_i32_0 = arith.constant 0 : i32
    return %arg0, %c0_i32 : i32, i32
  }
}

module attributes {stable_mosaic.version = 11 : i64} {
  func.func @conv_block_kernel(%arg0: i32, %arg1: memref<160x384xbf16, #tpu.memory_space<vmem>>, %arg2: memref<384x128xbf16, #tpu.memory_space<vmem>>, %arg3: memref<1x128xf32, #tpu.memory_space<vmem>>, %arg4: memref<1x128xf32, #tpu.memory_space<vmem>>, %arg5: memref<160x128xf32, #tpu.memory_space<vmem>>) attributes {dimension_semantics = [#tpu.dimension_semantics<parallel>], iteration_bounds = array<i64: 1>, scalar_prefetch = 0 : i64, scratch_operands = 0 : i64, tpu.core_type = #tpu.core_type<tc>, window_params = [{transform_indices = @transform_0, window_bounds = array<i64: 160, 384>}, {pipeline_mode = #tpu.pipeline_mode<synchronous>, transform_indices = @transform_1, window_bounds = array<i64: 384, 128>}, {pipeline_mode = #tpu.pipeline_mode<synchronous>, transform_indices = @transform_2, window_bounds = array<i64: 1, 128>}, {pipeline_mode = #tpu.pipeline_mode<synchronous>, transform_indices = @transform_3, window_bounds = array<i64: 1, 128>}, {transform_indices = @transform_4, window_bounds = array<i64: 160, 128>}]} {
    %c0 = arith.constant 0 : index
    %c0_0 = arith.constant 0 : index
    %0 = vector.load %arg1[%c0, %c0_0] : memref<160x384xbf16, #tpu.memory_space<vmem>>, vector<160x384xbf16>
    %c0_1 = arith.constant 0 : index
    %c0_2 = arith.constant 0 : index
    %1 = vector.load %arg2[%c0_1, %c0_2] : memref<384x128xbf16, #tpu.memory_space<vmem>>, vector<384x128xbf16>
    %cst = arith.constant dense<0.000000e+00> : vector<160x128xf32>
    %2 = tpu.matmul %0, %1, %cst {dimension_numbers = #tpu.dot_dimension_numbers<[1], [0], [0], [1], [0, 0, 1, 1], [], []>} : vector<160x384xbf16>, vector<384x128xbf16>, vector<160x128xf32> -> vector<160x128xf32>
    %c0_3 = arith.constant 0 : index
    %c0_4 = arith.constant 0 : index
    %3 = vector.load %arg3[%c0_3, %c0_4] : memref<1x128xf32, #tpu.memory_space<vmem>>, vector<1x128xf32>
    %c0_5 = arith.constant 0 : index
    %c0_6 = arith.constant 0 : index
    %4 = vector.load %arg4[%c0_5, %c0_6] : memref<1x128xf32, #tpu.memory_space<vmem>>, vector<1x128xf32>
    %cst_7 = arith.constant dense<0.000000e+00> : vector<160xf32>
    %5 = vector.multi_reduction <add>, %2, %cst_7 [1] : vector<160x128xf32> to vector<160xf32>
    %6 = vector.shape_cast %5 : vector<160xf32> to vector<160x1xf32>
    %cst_8 = arith.constant 1.280000e+02 : f32
    %7 = vector.broadcast %cst_8 : f32 to vector<160x1xf32>
    %8 = arith.divf %6, %7 : vector<160x1xf32>
    %9 = vector.broadcast %8 : vector<160x1xf32> to vector<160x128xf32>
    %10 = arith.subf %2, %9 : vector<160x128xf32>
    %11 = arith.mulf %10, %10 : vector<160x128xf32>
    %cst_9 = arith.constant dense<0.000000e+00> : vector<160xf32>
    %12 = vector.multi_reduction <add>, %11, %cst_9 [1] : vector<160x128xf32> to vector<160xf32>
    %13 = vector.shape_cast %12 : vector<160xf32> to vector<160x1xf32>
    %cst_10 = arith.constant 1.280000e+02 : f32
    %14 = vector.broadcast %cst_10 : f32 to vector<160x1xf32>
    %15 = arith.divf %13, %14 : vector<160x1xf32>
    %cst_11 = arith.constant 9.99999974E-6 : f32
    %16 = vector.broadcast %cst_11 : f32 to vector<160x1xf32>
    %17 = arith.addf %15, %16 : vector<160x1xf32>
    %18 = math.rsqrt %17 : vector<160x1xf32>
    %19 = vector.broadcast %18 : vector<160x1xf32> to vector<160x128xf32>
    %20 = arith.mulf %10, %19 : vector<160x128xf32>
    %21 = vector.broadcast %3 : vector<1x128xf32> to vector<160x128xf32>
    %22 = arith.mulf %20, %21 : vector<160x128xf32>
    %23 = vector.broadcast %4 : vector<1x128xf32> to vector<160x128xf32>
    %24 = arith.addf %22, %23 : vector<160x128xf32>
    %cst_12 = arith.constant 5.000000e-01 : f32
    %25 = vector.broadcast %cst_12 : f32 to vector<160x128xf32>
    %26 = arith.mulf %25, %24 : vector<160x128xf32>
    %cst_13 = arith.constant 4.471500e-02 : f32
    %27 = vector.broadcast %cst_13 : f32 to vector<160x128xf32>
    %28 = arith.mulf %27, %24 : vector<160x128xf32>
    %29 = arith.mulf %28, %24 : vector<160x128xf32>
    %30 = arith.mulf %29, %24 : vector<160x128xf32>
    %31 = arith.addf %24, %30 : vector<160x128xf32>
    %cst_14 = arith.constant 0.797884583 : f32
    %32 = vector.broadcast %cst_14 : f32 to vector<160x128xf32>
    %33 = arith.mulf %32, %31 : vector<160x128xf32>
    %34 = math.tanh %33 : vector<160x128xf32>
    %cst_15 = arith.constant 1.000000e+00 : f32
    %35 = vector.broadcast %cst_15 : f32 to vector<160x128xf32>
    %36 = arith.addf %35, %34 : vector<160x128xf32>
    %37 = arith.mulf %26, %36 : vector<160x128xf32>
    %c0_16 = arith.constant 0 : index
    %c0_17 = arith.constant 0 : index
    %38 = vector.load %arg5[%c0_16, %c0_17] : memref<160x128xf32, #tpu.memory_space<vmem>>, vector<160x128xf32>
    tpu.vector_store %arg5[%c0_16, %c0_17], %37 {strides = array<i32>} : memref<160x128xf32, #tpu.memory_space<vmem>>, vector<160x128xf32>,
    return
  }
  func.func @transform_0(%arg0: i32) -> (i32, i32) {
    %c0_i32 = arith.constant 0 : i32
    %c0_i32_0 = arith.constant 0 : i32
    return %arg0, %c0_i32 : i32, i32
  }
  func.func @transform_1(%arg0: i32) -> (i32, i32) {
    %c0_i32 = arith.constant 0 : i32
    %c0_i32_0 = arith.constant 0 : i32
    %c0_i32_1 = arith.constant 0 : i32
    return %c0_i32, %c0_i32_0 : i32, i32
  }
  func.func @transform_2(%arg0: i32) -> (i32, i32) {
    %c0_i32 = arith.constant 0 : i32
    %c0_i32_0 = arith.constant 0 : i32
    %c0_i32_1 = arith.constant 0 : i32
    return %c0_i32, %c0_i32_0 : i32, i32
  }
  func.func @transform_3(%arg0: i32) -> (i32, i32) {
    %c0_i32 = arith.constant 0 : i32
    %c0_i32_0 = arith.constant 0 : i32
    %c0_i32_1 = arith.constant 0 : i32
    return %c0_i32, %c0_i32_0 : i32, i32
  }
  func.func @transform_4(%arg0: i32) -> (i32, i32) {
    %c0_i32 = arith.constant 0 : i32
    %c0_i32_0 = arith.constant 0 : i32
    return %arg0, %c0_i32 : i32, i32
  }
}

module attributes {stable_mosaic.version = 11 : i64} {
  func.func @conv_block_kernel(%arg0: i32, %arg1: memref<80x384xbf16, #tpu.memory_space<vmem>>, %arg2: memref<384x128xbf16, #tpu.memory_space<vmem>>, %arg3: memref<1x128xf32, #tpu.memory_space<vmem>>, %arg4: memref<1x128xf32, #tpu.memory_space<vmem>>, %arg5: memref<80x128xf32, #tpu.memory_space<vmem>>) attributes {dimension_semantics = [#tpu.dimension_semantics<parallel>], iteration_bounds = array<i64: 1>, scalar_prefetch = 0 : i64, scratch_operands = 0 : i64, tpu.core_type = #tpu.core_type<tc>, window_params = [{transform_indices = @transform_0, window_bounds = array<i64: 80, 384>}, {pipeline_mode = #tpu.pipeline_mode<synchronous>, transform_indices = @transform_1, window_bounds = array<i64: 384, 128>}, {pipeline_mode = #tpu.pipeline_mode<synchronous>, transform_indices = @transform_2, window_bounds = array<i64: 1, 128>}, {pipeline_mode = #tpu.pipeline_mode<synchronous>, transform_indices = @transform_3, window_bounds = array<i64: 1, 128>}, {transform_indices = @transform_4, window_bounds = array<i64: 80, 128>}]} {
    %c0 = arith.constant 0 : index
    %c0_0 = arith.constant 0 : index
    %0 = vector.load %arg1[%c0, %c0_0] : memref<80x384xbf16, #tpu.memory_space<vmem>>, vector<80x384xbf16>
    %c0_1 = arith.constant 0 : index
    %c0_2 = arith.constant 0 : index
    %1 = vector.load %arg2[%c0_1, %c0_2] : memref<384x128xbf16, #tpu.memory_space<vmem>>, vector<384x128xbf16>
    %cst = arith.constant dense<0.000000e+00> : vector<80x128xf32>
    %2 = tpu.matmul %0, %1, %cst {dimension_numbers = #tpu.dot_dimension_numbers<[1], [0], [0], [1], [0, 0, 1, 1], [], []>} : vector<80x384xbf16>, vector<384x128xbf16>, vector<80x128xf32> -> vector<80x128xf32>
    %c0_3 = arith.constant 0 : index
    %c0_4 = arith.constant 0 : index
    %3 = vector.load %arg3[%c0_3, %c0_4] : memref<1x128xf32, #tpu.memory_space<vmem>>, vector<1x128xf32>
    %c0_5 = arith.constant 0 : index
    %c0_6 = arith.constant 0 : index
    %4 = vector.load %arg4[%c0_5, %c0_6] : memref<1x128xf32, #tpu.memory_space<vmem>>, vector<1x128xf32>
    %cst_7 = arith.constant dense<0.000000e+00> : vector<80xf32>
    %5 = vector.multi_reduction <add>, %2, %cst_7 [1] : vector<80x128xf32> to vector<80xf32>
    %6 = vector.shape_cast %5 : vector<80xf32> to vector<80x1xf32>
    %cst_8 = arith.constant 1.280000e+02 : f32
    %7 = vector.broadcast %cst_8 : f32 to vector<80x1xf32>
    %8 = arith.divf %6, %7 : vector<80x1xf32>
    %9 = vector.broadcast %8 : vector<80x1xf32> to vector<80x128xf32>
    %10 = arith.subf %2, %9 : vector<80x128xf32>
    %11 = arith.mulf %10, %10 : vector<80x128xf32>
    %cst_9 = arith.constant dense<0.000000e+00> : vector<80xf32>
    %12 = vector.multi_reduction <add>, %11, %cst_9 [1] : vector<80x128xf32> to vector<80xf32>
    %13 = vector.shape_cast %12 : vector<80xf32> to vector<80x1xf32>
    %cst_10 = arith.constant 1.280000e+02 : f32
    %14 = vector.broadcast %cst_10 : f32 to vector<80x1xf32>
    %15 = arith.divf %13, %14 : vector<80x1xf32>
    %cst_11 = arith.constant 9.99999974E-6 : f32
    %16 = vector.broadcast %cst_11 : f32 to vector<80x1xf32>
    %17 = arith.addf %15, %16 : vector<80x1xf32>
    %18 = math.rsqrt %17 : vector<80x1xf32>
    %19 = vector.broadcast %18 : vector<80x1xf32> to vector<80x128xf32>
    %20 = arith.mulf %10, %19 : vector<80x128xf32>
    %21 = vector.broadcast %3 : vector<1x128xf32> to vector<80x128xf32>
    %22 = arith.mulf %20, %21 : vector<80x128xf32>
    %23 = vector.broadcast %4 : vector<1x128xf32> to vector<80x128xf32>
    %24 = arith.addf %22, %23 : vector<80x128xf32>
    %cst_12 = arith.constant 5.000000e-01 : f32
    %25 = vector.broadcast %cst_12 : f32 to vector<80x128xf32>
    %26 = arith.mulf %25, %24 : vector<80x128xf32>
    %cst_13 = arith.constant 4.471500e-02 : f32
    %27 = vector.broadcast %cst_13 : f32 to vector<80x128xf32>
    %28 = arith.mulf %27, %24 : vector<80x128xf32>
    %29 = arith.mulf %28, %24 : vector<80x128xf32>
    %30 = arith.mulf %29, %24 : vector<80x128xf32>
    %31 = arith.addf %24, %30 : vector<80x128xf32>
    %cst_14 = arith.constant 0.797884583 : f32
    %32 = vector.broadcast %cst_14 : f32 to vector<80x128xf32>
    %33 = arith.mulf %32, %31 : vector<80x128xf32>
    %34 = math.tanh %33 : vector<80x128xf32>
    %cst_15 = arith.constant 1.000000e+00 : f32
    %35 = vector.broadcast %cst_15 : f32 to vector<80x128xf32>
    %36 = arith.addf %35, %34 : vector<80x128xf32>
    %37 = arith.mulf %26, %36 : vector<80x128xf32>
    %c0_16 = arith.constant 0 : index
    %c0_17 = arith.constant 0 : index
    %38 = vector.load %arg5[%c0_16, %c0_17] : memref<80x128xf32, #tpu.memory_space<vmem>>, vector<80x128xf32>
    tpu.vector_store %arg5[%c0_16, %c0_17], %37 {strides = array<i32>} : memref<80x128xf32, #tpu.memory_space<vmem>>, vector<80x128xf32>,
    return
  }
  func.func @transform_0(%arg0: i32) -> (i32, i32) {
    %c0_i32 = arith.constant 0 : i32
    %c0_i32_0 = arith.constant 0 : i32
    return %arg0, %c0_i32 : i32, i32
  }
  func.func @transform_1(%arg0: i32) -> (i32, i32) {
    %c0_i32 = arith.constant 0 : i32
    %c0_i32_0 = arith.constant 0 : i32
    %c0_i32_1 = arith.constant 0 : i32
    return %c0_i32, %c0_i32_0 : i32, i32
  }
  func.func @transform_2(%arg0: i32) -> (i32, i32) {
    %c0_i32 = arith.constant 0 : i32
    %c0_i32_0 = arith.constant 0 : i32
    %c0_i32_1 = arith.constant 0 : i32
    return %c0_i32, %c0_i32_0 : i32, i32
  }
  func.func @transform_3(%arg0: i32) -> (i32, i32) {
    %c0_i32 = arith.constant 0 : i32
    %c0_i32_0 = arith.constant 0 : i32
    %c0_i32_1 = arith.constant 0 : i32
    return %c0_i32, %c0_i32_0 : i32, i32
  }
  func.func @transform_4(%arg0: i32) -> (i32, i32) {
    %c0_i32 = arith.constant 0 : i32
    %c0_i32_0 = arith.constant 0 : i32
    return %arg0, %c0_i32 : i32, i32
  }
}

module attributes {stable_mosaic.version = 11 : i64} {
  func.func @conv_block_kernel(%arg0: i32, %arg1: memref<48x256xbf16, #tpu.memory_space<vmem>>, %arg2: memref<256x128xbf16, #tpu.memory_space<vmem>>, %arg3: memref<1x128xf32, #tpu.memory_space<vmem>>, %arg4: memref<1x128xf32, #tpu.memory_space<vmem>>, %arg5: memref<48x128xf32, #tpu.memory_space<vmem>>) attributes {dimension_semantics = [#tpu.dimension_semantics<parallel>], iteration_bounds = array<i64: 1>, scalar_prefetch = 0 : i64, scratch_operands = 0 : i64, tpu.core_type = #tpu.core_type<tc>, window_params = [{transform_indices = @transform_0, window_bounds = array<i64: 48, 256>}, {pipeline_mode = #tpu.pipeline_mode<synchronous>, transform_indices = @transform_1, window_bounds = array<i64: 256, 128>}, {pipeline_mode = #tpu.pipeline_mode<synchronous>, transform_indices = @transform_2, window_bounds = array<i64: 1, 128>}, {pipeline_mode = #tpu.pipeline_mode<synchronous>, transform_indices = @transform_3, window_bounds = array<i64: 1, 128>}, {transform_indices = @transform_4, window_bounds = array<i64: 48, 128>}]} {
    %c0 = arith.constant 0 : index
    %c0_0 = arith.constant 0 : index
    %0 = vector.load %arg1[%c0, %c0_0] : memref<48x256xbf16, #tpu.memory_space<vmem>>, vector<48x256xbf16>
    %c0_1 = arith.constant 0 : index
    %c0_2 = arith.constant 0 : index
    %1 = vector.load %arg2[%c0_1, %c0_2] : memref<256x128xbf16, #tpu.memory_space<vmem>>, vector<256x128xbf16>
    %cst = arith.constant dense<0.000000e+00> : vector<48x128xf32>
    %2 = tpu.matmul %0, %1, %cst {dimension_numbers = #tpu.dot_dimension_numbers<[1], [0], [0], [1], [0, 0, 1, 1], [], []>} : vector<48x256xbf16>, vector<256x128xbf16>, vector<48x128xf32> -> vector<48x128xf32>
    %c0_3 = arith.constant 0 : index
    %c0_4 = arith.constant 0 : index
    %3 = vector.load %arg3[%c0_3, %c0_4] : memref<1x128xf32, #tpu.memory_space<vmem>>, vector<1x128xf32>
    %c0_5 = arith.constant 0 : index
    %c0_6 = arith.constant 0 : index
    %4 = vector.load %arg4[%c0_5, %c0_6] : memref<1x128xf32, #tpu.memory_space<vmem>>, vector<1x128xf32>
    %cst_7 = arith.constant dense<0.000000e+00> : vector<48xf32>
    %5 = vector.multi_reduction <add>, %2, %cst_7 [1] : vector<48x128xf32> to vector<48xf32>
    %6 = vector.shape_cast %5 : vector<48xf32> to vector<48x1xf32>
    %cst_8 = arith.constant 1.280000e+02 : f32
    %7 = vector.broadcast %cst_8 : f32 to vector<48x1xf32>
    %8 = arith.divf %6, %7 : vector<48x1xf32>
    %9 = vector.broadcast %8 : vector<48x1xf32> to vector<48x128xf32>
    %10 = arith.subf %2, %9 : vector<48x128xf32>
    %11 = arith.mulf %10, %10 : vector<48x128xf32>
    %cst_9 = arith.constant dense<0.000000e+00> : vector<48xf32>
    %12 = vector.multi_reduction <add>, %11, %cst_9 [1] : vector<48x128xf32> to vector<48xf32>
    %13 = vector.shape_cast %12 : vector<48xf32> to vector<48x1xf32>
    %cst_10 = arith.constant 1.280000e+02 : f32
    %14 = vector.broadcast %cst_10 : f32 to vector<48x1xf32>
    %15 = arith.divf %13, %14 : vector<48x1xf32>
    %cst_11 = arith.constant 9.99999974E-6 : f32
    %16 = vector.broadcast %cst_11 : f32 to vector<48x1xf32>
    %17 = arith.addf %15, %16 : vector<48x1xf32>
    %18 = math.rsqrt %17 : vector<48x1xf32>
    %19 = vector.broadcast %18 : vector<48x1xf32> to vector<48x128xf32>
    %20 = arith.mulf %10, %19 : vector<48x128xf32>
    %21 = vector.broadcast %3 : vector<1x128xf32> to vector<48x128xf32>
    %22 = arith.mulf %20, %21 : vector<48x128xf32>
    %23 = vector.broadcast %4 : vector<1x128xf32> to vector<48x128xf32>
    %24 = arith.addf %22, %23 : vector<48x128xf32>
    %cst_12 = arith.constant 5.000000e-01 : f32
    %25 = vector.broadcast %cst_12 : f32 to vector<48x128xf32>
    %26 = arith.mulf %25, %24 : vector<48x128xf32>
    %cst_13 = arith.constant 4.471500e-02 : f32
    %27 = vector.broadcast %cst_13 : f32 to vector<48x128xf32>
    %28 = arith.mulf %27, %24 : vector<48x128xf32>
    %29 = arith.mulf %28, %24 : vector<48x128xf32>
    %30 = arith.mulf %29, %24 : vector<48x128xf32>
    %31 = arith.addf %24, %30 : vector<48x128xf32>
    %cst_14 = arith.constant 0.797884583 : f32
    %32 = vector.broadcast %cst_14 : f32 to vector<48x128xf32>
    %33 = arith.mulf %32, %31 : vector<48x128xf32>
    %34 = math.tanh %33 : vector<48x128xf32>
    %cst_15 = arith.constant 1.000000e+00 : f32
    %35 = vector.broadcast %cst_15 : f32 to vector<48x128xf32>
    %36 = arith.addf %35, %34 : vector<48x128xf32>
    %37 = arith.mulf %26, %36 : vector<48x128xf32>
    %c0_16 = arith.constant 0 : index
    %c0_17 = arith.constant 0 : index
    %38 = vector.load %arg5[%c0_16, %c0_17] : memref<48x128xf32, #tpu.memory_space<vmem>>, vector<48x128xf32>
    tpu.vector_store %arg5[%c0_16, %c0_17], %37 {strides = array<i32>} : memref<48x128xf32, #tpu.memory_space<vmem>>, vector<48x128xf32>,
    return
  }
  func.func @transform_0(%arg0: i32) -> (i32, i32) {
    %c0_i32 = arith.constant 0 : i32
    %c0_i32_0 = arith.constant 0 : i32
    return %arg0, %c0_i32 : i32, i32
  }
  func.func @transform_1(%arg0: i32) -> (i32, i32) {
    %c0_i32 = arith.constant 0 : i32
    %c0_i32_0 = arith.constant 0 : i32
    %c0_i32_1 = arith.constant 0 : i32
    return %c0_i32, %c0_i32_0 : i32, i32
  }
  func.func @transform_2(%arg0: i32) -> (i32, i32) {
    %c0_i32 = arith.constant 0 : i32
    %c0_i32_0 = arith.constant 0 : i32
    %c0_i32_1 = arith.constant 0 : i32
    return %c0_i32, %c0_i32_0 : i32, i32
  }
  func.func @transform_3(%arg0: i32) -> (i32, i32) {
    %c0_i32 = arith.constant 0 : i32
    %c0_i32_0 = arith.constant 0 : i32
    %c0_i32_1 = arith.constant 0 : i32
    return %c0_i32, %c0_i32_0 : i32, i32
  }
  func.func @transform_4(%arg0: i32) -> (i32, i32) {
    %c0_i32 = arith.constant 0 : i32
    %c0_i32_0 = arith.constant 0 : i32
    return %arg0, %c0_i32 : i32, i32
  }
}

module attributes {stable_mosaic.version = 11 : i64} {
  func.func @conv_block_proj_kernel(%arg0: i32, %arg1: memref<32x256xbf16, #tpu.memory_space<vmem>>, %arg2: memref<256x128xbf16, #tpu.memory_space<vmem>>, %arg3: memref<1x128xf32, #tpu.memory_space<vmem>>, %arg4: memref<1x128xf32, #tpu.memory_space<vmem>>, %arg5: memref<1x128xf32, #tpu.memory_space<vmem>>, %arg6: memref<1x128xf32, #tpu.memory_space<vmem>>, %arg7: memref<128x128xbf16, #tpu.memory_space<vmem>>, %arg8: memref<1x128xf32, #tpu.memory_space<vmem>>, %arg9: memref<32x128xf32, #tpu.memory_space<vmem>>) attributes {dimension_semantics = [#tpu.dimension_semantics<parallel>], iteration_bounds = array<i64: 1>, scalar_prefetch = 0 : i64, scratch_operands = 0 : i64, tpu.core_type = #tpu.core_type<tc>, window_params = [{transform_indices = @transform_0, window_bounds = array<i64: 32, 256>}, {pipeline_mode = #tpu.pipeline_mode<synchronous>, transform_indices = @transform_1, window_bounds = array<i64: 256, 128>}, {pipeline_mode = #tpu.pipeline_mode<synchronous>, transform_indices = @transform_2, window_bounds = array<i64: 1, 128>}, {pipeline_mode = #tpu.pipeline_mode<synchronous>, transform_indices = @transform_3, window_bounds = array<i64: 1, 128>}, {pipeline_mode = #tpu.pipeline_mode<synchronous>, transform_indices = @transform_4, window_bounds = array<i64: 1, 128>}, {pipeline_mode = #tpu.pipeline_mode<synchronous>, transform_indices = @transform_5, window_bounds = array<i64: 1, 128>}, {pipeline_mode = #tpu.pipeline_mode<synchronous>, transform_indices = @transform_6, window_bounds = array<i64: 128, 128>}, {pipeline_mode = #tpu.pipeline_mode<synchronous>, transform_indices = @transform_7, window_bounds = array<i64: 1, 128>}, {transform_indices = @transform_8, window_bounds = array<i64: 32, 128>}]} {
    %c0 = arith.constant 0 : index
    %c0_0 = arith.constant 0 : index
    %0 = vector.load %arg1[%c0, %c0_0] : memref<32x256xbf16, #tpu.memory_space<vmem>>, vector<32x256xbf16>
    %c0_1 = arith.constant 0 : index
    %c0_2 = arith.constant 0 : index
    %1 = vector.load %arg2[%c0_1, %c0_2] : memref<256x128xbf16, #tpu.memory_space<vmem>>, vector<256x128xbf16>
    %cst = arith.constant dense<0.000000e+00> : vector<32x128xf32>
    %2 = tpu.matmul %0, %1, %cst {dimension_numbers = #tpu.dot_dimension_numbers<[1], [0], [0], [1], [0, 0, 1, 1], [], []>} : vector<32x256xbf16>, vector<256x128xbf16>, vector<32x128xf32> -> vector<32x128xf32>
    %c0_3 = arith.constant 0 : index
    %c0_4 = arith.constant 0 : index
    %3 = vector.load %arg3[%c0_3, %c0_4] : memref<1x128xf32, #tpu.memory_space<vmem>>, vector<1x128xf32>
    %c0_5 = arith.constant 0 : index
    %c0_6 = arith.constant 0 : index
    %4 = vector.load %arg4[%c0_5, %c0_6] : memref<1x128xf32, #tpu.memory_space<vmem>>, vector<1x128xf32>
    %cst_7 = arith.constant dense<0.000000e+00> : vector<32xf32>
    %5 = vector.multi_reduction <add>, %2, %cst_7 [1] : vector<32x128xf32> to vector<32xf32>
    %6 = vector.shape_cast %5 : vector<32xf32> to vector<32x1xf32>
    %cst_8 = arith.constant 1.280000e+02 : f32
    %7 = vector.broadcast %cst_8 : f32 to vector<32x1xf32>
    %8 = arith.divf %6, %7 : vector<32x1xf32>
    %9 = vector.broadcast %8 : vector<32x1xf32> to vector<32x128xf32>
    %10 = arith.subf %2, %9 : vector<32x128xf32>
    %11 = arith.mulf %10, %10 : vector<32x128xf32>
    %cst_9 = arith.constant dense<0.000000e+00> : vector<32xf32>
    %12 = vector.multi_reduction <add>, %11, %cst_9 [1] : vector<32x128xf32> to vector<32xf32>
    %13 = vector.shape_cast %12 : vector<32xf32> to vector<32x1xf32>
    %cst_10 = arith.constant 1.280000e+02 : f32
    %14 = vector.broadcast %cst_10 : f32 to vector<32x1xf32>
    %15 = arith.divf %13, %14 : vector<32x1xf32>
    %cst_11 = arith.constant 9.99999974E-6 : f32
    %16 = vector.broadcast %cst_11 : f32 to vector<32x1xf32>
    %17 = arith.addf %15, %16 : vector<32x1xf32>
    %18 = math.rsqrt %17 : vector<32x1xf32>
    %19 = vector.broadcast %18 : vector<32x1xf32> to vector<32x128xf32>
    %20 = arith.mulf %10, %19 : vector<32x128xf32>
    %21 = vector.broadcast %3 : vector<1x128xf32> to vector<32x128xf32>
    %22 = arith.mulf %20, %21 : vector<32x128xf32>
    %23 = vector.broadcast %4 : vector<1x128xf32> to vector<32x128xf32>
    %24 = arith.addf %22, %23 : vector<32x128xf32>
    %cst_12 = arith.constant 5.000000e-01 : f32
    %25 = vector.broadcast %cst_12 : f32 to vector<32x128xf32>
    %26 = arith.mulf %25, %24 : vector<32x128xf32>
    %cst_13 = arith.constant 4.471500e-02 : f32
    %27 = vector.broadcast %cst_13 : f32 to vector<32x128xf32>
    %28 = arith.mulf %27, %24 : vector<32x128xf32>
    %29 = arith.mulf %28, %24 : vector<32x128xf32>
    %30 = arith.mulf %29, %24 : vector<32x128xf32>
    %31 = arith.addf %24, %30 : vector<32x128xf32>
    %cst_14 = arith.constant 0.797884583 : f32
    %32 = vector.broadcast %cst_14 : f32 to vector<32x128xf32>
    %33 = arith.mulf %32, %31 : vector<32x128xf32>
    %34 = math.tanh %33 : vector<32x128xf32>
    %cst_15 = arith.constant 1.000000e+00 : f32
    %35 = vector.broadcast %cst_15 : f32 to vector<32x128xf32>
    %36 = arith.addf %35, %34 : vector<32x128xf32>
    %37 = arith.mulf %26, %36 : vector<32x128xf32>
    %c0_16 = arith.constant 0 : index
    %c0_17 = arith.constant 0 : index
    %38 = vector.load %arg5[%c0_16, %c0_17] : memref<1x128xf32, #tpu.memory_space<vmem>>, vector<1x128xf32>
    %c0_18 = arith.constant 0 : index
    %c0_19 = arith.constant 0 : index
    %39 = vector.load %arg6[%c0_18, %c0_19] : memref<1x128xf32, #tpu.memory_space<vmem>>, vector<1x128xf32>
    %cst_20 = arith.constant dense<0.000000e+00> : vector<32xf32>
    %40 = vector.multi_reduction <add>, %37, %cst_20 [1] : vector<32x128xf32> to vector<32xf32>
    %41 = vector.shape_cast %40 : vector<32xf32> to vector<32x1xf32>
    %cst_21 = arith.constant 1.280000e+02 : f32
    %42 = vector.broadcast %cst_21 : f32 to vector<32x1xf32>
    %43 = arith.divf %41, %42 : vector<32x1xf32>
    %44 = vector.broadcast %43 : vector<32x1xf32> to vector<32x128xf32>
    %45 = arith.subf %37, %44 : vector<32x128xf32>
    %46 = arith.mulf %45, %45 : vector<32x128xf32>
    %cst_22 = arith.constant dense<0.000000e+00> : vector<32xf32>
    %47 = vector.multi_reduction <add>, %46, %cst_22 [1] : vector<32x128xf32> to vector<32xf32>
    %48 = vector.shape_cast %47 : vector<32xf32> to vector<32x1xf32>
    %cst_23 = arith.constant 1.280000e+02 : f32
    %49 = vector.broadcast %cst_23 : f32 to vector<32x1xf32>
    %50 = arith.divf %48, %49 : vector<32x1xf32>
    %cst_24 = arith.constant 9.99999974E-6 : f32
    %51 = vector.broadcast %cst_24 : f32 to vector<32x1xf32>
    %52 = arith.addf %50, %51 : vector<32x1xf32>
    %53 = math.rsqrt %52 : vector<32x1xf32>
    %54 = vector.broadcast %53 : vector<32x1xf32> to vector<32x128xf32>
    %55 = arith.mulf %45, %54 : vector<32x128xf32>
    %56 = vector.broadcast %38 : vector<1x128xf32> to vector<32x128xf32>
    %57 = arith.mulf %55, %56 : vector<32x128xf32>
    %58 = vector.broadcast %39 : vector<1x128xf32> to vector<32x128xf32>
    %59 = arith.addf %57, %58 : vector<32x128xf32>
    %60 = arith.truncf %59 : vector<32x128xf32> to vector<32x128xbf16>
    %c0_25 = arith.constant 0 : index
    %c0_26 = arith.constant 0 : index
    %61 = vector.load %arg7[%c0_25, %c0_26] : memref<128x128xbf16, #tpu.memory_space<vmem>>, vector<128x128xbf16>
    %cst_27 = arith.constant dense<0.000000e+00> : vector<32x128xf32>
    %62 = tpu.matmul %60, %61, %cst_27 {dimension_numbers = #tpu.dot_dimension_numbers<[1], [0], [0], [1], [0, 0, 1, 1], [], []>} : vector<32x128xbf16>, vector<128x128xbf16>, vector<32x128xf32> -> vector<32x128xf32>
    %c0_28 = arith.constant 0 : index
    %c0_29 = arith.constant 0 : index
    %63 = vector.load %arg8[%c0_28, %c0_29] : memref<1x128xf32, #tpu.memory_space<vmem>>, vector<1x128xf32>
    %64 = vector.broadcast %63 : vector<1x128xf32> to vector<32x128xf32>
    %65 = arith.addf %62, %64 : vector<32x128xf32>
    %c0_30 = arith.constant 0 : index
    %c0_31 = arith.constant 0 : index
    %66 = vector.load %arg9[%c0_30, %c0_31] : memref<32x128xf32, #tpu.memory_space<vmem>>, vector<32x128xf32>
    tpu.vector_store %arg9[%c0_30, %c0_31], %65 {strides = array<i32>} : memref<32x128xf32, #tpu.memory_space<vmem>>, vector<32x128xf32>,
    return
  }
  func.func @transform_0(%arg0: i32) -> (i32, i32) {
    %c0_i32 = arith.constant 0 : i32
    %c0_i32_0 = arith.constant 0 : i32
    return %arg0, %c0_i32 : i32, i32
  }
  func.func @transform_1(%arg0: i32) -> (i32, i32) {
    %c0_i32 = arith.constant 0 : i32
    %c0_i32_0 = arith.constant 0 : i32
    %c0_i32_1 = arith.constant 0 : i32
    return %c0_i32, %c0_i32_0 : i32, i32
  }
  func.func @transform_2(%arg0: i32) -> (i32, i32) {
    %c0_i32 = arith.constant 0 : i32
    %c0_i32_0 = arith.constant 0 : i32
    %c0_i32_1 = arith.constant 0 : i32
    return %c0_i32, %c0_i32_0 : i32, i32
  }
  func.func @transform_3(%arg0: i32) -> (i32, i32) {
    %c0_i32 = arith.constant 0 : i32
    %c0_i32_0 = arith.constant 0 : i32
    %c0_i32_1 = arith.constant 0 : i32
    return %c0_i32, %c0_i32_0 : i32, i32
  }
  func.func @transform_4(%arg0: i32) -> (i32, i32) {
    %c0_i32 = arith.constant 0 : i32
    %c0_i32_0 = arith.constant 0 : i32
    %c0_i32_1 = arith.constant 0 : i32
    return %c0_i32, %c0_i32_0 : i32, i32
  }
  func.func @transform_5(%arg0: i32) -> (i32, i32) {
    %c0_i32 = arith.constant 0 : i32
    %c0_i32_0 = arith.constant 0 : i32
    %c0_i32_1 = arith.constant 0 : i32
    return %c0_i32, %c0_i32_0 : i32, i32
  }
  func.func @transform_6(%arg0: i32) -> (i32, i32) {
    %c0_i32 = arith.constant 0 : i32
    %c0_i32_0 = arith.constant 0 : i32
    %c0_i32_1 = arith.constant 0 : i32
    return %c0_i32, %c0_i32_0 : i32, i32
  }
  func.func @transform_7(%arg0: i32) -> (i32, i32) {
    %c0_i32 = arith.constant 0 : i32
    %c0_i32_0 = arith.constant 0 : i32
    %c0_i32_1 = arith.constant 0 : i32
    return %c0_i32, %c0_i32_0 : i32, i32
  }
  func.func @transform_8(%arg0: i32) -> (i32, i32) {
    %c0_i32 = arith.constant 0 : i32
    %c0_i32_0 = arith.constant 0 : i32
    return %arg0, %c0_i32 : i32, i32
  }
}

module attributes {stable_mosaic.version = 11 : i64} {
  func.func @posconv_add_ln_kernel(%arg0: i32, %arg1: memref<1x17x128xf32, #tpu.memory_space<vmem>>, %arg2: memref<1x9x128xf32, #tpu.memory_space<vmem>>, %arg3: memref<8x4x32x32xbf16, #tpu.memory_space<vmem>>, %arg4: memref<1x128xf32, #tpu.memory_space<vmem>>, %arg5: memref<1x128xf32, #tpu.memory_space<vmem>>, %arg6: memref<1x128xf32, #tpu.memory_space<vmem>>, %arg7: memref<1x9x128xf32, #tpu.memory_space<vmem>>) attributes {dimension_semantics = [#tpu.dimension_semantics<parallel>], iteration_bounds = array<i64: 2>, scalar_prefetch = 0 : i64, scratch_operands = 0 : i64, tpu.core_type = #tpu.core_type<tc>, window_params = [{transform_indices = @transform_0, window_bounds = array<i64: 1, 17, 128>}, {transform_indices = @transform_1, window_bounds = array<i64: 1, 9, 128>}, {pipeline_mode = #tpu.pipeline_mode<synchronous>, transform_indices = @transform_2, window_bounds = array<i64: 8, 4, 32, 32>}, {pipeline_mode = #tpu.pipeline_mode<synchronous>, transform_indices = @transform_3, window_bounds = array<i64: 1, 128>}, {pipeline_mode = #tpu.pipeline_mode<synchronous>, transform_indices = @transform_4, window_bounds = array<i64: 1, 128>}, {pipeline_mode = #tpu.pipeline_mode<synchronous>, transform_indices = @transform_5, window_bounds = array<i64: 1, 128>}, {transform_indices = @transform_6, window_bounds = array<i64: 1, 9, 128>}]} {
    %c0 = arith.constant 0 : index
    %c0_0 = arith.constant 0 : index
    %c0_1 = arith.constant 0 : index
    %0 = vector.load %arg1[%c0, %c0_0, %c0_1] : memref<1x17x128xf32, #tpu.memory_space<vmem>>, vector<1x17x128xf32>
    %1 = vector.shape_cast %0 : vector<1x17x128xf32> to vector<17x128xf32>
    %2 = vector.extract_strided_slice %1 {offsets = [0, 0], sizes = [17, 32], strides = [1, 1]} : vector<17x128xf32> to vector<17x32xf32>
    %3 = vector.extract_strided_slice %1 {offsets = [0, 32], sizes = [17, 32], strides = [1, 1]} : vector<17x128xf32> to vector<17x32xf32>
    %4 = vector.extract_strided_slice %1 {offsets = [0, 64], sizes = [17, 32], strides = [1, 1]} : vector<17x128xf32> to vector<17x32xf32>
    %5 = vector.extract_strided_slice %1 {offsets = [0, 96], sizes = [17, 32], strides = [1, 1]} : vector<17x128xf32> to vector<17x32xf32>
    %6 = vector.shape_cast %2 : vector<17x32xf32> to vector<1x17x32xf32>
    %7 = vector.shape_cast %3 : vector<17x32xf32> to vector<1x17x32xf32>
    %8 = vector.shape_cast %4 : vector<17x32xf32> to vector<1x17x32xf32>
    %9 = vector.shape_cast %5 : vector<17x32xf32> to vector<1x17x32xf32>
    %10 = tpu.concatenate %6, %7, %8, %9 in 0 : vector<1x17x32xf32>, vector<1x17x32xf32>, vector<1x17x32xf32>, vector<1x17x32xf32> -> vector<4x17x32xf32>
    %cst = arith.constant 0.000000e+00 : f32
    %11 = vector.broadcast %cst : f32 to vector<4x9x32xf32>
    %12 = vector.extract_strided_slice %10 {offsets = [0, 0, 0], sizes = [4, 9, 32], strides = [1, 1, 1]} : vector<4x17x32xf32> to vector<4x9x32xf32>
    %13 = arith.truncf %12 : vector<4x9x32xf32> to vector<4x9x32xbf16>
    %c0_2 = arith.constant 0 : index
    %c0_3 = arith.constant 0 : index
    %c0_4 = arith.constant 0 : index
    %c0_5 = arith.constant 0 : index
    %14 = vector.load %arg3[%c0_2, %c0_3, %c0_4, %c0_5] : memref<8x4x32x32xbf16, #tpu.memory_space<vmem>>, vector<1x4x32x32xbf16>
    %15 = vector.shape_cast %14 : vector<1x4x32x32xbf16> to vector<4x32x32xbf16>
    %cst_6 = arith.constant dense<0.000000e+00> : vector<4x9x32xf32>
    %16 = tpu.matmul %13, %15, %cst_6 {dimension_numbers = #tpu.dot_dimension_numbers<[2], [1], [1], [2], [0, 0, 0, 1, 1, 2], [0], [0]>} : vector<4x9x32xbf16>, vector<4x32x32xbf16>, vector<4x9x32xf32> -> vector<4x9x32xf32>
    %17 = arith.addf %11, %16 : vector<4x9x32xf32>
    %18 = vector.extract_strided_slice %10 {offsets = [0, 1, 0], sizes = [4, 9, 32], strides = [1, 1, 1]} : vector<4x17x32xf32> to vector<4x9x32xf32>
    %19 = arith.truncf %18 : vector<4x9x32xf32> to vector<4x9x32xbf16>
    %c1 = arith.constant 1 : index
    %c0_7 = arith.constant 0 : index
    %c0_8 = arith.constant 0 : index
    %c0_9 = arith.constant 0 : index
    %20 = vector.load %arg3[%c1, %c0_7, %c0_8, %c0_9] : memref<8x4x32x32xbf16, #tpu.memory_space<vmem>>, vector<1x4x32x32xbf16>
    %21 = vector.shape_cast %20 : vector<1x4x32x32xbf16> to vector<4x32x32xbf16>
    %cst_10 = arith.constant dense<0.000000e+00> : vector<4x9x32xf32>
    %22 = tpu.matmul %19, %21, %cst_10 {dimension_numbers = #tpu.dot_dimension_numbers<[2], [1], [1], [2], [0, 0, 0, 1, 1, 2], [0], [0]>} : vector<4x9x32xbf16>, vector<4x32x32xbf16>, vector<4x9x32xf32> -> vector<4x9x32xf32>
    %23 = arith.addf %17, %22 : vector<4x9x32xf32>
    %24 = vector.extract_strided_slice %10 {offsets = [0, 2, 0], sizes = [4, 9, 32], strides = [1, 1, 1]} : vector<4x17x32xf32> to vector<4x9x32xf32>
    %25 = arith.truncf %24 : vector<4x9x32xf32> to vector<4x9x32xbf16>
    %c2 = arith.constant 2 : index
    %c0_11 = arith.constant 0 : index
    %c0_12 = arith.constant 0 : index
    %c0_13 = arith.constant 0 : index
    %26 = vector.load %arg3[%c2, %c0_11, %c0_12, %c0_13] : memref<8x4x32x32xbf16, #tpu.memory_space<vmem>>, vector<1x4x32x32xbf16>
    %27 = vector.shape_cast %26 : vector<1x4x32x32xbf16> to vector<4x32x32xbf16>
    %cst_14 = arith.constant dense<0.000000e+00> : vector<4x9x32xf32>
    %28 = tpu.matmul %25, %27, %cst_14 {dimension_numbers = #tpu.dot_dimension_numbers<[2], [1], [1], [2], [0, 0, 0, 1, 1, 2], [0], [0]>} : vector<4x9x32xbf16>, vector<4x32x32xbf16>, vector<4x9x32xf32> -> vector<4x9x32xf32>
    %29 = arith.addf %23, %28 : vector<4x9x32xf32>
    %30 = vector.extract_strided_slice %10 {offsets = [0, 3, 0], sizes = [4, 9, 32], strides = [1, 1, 1]} : vector<4x17x32xf32> to vector<4x9x32xf32>
    %31 = arith.truncf %30 : vector<4x9x32xf32> to vector<4x9x32xbf16>
    %c3 = arith.constant 3 : index
    %c0_15 = arith.constant 0 : index
    %c0_16 = arith.constant 0 : index
    %c0_17 = arith.constant 0 : index
    %32 = vector.load %arg3[%c3, %c0_15, %c0_16, %c0_17] : memref<8x4x32x32xbf16, #tpu.memory_space<vmem>>, vector<1x4x32x32xbf16>
    %33 = vector.shape_cast %32 : vector<1x4x32x32xbf16> to vector<4x32x32xbf16>
    %cst_18 = arith.constant dense<0.000000e+00> : vector<4x9x32xf32>
    %34 = tpu.matmul %31, %33, %cst_18 {dimension_numbers = #tpu.dot_dimension_numbers<[2], [1], [1], [2], [0, 0, 0, 1, 1, 2], [0], [0]>} : vector<4x9x32xbf16>, vector<4x32x32xbf16>, vector<4x9x32xf32> -> vector<4x9x32xf32>
    %35 = arith.addf %29, %34 : vector<4x9x32xf32>
    %36 = vector.extract_strided_slice %10 {offsets = [0, 4, 0], sizes = [4, 9, 32], strides = [1, 1, 1]} : vector<4x17x32xf32> to vector<4x9x32xf32>
    %37 = arith.truncf %36 : vector<4x9x32xf32> to vector<4x9x32xbf16>
    %c4 = arith.constant 4 : index
    %c0_19 = arith.constant 0 : index
    %c0_20 = arith.constant 0 : index
    %c0_21 = arith.constant 0 : index
    %38 = vector.load %arg3[%c4, %c0_19, %c0_20, %c0_21] : memref<8x4x32x32xbf16, #tpu.memory_space<vmem>>, vector<1x4x32x32xbf16>
    %39 = vector.shape_cast %38 : vector<1x4x32x32xbf16> to vector<4x32x32xbf16>
    %cst_22 = arith.constant dense<0.000000e+00> : vector<4x9x32xf32>
    %40 = tpu.matmul %37, %39, %cst_22 {dimension_numbers = #tpu.dot_dimension_numbers<[2], [1], [1], [2], [0, 0, 0, 1, 1, 2], [0], [0]>} : vector<4x9x32xbf16>, vector<4x32x32xbf16>, vector<4x9x32xf32> -> vector<4x9x32xf32>
    %41 = arith.addf %35, %40 : vector<4x9x32xf32>
    %42 = vector.extract_strided_slice %10 {offsets = [0, 5, 0], sizes = [4, 9, 32], strides = [1, 1, 1]} : vector<4x17x32xf32> to vector<4x9x32xf32>
    %43 = arith.truncf %42 : vector<4x9x32xf32> to vector<4x9x32xbf16>
    %c5 = arith.constant 5 : index
    %c0_23 = arith.constant 0 : index
    %c0_24 = arith.constant 0 : index
    %c0_25 = arith.constant 0 : index
    %44 = vector.load %arg3[%c5, %c0_23, %c0_24, %c0_25] : memref<8x4x32x32xbf16, #tpu.memory_space<vmem>>, vector<1x4x32x32xbf16>
    %45 = vector.shape_cast %44 : vector<1x4x32x32xbf16> to vector<4x32x32xbf16>
    %cst_26 = arith.constant dense<0.000000e+00> : vector<4x9x32xf32>
    %46 = tpu.matmul %43, %45, %cst_26 {dimension_numbers = #tpu.dot_dimension_numbers<[2], [1], [1], [2], [0, 0, 0, 1, 1, 2], [0], [0]>} : vector<4x9x32xbf16>, vector<4x32x32xbf16>, vector<4x9x32xf32> -> vector<4x9x32xf32>
    %47 = arith.addf %41, %46 : vector<4x9x32xf32>
    %48 = vector.extract_strided_slice %10 {offsets = [0, 6, 0], sizes = [4, 9, 32], strides = [1, 1, 1]} : vector<4x17x32xf32> to vector<4x9x32xf32>
    %49 = arith.truncf %48 : vector<4x9x32xf32> to vector<4x9x32xbf16>
    %c6 = arith.constant 6 : index
    %c0_27 = arith.constant 0 : index
    %c0_28 = arith.constant 0 : index
    %c0_29 = arith.constant 0 : index
    %50 = vector.load %arg3[%c6, %c0_27, %c0_28, %c0_29] : memref<8x4x32x32xbf16, #tpu.memory_space<vmem>>, vector<1x4x32x32xbf16>
    %51 = vector.shape_cast %50 : vector<1x4x32x32xbf16> to vector<4x32x32xbf16>
    %cst_30 = arith.constant dense<0.000000e+00> : vector<4x9x32xf32>
    %52 = tpu.matmul %49, %51, %cst_30 {dimension_numbers = #tpu.dot_dimension_numbers<[2], [1], [1], [2], [0, 0, 0, 1, 1, 2], [0], [0]>} : vector<4x9x32xbf16>, vector<4x32x32xbf16>, vector<4x9x32xf32> -> vector<4x9x32xf32>
    %53 = arith.addf %47, %52 : vector<4x9x32xf32>
    %54 = vector.extract_strided_slice %10 {offsets = [0, 7, 0], sizes = [4, 9, 32], strides = [1, 1, 1]} : vector<4x17x32xf32> to vector<4x9x32xf32>
    %55 = arith.truncf %54 : vector<4x9x32xf32> to vector<4x9x32xbf16>
    %c7 = arith.constant 7 : index
    %c0_31 = arith.constant 0 : index
    %c0_32 = arith.constant 0 : index
    %c0_33 = arith.constant 0 : index
    %56 = vector.load %arg3[%c7, %c0_31, %c0_32, %c0_33] : memref<8x4x32x32xbf16, #tpu.memory_space<vmem>>, vector<1x4x32x32xbf16>
    %57 = vector.shape_cast %56 : vector<1x4x32x32xbf16> to vector<4x32x32xbf16>
    %cst_34 = arith.constant dense<0.000000e+00> : vector<4x9x32xf32>
    %58 = tpu.matmul %55, %57, %cst_34 {dimension_numbers = #tpu.dot_dimension_numbers<[2], [1], [1], [2], [0, 0, 0, 1, 1, 2], [0], [0]>} : vector<4x9x32xbf16>, vector<4x32x32xbf16>, vector<4x9x32xf32> -> vector<4x9x32xf32>
    %59 = arith.addf %53, %58 : vector<4x9x32xf32>
    %60 = vector.extract_strided_slice %59 {offsets = [0, 0, 0], sizes = [1, 9, 32], strides = [1, 1, 1]} : vector<4x9x32xf32> to vector<1x9x32xf32>
    %61 = vector.shape_cast %60 : vector<1x9x32xf32> to vector<9x32xf32>
    %62 = vector.extract_strided_slice %59 {offsets = [1, 0, 0], sizes = [1, 9, 32], strides = [1, 1, 1]} : vector<4x9x32xf32> to vector<1x9x32xf32>
    %63 = vector.shape_cast %62 : vector<1x9x32xf32> to vector<9x32xf32>
    %64 = vector.extract_strided_slice %59 {offsets = [2, 0, 0], sizes = [1, 9, 32], strides = [1, 1, 1]} : vector<4x9x32xf32> to vector<1x9x32xf32>
    %65 = vector.shape_cast %64 : vector<1x9x32xf32> to vector<9x32xf32>
    %66 = vector.extract_strided_slice %59 {offsets = [3, 0, 0], sizes = [1, 9, 32], strides = [1, 1, 1]} : vector<4x9x32xf32> to vector<1x9x32xf32>
    %67 = vector.shape_cast %66 : vector<1x9x32xf32> to vector<9x32xf32>
    %68 = tpu.concatenate %61, %63, %65, %67 in 1 : vector<9x32xf32>, vector<9x32xf32>, vector<9x32xf32>, vector<9x32xf32> -> vector<9x128xf32>
    %c0_35 = arith.constant 0 : index
    %c0_36 = arith.constant 0 : index
    %69 = vector.load %arg4[%c0_35, %c0_36] : memref<1x128xf32, #tpu.memory_space<vmem>>, vector<1x128xf32>
    %70 = vector.broadcast %69 : vector<1x128xf32> to vector<9x128xf32>
    %71 = arith.addf %68, %70 : vector<9x128xf32>
    %cst_37 = arith.constant 5.000000e-01 : f32
    %72 = vector.broadcast %cst_37 : f32 to vector<9x128xf32>
    %73 = arith.mulf %72, %71 : vector<9x128xf32>
    %cst_38 = arith.constant 4.471500e-02 : f32
    %74 = vector.broadcast %cst_38 : f32 to vector<9x128xf32>
    %75 = arith.mulf %74, %71 : vector<9x128xf32>
    %76 = arith.mulf %75, %71 : vector<9x128xf32>
    %77 = arith.mulf %76, %71 : vector<9x128xf32>
    %78 = arith.addf %71, %77 : vector<9x128xf32>
    %cst_39 = arith.constant 0.797884583 : f32
    %79 = vector.broadcast %cst_39 : f32 to vector<9x128xf32>
    %80 = arith.mulf %79, %78 : vector<9x128xf32>
    %81 = math.tanh %80 : vector<9x128xf32>
    %cst_40 = arith.constant 1.000000e+00 : f32
    %82 = vector.broadcast %cst_40 : f32 to vector<9x128xf32>
    %83 = arith.addf %82, %81 : vector<9x128xf32>
    %84 = arith.mulf %73, %83 : vector<9x128xf32>
    %c0_41 = arith.constant 0 : index
    %c0_42 = arith.constant 0 : index
    %c0_43 = arith.constant 0 : index
    %85 = vector.load %arg2[%c0_41, %c0_42, %c0_43] : memref<1x9x128xf32, #tpu.memory_space<vmem>>, vector<1x9x128xf32>
    %86 = vector.shape_cast %85 : vector<1x9x128xf32> to vector<9x128xf32>
    %87 = arith.addf %86, %84 : vector<9x128xf32>
    %c0_44 = arith.constant 0 : index
    %c0_45 = arith.constant 0 : index
    %88 = vector.load %arg5[%c0_44, %c0_45] : memref<1x128xf32, #tpu.memory_space<vmem>>, vector<1x128xf32>
    %c0_46 = arith.constant 0 : index
    %c0_47 = arith.constant 0 : index
    %89 = vector.load %arg6[%c0_46, %c0_47] : memref<1x128xf32, #tpu.memory_space<vmem>>, vector<1x128xf32>
    %cst_48 = arith.constant dense<0.000000e+00> : vector<9xf32>
    %90 = vector.multi_reduction <add>, %87, %cst_48 [1] : vector<9x128xf32> to vector<9xf32>
    %91 = vector.shape_cast %90 : vector<9xf32> to vector<9x1xf32>
    %cst_49 = arith.constant 1.280000e+02 : f32
    %92 = vector.broadcast %cst_49 : f32 to vector<9x1xf32>
    %93 = arith.divf %91, %92 : vector<9x1xf32>
    %94 = vector.broadcast %93 : vector<9x1xf32> to vector<9x128xf32>
    %95 = arith.subf %87, %94 : vector<9x128xf32>
    %96 = arith.mulf %95, %95 : vector<9x128xf32>
    %cst_50 = arith.constant dense<0.000000e+00> : vector<9xf32>
    %97 = vector.multi_reduction <add>, %96, %cst_50 [1] : vector<9x128xf32> to vector<9xf32>
    %98 = vector.shape_cast %97 : vector<9xf32> to vector<9x1xf32>
    %cst_51 = arith.constant 1.280000e+02 : f32
    %99 = vector.broadcast %cst_51 : f32 to vector<9x1xf32>
    %100 = arith.divf %98, %99 : vector<9x1xf32>
    %cst_52 = arith.constant 9.99999974E-6 : f32
    %101 = vector.broadcast %cst_52 : f32 to vector<9x1xf32>
    %102 = arith.addf %100, %101 : vector<9x1xf32>
    %103 = math.rsqrt %102 : vector<9x1xf32>
    %104 = vector.broadcast %103 : vector<9x1xf32> to vector<9x128xf32>
    %105 = arith.mulf %95, %104 : vector<9x128xf32>
    %106 = vector.broadcast %88 : vector<1x128xf32> to vector<9x128xf32>
    %107 = arith.mulf %105, %106 : vector<9x128xf32>
    %108 = vector.broadcast %89 : vector<1x128xf32> to vector<9x128xf32>
    %109 = arith.addf %107, %108 : vector<9x128xf32>
    %c0_53 = arith.constant 0 : index
    %c0_54 = arith.constant 0 : index
    %c0_55 = arith.constant 0 : index
    %110 = vector.load %arg7[%c0_53, %c0_54, %c0_55] : memref<1x9x128xf32, #tpu.memory_space<vmem>>, vector<1x9x128xf32>
    %111 = vector.shape_cast %110 : vector<1x9x128xf32> to vector<9x128xf32>
    %112 = vector.shape_cast %109 : vector<9x128xf32> to vector<1x9x128xf32>
    tpu.vector_store %arg7[%c0_53, %c0_54, %c0_55], %112 {strides = array<i32>} : memref<1x9x128xf32, #tpu.memory_space<vmem>>, vector<1x9x128xf32>,
    return
  }
  func.func @transform_0(%arg0: i32) -> (i32, i32, i32) {
    %c0_i32 = arith.constant 0 : i32
    %c0_i32_0 = arith.constant 0 : i32
    %c0_i32_1 = arith.constant 0 : i32
    return %arg0, %c0_i32, %c0_i32_0 : i32, i32, i32
  }
  func.func @transform_1(%arg0: i32) -> (i32, i32, i32) {
    %c0_i32 = arith.constant 0 : i32
    %c0_i32_0 = arith.constant 0 : i32
    %c0_i32_1 = arith.constant 0 : i32
    return %arg0, %c0_i32, %c0_i32_0 : i32, i32, i32
  }
  func.func @transform_2(%arg0: i32) -> (i32, i32, i32, i32) {
    %c0_i32 = arith.constant 0 : i32
    %c0_i32_0 = arith.constant 0 : i32
    %c0_i32_1 = arith.constant 0 : i32
    %c0_i32_2 = arith.constant 0 : i32
    %c0_i32_3 = arith.constant 0 : i32
    return %c0_i32, %c0_i32_0, %c0_i32_1, %c0_i32_2 : i32, i32, i32, i32
  }
  func.func @transform_3(%arg0: i32) -> (i32, i32) {
    %c0_i32 = arith.constant 0 : i32
    %c0_i32_0 = arith.constant 0 : i32
    %c0_i32_1 = arith.constant 0 : i32
    return %c0_i32, %c0_i32_0 : i32, i32
  }
  func.func @transform_4(%arg0: i32) -> (i32, i32) {
    %c0_i32 = arith.constant 0 : i32
    %c0_i32_0 = arith.constant 0 : i32
    %c0_i32_1 = arith.constant 0 : i32
    return %c0_i32, %c0_i32_0 : i32, i32
  }
  func.func @transform_5(%arg0: i32) -> (i32, i32) {
    %c0_i32 = arith.constant 0 : i32
    %c0_i32_0 = arith.constant 0 : i32
    %c0_i32_1 = arith.constant 0 : i32
    return %c0_i32, %c0_i32_0 : i32, i32
  }
  func.func @transform_6(%arg0: i32) -> (i32, i32, i32) {
    %c0_i32 = arith.constant 0 : i32
    %c0_i32_0 = arith.constant 0 : i32
    %c0_i32_1 = arith.constant 0 : i32
    return %arg0, %c0_i32, %c0_i32_0 : i32, i32, i32
  }
}

module attributes {stable_mosaic.version = 11 : i64} {
  func.func @encoder_layer_kernel(%arg0: i32, %arg1: memref<1x9x128xf32, #tpu.memory_space<vmem>>, %arg2: memref<128x128xbf16, #tpu.memory_space<vmem>>, %arg3: memref<1x128xf32, #tpu.memory_space<vmem>>, %arg4: memref<128x128xbf16, #tpu.memory_space<vmem>>, %arg5: memref<1x128xf32, #tpu.memory_space<vmem>>, %arg6: memref<128x128xbf16, #tpu.memory_space<vmem>>, %arg7: memref<1x128xf32, #tpu.memory_space<vmem>>, %arg8: memref<4x32x128xbf16, #tpu.memory_space<vmem>>, %arg9: memref<1x128xf32, #tpu.memory_space<vmem>>, %arg10: memref<1x128xf32, #tpu.memory_space<vmem>>, %arg11: memref<1x128xf32, #tpu.memory_space<vmem>>, %arg12: memref<128x256xbf16, #tpu.memory_space<vmem>>, %arg13: memref<1x256xf32, #tpu.memory_space<vmem>>, %arg14: memref<256x128xbf16, #tpu.memory_space<vmem>>, %arg15: memref<1x128xf32, #tpu.memory_space<vmem>>, %arg16: memref<1x128xf32, #tpu.memory_space<vmem>>, %arg17: memref<1x128xf32, #tpu.memory_space<vmem>>, %arg18: memref<1x9x128xf32, #tpu.memory_space<vmem>>) attributes {dimension_semantics = [#tpu.dimension_semantics<parallel>], iteration_bounds = array<i64: 2>, scalar_prefetch = 0 : i64, scratch_operands = 0 : i64, tpu.core_type = #tpu.core_type<tc>, window_params = [{transform_indices = @transform_0, window_bounds = array<i64: 1, 9, 128>}, {pipeline_mode = #tpu.pipeline_mode<synchronous>, transform_indices = @transform_1, window_bounds = array<i64: 128, 128>}, {pipeline_mode = #tpu.pipeline_mode<synchronous>, transform_indices = @transform_2, window_bounds = array<i64: 1, 128>}, {pipeline_mode = #tpu.pipeline_mode<synchronous>, transform_indices = @transform_3, window_bounds = array<i64: 128, 128>}, {pipeline_mode = #tpu.pipeline_mode<synchronous>, transform_indices = @transform_4, window_bounds = array<i64: 1, 128>}, {pipeline_mode = #tpu.pipeline_mode<synchronous>, transform_indices = @transform_5, window_bounds = array<i64: 128, 128>}, {pipeline_mode = #tpu.pipeline_mode<synchronous>, transform_indices = @transform_6, window_bounds = array<i64: 1, 128>}, {pipeline_mode = #tpu.pipeline_mode<synchronous>, transform_indices = @transform_7, window_bounds = array<i64: 4, 32, 128>}, {pipeline_mode = #tpu.pipeline_mode<synchronous>, transform_indices = @transform_8, window_bounds = array<i64: 1, 128>}, {pipeline_mode = #tpu.pipeline_mode<synchronous>, transform_indices = @transform_9, window_bounds = array<i64: 1, 128>}, {pipeline_mode = #tpu.pipeline_mode<synchronous>, transform_indices = @transform_10, window_bounds = array<i64: 1, 128>}, {pipeline_mode = #tpu.pipeline_mode<synchronous>, transform_indices = @transform_11, window_bounds = array<i64: 128, 256>}, {pipeline_mode = #tpu.pipeline_mode<synchronous>, transform_indices = @transform_12, window_bounds = array<i64: 1, 256>}, {pipeline_mode = #tpu.pipeline_mode<synchronous>, transform_indices = @transform_13, window_bounds = array<i64: 256, 128>}, {pipeline_mode = #tpu.pipeline_mode<synchronous>, transform_indices = @transform_14, window_bounds = array<i64: 1, 128>}, {pipeline_mode = #tpu.pipeline_mode<synchronous>, transform_indices = @transform_15, window_bounds = array<i64: 1, 128>}, {pipeline_mode = #tpu.pipeline_mode<synchronous>, transform_indices = @transform_16, window_bounds = array<i64: 1, 128>}, {transform_indices = @transform_17, window_bounds = array<i64: 1, 9, 128>}]} {
    %c0 = arith.constant 0 : index
    %c0_0 = arith.constant 0 : index
    %c0_1 = arith.constant 0 : index
    %0 = vector.load %arg1[%c0, %c0_0, %c0_1] : memref<1x9x128xf32, #tpu.memory_space<vmem>>, vector<1x9x128xf32>
    %1 = vector.shape_cast %0 : vector<1x9x128xf32> to vector<9x128xf32>
    %2 = arith.truncf %1 : vector<9x128xf32> to vector<9x128xbf16>
    %c0_2 = arith.constant 0 : index
    %c0_3 = arith.constant 0 : index
    %3 = vector.load %arg2[%c0_2, %c0_3] : memref<128x128xbf16, #tpu.memory_space<vmem>>, vector<128x128xbf16>
    %cst = arith.constant dense<0.000000e+00> : vector<9x128xf32>
    %4 = tpu.matmul %2, %3, %cst {dimension_numbers = #tpu.dot_dimension_numbers<[1], [0], [0], [1], [0, 0, 1, 1], [], []>} : vector<9x128xbf16>, vector<128x128xbf16>, vector<9x128xf32> -> vector<9x128xf32>
    %c0_4 = arith.constant 0 : index
    %c0_5 = arith.constant 0 : index
    %5 = vector.load %arg3[%c0_4, %c0_5] : memref<1x128xf32, #tpu.memory_space<vmem>>, vector<1x128xf32>
    %6 = vector.broadcast %5 : vector<1x128xf32> to vector<9x128xf32>
    %7 = arith.addf %4, %6 : vector<9x128xf32>
    %c0_6 = arith.constant 0 : index
    %c0_7 = arith.constant 0 : index
    %8 = vector.load %arg4[%c0_6, %c0_7] : memref<128x128xbf16, #tpu.memory_space<vmem>>, vector<128x128xbf16>
    %cst_8 = arith.constant dense<0.000000e+00> : vector<9x128xf32>
    %9 = tpu.matmul %2, %8, %cst_8 {dimension_numbers = #tpu.dot_dimension_numbers<[1], [0], [0], [1], [0, 0, 1, 1], [], []>} : vector<9x128xbf16>, vector<128x128xbf16>, vector<9x128xf32> -> vector<9x128xf32>
    %c0_9 = arith.constant 0 : index
    %c0_10 = arith.constant 0 : index
    %10 = vector.load %arg5[%c0_9, %c0_10] : memref<1x128xf32, #tpu.memory_space<vmem>>, vector<1x128xf32>
    %11 = vector.broadcast %10 : vector<1x128xf32> to vector<9x128xf32>
    %12 = arith.addf %9, %11 : vector<9x128xf32>
    %c0_11 = arith.constant 0 : index
    %c0_12 = arith.constant 0 : index
    %13 = vector.load %arg6[%c0_11, %c0_12] : memref<128x128xbf16, #tpu.memory_space<vmem>>, vector<128x128xbf16>
    %cst_13 = arith.constant dense<0.000000e+00> : vector<9x128xf32>
    %14 = tpu.matmul %2, %13, %cst_13 {dimension_numbers = #tpu.dot_dimension_numbers<[1], [0], [0], [1], [0, 0, 1, 1], [], []>} : vector<9x128xbf16>, vector<128x128xbf16>, vector<9x128xf32> -> vector<9x128xf32>
    %c0_14 = arith.constant 0 : index
    %c0_15 = arith.constant 0 : index
    %15 = vector.load %arg7[%c0_14, %c0_15] : memref<1x128xf32, #tpu.memory_space<vmem>>, vector<1x128xf32>
    %16 = vector.broadcast %15 : vector<1x128xf32> to vector<9x128xf32>
    %17 = arith.addf %14, %16 : vector<9x128xf32>
    %cst_16 = arith.constant 0.176776692 : f32
    %18 = vector.broadcast %cst_16 : f32 to vector<9x128xf32>
    %19 = arith.mulf %7, %18 : vector<9x128xf32>
    %20 = vector.extract_strided_slice %19 {offsets = [0, 0], sizes = [9, 32], strides = [1, 1]} : vector<9x128xf32> to vector<9x32xf32>
    %21 = vector.extract_strided_slice %19 {offsets = [0, 32], sizes = [9, 32], strides = [1, 1]} : vector<9x128xf32> to vector<9x32xf32>
    %22 = vector.extract_strided_slice %19 {offsets = [0, 64], sizes = [9, 32], strides = [1, 1]} : vector<9x128xf32> to vector<9x32xf32>
    %23 = vector.extract_strided_slice %19 {offsets = [0, 96], sizes = [9, 32], strides = [1, 1]} : vector<9x128xf32> to vector<9x32xf32>
    %24 = vector.shape_cast %20 : vector<9x32xf32> to vector<1x9x32xf32>
    %25 = vector.shape_cast %21 : vector<9x32xf32> to vector<1x9x32xf32>
    %26 = vector.shape_cast %22 : vector<9x32xf32> to vector<1x9x32xf32>
    %27 = vector.shape_cast %23 : vector<9x32xf32> to vector<1x9x32xf32>
    %28 = tpu.concatenate %24, %25, %26, %27 in 0 : vector<1x9x32xf32>, vector<1x9x32xf32>, vector<1x9x32xf32>, vector<1x9x32xf32> -> vector<4x9x32xf32>
    %29 = arith.truncf %28 : vector<4x9x32xf32> to vector<4x9x32xbf16>
    %30 = vector.extract_strided_slice %12 {offsets = [0, 0], sizes = [9, 32], strides = [1, 1]} : vector<9x128xf32> to vector<9x32xf32>
    %31 = vector.extract_strided_slice %12 {offsets = [0, 32], sizes = [9, 32], strides = [1, 1]} : vector<9x128xf32> to vector<9x32xf32>
    %32 = vector.extract_strided_slice %12 {offsets = [0, 64], sizes = [9, 32], strides = [1, 1]} : vector<9x128xf32> to vector<9x32xf32>
    %33 = vector.extract_strided_slice %12 {offsets = [0, 96], sizes = [9, 32], strides = [1, 1]} : vector<9x128xf32> to vector<9x32xf32>
    %34 = vector.shape_cast %30 : vector<9x32xf32> to vector<1x9x32xf32>
    %35 = vector.shape_cast %31 : vector<9x32xf32> to vector<1x9x32xf32>
    %36 = vector.shape_cast %32 : vector<9x32xf32> to vector<1x9x32xf32>
    %37 = vector.shape_cast %33 : vector<9x32xf32> to vector<1x9x32xf32>
    %38 = tpu.concatenate %34, %35, %36, %37 in 0 : vector<1x9x32xf32>, vector<1x9x32xf32>, vector<1x9x32xf32>, vector<1x9x32xf32> -> vector<4x9x32xf32>
    %39 = arith.truncf %38 : vector<4x9x32xf32> to vector<4x9x32xbf16>
    %40 = vector.extract_strided_slice %17 {offsets = [0, 0], sizes = [9, 32], strides = [1, 1]} : vector<9x128xf32> to vector<9x32xf32>
    %41 = vector.extract_strided_slice %17 {offsets = [0, 32], sizes = [9, 32], strides = [1, 1]} : vector<9x128xf32> to vector<9x32xf32>
    %42 = vector.extract_strided_slice %17 {offsets = [0, 64], sizes = [9, 32], strides = [1, 1]} : vector<9x128xf32> to vector<9x32xf32>
    %43 = vector.extract_strided_slice %17 {offsets = [0, 96], sizes = [9, 32], strides = [1, 1]} : vector<9x128xf32> to vector<9x32xf32>
    %44 = vector.shape_cast %40 : vector<9x32xf32> to vector<1x9x32xf32>
    %45 = vector.shape_cast %41 : vector<9x32xf32> to vector<1x9x32xf32>
    %46 = vector.shape_cast %42 : vector<9x32xf32> to vector<1x9x32xf32>
    %47 = vector.shape_cast %43 : vector<9x32xf32> to vector<1x9x32xf32>
    %48 = tpu.concatenate %44, %45, %46, %47 in 0 : vector<1x9x32xf32>, vector<1x9x32xf32>, vector<1x9x32xf32>, vector<1x9x32xf32> -> vector<4x9x32xf32>
    %49 = arith.truncf %48 : vector<4x9x32xf32> to vector<4x9x32xbf16>
    %cst_17 = arith.constant dense<0.000000e+00> : vector<4x9x9xf32>
    %50 = tpu.matmul %29, %39, %cst_17 {dimension_numbers = #tpu.dot_dimension_numbers<[2], [2], [1], [1], [0, 0, 0, 1, 1, 1], [0], [0]>} : vector<4x9x32xbf16>, vector<4x9x32xbf16>, vector<4x9x9xf32> -> vector<4x9x9xf32>
    %cst_18 = arith.constant dense<0xFF800000> : vector<4x9xf32>
    %51 = vector.multi_reduction <maximumf>, %50, %cst_18 [2] : vector<4x9x9xf32> to vector<4x9xf32>
    %52 = vector.shape_cast %51 : vector<4x9xf32> to vector<4x9x1xf32>
    %53 = vector.broadcast %52 : vector<4x9x1xf32> to vector<4x9x9xf32>
    %54 = arith.subf %50, %53 : vector<4x9x9xf32>
    %55 = math.exp %54 : vector<4x9x9xf32>
    %cst_19 = arith.constant dense<0.000000e+00> : vector<4x9xf32>
    %56 = vector.multi_reduction <add>, %55, %cst_19 [2] : vector<4x9x9xf32> to vector<4x9xf32>
    %57 = vector.shape_cast %56 : vector<4x9xf32> to vector<4x9x1xf32>
    %58 = tpu.reciprocal %57 {approx = true} : vector<4x9x1xf32> -> vector<4x9x1xf32>
    %59 = vector.broadcast %58 : vector<4x9x1xf32> to vector<4x9x9xf32>
    %60 = arith.mulf %55, %59 : vector<4x9x9xf32>
    %61 = arith.truncf %60 : vector<4x9x9xf32> to vector<4x9x9xbf16>
    %cst_20 = arith.constant dense<0.000000e+00> : vector<4x9x32xf32>
    %62 = tpu.matmul %61, %49, %cst_20 {dimension_numbers = #tpu.dot_dimension_numbers<[2], [1], [1], [2], [0, 0, 0, 1, 1, 2], [0], [0]>} : vector<4x9x9xbf16>, vector<4x9x32xbf16>, vector<4x9x32xf32> -> vector<4x9x32xf32>
    %63 = arith.truncf %62 : vector<4x9x32xf32> to vector<4x9x32xbf16>
    %c0_21 = arith.constant 0 : index
    %c0_22 = arith.constant 0 : index
    %c0_23 = arith.constant 0 : index
    %64 = vector.load %arg8[%c0_21, %c0_22, %c0_23] : memref<4x32x128xbf16, #tpu.memory_space<vmem>>, vector<4x32x128xbf16>
    %cst_24 = arith.constant dense<0.000000e+00> : vector<4x9x128xf32>
    %65 = tpu.matmul %63, %64, %cst_24 {dimension_numbers = #tpu.dot_dimension_numbers<[2], [1], [1], [2], [0, 0, 0, 1, 1, 2], [0], [0]>} : vector<4x9x32xbf16>, vector<4x32x128xbf16>, vector<4x9x128xf32> -> vector<4x9x128xf32>
    %cst_25 = arith.constant dense<0.000000e+00> : vector<9x128xf32>
    %66 = vector.multi_reduction <add>, %65, %cst_25 [0] : vector<4x9x128xf32> to vector<9x128xf32>
    %c0_26 = arith.constant 0 : index
    %c0_27 = arith.constant 0 : index
    %67 = vector.load %arg9[%c0_26, %c0_27] : memref<1x128xf32, #tpu.memory_space<vmem>>, vector<1x128xf32>
    %68 = vector.broadcast %67 : vector<1x128xf32> to vector<9x128xf32>
    %69 = arith.addf %66, %68 : vector<9x128xf32>
    %70 = arith.addf %1, %69 : vector<9x128xf32>
    %c0_28 = arith.constant 0 : index
    %c0_29 = arith.constant 0 : index
    %71 = vector.load %arg10[%c0_28, %c0_29] : memref<1x128xf32, #tpu.memory_space<vmem>>, vector<1x128xf32>
    %c0_30 = arith.constant 0 : index
    %c0_31 = arith.constant 0 : index
    %72 = vector.load %arg11[%c0_30, %c0_31] : memref<1x128xf32, #tpu.memory_space<vmem>>, vector<1x128xf32>
    %cst_32 = arith.constant dense<0.000000e+00> : vector<9xf32>
    %73 = vector.multi_reduction <add>, %70, %cst_32 [1] : vector<9x128xf32> to vector<9xf32>
    %74 = vector.shape_cast %73 : vector<9xf32> to vector<9x1xf32>
    %cst_33 = arith.constant 1.280000e+02 : f32
    %75 = vector.broadcast %cst_33 : f32 to vector<9x1xf32>
    %76 = arith.divf %74, %75 : vector<9x1xf32>
    %77 = vector.broadcast %76 : vector<9x1xf32> to vector<9x128xf32>
    %78 = arith.subf %70, %77 : vector<9x128xf32>
    %79 = arith.mulf %78, %78 : vector<9x128xf32>
    %cst_34 = arith.constant dense<0.000000e+00> : vector<9xf32>
    %80 = vector.multi_reduction <add>, %79, %cst_34 [1] : vector<9x128xf32> to vector<9xf32>
    %81 = vector.shape_cast %80 : vector<9xf32> to vector<9x1xf32>
    %cst_35 = arith.constant 1.280000e+02 : f32
    %82 = vector.broadcast %cst_35 : f32 to vector<9x1xf32>
    %83 = arith.divf %81, %82 : vector<9x1xf32>
    %cst_36 = arith.constant 9.99999974E-6 : f32
    %84 = vector.broadcast %cst_36 : f32 to vector<9x1xf32>
    %85 = arith.addf %83, %84 : vector<9x1xf32>
    %86 = math.rsqrt %85 : vector<9x1xf32>
    %87 = vector.broadcast %86 : vector<9x1xf32> to vector<9x128xf32>
    %88 = arith.mulf %78, %87 : vector<9x128xf32>
    %89 = vector.broadcast %71 : vector<1x128xf32> to vector<9x128xf32>
    %90 = arith.mulf %88, %89 : vector<9x128xf32>
    %91 = vector.broadcast %72 : vector<1x128xf32> to vector<9x128xf32>
    %92 = arith.addf %90, %91 : vector<9x128xf32>
    %93 = arith.truncf %92 : vector<9x128xf32> to vector<9x128xbf16>
    %c0_37 = arith.constant 0 : index
    %c0_38 = arith.constant 0 : index
    %94 = vector.load %arg12[%c0_37, %c0_38] : memref<128x256xbf16, #tpu.memory_space<vmem>>, vector<128x256xbf16>
    %cst_39 = arith.constant dense<0.000000e+00> : vector<9x256xf32>
    %95 = tpu.matmul %93, %94, %cst_39 {dimension_numbers = #tpu.dot_dimension_numbers<[1], [0], [0], [1], [0, 0, 1, 1], [], []>} : vector<9x128xbf16>, vector<128x256xbf16>, vector<9x256xf32> -> vector<9x256xf32>
    %c0_40 = arith.constant 0 : index
    %c0_41 = arith.constant 0 : index
    %96 = vector.load %arg13[%c0_40, %c0_41] : memref<1x256xf32, #tpu.memory_space<vmem>>, vector<1x256xf32>
    %97 = vector.broadcast %96 : vector<1x256xf32> to vector<9x256xf32>
    %98 = arith.addf %95, %97 : vector<9x256xf32>
    %cst_42 = arith.constant 5.000000e-01 : f32
    %99 = vector.broadcast %cst_42 : f32 to vector<9x256xf32>
    %100 = arith.mulf %99, %98 : vector<9x256xf32>
    %cst_43 = arith.constant 4.471500e-02 : f32
    %101 = vector.broadcast %cst_43 : f32 to vector<9x256xf32>
    %102 = arith.mulf %101, %98 : vector<9x256xf32>
    %103 = arith.mulf %102, %98 : vector<9x256xf32>
    %104 = arith.mulf %103, %98 : vector<9x256xf32>
    %105 = arith.addf %98, %104 : vector<9x256xf32>
    %cst_44 = arith.constant 0.797884583 : f32
    %106 = vector.broadcast %cst_44 : f32 to vector<9x256xf32>
    %107 = arith.mulf %106, %105 : vector<9x256xf32>
    %108 = math.tanh %107 : vector<9x256xf32>
    %cst_45 = arith.constant 1.000000e+00 : f32
    %109 = vector.broadcast %cst_45 : f32 to vector<9x256xf32>
    %110 = arith.addf %109, %108 : vector<9x256xf32>
    %111 = arith.mulf %100, %110 : vector<9x256xf32>
    %112 = arith.truncf %111 : vector<9x256xf32> to vector<9x256xbf16>
    %c0_46 = arith.constant 0 : index
    %c0_47 = arith.constant 0 : index
    %113 = vector.load %arg14[%c0_46, %c0_47] : memref<256x128xbf16, #tpu.memory_space<vmem>>, vector<256x128xbf16>
    %cst_48 = arith.constant dense<0.000000e+00> : vector<9x128xf32>
    %114 = tpu.matmul %112, %113, %cst_48 {dimension_numbers = #tpu.dot_dimension_numbers<[1], [0], [0], [1], [0, 0, 1, 1], [], []>} : vector<9x256xbf16>, vector<256x128xbf16>, vector<9x128xf32> -> vector<9x128xf32>
    %c0_49 = arith.constant 0 : index
    %c0_50 = arith.constant 0 : index
    %115 = vector.load %arg15[%c0_49, %c0_50] : memref<1x128xf32, #tpu.memory_space<vmem>>, vector<1x128xf32>
    %116 = vector.broadcast %115 : vector<1x128xf32> to vector<9x128xf32>
    %117 = arith.addf %114, %116 : vector<9x128xf32>
    %118 = arith.addf %92, %117 : vector<9x128xf32>
    %c0_51 = arith.constant 0 : index
    %c0_52 = arith.constant 0 : index
    %119 = vector.load %arg16[%c0_51, %c0_52] : memref<1x128xf32, #tpu.memory_space<vmem>>, vector<1x128xf32>
    %c0_53 = arith.constant 0 : index
    %c0_54 = arith.constant 0 : index
    %120 = vector.load %arg17[%c0_53, %c0_54] : memref<1x128xf32, #tpu.memory_space<vmem>>, vector<1x128xf32>
    %cst_55 = arith.constant dense<0.000000e+00> : vector<9xf32>
    %121 = vector.multi_reduction <add>, %118, %cst_55 [1] : vector<9x128xf32> to vector<9xf32>
    %122 = vector.shape_cast %121 : vector<9xf32> to vector<9x1xf32>
    %cst_56 = arith.constant 1.280000e+02 : f32
    %123 = vector.broadcast %cst_56 : f32 to vector<9x1xf32>
    %124 = arith.divf %122, %123 : vector<9x1xf32>
    %125 = vector.broadcast %124 : vector<9x1xf32> to vector<9x128xf32>
    %126 = arith.subf %118, %125 : vector<9x128xf32>
    %127 = arith.mulf %126, %126 : vector<9x128xf32>
    %cst_57 = arith.constant dense<0.000000e+00> : vector<9xf32>
    %128 = vector.multi_reduction <add>, %127, %cst_57 [1] : vector<9x128xf32> to vector<9xf32>
    %129 = vector.shape_cast %128 : vector<9xf32> to vector<9x1xf32>
    %cst_58 = arith.constant 1.280000e+02 : f32
    %130 = vector.broadcast %cst_58 : f32 to vector<9x1xf32>
    %131 = arith.divf %129, %130 : vector<9x1xf32>
    %cst_59 = arith.constant 9.99999974E-6 : f32
    %132 = vector.broadcast %cst_59 : f32 to vector<9x1xf32>
    %133 = arith.addf %131, %132 : vector<9x1xf32>
    %134 = math.rsqrt %133 : vector<9x1xf32>
    %135 = vector.broadcast %134 : vector<9x1xf32> to vector<9x128xf32>
    %136 = arith.mulf %126, %135 : vector<9x128xf32>
    %137 = vector.broadcast %119 : vector<1x128xf32> to vector<9x128xf32>
    %138 = arith.mulf %136, %137 : vector<9x128xf32>
    %139 = vector.broadcast %120 : vector<1x128xf32> to vector<9x128xf32>
    %140 = arith.addf %138, %139 : vector<9x128xf32>
    %c0_60 = arith.constant 0 : index
    %c0_61 = arith.constant 0 : index
    %c0_62 = arith.constant 0 : index
    %141 = vector.load %arg18[%c0_60, %c0_61, %c0_62] : memref<1x9x128xf32, #tpu.memory_space<vmem>>, vector<1x9x128xf32>
    %142 = vector.shape_cast %141 : vector<1x9x128xf32> to vector<9x128xf32>
    %143 = vector.shape_cast %140 : vector<9x128xf32> to vector<1x9x128xf32>
    tpu.vector_store %arg18[%c0_60, %c0_61, %c0_62], %143 {strides = array<i32>} : memref<1x9x128xf32, #tpu.memory_space<vmem>>, vector<1x9x128xf32>,
    return
  }
  func.func @transform_0(%arg0: i32) -> (i32, i32, i32) {
    %c0_i32 = arith.constant 0 : i32
    %c0_i32_0 = arith.constant 0 : i32
    %c0_i32_1 = arith.constant 0 : i32
    return %arg0, %c0_i32, %c0_i32_0 : i32, i32, i32
  }
  func.func @transform_1(%arg0: i32) -> (i32, i32) {
    %c0_i32 = arith.constant 0 : i32
    %c0_i32_0 = arith.constant 0 : i32
    %c0_i32_1 = arith.constant 0 : i32
    return %c0_i32, %c0_i32_0 : i32, i32
  }
  func.func @transform_2(%arg0: i32) -> (i32, i32) {
    %c0_i32 = arith.constant 0 : i32
    %c0_i32_0 = arith.constant 0 : i32
    %c0_i32_1 = arith.constant 0 : i32
    return %c0_i32, %c0_i32_0 : i32, i32
  }
  func.func @transform_3(%arg0: i32) -> (i32, i32) {
    %c0_i32 = arith.constant 0 : i32
    %c0_i32_0 = arith.constant 0 : i32
    %c0_i32_1 = arith.constant 0 : i32
    return %c0_i32, %c0_i32_0 : i32, i32
  }
  func.func @transform_4(%arg0: i32) -> (i32, i32) {
    %c0_i32 = arith.constant 0 : i32
    %c0_i32_0 = arith.constant 0 : i32
    %c0_i32_1 = arith.constant 0 : i32
    return %c0_i32, %c0_i32_0 : i32, i32
  }
  func.func @transform_5(%arg0: i32) -> (i32, i32) {
    %c0_i32 = arith.constant 0 : i32
    %c0_i32_0 = arith.constant 0 : i32
    %c0_i32_1 = arith.constant 0 : i32
    return %c0_i32, %c0_i32_0 : i32, i32
  }
  func.func @transform_6(%arg0: i32) -> (i32, i32) {
    %c0_i32 = arith.constant 0 : i32
    %c0_i32_0 = arith.constant 0 : i32
    %c0_i32_1 = arith.constant 0 : i32
    return %c0_i32, %c0_i32_0 : i32, i32
  }
  func.func @transform_7(%arg0: i32) -> (i32, i32, i32) {
    %c0_i32 = arith.constant 0 : i32
    %c0_i32_0 = arith.constant 0 : i32
    %c0_i32_1 = arith.constant 0 : i32
    %c0_i32_2 = arith.constant 0 : i32
    return %c0_i32, %c0_i32_0, %c0_i32_1 : i32, i32, i32
  }
  func.func @transform_8(%arg0: i32) -> (i32, i32) {
    %c0_i32 = arith.constant 0 : i32
    %c0_i32_0 = arith.constant 0 : i32
    %c0_i32_1 = arith.constant 0 : i32
    return %c0_i32, %c0_i32_0 : i32, i32
  }
  func.func @transform_9(%arg0: i32) -> (i32, i32) {
    %c0_i32 = arith.constant 0 : i32
    %c0_i32_0 = arith.constant 0 : i32
    %c0_i32_1 = arith.constant 0 : i32
    return %c0_i32, %c0_i32_0 : i32, i32
  }
  func.func @transform_10(%arg0: i32) -> (i32, i32) {
    %c0_i32 = arith.constant 0 : i32
    %c0_i32_0 = arith.constant 0 : i32
    %c0_i32_1 = arith.constant 0 : i32
    return %c0_i32, %c0_i32_0 : i32, i32
  }
  func.func @transform_11(%arg0: i32) -> (i32, i32) {
    %c0_i32 = arith.constant 0 : i32
    %c0_i32_0 = arith.constant 0 : i32
    %c0_i32_1 = arith.constant 0 : i32
    return %c0_i32, %c0_i32_0 : i32, i32
  }
  func.func @transform_12(%arg0: i32) -> (i32, i32) {
    %c0_i32 = arith.constant 0 : i32
    %c0_i32_0 = arith.constant 0 : i32
    %c0_i32_1 = arith.constant 0 : i32
    return %c0_i32, %c0_i32_0 : i32, i32
  }
  func.func @transform_13(%arg0: i32) -> (i32, i32) {
    %c0_i32 = arith.constant 0 : i32
    %c0_i32_0 = arith.constant 0 : i32
    %c0_i32_1 = arith.constant 0 : i32
    return %c0_i32, %c0_i32_0 : i32, i32
  }
  func.func @transform_14(%arg0: i32) -> (i32, i32) {
    %c0_i32 = arith.constant 0 : i32
    %c0_i32_0 = arith.constant 0 : i32
    %c0_i32_1 = arith.constant 0 : i32
    return %c0_i32, %c0_i32_0 : i32, i32
  }
  func.func @transform_15(%arg0: i32) -> (i32, i32) {
    %c0_i32 = arith.constant 0 : i32
    %c0_i32_0 = arith.constant 0 : i32
    %c0_i32_1 = arith.constant 0 : i32
    return %c0_i32, %c0_i32_0 : i32, i32
  }
  func.func @transform_16(%arg0: i32) -> (i32, i32) {
    %c0_i32 = arith.constant 0 : i32
    %c0_i32_0 = arith.constant 0 : i32
    %c0_i32_1 = arith.constant 0 : i32
    return %c0_i32, %c0_i32_0 : i32, i32
  }
  func.func @transform_17(%arg0: i32) -> (i32, i32, i32) {
    %c0_i32 = arith.constant 0 : i32
    %c0_i32_0 = arith.constant 0 : i32
    %c0_i32_1 = arith.constant 0 : i32
    return %arg0, %c0_i32, %c0_i32_0 : i32, i32, i32
  }
}

</mosaic_0001>

<bundles_post_ra>
// kernel: wavlm_extract_features.10
= control target key start
LH: loop header
LB: loop body
LE: loop exit
PB: predicated region body
PF: predicated region fallthrough
CT: control target
= control target key end

     0   :  { %s1631_s15 = smov 0   ;;  %s2262_s0 = inlined_call_operand.vmem [shape: bf16[1280,10], index: 0, kind: input, shape index: {}]   ;;  %s2263_s1 = inlined_call_operand.vmem [shape: bf16[10,128], index: 1, kind: input, shape index: {}]   ;;  %s2264_s2 = inlined_call_operand.vmem [shape: f32[1,128], index: 2, kind: input, shape index: {}]   ;;  %s2265_s3 = inlined_call_operand.vmem [shape: f32[1,128], index: 3, kind: input, shape index: {}]   ;;  %s2266_s4 = inlined_call_operand.vmem [shape: f32[1280,128], index: 4, kind: output, shape index: {}]  }
   0x1 LB: > { %s1342_s16 = sadd.s32 4294967295, %s1604_s15   ;;  %p1346_p0 = scmp.ge.s32.totalorder %s1604_s15, 1  ;;  %s1604_s15 = sphi %s1631_s15, %s14_s15  }
   0x2   : > { %p163_p1 = scmp.lt.s32.totalorder %s1604_s15, 6 }
   0x4   : > { %p164_p2 = pnand %p1346_p0, %p163_p1 }
   0x5   : > { %v1451_v0 = vld [vmem:[%s2263_s1] sm:$0x1f] (!%p164_p2)   ;;  %vm370_vm0 = vcmask (!%p164_p2), 1044480   ;;  %s1347_s19 = sshll.u32 (!%p164_p2), %s1342_s16, 5  ;;  %vm321_vm1 = vcmask (!%p164_p2), 80896  }
   0x6   : > { %167 = sbr.rel (%p164_p2) target bundleno = 675 (0x2a3), region = 36  ;;  %1441 = vmatprep.subr.msk.bf16.mxu0 (!%p164_p2), %vm370_vm0, %v1451_v0  ;;  %1442 = vmatprep.subr.msk.bf16.mxu1 (!%p164_p2), %vm370_vm0, %v1451_v0  ;;  %v372_v1 = vsel (!%p164_p2), %vm370_vm0, %v1451_v0, 0  ;;  %p190_p3 = scmp.lt.s32.totalorder (!%p164_p2), %s1347_s19, 159 }
   0x7   : > { %1406 = vmatpush3.bf16.msra.mxu0 (!%p164_p2), %v372_v1  ;;  %1440 = vmatpush3.bf16.msra.mxu1 (!%p164_p2), %v372_v1 }
   0xd   : > { %s2268_s19 = smov (!%p190_p3, %s1347_s19), 159 }
   0xe   : > { %s1348_s20 = sshll.u32 %s2268_s19, 2  ;;  %s1350_s28 = sshll.u32 %s2268_s19, 3 }
   0xf   : > { %s1648_s23 = scalar_lea.vmem %s2262_s0, %s1348_s20  ;;  %s2021_s5 = scalar_lea.vmem %s2266_s4, %s1350_s28 }
  0x10   : > { %v1452_v2 = vld [vmem:[%s1648_s23] sm:$0xff]   ;;  %v1454_v4 = vld [vmem:[%s1648_s23 + $0x8] sm:$0xff]   ;;  %v1456_v6 = vld [vmem:[%s1648_s23 + $0x10] sm:$0xff]  }
  0x11   : > { %v1453_v3 = vld [vmem:[%s1648_s23 + $0x40] sm:$0xff]   ;;  %1407 = vmatprep.mubr.msk.bf16.mxu0 %vm321_vm1, %v1452_v2  ;;  %v1455_v5 = vld [vmem:[%s1648_s23 + $0x48] sm:$0xff]   ;;  %v1458_v7 = vld [vmem:[%s1648_s23 + $0x50] sm:$0xff]  }
  0x12   : > { %1423 = vmatprep.mubr.msk.bf16.mxu1 %vm321_vm1, %v1453_v3  ;;  %1408 = vmatmul.mubr.msk.bf16.vlgmr.msra.gmra.mrb[0].mxu0 %vm321_vm1, %v1454_v4  ;;  %v1457_v8 = vld [vmem:[%s1648_s23 + $0x18] sm:$0xff]   ;;  %v1460_v10 = vld [vmem:[%s1648_s23 + $0x20] sm:$0xff]   ;;  %v1461_v12 = vld [vmem:[%s1648_s23 + $0x28] sm:$0xff]  }
  0x13   : > { %1424 = vmatmul.mubr.msk.bf16.vlgmr.msra.gmra.mrb[0].mxu1 %vm321_vm1, %v1455_v5  ;;  %1411 = vmatprep.mubr.msk.bf16.mxu0 %vm321_vm1, %v1456_v6  ;;  %v1459_v9 = vld [vmem:[%s1648_s23 + $0x58] sm:$0xff]   ;;  %v1462_v11 = vld [vmem:[%s1648_s23 + $0x60] sm:$0xff]   ;;  %v1463_v13 = vld [vmem:[%s1648_s23 + $0x68] sm:$0xff]  }
  0x14   : > { %1427 = vmatprep.mubr.msk.bf16.mxu1 %vm321_vm1, %v1458_v7  ;;  %v1464_v14 = vld [vmem:[%s1648_s23 + $0x30] sm:$0xff]   ;;  %v1465_v16 = vld [vmem:[%s1648_s23 + $0x38] sm:$0xff]  }
  0x15   : > { %v1466_v15 = vld [vmem:[%s1648_s23 + $0x70] sm:$0xff]   ;;  %v1467_v17 = vld [vmem:[%s1648_s23 + $0x78] sm:$0xff]  }
  0x1a   : > { %1412 = vmatmul.mubr.msk.bf16.gmra.mrb[4].mxu0 %vm321_vm1, %v1457_v8 }
  0x1b   : > { %1428 = vmatmul.mubr.msk.bf16.gmra.mrb[4].mxu1 %vm321_vm1, %v1459_v9  ;;  %1415 = vmatprep.mubr.msk.bf16.mxu0 %vm321_vm1, %v1460_v10 }
  0x1c   : > { %1431 = vmatprep.mubr.msk.bf16.mxu1 %vm321_vm1, %v1462_v11 }
  0x22   : > { %1416 = vmatmul.mubr.msk.bf16.gmra.mrb[8].mxu0 %vm321_vm1, %v1461_v12 }
  0x23   : > { %1432 = vmatmul.mubr.msk.bf16.gmra.mrb[8].mxu1 %vm321_vm1, %v1463_v13  ;;  %1419 = vmatprep.mubr.msk.bf16.mxu0 %vm321_vm1, %v1464_v14 }
  0x24   : > { %1435 = vmatprep.mubr.msk.bf16.mxu1 %vm321_vm1, %v1466_v15 }
  0x2a   : > { %1420 = vmatmul.mubr.msk.bf16.gmra.mrb[12].mxu0 %vm321_vm1, %v1465_v16 }
  0x2b   : > { %1436 = vmatmul.mubr.msk.bf16.gmra.mrb[12].mxu1 %vm321_vm1, %v1467_v17 }
  0xe5   : > { %v1682_v18 = vpop.f32.mrb[0].mxu0 }
  0xe6   : > { %v1684_v19 = vpop.f32.mrb[0].mxu1  ;;  %541 = vadd.xlane.f32.xlu1 %v1682_v18  ;;  %v1687_v20 = vpop.f32.mrb[1].mxu0 }
  0xe7   : > { %573 = vadd.xlane.f32.xlu0 %v1684_v19  ;;  %v1690_v21 = vpop.f32.mrb[1].mxu1  ;;  %v1692_v22 = vpop.f32.mrb[2].mxu0 }
  0xe8   : > { %v1694_v23 = vpop.f32.mrb[2].mxu1  ;;  %v1696_v24 = vpop.f32.mrb[3].mxu0 }
  0xe9   : > { %v1698_v25 = vpop.f32.mrb[3].mxu1 }
  0xea   : > { %543 = vadd.xlane.f32.xlu1 %v1692_v22 }
  0xeb   : > { %537 = vadd.xlane.f32.xlu0 %v1687_v20 }
  0xed   : > { %v1702_v26 = vpop.f32.mrb[4].mxu0 }
  0xee   : > { %575 = vadd.xlane.f32.xlu1 %v1694_v23  ;;  %v1705_v27 = vpop.f32.mrb[5].mxu0  ;;  %v1707_v28 = vpop.f32.mrb[4].mxu1 }
  0xef   : > { %569 = vadd.xlane.f32.xlu0 %v1690_v21  ;;  %v1710_v29 = vpop.f32.mrb[6].mxu0  ;;  %v1712_v30 = vpop.f32.mrb[5].mxu1 }
  0xf0   : > { %v1714_v31 = vpop.f32.mrb[7].mxu0  ;;  %v1716_v32 = vpop.f32.mrb[6].mxu1 }
  0xf1   : > { %v1718_v33 = vpop.f32.mrb[7].mxu1 }
  0xf2   : > { %571 = vadd.xlane.f32.xlu1 %v1698_v25 }
  0xf3   : > { %539 = vadd.xlane.f32.xlu0 %v1696_v24 }
  0xf5   : > { %v1722_v34 = vpop.f32.mrb[8].mxu0 }
  0xf6   : > { %551 = vadd.xlane.f32.xlu1 %v1710_v29  ;;  %v1725_v35 = vpop.f32.mrb[9].mxu0  ;;  %v1727_v36 = vpop.f32.mrb[8].mxu1 }
  0xf7   : > { %549 = vadd.xlane.f32.xlu0 %v1702_v26  ;;  %v1730_v37 = vpop.f32.mrb[10].mxu0  ;;  %v1732_v38 = vpop.f32.mrb[9].mxu1 }
  0xf8   : > { %v1734_v39 = vpop.f32.mrb[11].mxu0  ;;  %v1736_v40 = vpop.f32.mrb[10].mxu1 }
  0xf9   : > { %v1738_v41 = vpop.f32.mrb[11].mxu1 }
  0xfa   : > { %583 = vadd.xlane.f32.xlu1 %v1716_v32 }
  0xfb   : > { %581 = vadd.xlane.f32.xlu0 %v1707_v28 }
  0xfd   : > { %v1742_v42 = vpop.f32.mrb[12].mxu0 }
  0xfe   : > { %547 = vadd.xlane.f32.xlu1 %v1714_v31  ;;  %v1745_v43 = vpop.f32.mrb[13].mxu0  ;;  %v1747_v44 = vpop.f32.mrb[12].mxu1 }
  0xff   : > { %545 = vadd.xlane.f32.xlu0 %v1705_v27  ;;  %v1750_v45 = vpop.f32.mrb[14].mxu0  ;;  %v1752_v46 = vpop.f32.mrb[13].mxu1 }
 0x100   : > { %v1754_v47 = vpop.f32.mrb[15].mxu0  ;;  %v1756_v48 = vpop.f32.mrb[14].mxu1 }
 0x101   : > { %v1758_v49 = vpop.f32.mrb[15].mxu1 }
 0x102   : > { %579 = vadd.xlane.f32.xlu1 %v1718_v33 }
 0x103   : > { %577 = vadd.xlane.f32.xlu0 %v1712_v30 }
 0x106   : > { %559 = vadd.xlane.f32.xlu1 %v1730_v37 }
 0x107   : > { %557 = vadd.xlane.f32.xlu0 %v1722_v34 }
 0x10a   : > { %591 = vadd.xlane.f32.xlu1 %v1736_v40 }
 0x10b   : > { %589 = vadd.xlane.f32.xlu0 %v1727_v36 }
 0x10e   : > { %555 = vadd.xlane.f32.xlu1 %v1734_v39 }
 0x10f   : > { %553 = vadd.xlane.f32.xlu0 %v1725_v35 }
 0x112   : > { %587 = vadd.xlane.f32.xlu1 %v1738_v41 }
 0x113   : > { %585 = vadd.xlane.f32.xlu0 %v1732_v38 }
 0x116   : > { %567 = vadd.xlane.f32.xlu1 %v1750_v45 }
 0x117   : > { %565 = vadd.xlane.f32.xlu0 %v1742_v42 }
 0x11a   : > { %563 = vadd.xlane.f32.xlu1 %v1754_v47 }
 0x11b   : > { %561 = vadd.xlane.f32.xlu0 %v1745_v43 }
 0x11e   : > { %595 = vadd.xlane.f32.xlu1 %v1758_v49 }
 0x11f   : > { %593 = vadd.xlane.f32.xlu0 %v1752_v46 }
 0x122   : > { %599 = vadd.xlane.f32.xlu1 %v1756_v48 }
 0x123   : > { %597 = vadd.xlane.f32.xlu0 %v1747_v44 }
 0x173   : > { %v542_v50 = vpop.xlane.xlu1 %541 }
 0x174   : > { %v574_v51 = vpop.xlane.xlu0 %573  ;;  %v604_v52 = vmul.f32 0.0078125, %v542_v50 }
 0x175   : > { %v620_v53 = vmul.f32 0.0078125, %v574_v51 }
 0x176   : > { %v1779_v54 = vsub.f32 %v1682_v18, %v604_v52 }
 0x177   : > { %v544_v55 = vpop.xlane.xlu1 %543  ;;  %v1782_v56 = vsub.f32 %v1684_v19, %v620_v53 }
 0x178   : > { %v538_v57 = vpop.xlane.xlu0 %537  ;;  %v605_v58 = vmul.f32 0.0078125, %v544_v55  ;;  %v668_v59 = vmul.f32 %v1779_v54, %v1779_v54 }
 0x179   : > { %v602_v60 = vmul.f32 0.0078125, %v538_v57  ;;  %v684_v2 = vmul.f32 %v1782_v56, %v1782_v56 }
 0x17a   : > { %v1787_v61 = vsub.f32 %v1692_v22, %v605_v58  ;;  %702 = vadd.xlane.f32.xlu0 %v668_v59 }
 0x17b   : > { %v576_v62 = vpop.xlane.xlu1 %575  ;;  %v1790_v63 = vsub.f32 %v1687_v20, %v602_v60 }
 0x17c   : > { %v570_v0 = vpop.xlane.xlu0 %569  ;;  %v621_v1 = vmul.f32 0.0078125, %v576_v62  ;;  %v669_v3 = vmul.f32 %v1787_v61, %v1787_v61 }
 0x17d   : > { %v618_v4 = vmul.f32 0.0078125, %v570_v0  ;;  %v666_v9 = vmul.f32 %v1790_v63, %v1790_v63 }
 0x17e   : > { %v1797_v5 = vsub.f32 %v1694_v23, %v621_v1  ;;  %734 = vadd.xlane.f32.xlu0 %v684_v2  ;;  %704 = vadd.xlane.f32.xlu1 %v669_v3 }
 0x17f   : > { %v572_v6 = vpop.xlane.xlu1 %571  ;;  %v1800_v7 = vsub.f32 %v1690_v21, %v618_v4 }
 0x180   : > { %v540_v8 = vpop.xlane.xlu0 %539  ;;  %v685_v10 = vmul.f32 %v1797_v5, %v1797_v5  ;;  %v619_v11 = vmul.f32 0.0078125, %v572_v6 }
 0x181   : > { %v603_v12 = vmul.f32 0.0078125, %v540_v8  ;;  %v682_v17 = vmul.f32 %v1800_v7, %v1800_v7 }
 0x182   : > { %698 = vadd.xlane.f32.xlu0 %v666_v9  ;;  %736 = vadd.xlane.f32.xlu1 %v685_v10  ;;  %v1812_v18 = vsub.f32 %v1698_v25, %v619_v11 }
 0x183   : > { %v1807_v13 = vsub.f32 %v1696_v24, %v603_v12  ;;  %v552_v14 = vpop.xlane.xlu1 %551 }
 0x184   : > { %v550_v15 = vpop.xlane.xlu0 %549  ;;  %v609_v16 = vmul.f32 0.0078125, %v552_v14  ;;  %v683_v52 = vmul.f32 %v1812_v18, %v1812_v18 }
 0x185   : > { %v608_v19 = vmul.f32 0.0078125, %v550_v15  ;;  %v667_v20 = vmul.f32 %v1807_v13, %v1807_v13 }
 0x186   : > { %730 = vadd.xlane.f32.xlu0 %v682_v17  ;;  %v1820_v23 = vsub.f32 %v1710_v29, %v609_v16 }
 0x187   : > { %v1817_v21 = vsub.f32 %v1702_v26, %v608_v19  ;;  %700 = vadd.xlane.f32.xlu1 %v667_v20  ;;  %v584_v22 = vpop.xlane.xlu1 %583 }
 0x188   : > { %v582_v24 = vpop.xlane.xlu0 %581  ;;  %v625_v51 = vmul.f32 0.0078125, %v584_v22  ;;  %v673_v29 = vmul.f32 %v1820_v23, %v1820_v23 }
 0x189   : > { %v624_v50 = vmul.f32 0.0078125, %v582_v24  ;;  %v672_v25 = vmul.f32 %v1817_v21, %v1817_v21 }
 0x18a   : > { %v1832_v57 = vsub.f32 %v1716_v32, %v625_v51 }
 0x18b   : > { %v1827_v53 = vsub.f32 %v1707_v28, %v624_v50  ;;  %710 = vadd.xlane.f32.xlu0 %v672_v25  ;;  %732 = vadd.xlane.f32.xlu1 %v683_v52  ;;  %v548_v26 = vpop.xlane.xlu1 %547 }
 0x18c   : > { %v546_v55 = vpop.xlane.xlu0 %545  ;;  %v607_v59 = vmul.f32 0.0078125, %v548_v26  ;;  %v689_v4 = vmul.f32 %v1832_v57, %v1832_v57 }
 0x18d   : > { %v606_v58 = vmul.f32 0.0078125, %v546_v55  ;;  %v688_v60 = vmul.f32 %v1827_v53, %v1827_v53 }
 0x18e   : > { %v1840_v2 = vsub.f32 %v1714_v31, %v607_v59 }
 0x18f   : > { %v1837_v62 = vsub.f32 %v1705_v27, %v606_v58  ;;  %742 = vadd.xlane.f32.xlu0 %v688_v60  ;;  %712 = vadd.xlane.f32.xlu1 %v673_v29  ;;  %v580_v28 = vpop.xlane.xlu1 %579 }
 0x190   : > { %v578_v0 = vpop.xlane.xlu0 %577  ;;  %v623_v1 = vmul.f32 0.0078125, %v580_v28  ;;  %v671_v12 = vmul.f32 %v1840_v2, %v1840_v2 }
 0x191   : > { %v622_v3 = vmul.f32 0.0078125, %v578_v0  ;;  %v670_v32 = vmul.f32 %v1837_v62, %v1837_v62 }
 0x192   : > { %v1850_v8 = vsub.f32 %v1718_v33, %v623_v1 }
 0x193   : > { %v1847_v6 = vsub.f32 %v1712_v30, %v622_v3  ;;  %706 = vadd.xlane.f32.xlu0 %v670_v32  ;;  %744 = vadd.xlane.f32.xlu1 %v689_v4  ;;  %v560_v27 = vpop.xlane.xlu1 %559 }
 0x194   : > { %v558_v9 = vpop.xlane.xlu0 %557  ;;  %v613_v31 = vmul.f32 0.0078125, %v560_v27  ;;  %v687_v33 = vmul.f32 %v1850_v8, %v1850_v8 }
 0x195   : > { %v612_v10 = vmul.f32 0.0078125, %v558_v9  ;;  %v686_v11 = vmul.f32 %v1847_v6, %v1847_v6 }
 0x196   : > { %v1862_v16 = vsub.f32 %v1730_v37, %v613_v31 }
 0x197   : > { %v1857_v14 = vsub.f32 %v1722_v34, %v612_v10  ;;  %738 = vadd.xlane.f32.xlu0 %v686_v11  ;;  %708 = vadd.xlane.f32.xlu1 %v671_v12  ;;  %v592_v30 = vpop.xlane.xlu1 %591 }
 0x198   : > { %v590_v15 = vpop.xlane.xlu0 %589  ;;  %v629_v19 = vmul.f32 0.0078125, %v592_v30  ;;  %v677_v52 = vmul.f32 %v1862_v16, %v1862_v16 }
 0x199   : > { %v628_v17 = vmul.f32 0.0078125, %v590_v15  ;;  %v676_v20 = vmul.f32 %v1857_v14, %v1857_v14 }
 0x19a   : > { %v1870_v51 = vsub.f32 %v1736_v40, %v629_v19 }
 0x19b   : > { %v1867_v22 = vsub.f32 %v1727_v36, %v628_v17  ;;  %718 = vadd.xlane.f32.xlu0 %v676_v20  ;;  %740 = vadd.xlane.f32.xlu1 %v687_v33  ;;  %v556_v34 = vpop.xlane.xlu1 %555 }
 0x19c   : > { %v554_v24 = vpop.xlane.xlu0 %553  ;;  %v611_v50 = vmul.f32 0.0078125, %v556_v34  ;;  %v693_v60 = vmul.f32 %v1870_v51, %v1870_v51 }
 0x19d   : > { %v610_v25 = vmul.f32 0.0078125, %v554_v24  ;;  %v692_v37 = vmul.f32 %v1867_v22, %v1867_v22 }
 0x19e   : > { %v1880_v55 = vsub.f32 %v1734_v39, %v611_v50 }
 0x19f   : > { %v1877_v26 = vsub.f32 %v1725_v35, %v610_v25  ;;  %750 = vadd.xlane.f32.xlu0 %v692_v37  ;;  %720 = vadd.xlane.f32.xlu1 %v677_v52  ;;  %v588_v36 = vpop.xlane.xlu1 %587 }
 0x1a0   : > { %v586_v29 = vpop.xlane.xlu0 %585  ;;  %v627_v40 = vmul.f32 0.0078125, %v588_v36  ;;  %v675_v39 = vmul.f32 %v1880_v55, %v1880_v55 }
 0x1a1   : > { %v626_v58 = vmul.f32 0.0078125, %v586_v29  ;;  %v674_v59 = vmul.f32 %v1877_v26, %v1877_v26 }
 0x1a2   : > { %v1892_v1 = vsub.f32 %v1738_v41, %v627_v40 }
 0x1a3   : > { %v1887_v28 = vsub.f32 %v1732_v38, %v626_v58  ;;  %714 = vadd.xlane.f32.xlu0 %v674_v59  ;;  %752 = vadd.xlane.f32.xlu1 %v693_v60  ;;  %v568_v35 = vpop.xlane.xlu1 %567 }
 0x1a4   : > { %v566_v0 = vpop.xlane.xlu0 %565  ;;  %v617_v32 = vmul.f32 0.0078125, %v568_v35  ;;  %v691_v12 = vmul.f32 %v1892_v1, %v1892_v1 }
 0x1a5   : > { %v616_v3 = vmul.f32 0.0078125, %v566_v0  ;;  %v690_v4 = vmul.f32 %v1887_v28, %v1887_v28 }
 0x1a6   : > { %v1900_v31 = vsub.f32 %v1750_v45, %v617_v32 }
 0x1a7   : > { %v1897_v27 = vsub.f32 %v1742_v42, %v616_v3  ;;  %746 = vadd.xlane.f32.xlu0 %v690_v4  ;;  %716 = vadd.xlane.f32.xlu1 %v675_v39  ;;  %v564_v38 = vpop.xlane.xlu1 %563 }
 0x1a8   : > { %v562_v9 = vpop.xlane.xlu0 %561  ;;  %v615_v10 = vmul.f32 0.0078125, %v564_v38  ;;  %v681_v20 = vmul.f32 %v1900_v31, %v1900_v31 }
 0x1a9   : > { %v614_v11 = vmul.f32 0.0078125, %v562_v9  ;;  %v680_v41 = vmul.f32 %v1897_v27, %v1897_v27 }
 0x1aa   : > { %v1910_v15 = vsub.f32 %v1754_v47, %v615_v10 }
 0x1ab   : > { %v1907_v30 = vsub.f32 %v1745_v43, %v614_v11  ;;  %726 = vadd.xlane.f32.xlu0 %v680_v41  ;;  %748 = vadd.xlane.f32.xlu1 %v691_v12  ;;  %v596_v42 = vpop.xlane.xlu1 %595 }
 0x1ac   : > { %v594_v33 = vpop.xlane.xlu0 %593  ;;  %v631_v45 = vmul.f32 0.0078125, %v596_v42  ;;  %v679_v47 = vmul.f32 %v1910_v15, %v1910_v15 }
 0x1ad   : > { %v630_v17 = vmul.f32 0.0078125, %v594_v33  ;;  %v678_v19 = vmul.f32 %v1907_v30, %v1907_v30 }
 0x1ae   : > { %v1922_v50 = vsub.f32 %v1758_v49, %v631_v45  ;;  %v1941_v45 = vld [vmem:[%s2264_s2] ss:$0 sm:$0xff] }
 0x1af   : > { %v1917_v34 = vsub.f32 %v1752_v46, %v630_v17  ;;  %722 = vadd.xlane.f32.xlu0 %v678_v19  ;;  %728 = vadd.xlane.f32.xlu1 %v681_v20  ;;  %v600_v43 = vpop.xlane.xlu1 %599 }
 0x1b0   : > { %v598_v24 = vpop.xlane.xlu0 %597  ;;  %v633_v37 = vmul.f32 0.0078125, %v600_v43  ;;  %v695_v49 = vmul.f32 %v1922_v50, %v1922_v50 }
 0x1b1   : > { %v632_v25 = vmul.f32 0.0078125, %v598_v24  ;;  %v694_v52 = vmul.f32 %v1917_v34, %v1917_v34  ;;  %v1947_v24 = vld [vmem:[%s2265_s3] ss:$0 sm:$0xff] }
 0x1b2   : > { %v1930_v46 = vsub.f32 %v1756_v48, %v633_v37 }
 0x1b3   : > { %v1927_v36 = vsub.f32 %v1747_v44, %v632_v25  ;;  %754 = vadd.xlane.f32.xlu0 %v694_v52  ;;  %724 = vadd.xlane.f32.xlu1 %v679_v47 }
 0x1b4   : > { %v697_v58 = vmul.f32 %v1930_v46, %v1930_v46 }
 0x1b5   : > { %v696_v29 = vmul.f32 %v1927_v36, %v1927_v36 }
 0x1b7   : > { %758 = vadd.xlane.f32.xlu0 %v696_v29  ;;  %756 = vadd.xlane.f32.xlu1 %v695_v49 }
 0x1bb   : > { %760 = vadd.xlane.f32.xlu1 %v697_v58 }
 0x207   : > { %v703_v40 = vpop.xlane.xlu0 %702 }
 0x208   : > { %v764_v44 = vmul.f32 0.0078125, %v703_v40 }
 0x20a   : > { %v796_v59 = vadd.f32 1e-05, %v764_v44 }
 0x20b   : > { %v735_v60 = vpop.xlane.xlu0 %734  ;;  %v705_v35 = vpop.xlane.xlu1 %704 }
 0x20c   : > { %1468 = vrsqrt.f32 %v796_v59  ;;  %v780_v48 = vmul.f32 0.0078125, %v735_v60  ;;  %v765_v0 = vmul.f32 0.0078125, %v705_v35 }
 0x20e   : > { %v812_v39 = vadd.f32 1e-05, %v780_v48  ;;  %v797_v3 = vadd.f32 1e-05, %v765_v0 }
 0x20f   : > { %v699_v32 = vpop.xlane.xlu0 %698  ;;  %v737_v4 = vpop.xlane.xlu1 %736 }
 0x210   : > { %1470 = vrsqrt.f32 %v812_v39  ;;  %v762_v38 = vmul.f32 0.0078125, %v699_v32  ;;  %v781_v9 = vmul.f32 0.0078125, %v737_v4 }
 0x211   : > { %1472 = vrsqrt.f32 %v797_v3 }
 0x212   : > { %v794_v10 = vadd.f32 1e-05, %v762_v38  ;;  %v813_v11 = vadd.f32 1e-05, %v781_v9 }
 0x213   : > { %v731_v41 = vpop.xlane.xlu0 %730 }
 0x214   : > { %1474 = vrsqrt.f32 %v794_v10  ;;  %v778_v12 = vmul.f32 0.0078125, %v731_v41  ;;  %v701_v42 = vpop.xlane.xlu1 %700 }
 0x215   : > { %1476 = vrsqrt.f32 %v813_v11  ;;  %v763_v33 = vmul.f32 0.0078125, %v701_v42 }
 0x216   : > { %v1469_v17 = vpop.eup %1468  ;;  %v810_v19 = vadd.f32 1e-05, %v778_v12 }
 0x217   : > { %v860_v20 = vmul.f32 %v1469_v17, %v1779_v54  ;;  %v795_v43 = vadd.f32 1e-05, %v763_v33 }
 0x218   : > { %1478 = vrsqrt.f32 %v810_v19  ;;  %v711_v47 = vpop.xlane.xlu0 %710  ;;  %v733_v25 = vpop.xlane.xlu1 %732 }
 0x219   : > { %v898_v37 = vmul.f32 %v1941_v45, %v860_v20  ;;  %1480 = vrsqrt.f32 %v795_v43  ;;  %v768_v52 = vmul.f32 0.0078125, %v711_v47  ;;  %v779_v29 = vmul.f32 0.0078125, %v733_v25 }
 0x21a   : > { %v1471_v49 = vpop.eup %1470 }
 0x21b   : > { %v1473_v58 = vpop.eup %1472  ;;  %v936_v40 = vadd.f32 %v1947_v24, %v898_v37  ;;  %v876_v54 = vmul.f32 %v1471_v49, %v1782_v56  ;;  %v800_v44 = vadd.f32 1e-05, %v768_v52  ;;  %v811_v59 = vadd.f32 1e-05, %v779_v29 }
 0x21c   : > { %v861_v60 = vmul.f32 %v1473_v58, %v1787_v61  ;;  %v743_v35 = vpop.xlane.xlu0 %742  ;;  %v713_v48 = vpop.xlane.xlu1 %712 }
 0x21d   : > { %v1000_v0 = vmul.f32 0.044715, %v936_v40  ;;  %v914_v39 = vmul.f32 %v1941_v45, %v876_v54  ;;  %1482 = vrsqrt.f32 %v800_v44  ;;  %v784_v4 = vmul.f32 0.0078125, %v743_v35 }
 0x21e   : > { %v1475_v3 = vpop.eup %1474  ;;  %v899_v32 = vmul.f32 %v1941_v45, %v861_v60  ;;  %1484 = vrsqrt.f32 %v811_v59  ;;  %v769_v38 = vmul.f32 0.0078125, %v713_v48  ;;  %v1969_v48 = vmul.f32 0.5, %v936_v40 }
 0x21f   : > { %v1477_v9 = vpop.eup %1476  ;;  %v1032_v10 = vmul.f32 %v1000_v0, %v936_v40  ;;  %v952_v56 = vadd.f32 %v1947_v24, %v914_v39  ;;  %v858_v11 = vmul.f32 %v1475_v3, %v1790_v63  ;;  %v816_v12 = vadd.f32 1e-05, %v784_v4 }
 0x220   : > { %v937_v61 = vadd.f32 %v1947_v24, %v899_v32  ;;  %v877_v41 = vmul.f32 %v1477_v9, %v1797_v5  ;;  %v1959_v42 = vpop.xlane.xlu0 %706  ;;  %v801_v20 = vadd.f32 1e-05, %v769_v38  ;;  %v1963_v37 = vpop.xlane.xlu1 %744 }
 0x221   : > { %v1064_v33 = vmul.f32 %v1032_v10, %v936_v40  ;;  %v1016_v17 = vmul.f32 0.044715, %v952_v56  ;;  %v896_v19 = vmul.f32 %v1941_v45, %v858_v11  ;;  %1486 = vrsqrt.f32 %v816_v12 }
 0x222   : > { %v1479_v43 = vpop.eup %1478  ;;  %v1001_v47 = vmul.f32 0.044715, %v937_v61  ;;  %v915_v25 = vmul.f32 %v1941_v45, %v877_v41  ;;  %1488 = vrsqrt.f32 %v801_v20 }
 0x223   : > { %v1481_v63 = vpop.eup %1480  ;;  %v1096_v52 = vadd.f32 %v1064_v33, %v936_v40  ;;  %v1048_v29 = vmul.f32 %v1016_v17, %v952_v56  ;;  %v934_v5 = vadd.f32 %v1947_v24, %v896_v19  ;;  %v874_v49 = vmul.f32 %v1479_v43, %v1800_v7 }
 0x224   : > { %v1033_v58 = vmul.f32 %v1001_v47, %v937_v61  ;;  %v953_v54 = vadd.f32 %v1947_v24, %v915_v25  ;;  %v859_v44 = vmul.f32 %v1481_v63, %v1807_v13  ;;  %v1972_v32 = vpop.xlane.xlu0 %738  ;;  %v1977_v12 = vpop.xlane.xlu1 %708  ;;  %v1983_v43 = vmul.f32 0.5, %v952_v56 }
 0x225   : > { %v1128_v59 = vmul.f32 0.7978846, %v1096_v52  ;;  %v1080_v60 = vmul.f32 %v1048_v29, %v952_v56  ;;  %v998_v35 = vmul.f32 0.044715, %v934_v5  ;;  %v912_v3 = vmul.f32 %v1941_v45, %v874_v49 }
 0x226   : > { %v1065_v0 = vmul.f32 %v1033_v58, %v937_v61  ;;  %v1017_v39 = vmul.f32 0.044715, %v953_v54  ;;  %v897_v9 = vmul.f32 %v1941_v45, %v859_v44  ;;  %v1985_v52 = vmul.f32 0.5, %v937_v61 }
 0x227   : > { %v1483_v4 = vpop.eup %1482  ;;  %1490 = vtanh.f32 %v1128_v59  ;;  %v1112_v7 = vadd.f32 %v1080_v60, %v952_v56  ;;  %v1030_v38 = vmul.f32 %v998_v35, %v934_v5  ;;  %v950_v41 = vadd.f32 %v1947_v24, %v912_v3 }
 0x228   : > { %v1485_v10 = vpop.eup %1484  ;;  %v1097_v13 = vadd.f32 %v1065_v0, %v937_v61  ;;  %v1049_v11 = vmul.f32 %v1017_v39, %v953_v54  ;;  %v864_v40 = vmul.f32 %v1483_v4, %v1817_v21  ;;  %v1980_v19 = vadd.f32 %v1947_v24, %v897_v9  ;;  %v1989_v60 = vpop.xlane.xlu0 %718 }
 0x229   : > { %v1144_v33 = vmul.f32 0.7978846, %v1112_v7  ;;  %v1062_v17 = vmul.f32 %v1030_v38, %v934_v5  ;;  %v875_v20 = vmul.f32 %v1485_v10, %v1812_v18  ;;  %v1014_v63 = vmul.f32 0.044715, %v950_v41  ;;  %v1999_v7 = vpop.xlane.xlu1 %740 }
 0x22a   : > { %v1129_v47 = vmul.f32 0.7978846, %v1097_v13  ;;  %v1081_v25 = vmul.f32 %v1049_v11, %v953_v54  ;;  %v999_v21 = vmul.f32 0.044715, %v1980_v19  ;;  %v902_v59 = vmul.f32 %v1941_v45, %v864_v40 }
 0x22b   : > { %1492 = vtanh.f32 %v1144_v33  ;;  %v1094_v29 = vadd.f32 %v1062_v17, %v934_v5  ;;  %v1487_v49 = vpop.eup %1486  ;;  %v1046_v44 = vmul.f32 %v1014_v63, %v950_v41  ;;  %v913_v35 = vmul.f32 %v1941_v45, %v875_v20 }
 0x22c   : > { %1494 = vtanh.f32 %v1129_v47  ;;  %v1113_v58 = vadd.f32 %v1081_v25, %v953_v54  ;;  %v1031_v56 = vmul.f32 %v999_v21, %v1980_v19  ;;  %v880_v61 = vmul.f32 %v1487_v49, %v1827_v53  ;;  %v1489_v38 = vpop.eup %1488  ;;  %v751_v21 = vpop.xlane.xlu0 %750 }
 0x22d   : > { %v1126_v18 = vmul.f32 0.7978846, %v1094_v29  ;;  %v1994_v0 = vmul.f32 0.5, %v934_v5  ;;  %v1078_v3 = vmul.f32 %v1046_v44, %v950_v41  ;;  %v1997_v4 = vadd.f32 %v1947_v24, %v902_v59 }
 0x22e   : > { %v1145_v39 = vmul.f32 0.7978846, %v1113_v58  ;;  %v1063_v9 = vmul.f32 %v1031_v56, %v1980_v19  ;;  %v2003_v10 = vadd.f32 %v1947_v24, %v913_v35  ;;  %v918_v13 = vmul.f32 %v1941_v45, %v880_v61  ;;  %v721_v56 = vpop.xlane.xlu1 %720 }
 0x22f   : > { %1496 = vtanh.f32 %v1126_v18  ;;  %v2007_v53 = vmul.f32 0.5, %v953_v54  ;;  %v1110_v5 = vadd.f32 %v1078_v3, %v950_v41  ;;  %v1004_v11 = vmul.f32 0.044715, %v1997_v4 }
 0x230   : > { %1498 = vtanh.f32 %v1145_v39  ;;  %v1095_v33 = vadd.f32 %v1063_v9, %v1980_v19  ;;  %v1015_v17 = vmul.f32 0.044715, %v2003_v10  ;;  %v2013_v20 = vadd.f32 %v1947_v24, %v918_v13 }
 0x231   : > { %v1491_v40 = vpop.eup %1490  ;;  %v766_v47 = vmul.f32 0.0078125, %v1959_v42  ;;  %v1142_v63 = vmul.f32 0.7978846, %v1110_v5  ;;  %v1036_v29 = vmul.f32 %v1004_v11, %v1997_v4  ;;  %v865_v54 = vmul.f32 %v1489_v38, %v1820_v23 }
 0x232   : > { %v1192_v25 = vadd.f32 1.0, %v1491_v40  ;;  %v2023_v49 = vmul.f32 0.5, %v950_v41  ;;  %v1127_v58 = vmul.f32 0.7978846, %v1095_v33  ;;  %v1047_v44 = vmul.f32 %v1015_v17, %v2003_v10 }
 0x233   : > { %v1020_v42 = vmul.f32 0.044715, %v2013_v20  ;;  %1500 = vtanh.f32 %v1142_v63  ;;  %v1068_v18 = vmul.f32 %v1036_v29, %v1997_v4  ;;  %v903_v23 = vmul.f32 %v1941_v45, %v865_v54  ;;  %v715_v63 = vpop.xlane.xlu0 %714 }
 0x234   : > { %v1224_v59 = vmul.f32 %v1192_v25, %v1969_v48  ;;  %1502 = vtanh.f32 %v1127_v58  ;;  %v1079_v61 = vmul.f32 %v1047_v44, %v2003_v10  ;;  %v798_v39 = vadd.f32 1e-05, %v766_v47 }
 0x235   : > { %v1493_v35 = vpop.eup %1492  ;;  %v1052_v41 = vmul.f32 %v1020_v42, %v2013_v20  ;;  %v1100_v9 = vadd.f32 %v1068_v18, %v1997_v4  ;;  %v2035_v48 = vadd.f32 %v1947_v24, %v903_v23  ;;  %v785_v13 = vmul.f32 0.0078125, %v1963_v37  ;;  %v753_v18 = vpop.xlane.xlu1 %752 }
 0x236   : > { %v1495_v3 = vpop.eup %1494  ;;  %1256 = vst [vmem:[%s2021_s5 + $0x10] sm:$0xff] %v1224_v59  ;;  %v1208_v38 = vadd.f32 1.0, %v1493_v35  ;;  %v1111_v11 = vadd.f32 %v1079_v61, %v2003_v10  ;;  %1504 = vrsqrt.f32 %v798_v39  ;;  %v967_v17 = vmul.f32 0.5, %v1980_v19 }
 0x237   : > { %v1193_v5 = vadd.f32 1.0, %v1495_v3  ;;  %v1084_v40 = vmul.f32 %v1052_v41, %v2013_v20  ;;  %v1132_v47 = vmul.f32 0.7978846, %v1100_v9  ;;  %v1005_v25 = vmul.f32 0.044715, %v2035_v48 }
 0x238   : > { %v1240_v33 = vmul.f32 %v1208_v38, %v1983_v43  ;;  %v1143_v37 = vmul.f32 0.7978846, %v1111_v11  ;;  %v817_v44 = vadd.f32 1e-05, %v785_v13  ;;  %v782_v19 = vmul.f32 0.0078125, %v1972_v32 }
 0x239   : > { %v1497_v29 = vpop.eup %1496  ;;  %v1225_v54 = vmul.f32 %v1193_v5, %v1985_v52  ;;  %v1116_v58 = vadd.f32 %v1084_v40, %v2013_v20  ;;  %1506 = vtanh.f32 %v1132_v47  ;;  %v1037_v43 = vmul.f32 %v1005_v25, %v2035_v48 }
 0x23a   : > { %v1499_v42 = vpop.eup %1498  ;;  %1272 = vst [vmem:[%s2021_s5 + $0x90] sm:$0xff] %v1240_v33  ;;  %v1190_v59 = vadd.f32 1.0, %v1497_v29  ;;  %1508 = vtanh.f32 %v1143_v37  ;;  %v767_v52 = vmul.f32 0.0078125, %v1977_v12  ;;  %v814_v39 = vadd.f32 1e-05, %v782_v19 }
 0x23b   : > { %1257 = vst [vmem:[%s2021_s5 + $0x18] sm:$0xff] %v1225_v54  ;;  %v1209_v23 = vadd.f32 1.0, %v1499_v42  ;;  %v1148_v35 = vmul.f32 0.7978846, %v1116_v58  ;;  %v1069_v41 = vmul.f32 %v1037_v43, %v2035_v48  ;;  %1510 = vrsqrt.f32 %v817_v44  ;;  %v717_v54 = vpop.xlane.xlu1 %716 }
 0x23c   : > { %v1222_v61 = vmul.f32 %v1190_v59, %v1994_v0  ;;  %v799_v38 = vadd.f32 1e-05, %v767_v52  ;;  %v772_v32 = vmul.f32 0.0078125, %v1989_v60  ;;  %v783_v12 = vmul.f32 0.0078125, %v1999_v7  ;;  %v747_v0 = vpop.xlane.xlu0 %746 }
 0x23d   : > { %v1241_v3 = vmul.f32 %v1209_v23, %v2007_v53  ;;  %1512 = vtanh.f32 %v1148_v35  ;;  %v1501_v9 = vpop.eup %1500  ;;  %v1101_v13 = vadd.f32 %v1069_v41, %v2035_v48  ;;  %v788_v5 = vmul.f32 0.0078125, %v751_v21 }
 0x23e   : > { %1254 = vst [vmem:[%s2021_s5] sm:$0xff] %v1222_v61  ;;  %1514 = vrsqrt.f32 %v814_v39  ;;  %v1503_v11 = vpop.eup %1502  ;;  %v1206_v40 = vadd.f32 1.0, %v1501_v9  ;;  %v804_v33 = vadd.f32 1e-05, %v772_v32  ;;  %v773_v53 = vmul.f32 0.0078125, %v721_v56 }
 0x23f   : > { %1273 = vst [vmem:[%s2021_s5 + $0x98] sm:$0xff] %v1241_v3  ;;  %1516 = vrsqrt.f32 %v799_v38  ;;  %v1191_v47 = vadd.f32 1.0, %v1503_v11  ;;  %v1133_v25 = vmul.f32 0.7978846, %v1101_v13  ;;  %v815_v29 = vadd.f32 1e-05, %v783_v12 }
 0x240   : > { %v770_v60 = vmul.f32 0.0078125, %v715_v63  ;;  %v1505_v37 = vpop.eup %1504  ;;  %v1238_v58 = vmul.f32 %v1206_v40, %v2023_v49  ;;  %1518 = vrsqrt.f32 %v804_v33  ;;  %v820_v7 = vadd.f32 1e-05, %v788_v5  ;;  %v727_v35 = vpop.xlane.xlu0 %726 }
 0x241   : > { %v1223_v21 = vmul.f32 %v1191_v47, %v967_v17  ;;  %1520 = vtanh.f32 %v1133_v25  ;;  %v862_v44 = vmul.f32 %v1505_v37, %v1837_v62  ;;  %v805_v42 = vadd.f32 1e-05, %v773_v53 }
 0x242   : > { %1270 = vst [vmem:[%s2021_s5 + $0x80] sm:$0xff] %v1238_v58  ;;  %v972_v59 = vmul.f32 0.5, %v1997_v4  ;;  %1522 = vrsqrt.f32 %v815_v29  ;;  %v802_v56 = vadd.f32 1e-05, %v770_v60  ;;  %v789_v43 = vmul.f32 0.0078125, %v753_v18 }
 0x243   : > { %v1507_v19 = vpop.eup %1506  ;;  %1255 = vst [vmem:[%s2021_s5 + $0x8] sm:$0xff] %v1223_v21  ;;  %v983_v63 = vmul.f32 0.5, %v2003_v10  ;;  %v900_v23 = vmul.f32 %v1941_v45, %v862_v44  ;;  %1524 = vrsqrt.f32 %v820_v7  ;;  %v786_v49 = vmul.f32 0.0078125, %v747_v0  ;;  %v749_v10 = vpop.xlane.xlu1 %748 }
 0x244   : > { %v1509_v17 = vpop.eup %1508  ;;  %v1196_v52 = vadd.f32 1.0, %v1507_v19  ;;  %v988_v62 = vmul.f32 0.5, %v2013_v20  ;;  %v973_v61 = vmul.f32 0.5, %v2035_v48  ;;  %v771_v41 = vmul.f32 0.0078125, %v717_v54 }
 0x245   : > { %v1511_v4 = vpop.eup %1510  ;;  %v1207_v39 = vadd.f32 1.0, %v1509_v17  ;;  %v938_v18 = vadd.f32 %v1947_v24, %v900_v23  ;;  %1526 = vrsqrt.f32 %v805_v42  ;;  %v821_v3 = vadd.f32 1e-05, %v789_v43 }
 0x246   : > { %v1228_v32 = vmul.f32 %v1196_v52, %v972_v59  ;;  %v881_v9 = vmul.f32 %v1511_v4, %v1832_v57  ;;  %1528 = vrsqrt.f32 %v802_v56  ;;  %v776_v13 = vmul.f32 0.0078125, %v727_v35 }
 0x247   : > { %v1513_v38 = vpop.eup %1512  ;;  %v1239_v20 = vmul.f32 %v1207_v39, %v983_v63  ;;  %v1002_v48 = vmul.f32 0.044715, %v938_v18  ;;  %v818_v0 = vadd.f32 1e-05, %v786_v49  ;;  %v803_v53 = vadd.f32 1e-05, %v771_v41  ;;  %v723_v41 = vpop.xlane.xlu0 %722 }
 0x248   : > { %v1515_v12 = vpop.eup %1514  ;;  %v1212_v5 = vadd.f32 1.0, %v1513_v38  ;;  %1260 = vst [vmem:[%s2021_s5 + $0x30] sm:$0xff] %v1228_v32  ;;  %v919_v40 = vmul.f32 %v1941_v45, %v881_v9  ;;  %v787_v47 = vmul.f32 0.0078125, %v749_v10  ;;  %1530 = vrsqrt.f32 %v821_v3 }
 0x249   : > { %v1517_v11 = vpop.eup %1516  ;;  %v878_v33 = vmul.f32 %v1515_v12, %v1847_v6  ;;  %1271 = vst [vmem:[%s2021_s5 + $0x88] sm:$0xff] %v1239_v20  ;;  %v1034_v29 = vmul.f32 %v1002_v48, %v938_v18  ;;  %v2074_v54 = vmul.f32 0.5, %v938_v18  ;;  %v808_v7 = vadd.f32 1e-05, %v776_v13 }
 0x24a   : > { %v1244_v25 = vmul.f32 %v1212_v5, %v988_v62  ;;  %v863_v57 = vmul.f32 %v1517_v11, %v1840_v2  ;;  %v1519_v60 = vpop.eup %1518  ;;  %v957_v37 = vadd.f32 %v1947_v24, %v919_v40  ;;  %1532 = vrsqrt.f32 %v818_v0 }
 0x24b   : > { %v916_v58 = vmul.f32 %v1941_v45, %v878_v33  ;;  %v1521_v21 = vpop.eup %1520  ;;  %v1066_v44 = vmul.f32 %v1034_v29, %v938_v18  ;;  %v868_v42 = vmul.f32 %v1519_v60, %v1857_v14  ;;  %v819_v19 = vadd.f32 1e-05, %v787_v47 }
 0x24c   : > { %1276 = vst [vmem:[%s2021_s5 + $0xb0] sm:$0xff] %v1244_v25  ;;  %v901_v6 = vmul.f32 %v1941_v45, %v863_v57  ;;  %v1523_v59 = vpop.eup %1522  ;;  %v1197_v56 = vadd.f32 1.0, %v1521_v21  ;;  %v1021_v2 = vmul.f32 0.044715, %v957_v37  ;;  %1534 = vrsqrt.f32 %v803_v53 }
 0x24d   : > { %v2082_v43 = vadd.f32 %v1947_v24, %v916_v58  ;;  %v1525_v63 = vpop.eup %1524  ;;  %v1098_v23 = vadd.f32 %v1066_v44, %v938_v18  ;;  %v906_v35 = vmul.f32 %v1941_v45, %v868_v42  ;;  %v879_v17 = vmul.f32 %v1523_v59, %v1850_v8 }
 0x24e   : > { %v939_v49 = vadd.f32 %v1947_v24, %v901_v6  ;;  %v1229_v52 = vmul.f32 %v1197_v56, %v973_v61  ;;  %v1053_v62 = vmul.f32 %v1021_v2, %v957_v37  ;;  %1536 = vrsqrt.f32 %v808_v7 }
 0x24f   : > { %v1018_v14 = vmul.f32 0.044715, %v2082_v43  ;;  %v1527_v4 = vpop.eup %1526  ;;  %v1130_v39 = vmul.f32 0.7978846, %v1098_v23  ;;  %v2089_v10 = vadd.f32 %v1947_v24, %v906_v35  ;;  %v917_v8 = vmul.f32 %v1941_v45, %v879_v17 }
 0x250   : > { %v1003_v3 = vmul.f32 0.044715, %v939_v49  ;;  %v1529_v18 = vpop.eup %1528  ;;  %1261 = vst [vmem:[%s2021_s5 + $0x38] sm:$0xff] %v1229_v52  ;;  %v1085_v38 = vmul.f32 %v1053_v62, %v957_v37  ;;  %v884_v61 = vmul.f32 %v1525_v63, %v1867_v22  ;;  %v2096_v12 = vmul.f32 0.0078125, %v723_v41 }
 0x251   : > { %v1050_v32 = vmul.f32 %v1018_v14, %v2082_v43  ;;  %1538 = vtanh.f32 %v1130_v39  ;;  %v1008_v13 = vmul.f32 0.044715, %v2089_v10  ;;  %v955_v48 = vadd.f32 %v1947_v24, %v917_v8 }
 0x252   : > { %v1035_v9 = vmul.f32 %v1003_v3, %v939_v49  ;;  %v1117_v20 = vadd.f32 %v1085_v38, %v957_v37  ;;  %v922_v0 = vmul.f32 %v1941_v45, %v884_v61  ;;  %v1531_v11 = vpop.eup %1530  ;;  %v869_v53 = vmul.f32 %v1527_v4, %v1862_v16 }
 0x253   : > { %v1082_v5 = vmul.f32 %v1050_v32, %v2082_v43  ;;  %v1040_v33 = vmul.f32 %v1008_v13, %v2089_v10  ;;  %v866_v22 = vmul.f32 %v1529_v18, %v1877_v26  ;;  %v1019_v29 = vmul.f32 0.044715, %v955_v48 }
 0x254   : > { %v1067_v40 = vmul.f32 %v1035_v9, %v939_v49  ;;  %v1149_v47 = vmul.f32 0.7978846, %v1117_v20  ;;  %1540 = vrsqrt.f32 %v819_v19  ;;  %v1533_v57 = vpop.eup %1532  ;;  %v2107_v7 = vadd.f32 %v1947_v24, %v922_v0  ;;  %v729_v20 = vpop.xlane.xlu1 %728 }
 0x255   : > { %v1114_v25 = vadd.f32 %v1082_v5, %v2082_v43  ;;  %v1072_v58 = vmul.f32 %v1040_v33, %v2089_v10  ;;  %v907_v21 = vmul.f32 %v1941_v45, %v869_v53  ;;  %v1051_v6 = vmul.f32 %v1019_v29, %v955_v48 }
 0x256   : > { %v1099_v60 = vadd.f32 %v1067_v40, %v939_v49  ;;  %1542 = vtanh.f32 %v1149_v47  ;;  %v904_v16 = vmul.f32 %v1941_v45, %v866_v22  ;;  %v989_v26 = vmul.f32 0.5, %v957_v37  ;;  %v1535_v2 = vpop.eup %1534 }
 0x257   : > { %v1146_v44 = vmul.f32 0.7978846, %v1114_v25  ;;  %v1104_v59 = vadd.f32 %v1072_v58, %v2089_v10  ;;  %v1024_v56 = vmul.f32 0.044715, %v2107_v7  ;;  %v1083_v19 = vmul.f32 %v1051_v6, %v955_v48 }
 0x258   : > { %v1131_v42 = vmul.f32 0.7978846, %v1099_v60  ;;  %v2114_v63 = vadd.f32 %v1947_v24, %v907_v21  ;;  %v2117_v23 = vadd.f32 %v1947_v24, %v904_v16  ;;  %v1537_v35 = vpop.eup %1536  ;;  %v885_v37 = vmul.f32 %v1531_v11, %v1870_v51 }
 0x259   : > { %1544 = vtanh.f32 %v1146_v44  ;;  %v1136_v17 = vmul.f32 0.7978846, %v1104_v59  ;;  %v1056_v52 = vmul.f32 %v1024_v56, %v2107_v7  ;;  %v986_v62 = vmul.f32 0.5, %v2082_v43 }
 0x25a   : > { %1546 = vtanh.f32 %v1131_v42  ;;  %v971_v14 = vmul.f32 0.5, %v939_v49  ;;  %v1115_v41 = vadd.f32 %v1083_v19, %v955_v48  ;;  %v1009_v4 = vmul.f32 0.044715, %v2114_v63  ;;  %v725_v19 = vpop.xlane.xlu1 %724 }
 0x25b   : > { %v1539_v39 = vpop.eup %1538  ;;  %1548 = vtanh.f32 %v1136_v17  ;;  %v1088_v3 = vmul.f32 %v1056_v52, %v2107_v7  ;;  %v1006_v18 = vmul.f32 0.044715, %v2117_v23  ;;  %v923_v38 = vmul.f32 %v1941_v45, %v885_v37 }
 0x25c   : > { %v1194_v32 = vadd.f32 1.0, %v1539_v39  ;;  %v1147_v8 = vmul.f32 0.7978846, %v1115_v41  ;;  %v1041_v61 = vmul.f32 %v1009_v4, %v2114_v63  ;;  %v882_v51 = vmul.f32 %v1533_v57, %v1887_v28 }
 0x25d   : > { %v1120_v43 = vadd.f32 %v1088_v3, %v2107_v7  ;;  %v1038_v49 = vmul.f32 %v1006_v18, %v2117_v23  ;;  %v2131_v9 = vadd.f32 %v1947_v24, %v923_v38  ;;  %v867_v13 = vmul.f32 %v1535_v2, %v1880_v55  ;;  %v755_v38 = vpop.xlane.xlu0 %754 }
 0x25e   : > { %v1541_v5 = vpop.eup %1540  ;;  %v1226_v0 = vmul.f32 %v1194_v32, %v2074_v54  ;;  %1550 = vtanh.f32 %v1147_v8  ;;  %v1073_v11 = vmul.f32 %v1041_v61, %v2114_v63  ;;  %v920_v40 = vmul.f32 %v1941_v45, %v882_v51 }
 0x25f   : > { %v976_v28 = vmul.f32 0.5, %v2089_v10  ;;  %v1152_v33 = vmul.f32 0.7978846, %v1120_v43  ;;  %v1070_v53 = vmul.f32 %v1038_v49, %v2117_v23  ;;  %v1025_v22 = vmul.f32 0.044715, %v2131_v9 }
 0x260   : > { %v1543_v47 = vpop.eup %1542  ;;  %1258 = vst [vmem:[%s2021_s5 + $0x20] sm:$0xff] %v1226_v0  ;;  %v987_v25 = vmul.f32 0.5, %v955_v48  ;;  %v1105_v55 = vadd.f32 %v1073_v11, %v2114_v63  ;;  %v2143_v29 = vadd.f32 %v1947_v24, %v920_v40  ;;  %v905_v54 = vmul.f32 %v1941_v45, %v867_v13  ;;  %v757_v40 = vpop.xlane.xlu1 %756 }
 0x261   : > { %v1213_v57 = vadd.f32 1.0, %v1543_v47  ;;  %1552 = vtanh.f32 %v1152_v33  ;;  %v1102_v60 = vadd.f32 %v1070_v53, %v2117_v23  ;;  %v1057_v10 = vmul.f32 %v1025_v22, %v2131_v9 }
 0x262   : > { %v1137_v21 = vmul.f32 0.7978846, %v1105_v55  ;;  %v1022_v44 = vmul.f32 0.044715, %v2143_v29  ;;  %v2150_v48 = vadd.f32 %v1947_v24, %v905_v54  ;;  %v872_v6 = vmul.f32 %v1537_v35, %v1897_v27 }
 0x263   : > { %v1545_v58 = vpop.eup %1544  ;;  %v1245_v42 = vmul.f32 %v1213_v57, %v989_v26  ;;  %v1134_v56 = vmul.f32 0.7978846, %v1102_v60  ;;  %v1089_v2 = vmul.f32 %v1057_v10, %v2131_v9  ;;  %v992_v52 = vmul.f32 0.5, %v2107_v7  ;;  %v759_v57 = vpop.xlane.xlu0 %758 }
 0x264   : > { %v1547_v16 = vpop.eup %1546  ;;  %v1210_v59 = vadd.f32 1.0, %v1545_v58  ;;  %1554 = vtanh.f32 %v1137_v21  ;;  %v1054_v37 = vmul.f32 %v1022_v44, %v2143_v29  ;;  %v1007_v26 = vmul.f32 0.044715, %v2150_v48 }
 0x265   : > { %v1195_v17 = vadd.f32 1.0, %v1547_v16  ;;  %v1549_v41 = vpop.eup %1548  ;;  %1277 = vst [vmem:[%s2021_s5 + $0xb8] sm:$0xff] %v1245_v42  ;;  %1556 = vtanh.f32 %v1134_v56  ;;  %v1121_v27 = vadd.f32 %v1089_v2, %v2131_v9  ;;  %v910_v18 = vmul.f32 %v1941_v45, %v872_v6  ;;  %v761_v2 = vpop.xlane.xlu1 %760 }
 0x266   : > { %v1242_v4 = vmul.f32 %v1210_v59, %v986_v62  ;;  %v1200_v39 = vadd.f32 1.0, %v1549_v41  ;;  %v1086_v3 = vmul.f32 %v1054_v37, %v2143_v29  ;;  %v1039_v32 = vmul.f32 %v1007_v26, %v2150_v48 }
 0x267   : > { %v1227_v35 = vmul.f32 %v1195_v17, %v971_v14  ;;  %v1153_v7 = vmul.f32 0.7978846, %v1121_v27  ;;  %v883_v8 = vmul.f32 %v1541_v5, %v1892_v1  ;;  %v806_v62 = vadd.f32 1e-05, %v2096_v12 }
 0x268   : > { %1274 = vst [vmem:[%s2021_s5 + $0xa0] sm:$0xff] %v1242_v4  ;;  %v1551_v61 = vpop.eup %1550  ;;  %v1232_v51 = vmul.f32 %v1200_v39, %v976_v28  ;;  %v1118_v14 = vadd.f32 %v1086_v3, %v2143_v29  ;;  %v2168_v43 = vadd.f32 %v1947_v24, %v910_v18  ;;  %v777_v49 = vmul.f32 0.0078125, %v729_v20 }
 0x269   : > { %1259 = vst [vmem:[%s2021_s5 + $0x28] sm:$0xff] %v1227_v35  ;;  %v1211_v13 = vadd.f32 1.0, %v1551_v61  ;;  %1558 = vtanh.f32 %v1153_v7  ;;  %v1071_v0 = vmul.f32 %v1039_v32, %v2150_v48  ;;  %v921_v11 = vmul.f32 %v1941_v45, %v883_v8 }
 0x26a   : > { %1264 = vst [vmem:[%s2021_s5 + $0x50] sm:$0xff] %v1232_v51  ;;  %v977_v1 = vmul.f32 0.5, %v2114_v63  ;;  %v1150_v12 = vmul.f32 0.7978846, %v1118_v14  ;;  %v1012_v5 = vmul.f32 0.044715, %v2168_v43  ;;  %1560 = vrsqrt.f32 %v806_v62 }
 0x26b   : > { %v1553_v28 = vpop.eup %1552  ;;  %v1243_v33 = vmul.f32 %v1211_v13, %v987_v25  ;;  %v1103_v53 = vadd.f32 %v1071_v0, %v2150_v48  ;;  %v2177_v20 = vadd.f32 %v1947_v24, %v921_v11  ;;  %v809_v22 = vadd.f32 1e-05, %v777_v49 }
 0x26c   : > { %v1216_v47 = vadd.f32 1.0, %v1553_v28  ;;  %1562 = vtanh.f32 %v1150_v12  ;;  %v1044_v55 = vmul.f32 %v1012_v5, %v2168_v43  ;;  %v790_v54 = vmul.f32 0.0078125, %v755_v38 }
 0x26d   : > { %1275 = vst [vmem:[%s2021_s5 + $0xa8] sm:$0xff] %v1243_v33  ;;  %v974_v63 = vmul.f32 0.5, %v2117_v23  ;;  %v1135_v60 = vmul.f32 0.7978846, %v1103_v53  ;;  %v1023_v10 = vmul.f32 0.044715, %v2177_v20  ;;  %1564 = vrsqrt.f32 %v809_v22 }
 0x26e   : > { %v1555_v25 = vpop.eup %1554  ;;  %v1248_v58 = vmul.f32 %v1216_v47, %v992_v52  ;;  %v1076_v21 = vmul.f32 %v1044_v55, %v2168_v43  ;;  %v822_v44 = vadd.f32 1e-05, %v790_v54  ;;  %v775_v6 = vmul.f32 0.0078125, %v725_v19 }
 0x26f   : > { %v1557_v16 = vpop.eup %1556  ;;  %v1201_v42 = vadd.f32 1.0, %v1555_v25  ;;  %1566 = vtanh.f32 %v1135_v60  ;;  %v1055_v59 = vmul.f32 %v1023_v10, %v2177_v20  ;;  %v792_v56 = vmul.f32 0.0078125, %v759_v57 }
 0x270   : > { %1280 = vst [vmem:[%s2021_s5 + $0xd0] sm:$0xff] %v1248_v58  ;;  %v1198_v23 = vadd.f32 1.0, %v1557_v16  ;;  %v1108_v17 = vadd.f32 %v1076_v21, %v2168_v43  ;;  %1568 = vrsqrt.f32 %v822_v44  ;;  %v807_v37 = vadd.f32 1e-05, %v775_v6 }
 0x271   : > { %v1233_v52 = vmul.f32 %v1201_v42, %v977_v1  ;;  %v1087_v41 = vmul.f32 %v1055_v59, %v2177_v20  ;;  %v824_v4 = vadd.f32 1e-05, %v792_v56  ;;  %v791_v19 = vmul.f32 0.0078125, %v757_v40 }
 0x272   : > { %v1230_v27 = vmul.f32 %v1198_v23, %v974_v63  ;;  %v1140_v26 = vmul.f32 0.7978846, %v1108_v17  ;;  %1570 = vrsqrt.f32 %v807_v37  ;;  %v793_v35 = vmul.f32 0.0078125, %v761_v2 }
 0x273   : > { %v1559_v39 = vpop.eup %1558  ;;  %1265 = vst [vmem:[%s2021_s5 + $0x58] sm:$0xff] %v1233_v52  ;;  %v1119_v3 = vadd.f32 %v1087_v41, %v2177_v20  ;;  %1572 = vrsqrt.f32 %v824_v4  ;;  %v823_v18 = vadd.f32 1e-05, %v791_v19  ;;  %v993_v7 = vmul.f32 0.5, %v2131_v9 }
 0x274   : > { %v1561_v38 = vpop.eup %1560  ;;  %1262 = vst [vmem:[%s2021_s5 + $0x40] sm:$0xff] %v1230_v27  ;;  %v1217_v32 = vadd.f32 1.0, %v1559_v39  ;;  %1574 = vtanh.f32 %v1140_v26  ;;  %v825_v8 = vadd.f32 1e-05, %v793_v35  ;;  %v990_v13 = vmul.f32 0.5, %v2143_v29 }
 0x275   : > { %v1151_v62 = vmul.f32 0.7978846, %v1119_v3  ;;  %v870_v61 = vmul.f32 %v1561_v38, %v1907_v30  ;;  %1576 = vrsqrt.f32 %v823_v18  ;;  %v975_v5 = vmul.f32 0.5, %v2150_v48  ;;  %v1597_v38 = vld [vmem:[%s2265_s3] ss:$0 sm:$0xff] }
 0x276   : > { %v1563_v51 = vpop.eup %1562  ;;  %v1249_v14 = vmul.f32 %v1217_v32, %v993_v7  ;;  %1578 = vrsqrt.f32 %v825_v8  ;;  %v980_v60 = vmul.f32 0.5, %v2168_v43 }
 0x277   : > { %v1565_v49 = vpop.eup %1564  ;;  %v1214_v0 = vadd.f32 1.0, %v1563_v51  ;;  %1580 = vtanh.f32 %v1151_v62  ;;  %v908_v11 = vmul.f32 %v1941_v45, %v870_v61 }
 0x278   : > { %1281 = vst [vmem:[%s2021_s5 + $0xd8] sm:$0xff] %v1249_v14  ;;  %v873_v9 = vmul.f32 %v1565_v49, %v1900_v31 }
 0x279   : > { %v1567_v40 = vpop.eup %1566  ;;  %v1246_v1 = vmul.f32 %v1214_v0, %v990_v13  ;;  %v2198_v12 = vadd.f32 %v1947_v24, %v908_v11 }
 0x27a   : > { %v1569_v30 = vpop.eup %1568  ;;  %v1199_v28 = vadd.f32 1.0, %v1567_v40  ;;  %v911_v33 = vmul.f32 %v1941_v45, %v873_v9 }
 0x27b   : > { %1278 = vst [vmem:[%s2021_s5 + $0xc0] sm:$0xff] %v1246_v1  ;;  %v1010_v29 = vmul.f32 0.044715, %v2198_v12  ;;  %v886_v53 = vmul.f32 %v1569_v30, %v1917_v34 }
 0x27c   : > { %v1571_v22 = vpop.eup %1570  ;;  %v1231_v47 = vmul.f32 %v1199_v28, %v975_v5  ;;  %v2206_v31 = vadd.f32 %v1947_v24, %v911_v33 }
 0x27d   : > { %v1573_v55 = vpop.eup %1572  ;;  %v1042_v54 = vmul.f32 %v1010_v29, %v2198_v12  ;;  %v924_v57 = vmul.f32 %v1941_v45, %v886_v53  ;;  %v871_v48 = vmul.f32 %v1571_v22, %v1910_v15  ;;  %v978_v53 = vmul.f32 0.5, %v2198_v12 }
 0x27e   : > { %v1575_v63 = vpop.eup %1574  ;;  %1263 = vst [vmem:[%s2021_s5 + $0x48] sm:$0xff] %v1231_v47  ;;  %v1013_v10 = vmul.f32 0.044715, %v2206_v31  ;;  %v888_v34 = vmul.f32 %v1573_v55, %v1927_v36  ;;  %v991_v36 = vmul.f32 0.5, %v2177_v20  ;;  %v1596_v20 = vld [vmem:[%s2264_s2] ss:$0 sm:$0xff] }
 0x27f   : > { %v1577_v25 = vpop.eup %1576  ;;  %v1204_v58 = vadd.f32 1.0, %v1575_v63  ;;  %v1074_v21 = vmul.f32 %v1042_v54, %v2198_v12  ;;  %v2217_v44 = vadd.f32 %v1947_v24, %v924_v57  ;;  %v909_v6 = vmul.f32 %v1941_v45, %v871_v48 }
 0x280   : > { %v1579_v16 = vpop.eup %1578  ;;  %v1045_v15 = vmul.f32 %v1013_v10, %v2206_v31  ;;  %v926_v42 = vmul.f32 %v1941_v45, %v888_v34  ;;  %v887_v43 = vmul.f32 %v1577_v25, %v1922_v50  ;;  %v981_v48 = vmul.f32 0.5, %v2206_v31 }
 0x281   : > { %v1581_v59 = vpop.eup %1580  ;;  %v1236_v56 = vmul.f32 %v1204_v58, %v980_v60  ;;  %v1106_v2 = vadd.f32 %v1074_v21, %v2198_v12  ;;  %v1026_v23 = vmul.f32 0.044715, %v2217_v44  ;;  %v947_v52 = vadd.f32 %v1947_v24, %v909_v6 }
 0x282   : > { %v1215_v17 = vadd.f32 1.0, %v1581_v59  ;;  %v1077_v37 = vmul.f32 %v1045_v15, %v2206_v31  ;;  %v2229_v41 = vadd.f32 %v1947_v24, %v926_v42  ;;  %v925_v4 = vmul.f32 %v1596_v20, %v887_v43 }
 0x283   : > { %1268 = vst [vmem:[%s2021_s5 + $0x70] sm:$0xff] %v1236_v56  ;;  %v1138_v45 = vmul.f32 0.7978846, %v1106_v2  ;;  %v1058_v50 = vmul.f32 %v1026_v23, %v2217_v44  ;;  %v889_v19 = vmul.f32 %v1579_v16, %v1930_v46  ;;  %v1011_v35 = vmul.f32 0.044715, %v947_v52 }
 0x284   : > { %v1247_v27 = vmul.f32 %v1215_v17, %v991_v36  ;;  %v1109_v26 = vadd.f32 %v1077_v37, %v2206_v31  ;;  %v1028_v24 = vmul.f32 0.044715, %v2229_v41  ;;  %v963_v7 = vadd.f32 %v1597_v38, %v925_v4 }
 0x285   : > { %1582 = vtanh.f32 %v1138_v45  ;;  %v1090_v39 = vmul.f32 %v1058_v50, %v2217_v44  ;;  %v1043_v18 = vmul.f32 %v1011_v35, %v947_v52  ;;  %v927_v32 = vmul.f32 %v1596_v20, %v889_v19 }
 0x286   : > { %1279 = vst [vmem:[%s2021_s5 + $0xc8] sm:$0xff] %v1247_v27  ;;  %v1141_v3 = vmul.f32 0.7978846, %v1109_v26  ;;  %v1060_v8 = vmul.f32 %v1028_v24, %v2229_v41  ;;  %v1027_v61 = vmul.f32 0.044715, %v963_v7  ;;  %v994_v25 = vmul.f32 0.5, %v2217_v44 }
 0x287   : > { %v1122_v46 = vadd.f32 %v1090_v39, %v2217_v44  ;;  %v1075_v62 = vmul.f32 %v1043_v18, %v947_v52  ;;  %v965_v49 = vadd.f32 %v1597_v38, %v927_v32  ;;  %v979_v16 = vmul.f32 0.5, %v947_v52 }
 0x288   : > { %1584 = vtanh.f32 %v1141_v3  ;;  %v1092_v14 = vmul.f32 %v1060_v8, %v2229_v41  ;;  %v1059_v0 = vmul.f32 %v1027_v61, %v963_v7  ;;  %v996_v31 = vmul.f32 0.5, %v2229_v41 }
 0x289   : > { %v1154_v51 = vmul.f32 0.7978846, %v1122_v46  ;;  %v1107_v13 = vadd.f32 %v1075_v62, %v947_v52  ;;  %v1029_v9 = vmul.f32 0.044715, %v965_v49  ;;  %v995_v36 = vmul.f32 0.5, %v963_v7 }
 0x28a   : > { %v1124_v11 = vadd.f32 %v1092_v14, %v2229_v41  ;;  %v1091_v1 = vmul.f32 %v1059_v0, %v963_v7  ;;  %v997_v17 = vmul.f32 0.5, %v965_v49 }
 0x28b   : > { %1586 = vtanh.f32 %v1154_v51  ;;  %v1139_v40 = vmul.f32 0.7978846, %v1107_v13  ;;  %v1061_v5 = vmul.f32 %v1029_v9, %v965_v49 }
 0x28c   : > { %v1156_v30 = vmul.f32 0.7978846, %v1124_v11  ;;  %v1123_v28 = vadd.f32 %v1091_v1, %v963_v7 }
 0x28d   : > { %1588 = vtanh.f32 %v1139_v40  ;;  %v1093_v29 = vmul.f32 %v1061_v5, %v965_v49 }
 0x28e   : > { %1590 = vtanh.f32 %v1156_v30  ;;  %v1155_v47 = vmul.f32 0.7978846, %v1123_v28 }
 0x28f   : > { %v1583_v33 = vpop.eup %1582  ;;  %v1125_v55 = vadd.f32 %v1093_v29, %v965_v49 }
 0x290   : > { %v1202_v22 = vadd.f32 1.0, %v1583_v33  ;;  %1592 = vtanh.f32 %v1155_v47 }
 0x291   : > { %v1157_v60 = vmul.f32 0.7978846, %v1125_v55 }
 0x292   : > { %v1585_v54 = vpop.eup %1584  ;;  %v1234_v57 = vmul.f32 %v1202_v22, %v978_v53 }
 0x293   : > { %v1205_v63 = vadd.f32 1.0, %v1585_v54  ;;  %1594 = vtanh.f32 %v1157_v60 }
 0x294   : > { %1266 = vst [vmem:[%s2021_s5 + $0x60] sm:$0xff] %v1234_v57 }
 0x295   : > { %v1587_v10 = vpop.eup %1586  ;;  %v1237_v34 = vmul.f32 %v1205_v63, %v981_v48 }
 0x296   : > { %v1218_v12 = vadd.f32 1.0, %v1587_v10 }
 0x297   : > { %1269 = vst [vmem:[%s2021_s5 + $0x78] sm:$0xff] %v1237_v34  ;;  %v1589_v58 = vpop.eup %1588 }
 0x298   : > { %v1250_v21 = vmul.f32 %v1218_v12, %v994_v25  ;;  %v1591_v6 = vpop.eup %1590  ;;  %v1203_v15 = vadd.f32 1.0, %v1589_v58 }
 0x299   : > { %v1220_v42 = vadd.f32 1.0, %v1591_v6 }
 0x29a   : > { %1282 = vst [vmem:[%s2021_s5 + $0xe0] sm:$0xff] %v1250_v21  ;;  %v1235_v43 = vmul.f32 %v1203_v15, %v979_v16  ;;  %v1593_v59 = vpop.eup %1592 }
 0x29b   : > { %v1252_v56 = vmul.f32 %v1220_v42, %v996_v31  ;;  %v1219_v44 = vadd.f32 1.0, %v1593_v59 }
 0x29c   : > { %1267 = vst [vmem:[%s2021_s5 + $0x68] sm:$0xff] %v1235_v43 }
 0x29d   : > { %1284 = vst [vmem:[%s2021_s5 + $0xf0] sm:$0xff] %v1252_v56  ;;  %v1595_v2 = vpop.eup %1594  ;;  %v1251_v23 = vmul.f32 %v1219_v44, %v995_v36 }
 0x29e   : > { %v1221_v37 = vadd.f32 1.0, %v1595_v2 }
 0x29f   : > { %1283 = vst [vmem:[%s2021_s5 + $0xe8] sm:$0xff] %v1251_v23 }
 0x2a0   : > { %v1253_v52 = vmul.f32 %v1221_v37, %v997_v17 }
 0x2a2   : > { %1285 = vst [vmem:[%s2021_s5 + $0xf8] sm:$0xff] %v1253_v52 }
 0x2a3 PF: > { %s14_s15 = sadd.s32 1, %s1604_s15  }
 0x2a4   : > { %p11_p4 = scmp.ge.s32.totalorder %s14_s15, 7  }
 0x2a6   :  { %13 = sbr.rel (!%p11_p4) target bundleno = 1 (0x1), region = 66 }

// kernel: wavlm_extract_features.11
= control target key start
LH: loop header
LB: loop body
LE: loop exit
PB: predicated region body
PF: predicated region fallthrough
CT: control target
= control target key end

     0   :  { %s2391_s15 = smov 0   ;;  %s3130_s0 = inlined_call_operand.vmem [shape: bf16[768,384], index: 0, kind: input, shape index: {}]   ;;  %s3131_s1 = inlined_call_operand.vmem [shape: bf16[384,128], index: 1, kind: input, shape index: {}]   ;;  %s3132_s2 = inlined_call_operand.vmem [shape: f32[1,128], index: 2, kind: input, shape index: {}]   ;;  %s3133_s3 = inlined_call_operand.vmem [shape: f32[1,128], index: 3, kind: input, shape index: {}]   ;;  %s3134_s4 = inlined_call_operand.vmem [shape: f32[768,128], index: 4, kind: output, shape index: {}]  }
   0x1 LB: > { %s1846_s16 = sadd.s32 4294967295, %s2364_s15   ;;  %p1850_p0 = scmp.ge.s32.totalorder %s2364_s15, 1  ;;  %s2364_s15 = sphi %s2391_s15, %s14_s15  }
   0x2   : > { %p164_p1 = scmp.lt.s32.totalorder %s2364_s15, 4 }
   0x4   : > { %p165_p2 = pnand %p1850_p0, %p164_p1 }
   0x5   : > { %v2140_v0 = vld [vmem:[%s3131_s1 + $0x40] sm:$0xff] (!%p165_p2)   ;;  %s1851_s19 = sshll.u32 (!%p165_p2), %s1846_s16, 5  ;;  %v2142_v2 = vld [vmem:[%s3131_s1 + $0x48] sm:$0xff] (!%p165_p2)   ;;  %v2144_v4 = vld [vmem:[%s3131_s1 + $0x50] sm:$0xff] (!%p165_p2)  }
   0x6   : > { %168 = sbr.rel (%p165_p2) target bundleno = 729 (0x2d9), region = 36  ;;  %v2141_v1 = vld [vmem:[%s3131_s1] sm:$0xff] (!%p165_p2)   ;;  %1931 = vmatprep.subr.bf16.mxu0 (!%p165_p2), %v2140_v0  ;;  %2115 = vmatprep.subr.bf16.mxu1 (!%p165_p2), %v2140_v0  ;;  %p192_p3 = scmp.lt.s32.totalorder (!%p165_p2), %s1851_s19, 95  ;;  %v2143_v3 = vld [vmem:[%s3131_s1 + $0x8] sm:$0xff] (!%p165_p2)   ;;  %v2145_v5 = vld [vmem:[%s3131_s1 + $0x10] sm:$0xff] (!%p165_p2)  }
   0x7   : > { %1932 = vmatpush3.bf16.msra.mxu0 (!%p165_p2), %v2141_v1  ;;  %2123 = vmatpush3.bf16.msra.mxu1 (!%p165_p2), %v2141_v1  ;;  %v2146_v6 = vld [vmem:[%s3131_s1 + $0x58] sm:$0xff] (!%p165_p2)   ;;  %v2148_v8 = vld [vmem:[%s3131_s1 + $0x60] sm:$0xff] (!%p165_p2)   ;;  %v2150_v10 = vld [vmem:[%s3131_s1 + $0x68] sm:$0xff] (!%p165_p2)  }
   0x8   : > { %1933 = vmatprep.subr.bf16.mxu0 (!%p165_p2), %v2142_v2  ;;  %2116 = vmatprep.subr.bf16.mxu1 (!%p165_p2), %v2142_v2  ;;  %v2147_v7 = vld [vmem:[%s3131_s1 + $0x18] sm:$0xff] (!%p165_p2)   ;;  %v2149_v9 = vld [vmem:[%s3131_s1 + $0x20] sm:$0xff] (!%p165_p2)   ;;  %v2151_v13 = vld [vmem:[%s3131_s1 + $0x28] sm:$0xff] (!%p165_p2)  }
   0x9   : > { %v2152_v14 = vld [vmem:[%s3131_s1 + $0x70] sm:$0xff] (!%p165_p2)   ;;  %v2154_v16 = vld [vmem:[%s3131_s1 + $0x78] sm:$0xff] (!%p165_p2)   ;;  %v2162_v18 = vld [vmem:[%s3131_s1 + $0x80] sm:$0xff] (!%p165_p2)  }
   0xa   : > { %v2153_v15 = vld [vmem:[%s3131_s1 + $0x30] sm:$0xff] (!%p165_p2)   ;;  %v2155_v17 = vld [vmem:[%s3131_s1 + $0x38] sm:$0xff] (!%p165_p2)   ;;  %v2163_v22 = vld [vmem:[%s3131_s1 + $0x88] sm:$0xff] (!%p165_p2)  }
   0xb   : > { %1934 = vmatpush3.bf16.msra.mxu0 (!%p165_p2), %v2143_v3  ;;  %2124 = vmatpush3.bf16.msra.mxu1 (!%p165_p2), %v2143_v3  ;;  %v2170_v25 = vld [vmem:[%s3131_s1 + $0x90] sm:$0xff] (!%p165_p2)   ;;  %v2171_v27 = vld [vmem:[%s3131_s1 + $0x98] sm:$0xff] (!%p165_p2)   ;;  %v2178_v30 = vld [vmem:[%s3131_s1 + $0xa0] sm:$0xff] (!%p165_p2)  }
   0xc   : > { %1935 = vmatprep.subr.bf16.mxu0 (!%p165_p2), %v2144_v4  ;;  %2117 = vmatprep.subr.bf16.mxu1 (!%p165_p2), %v2144_v4  ;;  %v2179_v33 = vld [vmem:[%s3131_s1 + $0xa8] sm:$0xff] (!%p165_p2)   ;;  %v2186_v36 = vld [vmem:[%s3131_s1 + $0xb0] sm:$0xff] (!%p165_p2)   ;;  %v2187_v40 = vld [vmem:[%s3131_s1 + $0xb8] sm:$0xff] (!%p165_p2)  }
   0xd   : > { %s3136_s19 = smov (!%p192_p3, %s1851_s19), 95 }
   0xe   : > { %s2131_s6 = smul.u32 12, %s3136_s19  ;;  %s1854_s26 = sshll.u32 %s3136_s19, 3 }
   0xf   : > { %1936 = vmatpush3.bf16.msra.mxu0 %v2145_v5  ;;  %2125 = vmatpush3.bf16.msra.mxu1 %v2145_v5  ;;  %s2901_s28 = scalar_lea.vmem %s3134_s4, %s1854_s26 }
  0x10   : > { %1937 = vmatprep.subr.bf16.mxu0 %v2146_v6  ;;  %2118 = vmatprep.subr.bf16.mxu1 %v2146_v6  ;;  %s2432_s13 = scalar_lea.vmem %s3130_s0, %s2131_s6 }
  0x11   : > { %v2158_v11 = vld [vmem:[%s2432_s13 + $0x4] ss:$12 sps:$4 sm:$0xff]   ;;  %v2156_v19 = vld [vmem:[%s2432_s13] ss:$12 sps:$4 sm:$0xff]   ;;  %v2164_v21 = vld [vmem:[%s2432_s13 + $0x1c] ss:$12 sps:$4 sm:$0xff]  }
  0x12   : > { %v2161_v12 = vld [vmem:[%s2432_s13 + $0x124] ss:$12 sps:$4 sm:$0xff]   ;;  %749 = vmatprep.mubr.bf16.mxu0 %v2158_v11  ;;  %v2159_v20 = vld [vmem:[%s2432_s13 + $0x120] ss:$12 sps:$4 sm:$0xff]   ;;  %v2166_v23 = vld [vmem:[%s2432_s13 + $0x13c] ss:$12 sps:$4 sm:$0xff]  }
  0x13   : > { %1938 = vmatpush3.bf16.msra.mxu0 %v2147_v7  ;;  %2126 = vmatpush3.bf16.msra.mxu1 %v2147_v7  ;;  %v2168_v24 = vld [vmem:[%s2432_s13 + $0x18] ss:$12 sps:$4 sm:$0xff]   ;;  %v2172_v28 = vld [vmem:[%s2432_s13 + $0x34] ss:$12 sps:$4 sm:$0xff]   ;;  %v2176_v31 = vld [vmem:[%s2432_s13 + $0x30] ss:$12 sps:$4 sm:$0xff]  }
  0x14   : > { %1939 = vmatprep.subr.bf16.mxu0 %v2148_v8  ;;  %2119 = vmatprep.subr.bf16.mxu1 %v2148_v8  ;;  %v2169_v26 = vld [vmem:[%s2432_s13 + $0x138] ss:$12 sps:$4 sm:$0xff]   ;;  %v2174_v29 = vld [vmem:[%s2432_s13 + $0x154] ss:$12 sps:$4 sm:$0xff]   ;;  %v2177_v32 = vld [vmem:[%s2432_s13 + $0x150] ss:$12 sps:$4 sm:$0xff]  }
  0x15   : > { %845 = vmatprep.mubr.bf16.mxu1 %v2161_v12  ;;  %v2180_v34 = vld [vmem:[%s2432_s13 + $0x4c] ss:$12 sps:$4 sm:$0xff]   ;;  %v2184_v37 = vld [vmem:[%s2432_s13 + $0x48] ss:$12 sps:$4 sm:$0xff]   ;;  %v2188_v39 = vld [vmem:[%s2432_s13 + $0x64] ss:$12 sps:$4 sm:$0xff]  }
  0x16   : > { %v2182_v35 = vld [vmem:[%s2432_s13 + $0x16c] ss:$12 sps:$4 sm:$0xff]   ;;  %v2185_v38 = vld [vmem:[%s2432_s13 + $0x168] ss:$12 sps:$4 sm:$0xff]   ;;  %v2197_v47 = vld [vmem:[%s2432_s13 + $0x50] ss:$12 sps:$4 sm:$0xff]  }
  0x17   : > { %1940 = vmatpush3.bf16.msra.mxu0 %v2149_v9  ;;  %2127 = vmatpush3.bf16.msra.mxu1 %v2149_v9  ;;  %v2190_v41 = vld [vmem:[%s2432_s13 + $0x8] ss:$12 sps:$4 sm:$0xff]   ;;  %v2191_v42 = vld [vmem:[%s2432_s13 + $0x60] ss:$12 sps:$4 sm:$0xff]   ;;  %v2195_v45 = vld [vmem:[%s2432_s13 + $0x38] ss:$12 sps:$4 sm:$0xff]  }
  0x18   : > { %1941 = vmatprep.subr.bf16.mxu0 %v2150_v10  ;;  %2120 = vmatprep.subr.bf16.mxu1 %v2150_v10  ;;  %v2192_v43 = vld [vmem:[%s2432_s13 + $0x20] ss:$12 sps:$4 sm:$0xff]   ;;  %v2193_v44 = vld [vmem:[%s2432_s13 + $0x7c] ss:$12 sps:$4 sm:$0xff]   ;;  %v2196_v46 = vld [vmem:[%s2432_s13 + $0x78] ss:$12 sps:$4 sm:$0xff]  }
  0x19   : > { %v2198_v48 = vld [vmem:[%s2432_s13 + $0x94] ss:$12 sps:$4 sm:$0xff]   ;;  %v2201_v50 = vld [vmem:[%s2432_s13 + $0x90] ss:$12 sps:$4 sm:$0xff]   ;;  %v2203_v52 = vld [vmem:[%s2432_s13 + $0xac] ss:$12 sps:$4 sm:$0xff]  }
  0x1a   : > { %v2200_v49 = vld [vmem:[%s2432_s13 + $0x68] ss:$12 sps:$4 sm:$0xff]   ;;  %v2202_v51 = vld [vmem:[%s2432_s13 + $0x80] ss:$12 sps:$4 sm:$0xff]   ;;  %v2205_v53 = vld [vmem:[%s2432_s13 + $0x98] ss:$12 sps:$4 sm:$0xff]  }
  0x1b   : > { %1942 = vmatpush3.bf16.msra.mxu0 %v2151_v13  ;;  %2128 = vmatpush3.bf16.msra.mxu1 %v2151_v13  ;;  %v2206_v54 = vld [vmem:[%s2432_s13 + $0xa8] ss:$12 sps:$4 sm:$0xff]   ;;  %v2207_v55 = vld [vmem:[%s2432_s13 + $0xb0] ss:$12 sps:$4 sm:$0xff]   ;;  %v2211_v58 = vld [vmem:[%s2432_s13 + $0xc0] ss:$12 sps:$4 sm:$0xff]  }
  0x1c   : > { %1943 = vmatprep.subr.bf16.mxu0 %v2152_v14  ;;  %2121 = vmatprep.subr.bf16.mxu1 %v2152_v14  ;;  %v2208_v56 = vld [vmem:[%s2432_s13 + $0xc4] ss:$12 sps:$4 sm:$0xff]   ;;  %v2210_v57 = vld [vmem:[%s2432_s13 + $0xc8] ss:$12 sps:$4 sm:$0xff]   ;;  %v2212_v59 = vld [vmem:[%s2432_s13 + $0xe0] ss:$12 sps:$4 sm:$0xff]  }
  0x1d   : > { %v2213_v60 = vld [vmem:[%s2432_s13 + $0xdc] ss:$12 sps:$4 sm:$0xff]   ;;  %v2215_v61 = vld [vmem:[%s2432_s13 + $0xf8] ss:$12 sps:$4 sm:$0xff]   ;;  %v2218_v0 = vld [vmem:[%s2432_s13 + $0xf4] ss:$12 sps:$4 sm:$0xff]  }
  0x1e   : > { %v2216_v62 = vld [vmem:[%s2432_s13 + $0xd8] ss:$12 sps:$4 sm:$0xff]   ;;  %v2217_v63 = vld [vmem:[%s2432_s13 + $0x110] ss:$12 sps:$4 sm:$0xff]   ;;  %v2220_v1 = vld [vmem:[%s2432_s13 + $0x128] ss:$12 sps:$4 sm:$0xff]  }
  0x1f   : > { %1944 = vmatpush3.bf16.msra.mxu0 %v2153_v15  ;;  %2129 = vmatpush3.bf16.msra.mxu1 %v2153_v15  ;;  %v2221_v2 = vld [vmem:[%s2432_s13 + $0xf0] ss:$12 sps:$4 sm:$0xff]   ;;  %v2222_v3 = vld [vmem:[%s2432_s13 + $0x140] ss:$12 sps:$4 sm:$0xff]   ;;  %v2225_v5 = vld [vmem:[%s2432_s13 + $0x158] ss:$12 sps:$4 sm:$0xff]  }
  0x20   : > { %1945 = vmatprep.subr.bf16.mxu0 %v2154_v16  ;;  %2122 = vmatprep.subr.bf16.mxu1 %v2154_v16  ;;  %v2223_v4 = vld [vmem:[%s2432_s13 + $0x10c] ss:$12 sps:$4 sm:$0xff]   ;;  %v2226_v6 = vld [vmem:[%s2432_s13 + $0x108] ss:$12 sps:$4 sm:$0xff]   ;;  %v2227_v7 = vld [vmem:[%s2432_s13 + $0x170] ss:$12 sps:$4 sm:$0xff]  }
  0x23   : > { %1946 = vmatpush3.bf16.msra.mxu0 %v2155_v17  ;;  %2130 = vmatpush3.bf16.msra.mxu1 %v2155_v17 }
  0x24   : > { %2067 = vmatprep.subr.bf16.mxu1 %v2162_v18 }
  0x26   : > { %750 = vmatmul.mubr.bf16.vlgmr.msra.gmra.mrb[0].mxu0 %v2156_v19  ;;  %846 = vmatmul.mubr.bf16.vlgmr.msra.gmra.mrb[0].mxu1 %v2159_v20 }
  0x27   : > { %2068 = vmatpush3.bf16.msra.mxu1 %v2162_v18  ;;  %757 = vmatprep.mubr.bf16.mxu0 %v2164_v21 }
  0x28   : > { %2069 = vmatprep.subr.bf16.mxu1 %v2163_v22  ;;  %853 = vmatprep.mubr.bf16.mxu1 %v2166_v23 }
  0x2b   : > { %2070 = vmatpush3.bf16.msra.mxu1 %v2163_v22 }
  0x2c   : > { %2071 = vmatprep.subr.bf16.mxu1 %v2170_v25 }
  0x2e   : > { %758 = vmatmul.mubr.bf16.gmra.mrb[4].mxu0 %v2168_v24  ;;  %854 = vmatmul.mubr.bf16.gmra.mrb[4].mxu1 %v2169_v26 }
  0x2f   : > { %2072 = vmatpush3.bf16.msra.mxu1 %v2170_v25  ;;  %765 = vmatprep.mubr.bf16.mxu0 %v2172_v28 }
  0x30   : > { %2073 = vmatprep.subr.bf16.mxu1 %v2171_v27  ;;  %861 = vmatprep.mubr.bf16.mxu1 %v2174_v29 }
  0x33   : > { %2074 = vmatpush3.bf16.msra.mxu1 %v2171_v27 }
  0x34   : > { %2075 = vmatprep.subr.bf16.mxu1 %v2178_v30 }
  0x36   : > { %766 = vmatmul.mubr.bf16.gmra.mrb[8].mxu0 %v2176_v31  ;;  %862 = vmatmul.mubr.bf16.gmra.mrb[8].mxu1 %v2177_v32 }
  0x37   : > { %2076 = vmatpush3.bf16.msra.mxu1 %v2178_v30  ;;  %773 = vmatprep.mubr.bf16.mxu0 %v2180_v34 }
  0x38   : > { %2077 = vmatprep.subr.bf16.mxu1 %v2179_v33  ;;  %869 = vmatprep.mubr.bf16.mxu1 %v2182_v35 }
  0x3b   : > { %2078 = vmatpush3.bf16.msra.mxu1 %v2179_v33 }
  0x3c   : > { %2079 = vmatprep.subr.bf16.mxu1 %v2186_v36 }
  0x3e   : > { %774 = vmatmul.mubr.bf16.gmra.mrb[12].mxu0 %v2184_v37  ;;  %870 = vmatmul.mubr.bf16.gmra.mrb[12].mxu1 %v2185_v38 }
  0x3f   : > { %2080 = vmatpush3.bf16.msra.mxu1 %v2186_v36  ;;  %781 = vmatprep.mubr.bf16.mxu0 %v2188_v39 }
  0x40   : > { %2081 = vmatprep.subr.bf16.mxu1 %v2187_v40  ;;  %2083 = vmatprep.mubr.bf16.mxu1 %v2190_v41 }
  0x43   : > { %2082 = vmatpush3.bf16.msra.mxu1 %v2187_v40 }
  0x46   : > { %782 = vmatmul.mubr.bf16.gmra.mrb[16].mxu0 %v2191_v42  ;;  %2084 = vmatmul.mubr.bf16.vlgmr.msra.gmra.mrb[16].mxu1 %v2192_v43 }
  0x47   : > { %789 = vmatprep.mubr.bf16.mxu0 %v2193_v44  ;;  %2087 = vmatprep.mubr.bf16.mxu1 %v2195_v45 }
  0x4e   : > { %790 = vmatmul.mubr.bf16.gmra.mrb[20].mxu0 %v2196_v46  ;;  %2088 = vmatmul.mubr.bf16.gmra.mrb[20].mxu1 %v2197_v47 }
  0x4f   : > { %797 = vmatprep.mubr.bf16.mxu0 %v2198_v48  ;;  %2091 = vmatprep.mubr.bf16.mxu1 %v2200_v49 }
  0x56   : > { %798 = vmatmul.mubr.bf16.gmra.mrb[24].mxu0 %v2201_v50  ;;  %2092 = vmatmul.mubr.bf16.gmra.mrb[24].mxu1 %v2202_v51 }
  0x57   : > { %805 = vmatprep.mubr.bf16.mxu0 %v2203_v52  ;;  %2095 = vmatprep.mubr.bf16.mxu1 %v2205_v53 }
  0x5e   : > { %806 = vmatmul.mubr.bf16.gmra.mrb[28].mxu0 %v2206_v54  ;;  %2096 = vmatmul.mubr.bf16.gmra.mrb[28].mxu1 %v2207_v55 }
  0x5f   : > { %813 = vmatprep.mubr.bf16.mxu0 %v2208_v56  ;;  %2099 = vmatprep.mubr.bf16.mxu1 %v2210_v57 }
  0x66   : > { %814 = vmatmul.mubr.bf16.gmra.mrb[32].mxu0 %v2211_v58  ;;  %2100 = vmatmul.mubr.bf16.gmra.mrb[32].mxu1 %v2212_v59 }
  0x67   : > { %821 = vmatprep.mubr.bf16.mxu0 %v2213_v60  ;;  %2103 = vmatprep.mubr.bf16.mxu1 %v2215_v61 }
  0x6e   : > { %822 = vmatmul.mubr.bf16.gmra.mrb[36].mxu0 %v2216_v62  ;;  %2104 = vmatmul.mubr.bf16.gmra.mrb[36].mxu1 %v2217_v63 }
  0x6f   : > { %829 = vmatprep.mubr.bf16.mxu0 %v2218_v0  ;;  %2107 = vmatprep.mubr.bf16.mxu1 %v2220_v1 }
  0x76   : > { %830 = vmatmul.mubr.bf16.gmra.mrb[40].mxu0 %v2221_v2  ;;  %2108 = vmatmul.mubr.bf16.gmra.mrb[40].mxu1 %v2222_v3 }
  0x77   : > { %837 = vmatprep.mubr.bf16.mxu0 %v2223_v4  ;;  %2111 = vmatprep.mubr.bf16.mxu1 %v2225_v5 }
  0x7e   : > { %838 = vmatmul.mubr.bf16.gmra.mrb[44].mxu0 %v2226_v6  ;;  %2112 = vmatmul.mubr.bf16.gmra.mrb[44].mxu1 %v2227_v7 }
  0xf9   : > { %v1947_v8 = vpop.f32.mrb[0].mxu0  ;;  %v2019_v9 = vpop.f32.mrb[0].mxu1 }
  0xfa   : > { %v1948_v10 = vpop.f32.mrb[1].mxu0  ;;  %v2020_v11 = vpop.f32.mrb[1].mxu1 }
  0xfb   : > { %v1949_v12 = vadd.f32 %v1948_v10, %v1947_v8  ;;  %v2527_v13 = vadd.f32 %v2020_v11, %v2019_v9  ;;  %v1950_v14 = vpop.f32.mrb[2].mxu0  ;;  %v2022_v15 = vpop.f32.mrb[2].mxu1 }
  0xfc   : > { %v1951_v16 = vpop.f32.mrb[3].mxu0  ;;  %v2023_v17 = vpop.f32.mrb[3].mxu1 }
  0xfd   : > { %v1952_v18 = vadd.f32 %v1951_v16, %v1950_v14  ;;  %v2529_v19 = vadd.f32 %v2023_v17, %v2022_v15 }
 0x101   : > { %v1953_v20 = vpop.f32.mrb[4].mxu0  ;;  %v2025_v21 = vpop.f32.mrb[4].mxu1 }
 0x102   : > { %v1954_v22 = vpop.f32.mrb[5].mxu0  ;;  %v2026_v23 = vpop.f32.mrb[5].mxu1 }
 0x103   : > { %v1955_v24 = vadd.f32 %v1954_v22, %v1953_v20  ;;  %v2531_v25 = vadd.f32 %v2026_v23, %v2025_v21  ;;  %v1956_v26 = vpop.f32.mrb[6].mxu0  ;;  %v2028_v27 = vpop.f32.mrb[6].mxu1 }
 0x104   : > { %v1957_v28 = vpop.f32.mrb[7].mxu0  ;;  %v2029_v29 = vpop.f32.mrb[7].mxu1 }
 0x105   : > { %v1958_v30 = vadd.f32 %v1957_v28, %v1956_v26  ;;  %v2533_v31 = vadd.f32 %v2029_v29, %v2028_v27 }
 0x109   : > { %v1959_v32 = vpop.f32.mrb[8].mxu0  ;;  %v2031_v33 = vpop.f32.mrb[8].mxu1 }
 0x10a   : > { %v1960_v34 = vpop.f32.mrb[9].mxu0  ;;  %v2032_v35 = vpop.f32.mrb[9].mxu1 }
 0x10b   : > { %v1961_v36 = vadd.f32 %v1960_v34, %v1959_v32  ;;  %v2535_v37 = vadd.f32 %v2032_v35, %v2031_v33  ;;  %v1962_v38 = vpop.f32.mrb[10].mxu0  ;;  %v2034_v39 = vpop.f32.mrb[10].mxu1 }
 0x10c   : > { %v1963_v40 = vpop.f32.mrb[11].mxu0  ;;  %v2035_v41 = vpop.f32.mrb[11].mxu1 }
 0x10d   : > { %v1964_v42 = vadd.f32 %v1963_v40, %v1962_v38  ;;  %v2537_v43 = vadd.f32 %v2035_v41, %v2034_v39 }
 0x111   : > { %v1965_v44 = vpop.f32.mrb[12].mxu0  ;;  %v2037_v45 = vpop.f32.mrb[12].mxu1 }
 0x112   : > { %v1966_v46 = vpop.f32.mrb[13].mxu0  ;;  %v2038_v47 = vpop.f32.mrb[13].mxu1 }
 0x113   : > { %v1967_v48 = vadd.f32 %v1966_v46, %v1965_v44  ;;  %v2539_v49 = vadd.f32 %v2038_v47, %v2037_v45  ;;  %v1968_v50 = vpop.f32.mrb[14].mxu0  ;;  %v2040_v51 = vpop.f32.mrb[14].mxu1 }
 0x114   : > { %v1969_v52 = vpop.f32.mrb[15].mxu0  ;;  %v2041_v53 = vpop.f32.mrb[15].mxu1 }
 0x115   : > { %v1970_v54 = vadd.f32 %v1969_v52, %v1968_v50  ;;  %v2541_v55 = vadd.f32 %v2041_v53, %v2040_v51 }
 0x119   : > { %v1971_v56 = vpop.f32.mrb[16].mxu0  ;;  %v2085_v57 = vpop.f32.mrb[16].mxu1 }
 0x11a   : > { %v2543_v58 = vadd.f32 %v2085_v57, %v1955_v24  ;;  %v1972_v59 = vpop.f32.mrb[17].mxu0  ;;  %v912_v60 = vpop.f32.mrb[17].mxu1 }
 0x11b   : > { %v1973_v61 = vadd.f32 %v1972_v59, %v1971_v56  ;;  %v2545_v62 = vadd.f32 %v1949_v12, %v912_v60  ;;  %v1974_v63 = vpop.f32.mrb[18].mxu0  ;;  %v2086_v0 = vpop.f32.mrb[18].mxu1 }
 0x11c   : > { %v2547_v1 = vadd.f32 %v2086_v0, %v1958_v30  ;;  %v1975_v2 = vpop.f32.mrb[19].mxu0  ;;  %v915_v3 = vpop.f32.mrb[19].mxu1  ;;  %1045 = vadd.xlane.f32.xlu1 %v2543_v58 }
 0x11d   : > { %v1976_v4 = vadd.f32 %v1975_v2, %v1974_v63  ;;  %v2550_v5 = vadd.f32 %v1952_v18, %v915_v3  ;;  %1041 = vadd.xlane.f32.xlu0 %v2545_v62 }
 0x120   : > { %1047 = vadd.xlane.f32.xlu1 %v2547_v1 }
 0x121   : > { %v1977_v6 = vpop.f32.mrb[20].mxu0  ;;  %v2089_v7 = vpop.f32.mrb[20].mxu1  ;;  %1043 = vadd.xlane.f32.xlu0 %v2550_v5 }
 0x122   : > { %v2555_v8 = vadd.f32 %v2089_v7, %v1967_v48  ;;  %v1978_v9 = vpop.f32.mrb[21].mxu0  ;;  %v928_v10 = vpop.f32.mrb[21].mxu1 }
 0x123   : > { %v1979_v11 = vadd.f32 %v1978_v9, %v1977_v6  ;;  %v2557_v12 = vadd.f32 %v1961_v36, %v928_v10  ;;  %v1980_v14 = vpop.f32.mrb[22].mxu0  ;;  %v2090_v15 = vpop.f32.mrb[22].mxu1 }
 0x124   : > { %v2559_v16 = vadd.f32 %v2090_v15, %v1970_v54  ;;  %v1981_v17 = vpop.f32.mrb[23].mxu0  ;;  %v931_v18 = vpop.f32.mrb[23].mxu1 }
 0x125   : > { %v1982_v20 = vadd.f32 %v1981_v17, %v1980_v14  ;;  %v2561_v21 = vadd.f32 %v1964_v42, %v931_v18  ;;  %1053 = vadd.xlane.f32.xlu0 %v2555_v8 }
 0x126   : > { %1055 = vadd.xlane.f32.xlu1 %v2559_v16 }
 0x129   : > { %v1983_v22 = vpop.f32.mrb[24].mxu0  ;;  %v2093_v23 = vpop.f32.mrb[24].mxu1  ;;  %1049 = vadd.xlane.f32.xlu0 %v2557_v12 }
 0x12a   : > { %v2566_v24 = vadd.f32 %v2093_v23, %v1979_v11  ;;  %v1984_v26 = vpop.f32.mrb[25].mxu0  ;;  %v944_v27 = vpop.f32.mrb[25].mxu1  ;;  %1051 = vadd.xlane.f32.xlu1 %v2561_v21 }
 0x12b   : > { %v1985_v28 = vadd.f32 %v1984_v26, %v1983_v22  ;;  %v2569_v29 = vadd.f32 %v1973_v61, %v944_v27  ;;  %v1986_v30 = vpop.f32.mrb[26].mxu0  ;;  %v2094_v32 = vpop.f32.mrb[26].mxu1 }
 0x12c   : > { %v2571_v33 = vadd.f32 %v2094_v32, %v1982_v20  ;;  %v1987_v34 = vpop.f32.mrb[27].mxu0  ;;  %v947_v35 = vpop.f32.mrb[27].mxu1 }
 0x12d   : > { %v1988_v36 = vadd.f32 %v1987_v34, %v1986_v30  ;;  %v2573_v38 = vadd.f32 %v1976_v4, %v947_v35  ;;  %1061 = vadd.xlane.f32.xlu0 %v2566_v24 }
 0x12e   : > { %1063 = vadd.xlane.f32.xlu1 %v2571_v33 }
 0x131   : > { %v1989_v39 = vpop.f32.mrb[28].mxu0  ;;  %v2097_v40 = vpop.f32.mrb[28].mxu1  ;;  %1057 = vadd.xlane.f32.xlu0 %v2569_v29 }
 0x132   : > { %v1990_v41 = vpop.f32.mrb[29].mxu0  ;;  %v960_v42 = vpop.f32.mrb[29].mxu1  ;;  %1059 = vadd.xlane.f32.xlu1 %v2573_v38 }
 0x133   : > { %v1991_v44 = vadd.f32 %v1990_v41, %v1989_v39  ;;  %v2579_v45 = vadd.f32 %v1985_v28, %v960_v42  ;;  %v1992_v46 = vpop.f32.mrb[30].mxu0  ;;  %v2098_v47 = vpop.f32.mrb[30].mxu1 }
 0x134   : > { %v1993_v48 = vpop.f32.mrb[31].mxu0  ;;  %v963_v50 = vpop.f32.mrb[31].mxu1 }
 0x135   : > { %v1994_v51 = vadd.f32 %v1993_v48, %v1992_v46  ;;  %v2581_v52 = vadd.f32 %v1988_v36, %v963_v50  ;;  %1065 = vadd.xlane.f32.xlu0 %v2579_v45  ;;  %v2584_v53 = vadd.f32 %v2097_v40, %v1991_v44 }
 0x137   : > { %1067 = vadd.xlane.f32.xlu1 %v2581_v52  ;;  %v2587_v54 = vadd.f32 %v2098_v47, %v1994_v51 }
 0x139   : > { %v1995_v56 = vpop.f32.mrb[32].mxu0  ;;  %v2101_v57 = vpop.f32.mrb[32].mxu1  ;;  %1069 = vadd.xlane.f32.xlu0 %v2584_v53 }
 0x13a   : > { %v1996_v59 = vpop.f32.mrb[33].mxu0  ;;  %v976_v60 = vpop.f32.mrb[33].mxu1 }
 0x13b   : > { %v1997_v61 = vadd.f32 %v1996_v59, %v1995_v56  ;;  %v1998_v63 = vpop.f32.mrb[34].mxu0  ;;  %v2102_v0 = vpop.f32.mrb[34].mxu1  ;;  %1071 = vadd.xlane.f32.xlu1 %v2587_v54 }
 0x13c   : > { %v1999_v2 = vpop.f32.mrb[35].mxu0  ;;  %v979_v3 = vpop.f32.mrb[35].mxu1 }
 0x13d   : > { %v2591_v4 = vadd.f32 %v1997_v61, %v976_v60  ;;  %v2000_v6 = vadd.f32 %v1999_v2, %v1998_v63 }
 0x13f   : > { %v2593_v7 = vadd.f32 %v2000_v6, %v979_v3  ;;  %1073 = vadd.xlane.f32.xlu0 %v2591_v4 }
 0x141   : > { %v2001_v9 = vpop.f32.mrb[36].mxu0  ;;  %v2105_v10 = vpop.f32.mrb[36].mxu1  ;;  %1075 = vadd.xlane.f32.xlu1 %v2593_v7 }
 0x142   : > { %v2002_v11 = vpop.f32.mrb[37].mxu0  ;;  %v992_v14 = vpop.f32.mrb[37].mxu1 }
 0x143   : > { %v2003_v15 = vadd.f32 %v2002_v11, %v2001_v9  ;;  %v2004_v17 = vpop.f32.mrb[38].mxu0  ;;  %v2106_v18 = vpop.f32.mrb[38].mxu1 }
 0x144   : > { %v2005_v20 = vpop.f32.mrb[39].mxu0  ;;  %v995_v22 = vpop.f32.mrb[39].mxu1 }
 0x145   : > { %v2006_v23 = vadd.f32 %v2005_v20, %v2004_v17  ;;  %v2597_v26 = vadd.f32 %v2101_v57, %v2003_v15 }
 0x147   : > { %1077 = vadd.xlane.f32.xlu0 %v2597_v26  ;;  %v2600_v27 = vadd.f32 %v2102_v0, %v2006_v23 }
 0x149   : > { %v2007_v28 = vpop.f32.mrb[40].mxu0  ;;  %v2109_v30 = vpop.f32.mrb[40].mxu1  ;;  %1079 = vadd.xlane.f32.xlu1 %v2600_v27 }
 0x14a   : > { %v2604_v32 = vadd.f32 %v2109_v30, %v2531_v25  ;;  %v2008_v34 = vpop.f32.mrb[41].mxu0  ;;  %v1008_v35 = vpop.f32.mrb[41].mxu1 }
 0x14b   : > { %v2009_v36 = vadd.f32 %v2008_v34, %v2007_v28  ;;  %v2607_v39 = vadd.f32 %v2527_v13, %v1008_v35  ;;  %v2010_v40 = vpop.f32.mrb[42].mxu0  ;;  %v2110_v41 = vpop.f32.mrb[42].mxu1 }
 0x14c   : > { %v2610_v42 = vadd.f32 %v2110_v41, %v2533_v31  ;;  %v2011_v44 = vpop.f32.mrb[43].mxu0  ;;  %v1011_v46 = vpop.f32.mrb[43].mxu1  ;;  %1093 = vadd.xlane.f32.xlu0 %v2604_v32 }
 0x14d   : > { %v2012_v47 = vadd.f32 %v2011_v44, %v2010_v40  ;;  %v2614_v48 = vadd.f32 %v2529_v19, %v1011_v46  ;;  %v2616_v25 = vadd.f32 %v2009_v36, %v992_v14 }
 0x14e   : > { %1095 = vadd.xlane.f32.xlu1 %v2610_v42 }
 0x14f   : > { %v2619_v50 = vadd.f32 %v2012_v47, %v995_v22 }
 0x150   : > { %1089 = vadd.xlane.f32.xlu0 %v2607_v39 }
 0x151   : > { %v2013_v13 = vpop.f32.mrb[44].mxu0  ;;  %v2113_v51 = vpop.f32.mrb[44].mxu1 }
 0x152   : > { %v2623_v31 = vadd.f32 %v2113_v51, %v2539_v49  ;;  %v2014_v56 = vpop.f32.mrb[45].mxu0  ;;  %v1024_v57 = vpop.f32.mrb[45].mxu1  ;;  %1091 = vadd.xlane.f32.xlu1 %v2614_v48 }
 0x153   : > { %v2015_v59 = vadd.f32 %v2014_v56, %v2013_v13  ;;  %v2627_v19 = vadd.f32 %v2535_v37, %v1024_v57  ;;  %v2016_v60 = vpop.f32.mrb[46].mxu0  ;;  %v2114_v61 = vpop.f32.mrb[46].mxu1 }
 0x154   : > { %v2630_v63 = vadd.f32 %v2114_v61, %v2541_v55  ;;  %v2017_v0 = vpop.f32.mrb[47].mxu0  ;;  %v1027_v2 = vpop.f32.mrb[47].mxu1  ;;  %1081 = vadd.xlane.f32.xlu0 %v2616_v25 }
 0x155   : > { %v2018_v3 = vadd.f32 %v2017_v0, %v2016_v60  ;;  %v2634_v49 = vadd.f32 %v2537_v43, %v1027_v2  ;;  %v2636_v6 = vadd.f32 %v2105_v10, %v2015_v59 }
 0x156   : > { %1083 = vadd.xlane.f32.xlu1 %v2619_v50 }
 0x157   : > { %v2639_v9 = vadd.f32 %v2106_v18, %v2018_v3 }
 0x158   : > { %1097 = vadd.xlane.f32.xlu0 %v2627_v19 }
 0x15a   : > { %1099 = vadd.xlane.f32.xlu1 %v2634_v49 }
 0x15c   : > { %1085 = vadd.xlane.f32.xlu0 %v2636_v6 }
 0x15e   : > { %1087 = vadd.xlane.f32.xlu1 %v2639_v9 }
 0x160   : > { %1101 = vadd.xlane.f32.xlu0 %v2623_v31 }
 0x162   : > { %1103 = vadd.xlane.f32.xlu1 %v2630_v63 }
 0x1a9   : > { %v1046_v37 = vpop.xlane.xlu1 %1045 }
 0x1aa   : > { %v1108_v43 = vmul.f32 0.0078125, %v1046_v37  ;;  %v1042_v55 = vpop.xlane.xlu0 %1041 }
 0x1ab   : > { %v1106_v10 = vmul.f32 0.0078125, %v1042_v55 }
 0x1ac   : > { %v2648_v11 = vsub.f32 %v2543_v58, %v1108_v43 }
 0x1ad   : > { %v1048_v14 = vpop.xlane.xlu1 %1047  ;;  %v2651_v15 = vsub.f32 %v2545_v62, %v1106_v10 }
 0x1ae   : > { %v1109_v17 = vmul.f32 0.0078125, %v1048_v14  ;;  %v1044_v18 = vpop.xlane.xlu0 %1043  ;;  %v1172_v20 = vmul.f32 %v2648_v11, %v2648_v11 }
 0x1af   : > { %v1107_v22 = vmul.f32 0.0078125, %v1044_v18  ;;  %v1170_v62 = vmul.f32 %v2651_v15, %v2651_v15 }
 0x1b0   : > { %v2656_v23 = vsub.f32 %v2547_v1, %v1109_v17  ;;  %1206 = vadd.xlane.f32.xlu0 %v1172_v20 }
 0x1b1   : > { %v2659_v28 = vsub.f32 %v2550_v5, %v1107_v22 }
 0x1b2   : > { %v1054_v30 = vpop.xlane.xlu0 %1053  ;;  %v1173_v58 = vmul.f32 %v2656_v23, %v2656_v23 }
 0x1b3   : > { %v1112_v34 = vmul.f32 0.0078125, %v1054_v30  ;;  %v1056_v35 = vpop.xlane.xlu1 %1055  ;;  %v1171_v41 = vmul.f32 %v2659_v28, %v2659_v28 }
 0x1b4   : > { %v1113_v36 = vmul.f32 0.0078125, %v1056_v35  ;;  %1208 = vadd.xlane.f32.xlu1 %v1173_v58  ;;  %1202 = vadd.xlane.f32.xlu0 %v1170_v62 }
 0x1b5   : > { %v2666_v40 = vsub.f32 %v2555_v8, %v1112_v34 }
 0x1b6   : > { %v2669_v1 = vsub.f32 %v2559_v16, %v1113_v36  ;;  %v1050_v5 = vpop.xlane.xlu0 %1049 }
 0x1b7   : > { %v1110_v44 = vmul.f32 0.0078125, %v1050_v5  ;;  %v1052_v46 = vpop.xlane.xlu1 %1051  ;;  %v1176_v47 = vmul.f32 %v2666_v40, %v2666_v40 }
 0x1b8   : > { %v1111_v13 = vmul.f32 0.0078125, %v1052_v46  ;;  %1204 = vadd.xlane.f32.xlu1 %v1171_v41  ;;  %v1177_v56 = vmul.f32 %v2669_v1, %v2669_v1 }
 0x1b9   : > { %v2676_v51 = vsub.f32 %v2557_v12, %v1110_v44  ;;  %1214 = vadd.xlane.f32.xlu0 %v1176_v47 }
 0x1ba   : > { %v2679_v8 = vsub.f32 %v2561_v21, %v1111_v13  ;;  %v1062_v16 = vpop.xlane.xlu0 %1061 }
 0x1bb   : > { %v1116_v57 = vmul.f32 0.0078125, %v1062_v16  ;;  %v1064_v59 = vpop.xlane.xlu1 %1063  ;;  %v1174_v60 = vmul.f32 %v2676_v51, %v2676_v51 }
 0x1bc   : > { %v1117_v61 = vmul.f32 0.0078125, %v1064_v59  ;;  %1216 = vadd.xlane.f32.xlu1 %v1177_v56  ;;  %v1175_v2 = vmul.f32 %v2679_v8, %v2679_v8 }
 0x1bd   : > { %v2686_v0 = vsub.f32 %v2566_v24, %v1116_v57  ;;  %1210 = vadd.xlane.f32.xlu0 %v1174_v60 }
 0x1be   : > { %v2689_v12 = vsub.f32 %v2571_v33, %v1117_v61  ;;  %v1058_v21 = vpop.xlane.xlu0 %1057 }
 0x1bf   : > { %v1114_v3 = vmul.f32 0.0078125, %v1058_v21  ;;  %v1060_v37 = vpop.xlane.xlu1 %1059  ;;  %v1180_v43 = vmul.f32 %v2686_v0, %v2686_v0 }
 0x1c0   : > { %v1115_v55 = vmul.f32 0.0078125, %v1060_v37  ;;  %1212 = vadd.xlane.f32.xlu1 %v1175_v2  ;;  %v1181_v14 = vmul.f32 %v2689_v12, %v2689_v12 }
 0x1c1   : > { %v2696_v10 = vsub.f32 %v2569_v29, %v1114_v3  ;;  %1222 = vadd.xlane.f32.xlu0 %v1180_v43 }
 0x1c2   : > { %v2699_v24 = vsub.f32 %v2573_v38, %v1115_v55  ;;  %v1066_v33 = vpop.xlane.xlu0 %1065 }
 0x1c3   : > { %v1118_v17 = vmul.f32 0.0078125, %v1066_v33  ;;  %v1178_v18 = vmul.f32 %v2696_v10, %v2696_v10 }
 0x1c4   : > { %v1068_v20 = vpop.xlane.xlu1 %1067  ;;  %1224 = vadd.xlane.f32.xlu1 %v1181_v14  ;;  %v1179_v38 = vmul.f32 %v2699_v24, %v2699_v24 }
 0x1c5   : > { %v2706_v22 = vsub.f32 %v2579_v45, %v1118_v17  ;;  %v1119_v30 = vmul.f32 0.0078125, %v1068_v20  ;;  %1218 = vadd.xlane.f32.xlu0 %v1178_v18 }
 0x1c6   : > { %v1070_v29 = vpop.xlane.xlu0 %1069 }
 0x1c7   : > { %v2711_v58 = vsub.f32 %v2581_v52, %v1119_v30  ;;  %v1120_v62 = vmul.f32 0.0078125, %v1070_v29  ;;  %v1182_v34 = vmul.f32 %v2706_v22, %v2706_v22 }
 0x1c8   : > { %v1072_v35 = vpop.xlane.xlu1 %1071  ;;  %1220 = vadd.xlane.f32.xlu1 %v1179_v38 }
 0x1c9   : > { %v2716_v36 = vsub.f32 %v2584_v53, %v1120_v62  ;;  %v1121_v45 = vmul.f32 0.0078125, %v1072_v35  ;;  %1226 = vadd.xlane.f32.xlu0 %v1182_v34  ;;  %v1183_v5 = vmul.f32 %v2711_v58, %v2711_v58 }
 0x1cb   : > { %v2721_v41 = vsub.f32 %v2587_v54, %v1121_v45  ;;  %v1184_v52 = vmul.f32 %v2716_v36, %v2716_v36 }
 0x1cc   : > { %1228 = vadd.xlane.f32.xlu1 %v1183_v5  ;;  %v1074_v44 = vpop.xlane.xlu0 %1073 }
 0x1cd   : > { %v1122_v46 = vmul.f32 0.0078125, %v1074_v44  ;;  %1230 = vadd.xlane.f32.xlu0 %v1184_v52  ;;  %v1185_v47 = vmul.f32 %v2721_v41, %v2721_v41 }
 0x1ce   : > { %v1076_v53 = vpop.xlane.xlu1 %1075 }
 0x1cf   : > { %v2728_v13 = vsub.f32 %v2591_v4, %v1122_v46  ;;  %v1123_v16 = vmul.f32 0.0078125, %v1076_v53 }
 0x1d0   : > { %1232 = vadd.xlane.f32.xlu1 %v1185_v47 }
 0x1d1   : > { %v2731_v56 = vsub.f32 %v2593_v7, %v1123_v16  ;;  %v1186_v54 = vmul.f32 %v2728_v13, %v2728_v13 }
 0x1d3   : > { %1234 = vadd.xlane.f32.xlu0 %v1186_v54  ;;  %v1187_v57 = vmul.f32 %v2731_v56, %v2731_v56 }
 0x1d4   : > { %v1078_v59 = vpop.xlane.xlu0 %1077 }
 0x1d5   : > { %v1124_v60 = vmul.f32 0.0078125, %v1078_v59  ;;  %1236 = vadd.xlane.f32.xlu1 %v1187_v57 }
 0x1d6   : > { %v1080_v61 = vpop.xlane.xlu1 %1079 }
 0x1d7   : > { %v2738_v21 = vsub.f32 %v2597_v26, %v1124_v60  ;;  %v1125_v4 = vmul.f32 0.0078125, %v1080_v61 }
 0x1d9   : > { %v2741_v2 = vsub.f32 %v2600_v27, %v1125_v4  ;;  %v1094_v7 = vpop.xlane.xlu0 %1093  ;;  %v1188_v3 = vmul.f32 %v2738_v21, %v2738_v21 }
 0x1da   : > { %v1132_v37 = vmul.f32 0.0078125, %v1094_v7 }
 0x1db   : > { %v1096_v43 = vpop.xlane.xlu1 %1095  ;;  %1238 = vadd.xlane.f32.xlu0 %v1188_v3  ;;  %v1189_v55 = vmul.f32 %v2741_v2, %v2741_v2 }
 0x1dc   : > { %v2748_v33 = vsub.f32 %v2604_v32, %v1132_v37  ;;  %v1133_v14 = vmul.f32 0.0078125, %v1096_v43 }
 0x1dd   : > { %1240 = vadd.xlane.f32.xlu1 %v1189_v55  ;;  %v1090_v26 = vpop.xlane.xlu0 %1089 }
 0x1de   : > { %v2751_v17 = vsub.f32 %v2610_v42, %v1133_v14  ;;  %v1130_v27 = vmul.f32 0.0078125, %v1090_v26  ;;  %v1196_v18 = vmul.f32 %v2748_v33, %v2748_v33 }
 0x1df   : > { %v1092_v20 = vpop.xlane.xlu1 %1091 }
 0x1e0   : > { %v2756_v30 = vsub.f32 %v2607_v39, %v1130_v27  ;;  %v1131_v29 = vmul.f32 0.0078125, %v1092_v20  ;;  %1254 = vadd.xlane.f32.xlu0 %v1196_v18  ;;  %v1197_v32 = vmul.f32 %v2751_v17, %v2751_v17 }
 0x1e1   : > { %v1082_v38 = vpop.xlane.xlu0 %1081 }
 0x1e2   : > { %v2761_v62 = vsub.f32 %v2614_v48, %v1131_v29  ;;  %v1126_v34 = vmul.f32 0.0078125, %v1082_v38  ;;  %1256 = vadd.xlane.f32.xlu1 %v1197_v32  ;;  %v1194_v42 = vmul.f32 %v2756_v30, %v2756_v30 }
 0x1e3   : > { %v1084_v35 = vpop.xlane.xlu1 %1083 }
 0x1e4   : > { %v2766_v45 = vsub.f32 %v2616_v25, %v1126_v34  ;;  %v1127_v39 = vmul.f32 0.0078125, %v1084_v35  ;;  %1250 = vadd.xlane.f32.xlu0 %v1194_v42  ;;  %v1195_v5 = vmul.f32 %v2761_v62, %v2761_v62 }
 0x1e5   : > { %v1098_v52 = vpop.xlane.xlu0 %1097 }
 0x1e6   : > { %v2771_v44 = vsub.f32 %v2619_v50, %v1127_v39  ;;  %v1134_v48 = vmul.f32 0.0078125, %v1098_v52  ;;  %1252 = vadd.xlane.f32.xlu1 %v1195_v5  ;;  %v1190_v46 = vmul.f32 %v2766_v45, %v2766_v45 }
 0x1e7   : > { %v1100_v47 = vpop.xlane.xlu1 %1099 }
 0x1e8   : > { %v2776_v53 = vsub.f32 %v2627_v19, %v1134_v48  ;;  %v1135_v25 = vmul.f32 0.0078125, %v1100_v47  ;;  %1242 = vadd.xlane.f32.xlu0 %v1190_v46  ;;  %v1191_v16 = vmul.f32 %v2771_v44, %v2771_v44 }
 0x1e9   : > { %v1086_v54 = vpop.xlane.xlu0 %1085 }
 0x1ea   : > { %v2781_v57 = vsub.f32 %v2634_v49, %v1135_v25  ;;  %v1128_v50 = vmul.f32 0.0078125, %v1086_v54  ;;  %1244 = vadd.xlane.f32.xlu1 %v1191_v16  ;;  %v1198_v59 = vmul.f32 %v2776_v53, %v2776_v53 }
 0x1eb   : > { %v1088_v60 = vpop.xlane.xlu1 %1087 }
 0x1ec   : > { %v2786_v61 = vsub.f32 %v2636_v6, %v1128_v50  ;;  %v1129_v19 = vmul.f32 0.0078125, %v1088_v60  ;;  %1258 = vadd.xlane.f32.xlu0 %v1198_v59  ;;  %v1199_v4 = vmul.f32 %v2781_v57, %v2781_v57  ;;  %v2810_v59 = vld [vmem:[%s3132_s2] ss:$0 sm:$0xff] }
 0x1ed   : > { %v1102_v7 = vpop.xlane.xlu0 %1101 }
 0x1ee   : > { %v2791_v3 = vsub.f32 %v2639_v9, %v1129_v19  ;;  %v1136_v49 = vmul.f32 0.0078125, %v1102_v7  ;;  %1260 = vadd.xlane.f32.xlu1 %v1199_v4  ;;  %v1192_v37 = vmul.f32 %v2786_v61, %v2786_v61 }
 0x1ef   : > { %v1104_v43 = vpop.xlane.xlu1 %1103 }
 0x1f0   : > { %v2796_v55 = vsub.f32 %v2623_v31, %v1136_v49  ;;  %v1137_v6 = vmul.f32 0.0078125, %v1104_v43  ;;  %1246 = vadd.xlane.f32.xlu0 %v1192_v37  ;;  %v1193_v14 = vmul.f32 %v2791_v3, %v2791_v3  ;;  %v2816_v49 = vld [vmem:[%s3133_s3] ss:$0 sm:$0xff] }
 0x1f2   : > { %v2801_v26 = vsub.f32 %v2630_v63, %v1137_v6  ;;  %1248 = vadd.xlane.f32.xlu1 %v1193_v14  ;;  %v1200_v9 = vmul.f32 %v2796_v55, %v2796_v55 }
 0x1f4   : > { %1262 = vadd.xlane.f32.xlu0 %v1200_v9  ;;  %v1201_v27 = vmul.f32 %v2801_v26, %v2801_v26 }
 0x1f6   : > { %1264 = vadd.xlane.f32.xlu1 %v1201_v27 }
 0x23d   : > { %v1207_v18 = vpop.xlane.xlu0 %1206 }
 0x23e   : > { %v1268_v31 = vmul.f32 0.0078125, %v1207_v18 }
 0x240   : > { %v1300_v20 = vadd.f32 1e-05, %v1268_v31 }
 0x241   : > { %v1209_v29 = vpop.xlane.xlu1 %1208  ;;  %v1203_v32 = vpop.xlane.xlu0 %1202 }
 0x242   : > { %2228 = vrsqrt.f32 %v1300_v20  ;;  %v1269_v38 = vmul.f32 0.0078125, %v1209_v29  ;;  %v1266_v34 = vmul.f32 0.0078125, %v1203_v32 }
 0x244   : > { %v1301_v42 = vadd.f32 1e-05, %v1269_v38  ;;  %v1298_v63 = vadd.f32 1e-05, %v1266_v34 }
 0x245   : > { %v1205_v35 = vpop.xlane.xlu1 %1204 }
 0x246   : > { %2230 = vrsqrt.f32 %v1301_v42  ;;  %v1267_v39 = vmul.f32 0.0078125, %v1205_v35  ;;  %v1215_v5 = vpop.xlane.xlu0 %1214 }
 0x247   : > { %2232 = vrsqrt.f32 %v1298_v63  ;;  %v1272_v52 = vmul.f32 0.0078125, %v1215_v5 }
 0x248   : > { %v1299_v48 = vadd.f32 1e-05, %v1267_v39 }
 0x249   : > { %v1304_v46 = vadd.f32 1e-05, %v1272_v52  ;;  %v1217_v47 = vpop.xlane.xlu1 %1216 }
 0x24a   : > { %2234 = vrsqrt.f32 %v1299_v48  ;;  %v1273_v25 = vmul.f32 0.0078125, %v1217_v47  ;;  %v1211_v16 = vpop.xlane.xlu0 %1210 }
 0x24b   : > { %2236 = vrsqrt.f32 %v1304_v46  ;;  %v1270_v54 = vmul.f32 0.0078125, %v1211_v16 }
 0x24c   : > { %v2229_v50 = vpop.eup %2228  ;;  %v1305_v60 = vadd.f32 1e-05, %v1273_v25 }
 0x24d   : > { %v1364_v19 = vmul.f32 %v2229_v50, %v2648_v11  ;;  %v1302_v4 = vadd.f32 1e-05, %v1270_v54  ;;  %v1213_v7 = vpop.xlane.xlu1 %1212 }
 0x24e   : > { %2238 = vrsqrt.f32 %v1305_v60  ;;  %v1271_v37 = vmul.f32 0.0078125, %v1213_v7  ;;  %v1223_v43 = vpop.xlane.xlu0 %1222 }
 0x24f   : > { %v1402_v6 = vmul.f32 %v2810_v59, %v1364_v19  ;;  %2240 = vrsqrt.f32 %v1302_v4  ;;  %v1276_v14 = vmul.f32 0.0078125, %v1223_v43 }
 0x250   : > { %v2231_v9 = vpop.eup %2230  ;;  %v1303_v27 = vadd.f32 1e-05, %v1271_v37 }
 0x251   : > { %v2233_v18 = vpop.eup %2232  ;;  %v1440_v31 = vadd.f32 %v2816_v49, %v1402_v6  ;;  %v1365_v11 = vmul.f32 %v2231_v9, %v2656_v23  ;;  %v1308_v20 = vadd.f32 1e-05, %v1276_v14  ;;  %v1225_v29 = vpop.xlane.xlu1 %1224 }
 0x252   : > { %v1362_v32 = vmul.f32 %v2233_v18, %v2651_v15  ;;  %2242 = vrsqrt.f32 %v1303_v27  ;;  %v1277_v38 = vmul.f32 0.0078125, %v1225_v29  ;;  %v1219_v34 = vpop.xlane.xlu0 %1218 }
 0x253   : > { %v1504_v42 = vmul.f32 0.044715, %v1440_v31  ;;  %v1403_v63 = vmul.f32 %v2810_v59, %v1365_v11  ;;  %2244 = vrsqrt.f32 %v1308_v20  ;;  %v1274_v52 = vmul.f32 0.0078125, %v1219_v34 }
 0x254   : > { %v2235_v35 = vpop.eup %2234  ;;  %v1400_v39 = vmul.f32 %v2810_v59, %v1362_v32  ;;  %v1309_v5 = vadd.f32 1e-05, %v1277_v38  ;;  %v2840_v34 = vmul.f32 0.5, %v1440_v31 }
 0x255   : > { %v2237_v48 = vpop.eup %2236  ;;  %v1536_v46 = vmul.f32 %v1504_v42, %v1440_v31  ;;  %v1441_v23 = vadd.f32 %v2816_v49, %v1403_v63  ;;  %v1363_v47 = vmul.f32 %v2235_v35, %v2659_v28  ;;  %v1306_v16 = vadd.f32 1e-05, %v1274_v52  ;;  %v2828_v54 = vpop.xlane.xlu1 %1220 }
 0x256   : > { %v1438_v15 = vadd.f32 %v2816_v49, %v1400_v39  ;;  %v1368_v25 = vmul.f32 %v2237_v48, %v2666_v40  ;;  %2246 = vrsqrt.f32 %v1309_v5  ;;  %v2838_v11 = vpop.xlane.xlu0 %1226 }
 0x257   : > { %v1568_v50 = vmul.f32 %v1536_v46, %v1440_v31  ;;  %v1505_v60 = vmul.f32 0.044715, %v1441_v23  ;;  %v1401_v19 = vmul.f32 %v2810_v59, %v1363_v47  ;;  %2248 = vrsqrt.f32 %v1306_v16 }
 0x258   : > { %v2239_v4 = vpop.eup %2238  ;;  %v1502_v7 = vmul.f32 0.044715, %v1438_v15  ;;  %v1406_v37 = vmul.f32 %v2810_v59, %v1368_v25 }
 0x259   : > { %v2241_v43 = vpop.eup %2240  ;;  %v1600_v6 = vadd.f32 %v1568_v50, %v1440_v31  ;;  %v1537_v28 = vmul.f32 %v1505_v60, %v1441_v23  ;;  %v1439_v14 = vadd.f32 %v2816_v49, %v1401_v19  ;;  %v1369_v40 = vmul.f32 %v2239_v4, %v2669_v1  ;;  %v2844_v1 = vpop.xlane.xlu1 %1228 }
 0x25a   : > { %v1534_v9 = vmul.f32 %v1502_v7, %v1438_v15  ;;  %v2835_v27 = vadd.f32 %v2816_v49, %v1406_v37  ;;  %v1366_v18 = vmul.f32 %v2241_v43, %v2676_v51  ;;  %v2856_v4 = vmul.f32 0.5, %v1441_v23 }
 0x25b   : > { %v1632_v20 = vmul.f32 0.7978846, %v1600_v6  ;;  %v1569_v29 = vmul.f32 %v1537_v28, %v1441_v23  ;;  %v1503_v32 = vmul.f32 0.044715, %v1439_v14  ;;  %v1407_v35 = vmul.f32 %v2810_v59, %v1369_v40  ;;  %v2860_v6 = vpop.xlane.xlu0 %1230 }
 0x25c   : > { %v2243_v38 = vpop.eup %2242  ;;  %v1566_v42 = vmul.f32 %v1534_v9, %v1438_v15  ;;  %v1508_v63 = vmul.f32 0.044715, %v2835_v27  ;;  %v1404_v51 = vmul.f32 %v2810_v59, %v1366_v18  ;;  %v2862_v28 = vmul.f32 0.5, %v1438_v15 }
 0x25d   : > { %v2245_v39 = vpop.eup %2244  ;;  %2250 = vtanh.f32 %v1632_v20  ;;  %v1601_v5 = vadd.f32 %v1569_v29, %v1441_v23  ;;  %v1535_v52 = vmul.f32 %v1503_v32, %v1439_v14  ;;  %v2849_v47 = vadd.f32 %v2816_v49, %v1407_v35  ;;  %v2868_v20 = vpop.xlane.xlu1 %1232 }
 0x25e   : > { %v1598_v48 = vadd.f32 %v1566_v42, %v1438_v15  ;;  %v1540_v46 = vmul.f32 %v1508_v63, %v2835_v27  ;;  %v1367_v31 = vmul.f32 %v2243_v38, %v2679_v8  ;;  %v2853_v50 = vadd.f32 %v2816_v49, %v1404_v51 }
 0x25f   : > { %v1633_v25 = vmul.f32 0.7978846, %v1601_v5  ;;  %v1567_v16 = vmul.f32 %v1535_v52, %v1439_v14  ;;  %v1372_v60 = vmul.f32 %v2245_v39, %v2686_v0  ;;  %v1509_v43 = vmul.f32 0.044715, %v2849_v47 }
 0x260   : > { %v2247_v19 = vpop.eup %2246  ;;  %v1630_v7 = vmul.f32 0.7978846, %v1598_v48  ;;  %v1572_v37 = vmul.f32 %v1540_v46, %v2835_v27  ;;  %v1506_v40 = vmul.f32 0.044715, %v2853_v50  ;;  %v1405_v18 = vmul.f32 %v2810_v59, %v1367_v31  ;;  %v2878_v5 = vpop.xlane.xlu0 %1234 }
 0x261   : > { %2252 = vtanh.f32 %v1633_v25  ;;  %v1599_v8 = vadd.f32 %v1567_v16, %v1439_v14  ;;  %v2249_v9 = vpop.eup %2248  ;;  %v1541_v23 = vmul.f32 %v1509_v43, %v2849_v47  ;;  %v1410_v15 = vmul.f32 %v2810_v59, %v1372_v60 }
 0x262   : > { %2254 = vtanh.f32 %v1630_v7  ;;  %v1604_v0 = vadd.f32 %v1572_v37, %v2835_v27  ;;  %v1538_v32 = vmul.f32 %v1506_v40, %v2853_v50  ;;  %v1373_v38 = vmul.f32 %v2247_v19, %v2689_v12  ;;  %v1237_v40 = vpop.xlane.xlu1 %1236 }
 0x263   : > { %v1631_v29 = vmul.f32 0.7978846, %v1599_v8  ;;  %v1573_v63 = vmul.f32 %v1541_v23, %v2849_v47  ;;  %v2875_v35 = vadd.f32 %v2816_v49, %v1405_v18  ;;  %v1370_v39 = vmul.f32 %v2249_v9, %v2696_v10 }
 0x264   : > { %v1636_v42 = vmul.f32 0.7978846, %v1604_v0  ;;  %v1570_v52 = vmul.f32 %v1538_v32, %v2853_v50  ;;  %v2882_v51 = vadd.f32 %v2816_v49, %v1410_v15  ;;  %v1411_v48 = vmul.f32 %v2810_v59, %v1373_v38 }
 0x265   : > { %2256 = vtanh.f32 %v1631_v29  ;;  %v1605_v12 = vadd.f32 %v1573_v63, %v2849_v47  ;;  %v1507_v46 = vmul.f32 0.044715, %v2875_v35  ;;  %v1275_v31 = vmul.f32 0.0078125, %v2828_v54 }
 0x266   : > { %2258 = vtanh.f32 %v1636_v42  ;;  %v1471_v10 = vmul.f32 0.5, %v1439_v14  ;;  %v1602_v16 = vadd.f32 %v1570_v52, %v2853_v50  ;;  %v1512_v60 = vmul.f32 0.044715, %v2882_v51 }
 0x267   : > { %v2251_v25 = vpop.eup %2250  ;;  %v2892_v19 = vadd.f32 %v2816_v49, %v1411_v48  ;;  %v1637_v37 = vmul.f32 0.7978846, %v1605_v12  ;;  %v1539_v43 = vmul.f32 %v1507_v46, %v2875_v35  ;;  %v1408_v8 = vmul.f32 %v2810_v59, %v1370_v39 }
 0x268   : > { %v1696_v7 = vadd.f32 1.0, %v2251_v25  ;;  %v2896_v9 = vpop.xlane.xlu0 %1238  ;;  %v1476_v54 = vmul.f32 0.5, %v2835_v27  ;;  %v1634_v14 = vmul.f32 0.7978846, %v1602_v16  ;;  %v1544_v0 = vmul.f32 %v1512_v60, %v2882_v51 }
 0x269   : > { %v1513_v23 = vmul.f32 0.044715, %v2892_v19  ;;  %2260 = vtanh.f32 %v1637_v37  ;;  %v1571_v29 = vmul.f32 %v1539_v43, %v2875_v35  ;;  %v2909_v32 = vadd.f32 %v2816_v49, %v1408_v8 }
 0x26a   : > { %v1728_v18 = vmul.f32 %v1696_v7, %v2840_v34  ;;  %2262 = vtanh.f32 %v1634_v14  ;;  %v1576_v38 = vmul.f32 %v1544_v0, %v2882_v51  ;;  %v1307_v27 = vadd.f32 1e-05, %v1275_v31  ;;  %v1241_v12 = vpop.xlane.xlu1 %1240 }
 0x26b   : > { %v2253_v15 = vpop.eup %2252  ;;  %v1545_v42 = vmul.f32 %v1513_v23, %v2892_v19  ;;  %v1477_v52 = vmul.f32 0.5, %v2849_v47  ;;  %v1603_v34 = vadd.f32 %v1571_v29, %v2875_v35  ;;  %v1510_v48 = vmul.f32 0.044715, %v2909_v32 }
 0x26c   : > { %v2255_v63 = vpop.eup %2254  ;;  %1760 = vst [vmem:[%s2901_s28 + $0x10] sm:$0xff] %v1728_v18  ;;  %v1697_v39 = vadd.f32 1.0, %v2253_v15  ;;  %v1608_v25 = vadd.f32 %v1576_v38, %v2882_v51  ;;  %2264 = vrsqrt.f32 %v1307_v27  ;;  %v1278_v47 = vmul.f32 0.0078125, %v2838_v11 }
 0x26d   : > { %v1694_v46 = vadd.f32 1.0, %v2255_v63  ;;  %v1577_v16 = vmul.f32 %v1545_v42, %v2892_v19  ;;  %v1255_v60 = vpop.xlane.xlu0 %1254  ;;  %v1635_v7 = vmul.f32 0.7978846, %v1603_v34  ;;  %v1542_v37 = vmul.f32 %v1510_v48, %v2909_v32 }
 0x26e   : > { %v1729_v31 = vmul.f32 %v1697_v39, %v2856_v4  ;;  %v1640_v14 = vmul.f32 0.7978846, %v1608_v25  ;;  %v1279_v23 = vmul.f32 0.0078125, %v2844_v1  ;;  %v1310_v4 = vadd.f32 1e-05, %v1278_v47 }
 0x26f   : > { %v2257_v43 = vpop.eup %2256  ;;  %v1726_v8 = vmul.f32 %v1694_v46, %v2862_v28  ;;  %v1609_v0 = vadd.f32 %v1577_v16, %v2892_v19  ;;  %2266 = vtanh.f32 %v1635_v7  ;;  %v1574_v15 = vmul.f32 %v1542_v37, %v2909_v32  ;;  %v1257_v63 = vpop.xlane.xlu1 %1256 }
 0x270   : > { %v2259_v18 = vpop.eup %2258  ;;  %1761 = vst [vmem:[%s2901_s28 + $0x18] sm:$0xff] %v1729_v31  ;;  %v1695_v29 = vadd.f32 1.0, %v2257_v43  ;;  %2268 = vtanh.f32 %v1640_v14  ;;  %v1311_v42 = vadd.f32 1e-05, %v1279_v23  ;;  %v1280_v1 = vmul.f32 0.0078125, %v2860_v6 }
 0x271   : > { %1758 = vst [vmem:[%s2901_s28] sm:$0xff] %v1726_v8  ;;  %v1700_v38 = vadd.f32 1.0, %v2259_v18  ;;  %v1641_v11 = vmul.f32 0.7978846, %v1609_v0  ;;  %v1606_v28 = vadd.f32 %v1574_v15, %v2909_v32  ;;  %2270 = vrsqrt.f32 %v1310_v4  ;;  %v1251_v46 = vpop.xlane.xlu0 %1250 }
 0x272   : > { %v1727_v27 = vmul.f32 %v1695_v29, %v1471_v10  ;;  %v1281_v34 = vmul.f32 0.0078125, %v2868_v20  ;;  %v1282_v48 = vmul.f32 0.0078125, %v2878_v5  ;;  %v1312_v31 = vadd.f32 1e-05, %v1280_v1 }
 0x273   : > { %v1732_v39 = vmul.f32 %v1700_v38, %v1476_v54  ;;  %2272 = vtanh.f32 %v1641_v11  ;;  %v2261_v25 = vpop.eup %2260  ;;  %v1638_v16 = vmul.f32 0.7978846, %v1606_v28  ;;  %v1283_v10 = vmul.f32 0.0078125, %v1237_v40  ;;  %v1253_v15 = vpop.xlane.xlu1 %1252 }
 0x274   : > { %1759 = vst [vmem:[%s2901_s28 + $0x8] sm:$0xff] %v1727_v27  ;;  %2274 = vrsqrt.f32 %v1311_v42  ;;  %v2263_v7 = vpop.eup %2262  ;;  %v1701_v37 = vadd.f32 1.0, %v2261_v25  ;;  %v1313_v47 = vadd.f32 1e-05, %v1281_v34  ;;  %v1314_v43 = vadd.f32 1e-05, %v1282_v48 }
 0x275   : > { %1764 = vst [vmem:[%s2901_s28 + $0x30] sm:$0xff] %v1732_v39  ;;  %v1284_v6 = vmul.f32 0.0078125, %v2896_v9  ;;  %v1474_v54 = vmul.f32 0.5, %v2853_v50  ;;  %v1698_v20 = vadd.f32 1.0, %v2263_v7  ;;  %2276 = vtanh.f32 %v1638_v16  ;;  %v1243_v38 = vpop.xlane.xlu0 %1242 }
 0x276   : > { %v1315_v5 = vadd.f32 1e-05, %v1283_v10  ;;  %v2265_v8 = vpop.eup %2264  ;;  %v1733_v14 = vmul.f32 %v1701_v37, %v1477_v52  ;;  %2278 = vrsqrt.f32 %v1312_v31  ;;  %v1285_v23 = vmul.f32 0.0078125, %v1241_v12 }
 0x277   : > { %v1316_v0 = vadd.f32 1e-05, %v1284_v6  ;;  %v1730_v40 = vmul.f32 %v1698_v20, %v1474_v54  ;;  %v1371_v18 = vmul.f32 %v2265_v8, %v2699_v24  ;;  %2280 = vrsqrt.f32 %v1313_v47  ;;  %v1245_v54 = vpop.xlane.xlu1 %1244 }
 0x278   : > { %v1292_v29 = vmul.f32 0.0078125, %v1255_v60  ;;  %1765 = vst [vmem:[%s2901_s28 + $0x38] sm:$0xff] %v1733_v14  ;;  %v1475_v9 = vmul.f32 0.5, %v2875_v35  ;;  %v1480_v50 = vmul.f32 0.5, %v2882_v51  ;;  %2282 = vrsqrt.f32 %v1314_v43 }
 0x279   : > { %v1293_v4 = vmul.f32 0.0078125, %v1257_v63  ;;  %v2267_v11 = vpop.eup %2266  ;;  %1762 = vst [vmem:[%s2901_s28 + $0x20] sm:$0xff] %v1730_v40  ;;  %v1481_v52 = vmul.f32 0.5, %v2892_v19  ;;  %v1409_v12 = vmul.f32 %v2810_v59, %v1371_v18  ;;  %2284 = vrsqrt.f32 %v1315_v5 }
 0x27a   : > { %v1290_v42 = vmul.f32 0.0078125, %v1251_v46  ;;  %v2269_v24 = vpop.eup %2268  ;;  %v1699_v27 = vadd.f32 1.0, %v2267_v11  ;;  %2286 = vrsqrt.f32 %v1316_v0  ;;  %v1317_v60 = vadd.f32 1e-05, %v1285_v23 }
 0x27b   : > { %v1291_v28 = vmul.f32 0.0078125, %v1253_v15  ;;  %v2271_v35 = vpop.eup %2270  ;;  %v1704_v1 = vadd.f32 1.0, %v2269_v24  ;;  %v1447_v51 = vadd.f32 %v2816_v49, %v1409_v12  ;;  %v1324_v63 = vadd.f32 1e-05, %v1292_v29 }
 0x27c   : > { %v1286_v39 = vmul.f32 0.0078125, %v1243_v38  ;;  %v1731_v48 = vmul.f32 %v1699_v27, %v1475_v9  ;;  %v1478_v19 = vmul.f32 0.5, %v2909_v32  ;;  %v1374_v25 = vmul.f32 %v2271_v35, %v2706_v22  ;;  %v1259_v35 = vpop.xlane.xlu0 %1258 }
 0x27d   : > { %v2273_v34 = vpop.eup %2272  ;;  %v1325_v46 = vadd.f32 1e-05, %v1293_v4  ;;  %v1736_v31 = vmul.f32 %v1704_v1, %v1480_v50  ;;  %v1511_v7 = vmul.f32 0.044715, %v1447_v51  ;;  %v1322_v37 = vadd.f32 1e-05, %v1290_v42 }
 0x27e   : > { %v2275_v16 = vpop.eup %2274  ;;  %v1705_v10 = vadd.f32 1.0, %v2273_v34  ;;  %1763 = vst [vmem:[%s2901_s28 + $0x28] sm:$0xff] %v1731_v48  ;;  %v1412_v47 = vmul.f32 %v2810_v59, %v1374_v25  ;;  %2288 = vrsqrt.f32 %v1317_v60  ;;  %v1323_v6 = vadd.f32 1e-05, %v1291_v28 }
 0x27f   : > { %v1375_v43 = vmul.f32 %v2275_v16, %v2711_v58  ;;  %v2277_v20 = vpop.eup %2276  ;;  %1768 = vst [vmem:[%s2901_s28 + $0x50] sm:$0xff] %v1736_v31  ;;  %v1543_v5 = vmul.f32 %v1511_v7, %v1447_v51  ;;  %2290 = vrsqrt.f32 %v1324_v63  ;;  %v1318_v22 = vadd.f32 1e-05, %v1286_v39 }
 0x280   : > { %v1737_v32 = vmul.f32 %v1705_v10, %v1481_v52  ;;  %v2279_v8 = vpop.eup %2278  ;;  %v1702_v14 = vadd.f32 1.0, %v2277_v20  ;;  %v2950_v0 = vmul.f32 0.5, %v1447_v51  ;;  %v1450_v23 = vadd.f32 %v2816_v49, %v1412_v47 }
 0x281   : > { %v1413_v40 = vmul.f32 %v2810_v59, %v1375_v43  ;;  %v2281_v18 = vpop.eup %2280  ;;  %v1575_v58 = vmul.f32 %v1543_v5, %v1447_v51  ;;  %v1376_v29 = vmul.f32 %v2279_v8, %v2716_v36  ;;  %2292 = vrsqrt.f32 %v1325_v46 }
 0x282   : > { %1769 = vst [vmem:[%s2901_s28 + $0x58] sm:$0xff] %v1737_v32  ;;  %v1287_v15 = vmul.f32 0.0078125, %v1245_v54  ;;  %v2283_v9 = vpop.eup %2282  ;;  %v1734_v50 = vmul.f32 %v1702_v14, %v1478_v19  ;;  %v1514_v4 = vmul.f32 0.044715, %v1450_v23  ;;  %2294 = vrsqrt.f32 %v1322_v37 }
 0x283   : > { %v1451_v38 = vadd.f32 %v2816_v49, %v1413_v40  ;;  %v2285_v11 = vpop.eup %2284  ;;  %v1607_v52 = vadd.f32 %v1575_v58, %v1447_v51  ;;  %v1414_v12 = vmul.f32 %v2810_v59, %v1376_v29  ;;  %v1377_v42 = vmul.f32 %v2281_v18, %v2721_v41 }
 0x284   : > { %v1378_v24 = vmul.f32 %v2283_v9, %v2728_v13  ;;  %v2287_v27 = vpop.eup %2286  ;;  %1766 = vst [vmem:[%s2901_s28 + $0x40] sm:$0xff] %v1734_v50  ;;  %v1546_v60 = vmul.f32 %v1514_v4, %v1450_v23  ;;  %v1379_v28 = vmul.f32 %v2285_v11, %v2731_v56  ;;  %2296 = vrsqrt.f32 %v1323_v6 }
 0x285   : > { %v1515_v36 = vmul.f32 0.044715, %v1451_v38  ;;  %v1639_v1 = vmul.f32 0.7978846, %v1607_v52  ;;  %v1452_v63 = vadd.f32 %v2816_v49, %v1414_v12  ;;  %v1415_v39 = vmul.f32 %v2810_v59, %v1377_v42 }
 0x286   : > { %v1416_v51 = vmul.f32 %v2810_v59, %v1378_v24  ;;  %v1578_v34 = vmul.f32 %v1546_v60, %v1450_v23  ;;  %v1417_v41 = vmul.f32 %v2810_v59, %v1379_v28  ;;  %v1380_v13 = vmul.f32 %v2287_v27, %v2738_v21 }
 0x287   : > { %v1547_v48 = vmul.f32 %v1515_v36, %v1451_v38  ;;  %2298 = vtanh.f32 %v1639_v1  ;;  %v1516_v19 = vmul.f32 0.044715, %v1452_v63  ;;  %v2968_v25 = vadd.f32 %v2816_v49, %v1415_v39 }
 0x288   : > { %v2970_v56 = vmul.f32 0.0078125, %v1259_v35  ;;  %v2289_v46 = vpop.eup %2288  ;;  %v1610_v16 = vadd.f32 %v1578_v34, %v1450_v23  ;;  %v2973_v10 = vadd.f32 %v2816_v49, %v1416_v51  ;;  %v2976_v7 = vadd.f32 %v2816_v49, %v1417_v41 }
 0x289   : > { %v1579_v31 = vmul.f32 %v1547_v48, %v1451_v38  ;;  %v2291_v37 = vpop.eup %2290  ;;  %v1548_v47 = vmul.f32 %v1516_v19, %v1452_v63  ;;  %v1517_v21 = vmul.f32 0.044715, %v2968_v25  ;;  %v1418_v43 = vmul.f32 %v2810_v59, %v1380_v13 }
 0x28a   : > { %2300 = vrsqrt.f32 %v1318_v22  ;;  %v1642_v6 = vmul.f32 0.7978846, %v1610_v16  ;;  %v1518_v20 = vmul.f32 0.044715, %v2973_v10  ;;  %v2981_v32 = vadd.f32 1e-05, %v1287_v15 }
 0x28b   : > { %v1611_v54 = vadd.f32 %v1579_v31, %v1451_v38  ;;  %v2293_v5 = vpop.eup %2292  ;;  %v2983_v8 = vmul.f32 0.5, %v1450_v23  ;;  %v1580_v14 = vmul.f32 %v1548_v47, %v1452_v63  ;;  %v1549_v40 = vmul.f32 %v1517_v21, %v2968_v25 }
 0x28c   : > { %v1519_v18 = vmul.f32 0.044715, %v2976_v7  ;;  %v2295_v58 = vpop.eup %2294  ;;  %2302 = vtanh.f32 %v1642_v6  ;;  %v1550_v9 = vmul.f32 %v1518_v20, %v2973_v10  ;;  %v2989_v22 = vadd.f32 %v2816_v49, %v1418_v43 }
 0x28d   : > { %v1643_v29 = vmul.f32 0.7978846, %v1611_v54  ;;  %v1612_v50 = vadd.f32 %v1580_v14, %v1452_v63  ;;  %v1581_v15 = vmul.f32 %v1549_v40, %v2968_v25  ;;  %v1381_v23 = vmul.f32 %v2289_v46, %v2741_v2 }
 0x28e   : > { %v1551_v4 = vmul.f32 %v1519_v18, %v2976_v7  ;;  %v2297_v11 = vpop.eup %2296  ;;  %v1483_v52 = vmul.f32 0.5, %v1451_v38  ;;  %v1582_v12 = vmul.f32 %v1550_v9, %v2973_v10  ;;  %v1520_v42 = vmul.f32 0.044715, %v2989_v22 }
 0x28f   : > { %2304 = vtanh.f32 %v1643_v29  ;;  %v1644_v24 = vmul.f32 0.7978846, %v1612_v50  ;;  %v1613_v27 = vadd.f32 %v1581_v15, %v2968_v25  ;;  %v1419_v36 = vmul.f32 %v2810_v59, %v1381_v23  ;;  %v1261_v50 = vpop.xlane.xlu1 %1260 }
 0x290   : > { %v1583_v60 = vmul.f32 %v1551_v4, %v2976_v7  ;;  %v1614_v28 = vadd.f32 %v1582_v12, %v2973_v10  ;;  %v1552_v35 = vmul.f32 %v1520_v42, %v2989_v22  ;;  %v1388_v2 = vmul.f32 %v2291_v37, %v2748_v33 }
 0x291   : > { %v1389_v38 = vmul.f32 %v2293_v5, %v2751_v17  ;;  %v2299_v1 = vpop.eup %2298  ;;  %2306 = vtanh.f32 %v1644_v24  ;;  %v1645_v39 = vmul.f32 0.7978846, %v1613_v27  ;;  %v3005_v34 = vadd.f32 %v2816_v49, %v1419_v36 }
 0x292   : > { %v1615_v51 = vadd.f32 %v1583_v60, %v2976_v7  ;;  %v1703_v48 = vadd.f32 1.0, %v2299_v1  ;;  %v1646_v41 = vmul.f32 0.7978846, %v1614_v28  ;;  %v1584_v13 = vmul.f32 %v1552_v35, %v2989_v22 }
 0x293   : > { %v1426_v19 = vmul.f32 %v2810_v59, %v1388_v2  ;;  %v1484_v16 = vmul.f32 0.5, %v1452_v63  ;;  %2308 = vtanh.f32 %v1645_v39  ;;  %v1521_v17 = vmul.f32 0.044715, %v3005_v34 }
 0x294   : > { %v2301_v46 = vpop.eup %2300  ;;  %v1647_v33 = vmul.f32 0.7978846, %v1615_v51  ;;  %v1735_v31 = vmul.f32 %v1703_v48, %v2950_v0  ;;  %2310 = vtanh.f32 %v1646_v41  ;;  %v1616_v37 = vadd.f32 %v1584_v13, %v2989_v22  ;;  %v1247_v41 = vpop.xlane.xlu0 %1246 }
 0x295   : > { %v3013_v47 = vadd.f32 %v2816_v49, %v1426_v19  ;;  %v1553_v21 = vmul.f32 %v1521_v17, %v3005_v34  ;;  %v1427_v43 = vmul.f32 %v2810_v59, %v1389_v38  ;;  %v1386_v6 = vmul.f32 %v2295_v58, %v2756_v30  ;;  %v1249_v13 = vpop.xlane.xlu1 %1248 }
 0x296   : > { %2312 = vtanh.f32 %v1647_v33  ;;  %v2303_v63 = vpop.eup %2302  ;;  %1767 = vst [vmem:[%s2901_s28 + $0x48] sm:$0xff] %v1735_v31  ;;  %v1485_v54 = vmul.f32 0.5, %v2968_v25  ;;  %v1648_v20 = vmul.f32 0.7978846, %v1616_v37  ;;  %v1387_v5 = vmul.f32 %v2297_v11, %v2761_v62 }
 0x297   : > { %v1528_v0 = vmul.f32 0.044715, %v3013_v47  ;;  %v1706_v14 = vadd.f32 1.0, %v2303_v63  ;;  %v1585_v40 = vmul.f32 %v1553_v21, %v3005_v34  ;;  %v3024_v18 = vadd.f32 %v2816_v49, %v1427_v43 }
 0x298   : > { %v1424_v29 = vmul.f32 %v2810_v59, %v1386_v6  ;;  %2314 = vtanh.f32 %v1648_v20  ;;  %v1425_v25 = vmul.f32 %v2810_v59, %v1387_v5  ;;  %v1382_v58 = vmul.f32 %v2301_v46, %v2766_v45 }
 0x299   : > { %v2305_v9 = vpop.eup %2304  ;;  %v1560_v30 = vmul.f32 %v1528_v0, %v3013_v47  ;;  %v1738_v62 = vmul.f32 %v1706_v14, %v2983_v8  ;;  %v1486_v4 = vmul.f32 0.5, %v2973_v10  ;;  %v1617_v23 = vadd.f32 %v1585_v40, %v3005_v34 }
 0x29a   : > { %v1707_v15 = vadd.f32 1.0, %v2305_v9  ;;  %v1529_v12 = vmul.f32 0.044715, %v3024_v18  ;;  %v3036_v42 = vadd.f32 %v2816_v49, %v1424_v29  ;;  %v3039_v24 = vadd.f32 %v2816_v49, %v1425_v25 }
 0x29b   : > { %v1592_v11 = vmul.f32 %v1560_v30, %v3013_v47  ;;  %v2307_v45 = vpop.eup %2306  ;;  %1770 = vst [vmem:[%s2901_s28 + $0x60] sm:$0xff] %v1738_v62  ;;  %v1649_v8 = vmul.f32 0.7978846, %v1617_v23  ;;  %v1420_v60 = vmul.f32 %v2810_v59, %v1382_v58  ;;  %2316 = vrsqrt.f32 %v2981_v32  ;;  %v1263_v62 = vpop.xlane.xlu0 %1262 }
 0x29c   : > { %v1739_v27 = vmul.f32 %v1707_v15, %v1483_v52  ;;  %v1708_v10 = vadd.f32 1.0, %v2307_v45  ;;  %v1487_v36 = vmul.f32 0.5, %v2976_v7  ;;  %v1561_v35 = vmul.f32 %v1529_v12, %v3024_v18  ;;  %v1265_v15 = vpop.xlane.xlu1 %1264 }
 0x29d   : > { %v1624_v28 = vadd.f32 %v1592_v11, %v3013_v47  ;;  %v2309_v2 = vpop.eup %2308  ;;  %v1488_v38 = vmul.f32 0.5, %v2989_v22  ;;  %2318 = vtanh.f32 %v1649_v8  ;;  %v1526_v52 = vmul.f32 0.044715, %v3036_v42 }
 0x29e   : > { %1771 = vst [vmem:[%s2901_s28 + $0x68] sm:$0xff] %v1739_v27  ;;  %v1527_v1 = vmul.f32 0.044715, %v3039_v24  ;;  %v2311_v39 = vpop.eup %2310  ;;  %v1740_v51 = vmul.f32 %v1708_v10, %v1484_v16  ;;  %v1709_v32 = vadd.f32 1.0, %v2309_v2  ;;  %v1593_v7 = vmul.f32 %v1561_v35, %v3024_v18 }
 0x29f   : > { %v1656_v48 = vmul.f32 0.7978846, %v1624_v28  ;;  %v1710_v46 = vadd.f32 1.0, %v2311_v39  ;;  %v1558_v33 = vmul.f32 %v1526_v52, %v3036_v42  ;;  %v3055_v17 = vadd.f32 %v2816_v49, %v1420_v60 }
 0x2a0   : > { %v2313_v19 = vpop.eup %2312  ;;  %v1559_v22 = vmul.f32 %v1527_v1, %v3039_v24  ;;  %1772 = vst [vmem:[%s2901_s28 + $0x70] sm:$0xff] %v1740_v51  ;;  %v1741_v31 = vmul.f32 %v1709_v32, %v1485_v54  ;;  %v1625_v37 = vadd.f32 %v1593_v7, %v3024_v18  ;;  %v1489_v43 = vmul.f32 0.5, %v3005_v34 }
 0x2a1   : > { %v1711_v16 = vadd.f32 1.0, %v2313_v19  ;;  %2320 = vtanh.f32 %v1656_v48  ;;  %v1742_v21 = vmul.f32 %v1710_v46, %v1486_v4  ;;  %v1590_v6 = vmul.f32 %v1558_v33, %v3036_v42 }
 0x2a2   : > { %v1591_v63 = vmul.f32 %v1559_v22, %v3039_v24  ;;  %v2315_v20 = vpop.eup %2314  ;;  %1773 = vst [vmem:[%s2901_s28 + $0x78] sm:$0xff] %v1741_v31  ;;  %v1657_v5 = vmul.f32 0.7978846, %v1625_v37  ;;  %v1522_v14 = vmul.f32 0.044715, %v3055_v17  ;;  %v1295_v30 = vmul.f32 0.0078125, %v1261_v50 }
 0x2a3   : > { %v1743_v0 = vmul.f32 %v1711_v16, %v1487_v36  ;;  %v1326_v54 = vadd.f32 1e-05, %v2970_v56  ;;  %1774 = vst [vmem:[%s2901_s28 + $0x80] sm:$0xff] %v1742_v21  ;;  %v1712_v40 = vadd.f32 1.0, %v2315_v20  ;;  %v1622_v29 = vadd.f32 %v1590_v6, %v3036_v42 }
 0x2a4   : > { %v1623_v9 = vadd.f32 %v1591_v63, %v3039_v24  ;;  %2322 = vtanh.f32 %v1657_v5  ;;  %v1554_v34 = vmul.f32 %v1522_v14, %v3055_v17  ;;  %v1288_v25 = vmul.f32 0.0078125, %v1247_v41 }
 0x2a5   : > { %1775 = vst [vmem:[%s2901_s28 + $0x88] sm:$0xff] %v1743_v0  ;;  %v1289_v58 = vmul.f32 0.0078125, %v1249_v13  ;;  %v2317_v4 = vpop.eup %2316  ;;  %v1744_v23 = vmul.f32 %v1712_v40, %v1488_v38  ;;  %v1654_v11 = vmul.f32 0.7978846, %v1622_v29  ;;  %2324 = vrsqrt.f32 %v1326_v54 }
 0x2a6   : > { %v1655_v56 = vmul.f32 0.7978846, %v1623_v9  ;;  %v1586_v12 = vmul.f32 %v1554_v34, %v3055_v17  ;;  %v1383_v45 = vmul.f32 %v2317_v4, %v2771_v44  ;;  %v1327_v27 = vadd.f32 1e-05, %v1295_v30 }
 0x2a7   : > { %v1320_v50 = vadd.f32 1e-05, %v1288_v25  ;;  %v2319_v8 = vpop.eup %2318  ;;  %1776 = vst [vmem:[%s2901_s28 + $0x90] sm:$0xff] %v1744_v23  ;;  %2326 = vtanh.f32 %v1654_v11  ;;  %v1321_v60 = vadd.f32 1e-05, %v1289_v58  ;;  %v1296_v10 = vmul.f32 0.0078125, %v1263_v62 }
 0x2a8   : > { %v1297_v36 = vmul.f32 0.0078125, %v1265_v15  ;;  %v1713_v28 = vadd.f32 1.0, %v2319_v8  ;;  %2328 = vtanh.f32 %v1655_v56  ;;  %v1618_v35 = vadd.f32 %v1586_v12, %v3055_v17 }
 0x2a9   : > { %v1421_v2 = vmul.f32 %v2810_v59, %v1383_v45  ;;  %2330 = vrsqrt.f32 %v1327_v27  ;;  %v1328_v38 = vadd.f32 1e-05, %v1296_v10  ;;  %v1496_v32 = vmul.f32 0.5, %v3013_v47 }
 0x2aa   : > { %v1329_v52 = vadd.f32 1e-05, %v1297_v36  ;;  %v1745_v44 = vmul.f32 %v1713_v28, %v1489_v43  ;;  %v1650_v39 = vmul.f32 0.7978846, %v1618_v35  ;;  %2332 = vrsqrt.f32 %v1320_v50 }
 0x2ab   : > { %v2321_v1 = vpop.eup %2320  ;;  %v3076_v51 = vadd.f32 %v2816_v49, %v1421_v2  ;;  %2334 = vrsqrt.f32 %v1321_v60  ;;  %v1497_v33 = vmul.f32 0.5, %v3024_v18  ;;  %v1494_v43 = vmul.f32 0.5, %v3036_v42 }
 0x2ac   : > { %v1720_v48 = vadd.f32 1.0, %v2321_v1  ;;  %1777 = vst [vmem:[%s2901_s28 + $0x98] sm:$0xff] %v1745_v44  ;;  %2336 = vtanh.f32 %v1650_v39  ;;  %v1495_v18 = vmul.f32 0.5, %v3039_v24  ;;  %v1490_v62 = vmul.f32 0.5, %v3055_v17 }
 0x2ad   : > { %v1523_v7 = vmul.f32 0.044715, %v3076_v51  ;;  %2338 = vrsqrt.f32 %v1328_v38 }
 0x2ae   : > { %v1752_v41 = vmul.f32 %v1720_v48, %v1496_v32  ;;  %v2323_v13 = vpop.eup %2322  ;;  %2340 = vrsqrt.f32 %v1329_v52 }
 0x2af   : > { %v1555_v19 = vmul.f32 %v1523_v7, %v3076_v51  ;;  %v2325_v46 = vpop.eup %2324  ;;  %v1721_v22 = vadd.f32 1.0, %v2323_v13 }
 0x2b0   : > { %1784 = vst [vmem:[%s2901_s28 + $0xd0] sm:$0xff] %v1752_v41  ;;  %v1390_v31 = vmul.f32 %v2325_v46, %v2776_v53  ;;  %v1491_v41 = vmul.f32 0.5, %v3076_v51 }
 0x2b1   : > { %v1587_v47 = vmul.f32 %v1555_v19, %v3076_v51  ;;  %v2327_v16 = vpop.eup %2326  ;;  %v1753_v37 = vmul.f32 %v1721_v22, %v1497_v33 }
 0x2b2   : > { %v2329_v21 = vpop.eup %2328  ;;  %v1718_v6 = vadd.f32 1.0, %v2327_v16  ;;  %v1428_v20 = vmul.f32 %v2810_v59, %v1390_v31 }
 0x2b3   : > { %v1619_v63 = vadd.f32 %v1587_v47, %v3076_v51  ;;  %v2331_v0 = vpop.eup %2330  ;;  %1785 = vst [vmem:[%s2901_s28 + $0xd8] sm:$0xff] %v1753_v37  ;;  %v1719_v5 = vadd.f32 1.0, %v2329_v21 }
 0x2b4   : > { %v2333_v14 = vpop.eup %2332  ;;  %v1750_v54 = vmul.f32 %v1718_v6, %v1494_v43  ;;  %v3092_v40 = vadd.f32 %v2816_v49, %v1428_v20  ;;  %v1391_v42 = vmul.f32 %v2331_v0, %v2781_v57 }
 0x2b5   : > { %v1651_v53 = vmul.f32 0.7978846, %v1619_v63  ;;  %v2335_v29 = vpop.eup %2334  ;;  %v1751_v9 = vmul.f32 %v1719_v5, %v1495_v18  ;;  %v1384_v30 = vmul.f32 %v2333_v14, %v2786_v61 }
 0x2b6   : > { %v2337_v34 = vpop.eup %2336  ;;  %1782 = vst [vmem:[%s2901_s28 + $0xc0] sm:$0xff] %v1750_v54  ;;  %v1530_v25 = vmul.f32 0.044715, %v3092_v40  ;;  %v1429_v24 = vmul.f32 %v2810_v59, %v1391_v42  ;;  %v1385_v57 = vmul.f32 %v2335_v29, %v2791_v3  ;;  %v2356_v3 = vld [vmem:[%s3132_s2] ss:$0 sm:$0xff]  ;;  %v1498_v14 = vmul.f32 0.5, %v3092_v40 }
 0x2b7   : > { %2342 = vtanh.f32 %v1651_v53  ;;  %v2339_v58 = vpop.eup %2338  ;;  %1783 = vst [vmem:[%s2901_s28 + $0xc8] sm:$0xff] %v1751_v9  ;;  %v1714_v15 = vadd.f32 1.0, %v2337_v34  ;;  %v1422_v4 = vmul.f32 %v2810_v59, %v1384_v30 }
 0x2b8   : > { %v2341_v23 = vpop.eup %2340  ;;  %v1562_v61 = vmul.f32 %v1530_v25, %v3092_v40  ;;  %v1467_v11 = vadd.f32 %v2816_v49, %v1429_v24  ;;  %v1392_v56 = vmul.f32 %v2339_v58, %v2796_v55  ;;  %v1423_v27 = vmul.f32 %v2810_v59, %v1385_v57  ;;  %v2357_v55 = vld [vmem:[%s3133_s3] ss:$0 sm:$0xff] }
 0x2b9   : > { %v1746_v12 = vmul.f32 %v1714_v15, %v1490_v62  ;;  %v1460_v45 = vadd.f32 %v2816_v49, %v1422_v4  ;;  %v1393_v17 = vmul.f32 %v2341_v23, %v2801_v26 }
 0x2ba   : > { %v1594_v50 = vmul.f32 %v1562_v61, %v3092_v40  ;;  %v1531_v8 = vmul.f32 0.044715, %v1467_v11  ;;  %v1430_v60 = vmul.f32 %v2356_v3, %v1392_v56  ;;  %v1461_v36 = vadd.f32 %v2357_v55, %v1423_v27 }
 0x2bb   : > { %1778 = vst [vmem:[%s2901_s28 + $0xa0] sm:$0xff] %v1746_v12  ;;  %v1524_v10 = vmul.f32 0.044715, %v1460_v45  ;;  %v1431_v49 = vmul.f32 %v2356_v3, %v1393_v17  ;;  %v1499_v9 = vmul.f32 0.5, %v1467_v11  ;;  %v1492_v34 = vmul.f32 0.5, %v1460_v45 }
 0x2bc   : > { %v1626_v59 = vadd.f32 %v1594_v50, %v3092_v40  ;;  %v1563_v28 = vmul.f32 %v1531_v8, %v1467_v11  ;;  %v1468_v26 = vadd.f32 %v2357_v55, %v1430_v60  ;;  %v1525_v2 = vmul.f32 0.044715, %v1461_v36 }
 0x2bd   : > { %v1556_v35 = vmul.f32 %v1524_v10, %v1460_v45  ;;  %v1469_v38 = vadd.f32 %v2357_v55, %v1431_v49  ;;  %v1493_v4 = vmul.f32 0.5, %v1461_v36 }
 0x2be   : > { %v1658_v52 = vmul.f32 0.7978846, %v1626_v59  ;;  %v1595_v1 = vmul.f32 %v1563_v28, %v1467_v11  ;;  %v1532_v44 = vmul.f32 0.044715, %v1468_v26  ;;  %v1557_v32 = vmul.f32 %v1525_v2, %v1461_v36 }
 0x2bf   : > { %v1588_v39 = vmul.f32 %v1556_v35, %v1460_v45  ;;  %v1533_v48 = vmul.f32 0.044715, %v1469_v38  ;;  %v1500_v23 = vmul.f32 0.5, %v1468_v26  ;;  %v1501_v12 = vmul.f32 0.5, %v1469_v38 }
 0x2c0   : > { %2344 = vtanh.f32 %v1658_v52  ;;  %v1627_v13 = vadd.f32 %v1595_v1, %v1467_v11  ;;  %v1564_v19 = vmul.f32 %v1532_v44, %v1468_v26  ;;  %v1589_v22 = vmul.f32 %v1557_v32, %v1461_v36 }
 0x2c1   : > { %v2343_v7 = vpop.eup %2342  ;;  %v1620_v33 = vadd.f32 %v1588_v39, %v1460_v45  ;;  %v1565_v47 = vmul.f32 %v1533_v48, %v1469_v38 }
 0x2c2   : > { %v1715_v46 = vadd.f32 1.0, %v2343_v7  ;;  %v1659_v31 = vmul.f32 0.7978846, %v1627_v13  ;;  %v1596_v16 = vmul.f32 %v1564_v19, %v1468_v26  ;;  %v1621_v43 = vadd.f32 %v1589_v22, %v1461_v36 }
 0x2c3   : > { %v1652_v21 = vmul.f32 0.7978846, %v1620_v33  ;;  %v1597_v6 = vmul.f32 %v1565_v47, %v1469_v38 }
 0x2c4   : > { %v1747_v37 = vmul.f32 %v1715_v46, %v1491_v41  ;;  %2346 = vtanh.f32 %v1659_v31  ;;  %v1628_v63 = vadd.f32 %v1596_v16, %v1468_v26  ;;  %v1653_v51 = vmul.f32 0.7978846, %v1621_v43 }
 0x2c5   : > { %2348 = vtanh.f32 %v1652_v21  ;;  %v1629_v20 = vadd.f32 %v1597_v6, %v1469_v38 }
 0x2c6   : > { %1779 = vst [vmem:[%s2901_s28 + $0xa8] sm:$0xff] %v1747_v37  ;;  %v1660_v0 = vmul.f32 0.7978846, %v1628_v63  ;;  %2350 = vtanh.f32 %v1653_v51 }
 0x2c7   : > { %v1661_v18 = vmul.f32 0.7978846, %v1629_v20 }
 0x2c8   : > { %2352 = vtanh.f32 %v1660_v0 }
 0x2c9   : > { %2354 = vtanh.f32 %v1661_v18 }
 0x2ca   : > { %v2345_v5 = vpop.eup %2344 }
 0x2cb   : > { %v1722_v54 = vadd.f32 1.0, %v2345_v5 }
 0x2cd   : > { %v1754_v53 = vmul.f32 %v1722_v54, %v1498_v14 }
 0x2ce   : > { %v2347_v42 = vpop.eup %2346 }
 0x2cf   : > { %v2349_v29 = vpop.eup %2348  ;;  %1786 = vst [vmem:[%s2901_s28 + $0xe0] sm:$0xff] %v1754_v53  ;;  %v1723_v30 = vadd.f32 1.0, %v2347_v42 }
 0x2d0   : > { %v1716_v25 = vadd.f32 1.0, %v2349_v29  ;;  %v2351_v24 = vpop.eup %2350 }
 0x2d1   : > { %v1755_v58 = vmul.f32 %v1723_v30, %v1499_v9  ;;  %v1717_v40 = vadd.f32 1.0, %v2351_v24 }
 0x2d2   : > { %v2353_v62 = vpop.eup %2352  ;;  %v1748_v15 = vmul.f32 %v1716_v25, %v1492_v34 }
 0x2d3   : > { %v2355_v57 = vpop.eup %2354  ;;  %1787 = vst [vmem:[%s2901_s28 + $0xe8] sm:$0xff] %v1755_v58  ;;  %v1724_v61 = vadd.f32 1.0, %v2353_v62  ;;  %v1749_v56 = vmul.f32 %v1717_v40, %v1493_v4 }
 0x2d4   : > { %1780 = vst [vmem:[%s2901_s28 + $0xb0] sm:$0xff] %v1748_v15  ;;  %v1725_v11 = vadd.f32 1.0, %v2355_v57 }
 0x2d5   : > { %v1756_v27 = vmul.f32 %v1724_v61, %v1500_v23  ;;  %1781 = vst [vmem:[%s2901_s28 + $0xb8] sm:$0xff] %v1749_v56 }
 0x2d6   : > { %v1757_v45 = vmul.f32 %v1725_v11, %v1501_v12 }
 0x2d7   : > { %1788 = vst [vmem:[%s2901_s28 + $0xf0] sm:$0xff] %v1756_v27 }
 0x2d8   : > { %1789 = vst [vmem:[%s2901_s28 + $0xf8] sm:$0xff] %v1757_v45 }
 0x2d9 PF: > { %s14_s15 = sadd.s32 1, %s2364_s15  }
 0x2da   : > { %p11_p4 = scmp.ge.s32.totalorder %s14_s15, 5  }
 0x2dc   :  { %13 = sbr.rel (!%p11_p4) target bundleno = 1 (0x1), region = 66 }

// kernel: wavlm_extract_features.12
= control target key start
LH: loop header
LB: loop body
LE: loop exit
PB: predicated region body
PF: predicated region fallthrough
CT: control target
= control target key end

     0   :  { %s2391_s15 = smov 0   ;;  %s3130_s0 = inlined_call_operand.vmem [shape: bf16[512,384], index: 0, kind: input, shape index: {}]   ;;  %s3131_s1 = inlined_call_operand.vmem [shape: bf16[384,128], index: 1, kind: input, shape index: {}]   ;;  %s3132_s2 = inlined_call_operand.vmem [shape: f32[1,128], index: 2, kind: input, shape index: {}]   ;;  %s3133_s3 = inlined_call_operand.vmem [shape: f32[1,128], index: 3, kind: input, shape index: {}]   ;;  %s3134_s4 = inlined_call_operand.vmem [shape: f32[512,128], index: 4, kind: output, shape index: {}]  }
   0x1 LB: > { %s1846_s16 = sadd.s32 4294967295, %s2364_s15   ;;  %p1850_p0 = scmp.ge.s32.totalorder %s2364_s15, 1  ;;  %s2364_s15 = sphi %s2391_s15, %s14_s15  }
   0x2   : > { %p164_p1 = scmp.lt.s32.totalorder %s2364_s15, 3 }
   0x4   : > { %p165_p2 = pnand %p1850_p0, %p164_p1 }
   0x5   : > { %v2140_v0 = vld [vmem:[%s3131_s1 + $0x40] sm:$0xff] (!%p165_p2)   ;;  %s1851_s19 = sshll.u32 (!%p165_p2), %s1846_s16, 5  ;;  %v2142_v2 = vld [vmem:[%s3131_s1 + $0x48] sm:$0xff] (!%p165_p2)   ;;  %v2144_v4 = vld [vmem:[%s3131_s1 + $0x50] sm:$0xff] (!%p165_p2)  }
   0x6   : > { %168 = sbr.rel (%p165_p2) target bundleno = 729 (0x2d9), region = 36  ;;  %v2141_v1 = vld [vmem:[%s3131_s1] sm:$0xff] (!%p165_p2)   ;;  %1931 = vmatprep.subr.bf16.mxu0 (!%p165_p2), %v2140_v0  ;;  %2115 = vmatprep.subr.bf16.mxu1 (!%p165_p2), %v2140_v0  ;;  %p192_p3 = scmp.lt.s32.totalorder (!%p165_p2), %s1851_s19, 63  ;;  %v2143_v3 = vld [vmem:[%s3131_s1 + $0x8] sm:$0xff] (!%p165_p2)   ;;  %v2145_v5 = vld [vmem:[%s3131_s1 + $0x10] sm:$0xff] (!%p165_p2)  }
   0x7   : > { %1932 = vmatpush3.bf16.msra.mxu0 (!%p165_p2), %v2141_v1  ;;  %2123 = vmatpush3.bf16.msra.mxu1 (!%p165_p2), %v2141_v1  ;;  %v2146_v6 = vld [vmem:[%s3131_s1 + $0x58] sm:$0xff] (!%p165_p2)   ;;  %v2148_v8 = vld [vmem:[%s3131_s1 + $0x60] sm:$0xff] (!%p165_p2)   ;;  %v2150_v10 = vld [vmem:[%s3131_s1 + $0x68] sm:$0xff] (!%p165_p2)  }
   0x8   : > { %1933 = vmatprep.subr.bf16.mxu0 (!%p165_p2), %v2142_v2  ;;  %2116 = vmatprep.subr.bf16.mxu1 (!%p165_p2), %v2142_v2  ;;  %v2147_v7 = vld [vmem:[%s3131_s1 + $0x18] sm:$0xff] (!%p165_p2)   ;;  %v2149_v9 = vld [vmem:[%s3131_s1 + $0x20] sm:$0xff] (!%p165_p2)   ;;  %v2151_v13 = vld [vmem:[%s3131_s1 + $0x28] sm:$0xff] (!%p165_p2)  }
   0x9   : > { %v2152_v14 = vld [vmem:[%s3131_s1 + $0x70] sm:$0xff] (!%p165_p2)   ;;  %v2154_v16 = vld [vmem:[%s3131_s1 + $0x78] sm:$0xff] (!%p165_p2)   ;;  %v2162_v18 = vld [vmem:[%s3131_s1 + $0x80] sm:$0xff] (!%p165_p2)  }
   0xa   : > { %v2153_v15 = vld [vmem:[%s3131_s1 + $0x30] sm:$0xff] (!%p165_p2)   ;;  %v2155_v17 = vld [vmem:[%s3131_s1 + $0x38] sm:$0xff] (!%p165_p2)   ;;  %v2163_v22 = vld [vmem:[%s3131_s1 + $0x88] sm:$0xff] (!%p165_p2)  }
   0xb   : > { %1934 = vmatpush3.bf16.msra.mxu0 (!%p165_p2), %v2143_v3  ;;  %2124 = vmatpush3.bf16.msra.mxu1 (!%p165_p2), %v2143_v3  ;;  %v2170_v25 = vld [vmem:[%s3131_s1 + $0x90] sm:$0xff] (!%p165_p2)   ;;  %v2171_v27 = vld [vmem:[%s3131_s1 + $0x98] sm:$0xff] (!%p165_p2)   ;;  %v2178_v30 = vld [vmem:[%s3131_s1 + $0xa0] sm:$0xff] (!%p165_p2)  }
   0xc   : > { %1935 = vmatprep.subr.bf16.mxu0 (!%p165_p2), %v2144_v4  ;;  %2117 = vmatprep.subr.bf16.mxu1 (!%p165_p2), %v2144_v4  ;;  %v2179_v33 = vld [vmem:[%s3131_s1 + $0xa8] sm:$0xff] (!%p165_p2)   ;;  %v2186_v36 = vld [vmem:[%s3131_s1 + $0xb0] sm:$0xff] (!%p165_p2)   ;;  %v2187_v40 = vld [vmem:[%s3131_s1 + $0xb8] sm:$0xff] (!%p165_p2)  }
   0xd   : > { %s3136_s19 = smov (!%p192_p3, %s1851_s19), 63 }
   0xe   : > { %s2131_s6 = smul.u32 12, %s3136_s19  ;;  %s1854_s26 = sshll.u32 %s3136_s19, 3 }
   0xf   : > { %1936 = vmatpush3.bf16.msra.mxu0 %v2145_v5  ;;  %2125 = vmatpush3.bf16.msra.mxu1 %v2145_v5  ;;  %s2901_s28 = scalar_lea.vmem %s3134_s4, %s1854_s26 }
  0x10   : > { %1937 = vmatprep.subr.bf16.mxu0 %v2146_v6  ;;  %2118 = vmatprep.subr.bf16.mxu1 %v2146_v6  ;;  %s2432_s13 = scalar_lea.vmem %s3130_s0, %s2131_s6 }
  0x11   : > { %v2158_v11 = vld [vmem:[%s2432_s13 + $0x4] ss:$12 sps:$4 sm:$0xff]   ;;  %v2156_v19 = vld [vmem:[%s2432_s13] ss:$12 sps:$4 sm:$0xff]   ;;  %v2164_v21 = vld [vmem:[%s2432_s13 + $0x1c] ss:$12 sps:$4 sm:$0xff]  }
  0x12   : > { %v2161_v12 = vld [vmem:[%s2432_s13 + $0x124] ss:$12 sps:$4 sm:$0xff]   ;;  %749 = vmatprep.mubr.bf16.mxu0 %v2158_v11  ;;  %v2159_v20 = vld [vmem:[%s2432_s13 + $0x120] ss:$12 sps:$4 sm:$0xff]   ;;  %v2166_v23 = vld [vmem:[%s2432_s13 + $0x13c] ss:$12 sps:$4 sm:$0xff]  }
  0x13   : > { %1938 = vmatpush3.bf16.msra.mxu0 %v2147_v7  ;;  %2126 = vmatpush3.bf16.msra.mxu1 %v2147_v7  ;;  %v2168_v24 = vld [vmem:[%s2432_s13 + $0x18] ss:$12 sps:$4 sm:$0xff]   ;;  %v2172_v28 = vld [vmem:[%s2432_s13 + $0x34] ss:$12 sps:$4 sm:$0xff]   ;;  %v2176_v31 = vld [vmem:[%s2432_s13 + $0x30] ss:$12 sps:$4 sm:$0xff]  }
  0x14   : > { %1939 = vmatprep.subr.bf16.mxu0 %v2148_v8  ;;  %2119 = vmatprep.subr.bf16.mxu1 %v2148_v8  ;;  %v2169_v26 = vld [vmem:[%s2432_s13 + $0x138] ss:$12 sps:$4 sm:$0xff]   ;;  %v2174_v29 = vld [vmem:[%s2432_s13 + $0x154] ss:$12 sps:$4 sm:$0xff]   ;;  %v2177_v32 = vld [vmem:[%s2432_s13 + $0x150] ss:$12 sps:$4 sm:$0xff]  }
  0x15   : > { %845 = vmatprep.mubr.bf16.mxu1 %v2161_v12  ;;  %v2180_v34 = vld [vmem:[%s2432_s13 + $0x4c] ss:$12 sps:$4 sm:$0xff]   ;;  %v2184_v37 = vld [vmem:[%s2432_s13 + $0x48] ss:$12 sps:$4 sm:$0xff]   ;;  %v2188_v39 = vld [vmem:[%s2432_s13 + $0x64] ss:$12 sps:$4 sm:$0xff]  }
  0x16   : > { %v2182_v35 = vld [vmem:[%s2432_s13 + $0x16c] ss:$12 sps:$4 sm:$0xff]   ;;  %v2185_v38 = vld [vmem:[%s2432_s13 + $0x168] ss:$12 sps:$4 sm:$0xff]   ;;  %v2197_v47 = vld [vmem:[%s2432_s13 + $0x50] ss:$12 sps:$4 sm:$0xff]  }
  0x17   : > { %1940 = vmatpush3.bf16.msra.mxu0 %v2149_v9  ;;  %2127 = vmatpush3.bf16.msra.mxu1 %v2149_v9  ;;  %v2190_v41 = vld [vmem:[%s2432_s13 + $0x8] ss:$12 sps:$4 sm:$0xff]   ;;  %v2191_v42 = vld [vmem:[%s2432_s13 + $0x60] ss:$12 sps:$4 sm:$0xff]   ;;  %v2195_v45 = vld [vmem:[%s2432_s13 + $0x38] ss:$12 sps:$4 sm:$0xff]  }
  0x18   : > { %1941 = vmatprep.subr.bf16.mxu0 %v2150_v10  ;;  %2120 = vmatprep.subr.bf16.mxu1 %v2150_v10  ;;  %v2192_v43 = vld [vmem:[%s2432_s13 + $0x20] ss:$12 sps:$4 sm:$0xff]   ;;  %v2193_v44 = vld [vmem:[%s2432_s13 + $0x7c] ss:$12 sps:$4 sm:$0xff]   ;;  %v2196_v46 = vld [vmem:[%s2432_s13 + $0x78] ss:$12 sps:$4 sm:$0xff]  }
  0x19   : > { %v2198_v48 = vld [vmem:[%s2432_s13 + $0x94] ss:$12 sps:$4 sm:$0xff]   ;;  %v2201_v50 = vld [vmem:[%s2432_s13 + $0x90] ss:$12 sps:$4 sm:$0xff]   ;;  %v2203_v52 = vld [vmem:[%s2432_s13 + $0xac] ss:$12 sps:$4 sm:$0xff]  }
  0x1a   : > { %v2200_v49 = vld [vmem:[%s2432_s13 + $0x68] ss:$12 sps:$4 sm:$0xff]   ;;  %v2202_v51 = vld [vmem:[%s2432_s13 + $0x80] ss:$12 sps:$4 sm:$0xff]   ;;  %v2205_v53 = vld [vmem:[%s2432_s13 + $0x98] ss:$12 sps:$4 sm:$0xff]  }
  0x1b   : > { %1942 = vmatpush3.bf16.msra.mxu0 %v2151_v13  ;;  %2128 = vmatpush3.bf16.msra.mxu1 %v2151_v13  ;;  %v2206_v54 = vld [vmem:[%s2432_s13 + $0xa8] ss:$12 sps:$4 sm:$0xff]   ;;  %v2207_v55 = vld [vmem:[%s2432_s13 + $0xb0] ss:$12 sps:$4 sm:$0xff]   ;;  %v2211_v58 = vld [vmem:[%s2432_s13 + $0xc0] ss:$12 sps:$4 sm:$0xff]  }
  0x1c   : > { %1943 = vmatprep.subr.bf16.mxu0 %v2152_v14  ;;  %2121 = vmatprep.subr.bf16.mxu1 %v2152_v14  ;;  %v2208_v56 = vld [vmem:[%s2432_s13 + $0xc4] ss:$12 sps:$4 sm:$0xff]   ;;  %v2210_v57 = vld [vmem:[%s2432_s13 + $0xc8] ss:$12 sps:$4 sm:$0xff]   ;;  %v2212_v59 = vld [vmem:[%s2432_s13 + $0xe0] ss:$12 sps:$4 sm:$0xff]  }
  0x1d   : > { %v2213_v60 = vld [vmem:[%s2432_s13 + $0xdc] ss:$12 sps:$4 sm:$0xff]   ;;  %v2215_v61 = vld [vmem:[%s2432_s13 + $0xf8] ss:$12 sps:$4 sm:$0xff]   ;;  %v2218_v0 = vld [vmem:[%s2432_s13 + $0xf4] ss:$12 sps:$4 sm:$0xff]  }
  0x1e   : > { %v2216_v62 = vld [vmem:[%s2432_s13 + $0xd8] ss:$12 sps:$4 sm:$0xff]   ;;  %v2217_v63 = vld [vmem:[%s2432_s13 + $0x110] ss:$12 sps:$4 sm:$0xff]   ;;  %v2220_v1 = vld [vmem:[%s2432_s13 + $0x128] ss:$12 sps:$4 sm:$0xff]  }
  0x1f   : > { %1944 = vmatpush3.bf16.msra.mxu0 %v2153_v15  ;;  %2129 = vmatpush3.bf16.msra.mxu1 %v2153_v15  ;;  %v2221_v2 = vld [vmem:[%s2432_s13 + $0xf0] ss:$12 sps:$4 sm:$0xff]   ;;  %v2222_v3 = vld [vmem:[%s2432_s13 + $0x140] ss:$12 sps:$4 sm:$0xff]   ;;  %v2225_v5 = vld [vmem:[%s2432_s13 + $0x158] ss:$12 sps:$4 sm:$0xff]  }
  0x20   : > { %1945 = vmatprep.subr.bf16.mxu0 %v2154_v16  ;;  %2122 = vmatprep.subr.bf16.mxu1 %v2154_v16  ;;  %v2223_v4 = vld [vmem:[%s2432_s13 + $0x10c] ss:$12 sps:$4 sm:$0xff]   ;;  %v2226_v6 = vld [vmem:[%s2432_s13 + $0x108] ss:$12 sps:$4 sm:$0xff]   ;;  %v2227_v7 = vld [vmem:[%s2432_s13 + $0x170] ss:$12 sps:$4 sm:$0xff]  }
  0x23   : > { %1946 = vmatpush3.bf16.msra.mxu0 %v2155_v17  ;;  %2130 = vmatpush3.bf16.msra.mxu1 %v2155_v17 }
  0x24   : > { %2067 = vmatprep.subr.bf16.mxu1 %v2162_v18 }
  0x26   : > { %750 = vmatmul.mubr.bf16.vlgmr.msra.gmra.mrb[0].mxu0 %v2156_v19  ;;  %846 = vmatmul.mubr.bf16.vlgmr.msra.gmra.mrb[0].mxu1 %v2159_v20 }
  0x27   : > { %2068 = vmatpush3.bf16.msra.mxu1 %v2162_v18  ;;  %757 = vmatprep.mubr.bf16.mxu0 %v2164_v21 }
  0x28   : > { %2069 = vmatprep.subr.bf16.mxu1 %v2163_v22  ;;  %853 = vmatprep.mubr.bf16.mxu1 %v2166_v23 }
  0x2b   : > { %2070 = vmatpush3.bf16.msra.mxu1 %v2163_v22 }
  0x2c   : > { %2071 = vmatprep.subr.bf16.mxu1 %v2170_v25 }
  0x2e   : > { %758 = vmatmul.mubr.bf16.gmra.mrb[4].mxu0 %v2168_v24  ;;  %854 = vmatmul.mubr.bf16.gmra.mrb[4].mxu1 %v2169_v26 }
  0x2f   : > { %2072 = vmatpush3.bf16.msra.mxu1 %v2170_v25  ;;  %765 = vmatprep.mubr.bf16.mxu0 %v2172_v28 }
  0x30   : > { %2073 = vmatprep.subr.bf16.mxu1 %v2171_v27  ;;  %861 = vmatprep.mubr.bf16.mxu1 %v2174_v29 }
  0x33   : > { %2074 = vmatpush3.bf16.msra.mxu1 %v2171_v27 }
  0x34   : > { %2075 = vmatprep.subr.bf16.mxu1 %v2178_v30 }
  0x36   : > { %766 = vmatmul.mubr.bf16.gmra.mrb[8].mxu0 %v2176_v31  ;;  %862 = vmatmul.mubr.bf16.gmra.mrb[8].mxu1 %v2177_v32 }
  0x37   : > { %2076 = vmatpush3.bf16.msra.mxu1 %v2178_v30  ;;  %773 = vmatprep.mubr.bf16.mxu0 %v2180_v34 }
  0x38   : > { %2077 = vmatprep.subr.bf16.mxu1 %v2179_v33  ;;  %869 = vmatprep.mubr.bf16.mxu1 %v2182_v35 }
  0x3b   : > { %2078 = vmatpush3.bf16.msra.mxu1 %v2179_v33 }
  0x3c   : > { %2079 = vmatprep.subr.bf16.mxu1 %v2186_v36 }
  0x3e   : > { %774 = vmatmul.mubr.bf16.gmra.mrb[12].mxu0 %v2184_v37  ;;  %870 = vmatmul.mubr.bf16.gmra.mrb[12].mxu1 %v2185_v38 }
  0x3f   : > { %2080 = vmatpush3.bf16.msra.mxu1 %v2186_v36  ;;  %781 = vmatprep.mubr.bf16.mxu0 %v2188_v39 }
  0x40   : > { %2081 = vmatprep.subr.bf16.mxu1 %v2187_v40  ;;  %2083 = vmatprep.mubr.bf16.mxu1 %v2190_v41 }
  0x43   : > { %2082 = vmatpush3.bf16.msra.mxu1 %v2187_v40 }
  0x46   : > { %782 = vmatmul.mubr.bf16.gmra.mrb[16].mxu0 %v2191_v42  ;;  %2084 = vmatmul.mubr.bf16.vlgmr.msra.gmra.mrb[16].mxu1 %v2192_v43 }
  0x47   : > { %789 = vmatprep.mubr.bf16.mxu0 %v2193_v44  ;;  %2087 = vmatprep.mubr.bf16.mxu1 %v2195_v45 }
  0x4e   : > { %790 = vmatmul.mubr.bf16.gmra.mrb[20].mxu0 %v2196_v46  ;;  %2088 = vmatmul.mubr.bf16.gmra.mrb[20].mxu1 %v2197_v47 }
  0x4f   : > { %797 = vmatprep.mubr.bf16.mxu0 %v2198_v48  ;;  %2091 = vmatprep.mubr.bf16.mxu1 %v2200_v49 }
  0x56   : > { %798 = vmatmul.mubr.bf16.gmra.mrb[24].mxu0 %v2201_v50  ;;  %2092 = vmatmul.mubr.bf16.gmra.mrb[24].mxu1 %v2202_v51 }
  0x57   : > { %805 = vmatprep.mubr.bf16.mxu0 %v2203_v52  ;;  %2095 = vmatprep.mubr.bf16.mxu1 %v2205_v53 }
  0x5e   : > { %806 = vmatmul.mubr.bf16.gmra.mrb[28].mxu0 %v2206_v54  ;;  %2096 = vmatmul.mubr.bf16.gmra.mrb[28].mxu1 %v2207_v55 }
  0x5f   : > { %813 = vmatprep.mubr.bf16.mxu0 %v2208_v56  ;;  %2099 = vmatprep.mubr.bf16.mxu1 %v2210_v57 }
  0x66   : > { %814 = vmatmul.mubr.bf16.gmra.mrb[32].mxu0 %v2211_v58  ;;  %2100 = vmatmul.mubr.bf16.gmra.mrb[32].mxu1 %v2212_v59 }
  0x67   : > { %821 = vmatprep.mubr.bf16.mxu0 %v2213_v60  ;;  %2103 = vmatprep.mubr.bf16.mxu1 %v2215_v61 }
  0x6e   : > { %822 = vmatmul.mubr.bf16.gmra.mrb[36].mxu0 %v2216_v62  ;;  %2104 = vmatmul.mubr.bf16.gmra.mrb[36].mxu1 %v2217_v63 }
  0x6f   : > { %829 = vmatprep.mubr.bf16.mxu0 %v2218_v0  ;;  %2107 = vmatprep.mubr.bf16.mxu1 %v2220_v1 }
  0x76   : > { %830 = vmatmul.mubr.bf16.gmra.mrb[40].mxu0 %v2221_v2  ;;  %2108 = vmatmul.mubr.bf16.gmra.mrb[40].mxu1 %v2222_v3 }
  0x77   : > { %837 = vmatprep.mubr.bf16.mxu0 %v2223_v4  ;;  %2111 = vmatprep.mubr.bf16.mxu1 %v2225_v5 }
  0x7e   : > { %838 = vmatmul.mubr.bf16.gmra.mrb[44].mxu0 %v2226_v6  ;;  %2112 = vmatmul.mubr.bf16.gmra.mrb[44].mxu1 %v2227_v7 }
  0xf9   : > { %v1947_v8 = vpop.f32.mrb[0].mxu0  ;;  %v2019_v9 = vpop.f32.mrb[0].mxu1 }
  0xfa   : > { %v1948_v10 = vpop.f32.mrb[1].mxu0  ;;  %v2020_v11 = vpop.f32.mrb[1].mxu1 }
  0xfb   : > { %v1949_v12 = vadd.f32 %v1948_v10, %v1947_v8  ;;  %v2527_v13 = vadd.f32 %v2020_v11, %v2019_v9  ;;  %v1950_v14 = vpop.f32.mrb[2].mxu0  ;;  %v2022_v15 = vpop.f32.mrb[2].mxu1 }
  0xfc   : > { %v1951_v16 = vpop.f32.mrb[3].mxu0  ;;  %v2023_v17 = vpop.f32.mrb[3].mxu1 }
  0xfd   : > { %v1952_v18 = vadd.f32 %v1951_v16, %v1950_v14  ;;  %v2529_v19 = vadd.f32 %v2023_v17, %v2022_v15 }
 0x101   : > { %v1953_v20 = vpop.f32.mrb[4].mxu0  ;;  %v2025_v21 = vpop.f32.mrb[4].mxu1 }
 0x102   : > { %v1954_v22 = vpop.f32.mrb[5].mxu0  ;;  %v2026_v23 = vpop.f32.mrb[5].mxu1 }
 0x103   : > { %v1955_v24 = vadd.f32 %v1954_v22, %v1953_v20  ;;  %v2531_v25 = vadd.f32 %v2026_v23, %v2025_v21  ;;  %v1956_v26 = vpop.f32.mrb[6].mxu0  ;;  %v2028_v27 = vpop.f32.mrb[6].mxu1 }
 0x104   : > { %v1957_v28 = vpop.f32.mrb[7].mxu0  ;;  %v2029_v29 = vpop.f32.mrb[7].mxu1 }
 0x105   : > { %v1958_v30 = vadd.f32 %v1957_v28, %v1956_v26  ;;  %v2533_v31 = vadd.f32 %v2029_v29, %v2028_v27 }
 0x109   : > { %v1959_v32 = vpop.f32.mrb[8].mxu0  ;;  %v2031_v33 = vpop.f32.mrb[8].mxu1 }
 0x10a   : > { %v1960_v34 = vpop.f32.mrb[9].mxu0  ;;  %v2032_v35 = vpop.f32.mrb[9].mxu1 }
 0x10b   : > { %v1961_v36 = vadd.f32 %v1960_v34, %v1959_v32  ;;  %v2535_v37 = vadd.f32 %v2032_v35, %v2031_v33  ;;  %v1962_v38 = vpop.f32.mrb[10].mxu0  ;;  %v2034_v39 = vpop.f32.mrb[10].mxu1 }
 0x10c   : > { %v1963_v40 = vpop.f32.mrb[11].mxu0  ;;  %v2035_v41 = vpop.f32.mrb[11].mxu1 }
 0x10d   : > { %v1964_v42 = vadd.f32 %v1963_v40, %v1962_v38  ;;  %v2537_v43 = vadd.f32 %v2035_v41, %v2034_v39 }
 0x111   : > { %v1965_v44 = vpop.f32.mrb[12].mxu0  ;;  %v2037_v45 = vpop.f32.mrb[12].mxu1 }
 0x112   : > { %v1966_v46 = vpop.f32.mrb[13].mxu0  ;;  %v2038_v47 = vpop.f32.mrb[13].mxu1 }
 0x113   : > { %v1967_v48 = vadd.f32 %v1966_v46, %v1965_v44  ;;  %v2539_v49 = vadd.f32 %v2038_v47, %v2037_v45  ;;  %v1968_v50 = vpop.f32.mrb[14].mxu0  ;;  %v2040_v51 = vpop.f32.mrb[14].mxu1 }
 0x114   : > { %v1969_v52 = vpop.f32.mrb[15].mxu0  ;;  %v2041_v53 = vpop.f32.mrb[15].mxu1 }
 0x115   : > { %v1970_v54 = vadd.f32 %v1969_v52, %v1968_v50  ;;  %v2541_v55 = vadd.f32 %v2041_v53, %v2040_v51 }
 0x119   : > { %v1971_v56 = vpop.f32.mrb[16].mxu0  ;;  %v2085_v57 = vpop.f32.mrb[16].mxu1 }
 0x11a   : > { %v2543_v58 = vadd.f32 %v2085_v57, %v1955_v24  ;;  %v1972_v59 = vpop.f32.mrb[17].mxu0  ;;  %v912_v60 = vpop.f32.mrb[17].mxu1 }
 0x11b   : > { %v1973_v61 = vadd.f32 %v1972_v59, %v1971_v56  ;;  %v2545_v62 = vadd.f32 %v1949_v12, %v912_v60  ;;  %v1974_v63 = vpop.f32.mrb[18].mxu0  ;;  %v2086_v0 = vpop.f32.mrb[18].mxu1 }
 0x11c   : > { %v2547_v1 = vadd.f32 %v2086_v0, %v1958_v30  ;;  %v1975_v2 = vpop.f32.mrb[19].mxu0  ;;  %v915_v3 = vpop.f32.mrb[19].mxu1  ;;  %1045 = vadd.xlane.f32.xlu1 %v2543_v58 }
 0x11d   : > { %v1976_v4 = vadd.f32 %v1975_v2, %v1974_v63  ;;  %v2550_v5 = vadd.f32 %v1952_v18, %v915_v3  ;;  %1041 = vadd.xlane.f32.xlu0 %v2545_v62 }
 0x120   : > { %1047 = vadd.xlane.f32.xlu1 %v2547_v1 }
 0x121   : > { %v1977_v6 = vpop.f32.mrb[20].mxu0  ;;  %v2089_v7 = vpop.f32.mrb[20].mxu1  ;;  %1043 = vadd.xlane.f32.xlu0 %v2550_v5 }
 0x122   : > { %v2555_v8 = vadd.f32 %v2089_v7, %v1967_v48  ;;  %v1978_v9 = vpop.f32.mrb[21].mxu0  ;;  %v928_v10 = vpop.f32.mrb[21].mxu1 }
 0x123   : > { %v1979_v11 = vadd.f32 %v1978_v9, %v1977_v6  ;;  %v2557_v12 = vadd.f32 %v1961_v36, %v928_v10  ;;  %v1980_v14 = vpop.f32.mrb[22].mxu0  ;;  %v2090_v15 = vpop.f32.mrb[22].mxu1 }
 0x124   : > { %v2559_v16 = vadd.f32 %v2090_v15, %v1970_v54  ;;  %v1981_v17 = vpop.f32.mrb[23].mxu0  ;;  %v931_v18 = vpop.f32.mrb[23].mxu1 }
 0x125   : > { %v1982_v20 = vadd.f32 %v1981_v17, %v1980_v14  ;;  %v2561_v21 = vadd.f32 %v1964_v42, %v931_v18  ;;  %1053 = vadd.xlane.f32.xlu0 %v2555_v8 }
 0x126   : > { %1055 = vadd.xlane.f32.xlu1 %v2559_v16 }
 0x129   : > { %v1983_v22 = vpop.f32.mrb[24].mxu0  ;;  %v2093_v23 = vpop.f32.mrb[24].mxu1  ;;  %1049 = vadd.xlane.f32.xlu0 %v2557_v12 }
 0x12a   : > { %v2566_v24 = vadd.f32 %v2093_v23, %v1979_v11  ;;  %v1984_v26 = vpop.f32.mrb[25].mxu0  ;;  %v944_v27 = vpop.f32.mrb[25].mxu1  ;;  %1051 = vadd.xlane.f32.xlu1 %v2561_v21 }
 0x12b   : > { %v1985_v28 = vadd.f32 %v1984_v26, %v1983_v22  ;;  %v2569_v29 = vadd.f32 %v1973_v61, %v944_v27  ;;  %v1986_v30 = vpop.f32.mrb[26].mxu0  ;;  %v2094_v32 = vpop.f32.mrb[26].mxu1 }
 0x12c   : > { %v2571_v33 = vadd.f32 %v2094_v32, %v1982_v20  ;;  %v1987_v34 = vpop.f32.mrb[27].mxu0  ;;  %v947_v35 = vpop.f32.mrb[27].mxu1 }
 0x12d   : > { %v1988_v36 = vadd.f32 %v1987_v34, %v1986_v30  ;;  %v2573_v38 = vadd.f32 %v1976_v4, %v947_v35  ;;  %1061 = vadd.xlane.f32.xlu0 %v2566_v24 }
 0x12e   : > { %1063 = vadd.xlane.f32.xlu1 %v2571_v33 }
 0x131   : > { %v1989_v39 = vpop.f32.mrb[28].mxu0  ;;  %v2097_v40 = vpop.f32.mrb[28].mxu1  ;;  %1057 = vadd.xlane.f32.xlu0 %v2569_v29 }
 0x132   : > { %v1990_v41 = vpop.f32.mrb[29].mxu0  ;;  %v960_v42 = vpop.f32.mrb[29].mxu1  ;;  %1059 = vadd.xlane.f32.xlu1 %v2573_v38 }
 0x133   : > { %v1991_v44 = vadd.f32 %v1990_v41, %v1989_v39  ;;  %v2579_v45 = vadd.f32 %v1985_v28, %v960_v42  ;;  %v1992_v46 = vpop.f32.mrb[30].mxu0  ;;  %v2098_v47 = vpop.f32.mrb[30].mxu1 }
 0x134   : > { %v1993_v48 = vpop.f32.mrb[31].mxu0  ;;  %v963_v50 = vpop.f32.mrb[31].mxu1 }
 0x135   : > { %v1994_v51 = vadd.f32 %v1993_v48, %v1992_v46  ;;  %v2581_v52 = vadd.f32 %v1988_v36, %v963_v50  ;;  %1065 = vadd.xlane.f32.xlu0 %v2579_v45  ;;  %v2584_v53 = vadd.f32 %v2097_v40, %v1991_v44 }
 0x137   : > { %1067 = vadd.xlane.f32.xlu1 %v2581_v52  ;;  %v2587_v54 = vadd.f32 %v2098_v47, %v1994_v51 }
 0x139   : > { %v1995_v56 = vpop.f32.mrb[32].mxu0  ;;  %v2101_v57 = vpop.f32.mrb[32].mxu1  ;;  %1069 = vadd.xlane.f32.xlu0 %v2584_v53 }
 0x13a   : > { %v1996_v59 = vpop.f32.mrb[33].mxu0  ;;  %v976_v60 = vpop.f32.mrb[33].mxu1 }
 0x13b   : > { %v1997_v61 = vadd.f32 %v1996_v59, %v1995_v56  ;;  %v1998_v63 = vpop.f32.mrb[34].mxu0  ;;  %v2102_v0 = vpop.f32.mrb[34].mxu1  ;;  %1071 = vadd.xlane.f32.xlu1 %v2587_v54 }
 0x13c   : > { %v1999_v2 = vpop.f32.mrb[35].mxu0  ;;  %v979_v3 = vpop.f32.mrb[35].mxu1 }
 0x13d   : > { %v2591_v4 = vadd.f32 %v1997_v61, %v976_v60  ;;  %v2000_v6 = vadd.f32 %v1999_v2, %v1998_v63 }
 0x13f   : > { %v2593_v7 = vadd.f32 %v2000_v6, %v979_v3  ;;  %1073 = vadd.xlane.f32.xlu0 %v2591_v4 }
 0x141   : > { %v2001_v9 = vpop.f32.mrb[36].mxu0  ;;  %v2105_v10 = vpop.f32.mrb[36].mxu1  ;;  %1075 = vadd.xlane.f32.xlu1 %v2593_v7 }
 0x142   : > { %v2002_v11 = vpop.f32.mrb[37].mxu0  ;;  %v992_v14 = vpop.f32.mrb[37].mxu1 }
 0x143   : > { %v2003_v15 = vadd.f32 %v2002_v11, %v2001_v9  ;;  %v2004_v17 = vpop.f32.mrb[38].mxu0  ;;  %v2106_v18 = vpop.f32.mrb[38].mxu1 }
 0x144   : > { %v2005_v20 = vpop.f32.mrb[39].mxu0  ;;  %v995_v22 = vpop.f32.mrb[39].mxu1 }
 0x145   : > { %v2006_v23 = vadd.f32 %v2005_v20, %v2004_v17  ;;  %v2597_v26 = vadd.f32 %v2101_v57, %v2003_v15 }
 0x147   : > { %1077 = vadd.xlane.f32.xlu0 %v2597_v26  ;;  %v2600_v27 = vadd.f32 %v2102_v0, %v2006_v23 }
 0x149   : > { %v2007_v28 = vpop.f32.mrb[40].mxu0  ;;  %v2109_v30 = vpop.f32.mrb[40].mxu1  ;;  %1079 = vadd.xlane.f32.xlu1 %v2600_v27 }
 0x14a   : > { %v2604_v32 = vadd.f32 %v2109_v30, %v2531_v25  ;;  %v2008_v34 = vpop.f32.mrb[41].mxu0  ;;  %v1008_v35 = vpop.f32.mrb[41].mxu1 }
 0x14b   : > { %v2009_v36 = vadd.f32 %v2008_v34, %v2007_v28  ;;  %v2607_v39 = vadd.f32 %v2527_v13, %v1008_v35  ;;  %v2010_v40 = vpop.f32.mrb[42].mxu0  ;;  %v2110_v41 = vpop.f32.mrb[42].mxu1 }
 0x14c   : > { %v2610_v42 = vadd.f32 %v2110_v41, %v2533_v31  ;;  %v2011_v44 = vpop.f32.mrb[43].mxu0  ;;  %v1011_v46 = vpop.f32.mrb[43].mxu1  ;;  %1093 = vadd.xlane.f32.xlu0 %v2604_v32 }
 0x14d   : > { %v2012_v47 = vadd.f32 %v2011_v44, %v2010_v40  ;;  %v2614_v48 = vadd.f32 %v2529_v19, %v1011_v46  ;;  %v2616_v25 = vadd.f32 %v2009_v36, %v992_v14 }
 0x14e   : > { %1095 = vadd.xlane.f32.xlu1 %v2610_v42 }
 0x14f   : > { %v2619_v50 = vadd.f32 %v2012_v47, %v995_v22 }
 0x150   : > { %1089 = vadd.xlane.f32.xlu0 %v2607_v39 }
 0x151   : > { %v2013_v13 = vpop.f32.mrb[44].mxu0  ;;  %v2113_v51 = vpop.f32.mrb[44].mxu1 }
 0x152   : > { %v2623_v31 = vadd.f32 %v2113_v51, %v2539_v49  ;;  %v2014_v56 = vpop.f32.mrb[45].mxu0  ;;  %v1024_v57 = vpop.f32.mrb[45].mxu1  ;;  %1091 = vadd.xlane.f32.xlu1 %v2614_v48 }
 0x153   : > { %v2015_v59 = vadd.f32 %v2014_v56, %v2013_v13  ;;  %v2627_v19 = vadd.f32 %v2535_v37, %v1024_v57  ;;  %v2016_v60 = vpop.f32.mrb[46].mxu0  ;;  %v2114_v61 = vpop.f32.mrb[46].mxu1 }
 0x154   : > { %v2630_v63 = vadd.f32 %v2114_v61, %v2541_v55  ;;  %v2017_v0 = vpop.f32.mrb[47].mxu0  ;;  %v1027_v2 = vpop.f32.mrb[47].mxu1  ;;  %1081 = vadd.xlane.f32.xlu0 %v2616_v25 }
 0x155   : > { %v2018_v3 = vadd.f32 %v2017_v0, %v2016_v60  ;;  %v2634_v49 = vadd.f32 %v2537_v43, %v1027_v2  ;;  %v2636_v6 = vadd.f32 %v2105_v10, %v2015_v59 }
 0x156   : > { %1083 = vadd.xlane.f32.xlu1 %v2619_v50 }
 0x157   : > { %v2639_v9 = vadd.f32 %v2106_v18, %v2018_v3 }
 0x158   : > { %1097 = vadd.xlane.f32.xlu0 %v2627_v19 }
 0x15a   : > { %1099 = vadd.xlane.f32.xlu1 %v2634_v49 }
 0x15c   : > { %1085 = vadd.xlane.f32.xlu0 %v2636_v6 }
 0x15e   : > { %1087 = vadd.xlane.f32.xlu1 %v2639_v9 }
 0x160   : > { %1101 = vadd.xlane.f32.xlu0 %v2623_v31 }
 0x162   : > { %1103 = vadd.xlane.f32.xlu1 %v2630_v63 }
 0x1a9   : > { %v1046_v37 = vpop.xlane.xlu1 %1045 }
 0x1aa   : > { %v1108_v43 = vmul.f32 0.0078125, %v1046_v37  ;;  %v1042_v55 = vpop.xlane.xlu0 %1041 }
 0x1ab   : > { %v1106_v10 = vmul.f32 0.0078125, %v1042_v55 }
 0x1ac   : > { %v2648_v11 = vsub.f32 %v2543_v58, %v1108_v43 }
 0x1ad   : > { %v1048_v14 = vpop.xlane.xlu1 %1047  ;;  %v2651_v15 = vsub.f32 %v2545_v62, %v1106_v10 }
 0x1ae   : > { %v1109_v17 = vmul.f32 0.0078125, %v1048_v14  ;;  %v1044_v18 = vpop.xlane.xlu0 %1043  ;;  %v1172_v20 = vmul.f32 %v2648_v11, %v2648_v11 }
 0x1af   : > { %v1107_v22 = vmul.f32 0.0078125, %v1044_v18  ;;  %v1170_v62 = vmul.f32 %v2651_v15, %v2651_v15 }
 0x1b0   : > { %v2656_v23 = vsub.f32 %v2547_v1, %v1109_v17  ;;  %1206 = vadd.xlane.f32.xlu0 %v1172_v20 }
 0x1b1   : > { %v2659_v28 = vsub.f32 %v2550_v5, %v1107_v22 }
 0x1b2   : > { %v1054_v30 = vpop.xlane.xlu0 %1053  ;;  %v1173_v58 = vmul.f32 %v2656_v23, %v2656_v23 }
 0x1b3   : > { %v1112_v34 = vmul.f32 0.0078125, %v1054_v30  ;;  %v1056_v35 = vpop.xlane.xlu1 %1055  ;;  %v1171_v41 = vmul.f32 %v2659_v28, %v2659_v28 }
 0x1b4   : > { %v1113_v36 = vmul.f32 0.0078125, %v1056_v35  ;;  %1208 = vadd.xlane.f32.xlu1 %v1173_v58  ;;  %1202 = vadd.xlane.f32.xlu0 %v1170_v62 }
 0x1b5   : > { %v2666_v40 = vsub.f32 %v2555_v8, %v1112_v34 }
 0x1b6   : > { %v2669_v1 = vsub.f32 %v2559_v16, %v1113_v36  ;;  %v1050_v5 = vpop.xlane.xlu0 %1049 }
 0x1b7   : > { %v1110_v44 = vmul.f32 0.0078125, %v1050_v5  ;;  %v1052_v46 = vpop.xlane.xlu1 %1051  ;;  %v1176_v47 = vmul.f32 %v2666_v40, %v2666_v40 }
 0x1b8   : > { %v1111_v13 = vmul.f32 0.0078125, %v1052_v46  ;;  %1204 = vadd.xlane.f32.xlu1 %v1171_v41  ;;  %v1177_v56 = vmul.f32 %v2669_v1, %v2669_v1 }
 0x1b9   : > { %v2676_v51 = vsub.f32 %v2557_v12, %v1110_v44  ;;  %1214 = vadd.xlane.f32.xlu0 %v1176_v47 }
 0x1ba   : > { %v2679_v8 = vsub.f32 %v2561_v21, %v1111_v13  ;;  %v1062_v16 = vpop.xlane.xlu0 %1061 }
 0x1bb   : > { %v1116_v57 = vmul.f32 0.0078125, %v1062_v16  ;;  %v1064_v59 = vpop.xlane.xlu1 %1063  ;;  %v1174_v60 = vmul.f32 %v2676_v51, %v2676_v51 }
 0x1bc   : > { %v1117_v61 = vmul.f32 0.0078125, %v1064_v59  ;;  %1216 = vadd.xlane.f32.xlu1 %v1177_v56  ;;  %v1175_v2 = vmul.f32 %v2679_v8, %v2679_v8 }
 0x1bd   : > { %v2686_v0 = vsub.f32 %v2566_v24, %v1116_v57  ;;  %1210 = vadd.xlane.f32.xlu0 %v1174_v60 }
 0x1be   : > { %v2689_v12 = vsub.f32 %v2571_v33, %v1117_v61  ;;  %v1058_v21 = vpop.xlane.xlu0 %1057 }
 0x1bf   : > { %v1114_v3 = vmul.f32 0.0078125, %v1058_v21  ;;  %v1060_v37 = vpop.xlane.xlu1 %1059  ;;  %v1180_v43 = vmul.f32 %v2686_v0, %v2686_v0 }
 0x1c0   : > { %v1115_v55 = vmul.f32 0.0078125, %v1060_v37  ;;  %1212 = vadd.xlane.f32.xlu1 %v1175_v2  ;;  %v1181_v14 = vmul.f32 %v2689_v12, %v2689_v12 }
 0x1c1   : > { %v2696_v10 = vsub.f32 %v2569_v29, %v1114_v3  ;;  %1222 = vadd.xlane.f32.xlu0 %v1180_v43 }
 0x1c2   : > { %v2699_v24 = vsub.f32 %v2573_v38, %v1115_v55  ;;  %v1066_v33 = vpop.xlane.xlu0 %1065 }
 0x1c3   : > { %v1118_v17 = vmul.f32 0.0078125, %v1066_v33  ;;  %v1178_v18 = vmul.f32 %v2696_v10, %v2696_v10 }
 0x1c4   : > { %v1068_v20 = vpop.xlane.xlu1 %1067  ;;  %1224 = vadd.xlane.f32.xlu1 %v1181_v14  ;;  %v1179_v38 = vmul.f32 %v2699_v24, %v2699_v24 }
 0x1c5   : > { %v2706_v22 = vsub.f32 %v2579_v45, %v1118_v17  ;;  %v1119_v30 = vmul.f32 0.0078125, %v1068_v20  ;;  %1218 = vadd.xlane.f32.xlu0 %v1178_v18 }
 0x1c6   : > { %v1070_v29 = vpop.xlane.xlu0 %1069 }
 0x1c7   : > { %v2711_v58 = vsub.f32 %v2581_v52, %v1119_v30  ;;  %v1120_v62 = vmul.f32 0.0078125, %v1070_v29  ;;  %v1182_v34 = vmul.f32 %v2706_v22, %v2706_v22 }
 0x1c8   : > { %v1072_v35 = vpop.xlane.xlu1 %1071  ;;  %1220 = vadd.xlane.f32.xlu1 %v1179_v38 }
 0x1c9   : > { %v2716_v36 = vsub.f32 %v2584_v53, %v1120_v62  ;;  %v1121_v45 = vmul.f32 0.0078125, %v1072_v35  ;;  %1226 = vadd.xlane.f32.xlu0 %v1182_v34  ;;  %v1183_v5 = vmul.f32 %v2711_v58, %v2711_v58 }
 0x1cb   : > { %v2721_v41 = vsub.f32 %v2587_v54, %v1121_v45  ;;  %v1184_v52 = vmul.f32 %v2716_v36, %v2716_v36 }
 0x1cc   : > { %1228 = vadd.xlane.f32.xlu1 %v1183_v5  ;;  %v1074_v44 = vpop.xlane.xlu0 %1073 }
 0x1cd   : > { %v1122_v46 = vmul.f32 0.0078125, %v1074_v44  ;;  %1230 = vadd.xlane.f32.xlu0 %v1184_v52  ;;  %v1185_v47 = vmul.f32 %v2721_v41, %v2721_v41 }
 0x1ce   : > { %v1076_v53 = vpop.xlane.xlu1 %1075 }
 0x1cf   : > { %v2728_v13 = vsub.f32 %v2591_v4, %v1122_v46  ;;  %v1123_v16 = vmul.f32 0.0078125, %v1076_v53 }
 0x1d0   : > { %1232 = vadd.xlane.f32.xlu1 %v1185_v47 }
 0x1d1   : > { %v2731_v56 = vsub.f32 %v2593_v7, %v1123_v16  ;;  %v1186_v54 = vmul.f32 %v2728_v13, %v2728_v13 }
 0x1d3   : > { %1234 = vadd.xlane.f32.xlu0 %v1186_v54  ;;  %v1187_v57 = vmul.f32 %v2731_v56, %v2731_v56 }
 0x1d4   : > { %v1078_v59 = vpop.xlane.xlu0 %1077 }
 0x1d5   : > { %v1124_v60 = vmul.f32 0.0078125, %v1078_v59  ;;  %1236 = vadd.xlane.f32.xlu1 %v1187_v57 }
 0x1d6   : > { %v1080_v61 = vpop.xlane.xlu1 %1079 }
 0x1d7   : > { %v2738_v21 = vsub.f32 %v2597_v26, %v1124_v60  ;;  %v1125_v4 = vmul.f32 0.0078125, %v1080_v61 }
 0x1d9   : > { %v2741_v2 = vsub.f32 %v2600_v27, %v1125_v4  ;;  %v1094_v7 = vpop.xlane.xlu0 %1093  ;;  %v1188_v3 = vmul.f32 %v2738_v21, %v2738_v21 }
 0x1da   : > { %v1132_v37 = vmul.f32 0.0078125, %v1094_v7 }
 0x1db   : > { %v1096_v43 = vpop.xlane.xlu1 %1095  ;;  %1238 = vadd.xlane.f32.xlu0 %v1188_v3  ;;  %v1189_v55 = vmul.f32 %v2741_v2, %v2741_v2 }
 0x1dc   : > { %v2748_v33 = vsub.f32 %v2604_v32, %v1132_v37  ;;  %v1133_v14 = vmul.f32 0.0078125, %v1096_v43 }
 0x1dd   : > { %1240 = vadd.xlane.f32.xlu1 %v1189_v55  ;;  %v1090_v26 = vpop.xlane.xlu0 %1089 }
 0x1de   : > { %v2751_v17 = vsub.f32 %v2610_v42, %v1133_v14  ;;  %v1130_v27 = vmul.f32 0.0078125, %v1090_v26  ;;  %v1196_v18 = vmul.f32 %v2748_v33, %v2748_v33 }
 0x1df   : > { %v1092_v20 = vpop.xlane.xlu1 %1091 }
 0x1e0   : > { %v2756_v30 = vsub.f32 %v2607_v39, %v1130_v27  ;;  %v1131_v29 = vmul.f32 0.0078125, %v1092_v20  ;;  %1254 = vadd.xlane.f32.xlu0 %v1196_v18  ;;  %v1197_v32 = vmul.f32 %v2751_v17, %v2751_v17 }
 0x1e1   : > { %v1082_v38 = vpop.xlane.xlu0 %1081 }
 0x1e2   : > { %v2761_v62 = vsub.f32 %v2614_v48, %v1131_v29  ;;  %v1126_v34 = vmul.f32 0.0078125, %v1082_v38  ;;  %1256 = vadd.xlane.f32.xlu1 %v1197_v32  ;;  %v1194_v42 = vmul.f32 %v2756_v30, %v2756_v30 }
 0x1e3   : > { %v1084_v35 = vpop.xlane.xlu1 %1083 }
 0x1e4   : > { %v2766_v45 = vsub.f32 %v2616_v25, %v1126_v34  ;;  %v1127_v39 = vmul.f32 0.0078125, %v1084_v35  ;;  %1250 = vadd.xlane.f32.xlu0 %v1194_v42  ;;  %v1195_v5 = vmul.f32 %v2761_v62, %v2761_v62 }
 0x1e5   : > { %v1098_v52 = vpop.xlane.xlu0 %1097 }
 0x1e6   : > { %v2771_v44 = vsub.f32 %v2619_v50, %v1127_v39  ;;  %v1134_v48 = vmul.f32 0.0078125, %v1098_v52  ;;  %1252 = vadd.xlane.f32.xlu1 %v1195_v5  ;;  %v1190_v46 = vmul.f32 %v2766_v45, %v2766_v45 }
 0x1e7   : > { %v1100_v47 = vpop.xlane.xlu1 %1099 }
 0x1e8   : > { %v2776_v53 = vsub.f32 %v2627_v19, %v1134_v48  ;;  %v1135_v25 = vmul.f32 0.0078125, %v1100_v47  ;;  %1242 = vadd.xlane.f32.xlu0 %v1190_v46  ;;  %v1191_v16 = vmul.f32 %v2771_v44, %v2771_v44 }
 0x1e9   : > { %v1086_v54 = vpop.xlane.xlu0 %1085 }
 0x1ea   : > { %v2781_v57 = vsub.f32 %v2634_v49, %v1135_v25  ;;  %v1128_v50 = vmul.f32 0.0078125, %v1086_v54  ;;  %1244 = vadd.xlane.f32.xlu1 %v1191_v16  ;;  %v1198_v59 = vmul.f32 %v2776_v53, %v2776_v53 }
 0x1eb   : > { %v1088_v60 = vpop.xlane.xlu1 %1087 }
 0x1ec   : > { %v2786_v61 = vsub.f32 %v2636_v6, %v1128_v50  ;;  %v1129_v19 = vmul.f32 0.0078125, %v1088_v60  ;;  %1258 = vadd.xlane.f32.xlu0 %v1198_v59  ;;  %v1199_v4 = vmul.f32 %v2781_v57, %v2781_v57  ;;  %v2810_v59 = vld [vmem:[%s3132_s2] ss:$0 sm:$0xff] }
 0x1ed   : > { %v1102_v7 = vpop.xlane.xlu0 %1101 }
 0x1ee   : > { %v2791_v3 = vsub.f32 %v2639_v9, %v1129_v19  ;;  %v1136_v49 = vmul.f32 0.0078125, %v1102_v7  ;;  %1260 = vadd.xlane.f32.xlu1 %v1199_v4  ;;  %v1192_v37 = vmul.f32 %v2786_v61, %v2786_v61 }
 0x1ef   : > { %v1104_v43 = vpop.xlane.xlu1 %1103 }
 0x1f0   : > { %v2796_v55 = vsub.f32 %v2623_v31, %v1136_v49  ;;  %v1137_v6 = vmul.f32 0.0078125, %v1104_v43  ;;  %1246 = vadd.xlane.f32.xlu0 %v1192_v37  ;;  %v1193_v14 = vmul.f32 %v2791_v3, %v2791_v3  ;;  %v2816_v49 = vld [vmem:[%s3133_s3] ss:$0 sm:$0xff] }
 0x1f2   : > { %v2801_v26 = vsub.f32 %v2630_v63, %v1137_v6  ;;  %1248 = vadd.xlane.f32.xlu1 %v1193_v14  ;;  %v1200_v9 = vmul.f32 %v2796_v55, %v2796_v55 }
 0x1f4   : > { %1262 = vadd.xlane.f32.xlu0 %v1200_v9  ;;  %v1201_v27 = vmul.f32 %v2801_v26, %v2801_v26 }
 0x1f6   : > { %1264 = vadd.xlane.f32.xlu1 %v1201_v27 }
 0x23d   : > { %v1207_v18 = vpop.xlane.xlu0 %1206 }
 0x23e   : > { %v1268_v31 = vmul.f32 0.0078125, %v1207_v18 }
 0x240   : > { %v1300_v20 = vadd.f32 1e-05, %v1268_v31 }
 0x241   : > { %v1209_v29 = vpop.xlane.xlu1 %1208  ;;  %v1203_v32 = vpop.xlane.xlu0 %1202 }
 0x242   : > { %2228 = vrsqrt.f32 %v1300_v20  ;;  %v1269_v38 = vmul.f32 0.0078125, %v1209_v29  ;;  %v1266_v34 = vmul.f32 0.0078125, %v1203_v32 }
 0x244   : > { %v1301_v42 = vadd.f32 1e-05, %v1269_v38  ;;  %v1298_v63 = vadd.f32 1e-05, %v1266_v34 }
 0x245   : > { %v1205_v35 = vpop.xlane.xlu1 %1204 }
 0x246   : > { %2230 = vrsqrt.f32 %v1301_v42  ;;  %v1267_v39 = vmul.f32 0.0078125, %v1205_v35  ;;  %v1215_v5 = vpop.xlane.xlu0 %1214 }
 0x247   : > { %2232 = vrsqrt.f32 %v1298_v63  ;;  %v1272_v52 = vmul.f32 0.0078125, %v1215_v5 }
 0x248   : > { %v1299_v48 = vadd.f32 1e-05, %v1267_v39 }
 0x249   : > { %v1304_v46 = vadd.f32 1e-05, %v1272_v52  ;;  %v1217_v47 = vpop.xlane.xlu1 %1216 }
 0x24a   : > { %2234 = vrsqrt.f32 %v1299_v48  ;;  %v1273_v25 = vmul.f32 0.0078125, %v1217_v47  ;;  %v1211_v16 = vpop.xlane.xlu0 %1210 }
 0x24b   : > { %2236 = vrsqrt.f32 %v1304_v46  ;;  %v1270_v54 = vmul.f32 0.0078125, %v1211_v16 }
 0x24c   : > { %v2229_v50 = vpop.eup %2228  ;;  %v1305_v60 = vadd.f32 1e-05, %v1273_v25 }
 0x24d   : > { %v1364_v19 = vmul.f32 %v2229_v50, %v2648_v11  ;;  %v1302_v4 = vadd.f32 1e-05, %v1270_v54  ;;  %v1213_v7 = vpop.xlane.xlu1 %1212 }
 0x24e   : > { %2238 = vrsqrt.f32 %v1305_v60  ;;  %v1271_v37 = vmul.f32 0.0078125, %v1213_v7  ;;  %v1223_v43 = vpop.xlane.xlu0 %1222 }
 0x24f   : > { %v1402_v6 = vmul.f32 %v2810_v59, %v1364_v19  ;;  %2240 = vrsqrt.f32 %v1302_v4  ;;  %v1276_v14 = vmul.f32 0.0078125, %v1223_v43 }
 0x250   : > { %v2231_v9 = vpop.eup %2230  ;;  %v1303_v27 = vadd.f32 1e-05, %v1271_v37 }
 0x251   : > { %v2233_v18 = vpop.eup %2232  ;;  %v1440_v31 = vadd.f32 %v2816_v49, %v1402_v6  ;;  %v1365_v11 = vmul.f32 %v2231_v9, %v2656_v23  ;;  %v1308_v20 = vadd.f32 1e-05, %v1276_v14  ;;  %v1225_v29 = vpop.xlane.xlu1 %1224 }
 0x252   : > { %v1362_v32 = vmul.f32 %v2233_v18, %v2651_v15  ;;  %2242 = vrsqrt.f32 %v1303_v27  ;;  %v1277_v38 = vmul.f32 0.0078125, %v1225_v29  ;;  %v1219_v34 = vpop.xlane.xlu0 %1218 }
 0x253   : > { %v1504_v42 = vmul.f32 0.044715, %v1440_v31  ;;  %v1403_v63 = vmul.f32 %v2810_v59, %v1365_v11  ;;  %2244 = vrsqrt.f32 %v1308_v20  ;;  %v1274_v52 = vmul.f32 0.0078125, %v1219_v34 }
 0x254   : > { %v2235_v35 = vpop.eup %2234  ;;  %v1400_v39 = vmul.f32 %v2810_v59, %v1362_v32  ;;  %v1309_v5 = vadd.f32 1e-05, %v1277_v38  ;;  %v2840_v34 = vmul.f32 0.5, %v1440_v31 }
 0x255   : > { %v2237_v48 = vpop.eup %2236  ;;  %v1536_v46 = vmul.f32 %v1504_v42, %v1440_v31  ;;  %v1441_v23 = vadd.f32 %v2816_v49, %v1403_v63  ;;  %v1363_v47 = vmul.f32 %v2235_v35, %v2659_v28  ;;  %v1306_v16 = vadd.f32 1e-05, %v1274_v52  ;;  %v2828_v54 = vpop.xlane.xlu1 %1220 }
 0x256   : > { %v1438_v15 = vadd.f32 %v2816_v49, %v1400_v39  ;;  %v1368_v25 = vmul.f32 %v2237_v48, %v2666_v40  ;;  %2246 = vrsqrt.f32 %v1309_v5  ;;  %v2838_v11 = vpop.xlane.xlu0 %1226 }
 0x257   : > { %v1568_v50 = vmul.f32 %v1536_v46, %v1440_v31  ;;  %v1505_v60 = vmul.f32 0.044715, %v1441_v23  ;;  %v1401_v19 = vmul.f32 %v2810_v59, %v1363_v47  ;;  %2248 = vrsqrt.f32 %v1306_v16 }
 0x258   : > { %v2239_v4 = vpop.eup %2238  ;;  %v1502_v7 = vmul.f32 0.044715, %v1438_v15  ;;  %v1406_v37 = vmul.f32 %v2810_v59, %v1368_v25 }
 0x259   : > { %v2241_v43 = vpop.eup %2240  ;;  %v1600_v6 = vadd.f32 %v1568_v50, %v1440_v31  ;;  %v1537_v28 = vmul.f32 %v1505_v60, %v1441_v23  ;;  %v1439_v14 = vadd.f32 %v2816_v49, %v1401_v19  ;;  %v1369_v40 = vmul.f32 %v2239_v4, %v2669_v1  ;;  %v2844_v1 = vpop.xlane.xlu1 %1228 }
 0x25a   : > { %v1534_v9 = vmul.f32 %v1502_v7, %v1438_v15  ;;  %v2835_v27 = vadd.f32 %v2816_v49, %v1406_v37  ;;  %v1366_v18 = vmul.f32 %v2241_v43, %v2676_v51  ;;  %v2856_v4 = vmul.f32 0.5, %v1441_v23 }
 0x25b   : > { %v1632_v20 = vmul.f32 0.7978846, %v1600_v6  ;;  %v1569_v29 = vmul.f32 %v1537_v28, %v1441_v23  ;;  %v1503_v32 = vmul.f32 0.044715, %v1439_v14  ;;  %v1407_v35 = vmul.f32 %v2810_v59, %v1369_v40  ;;  %v2860_v6 = vpop.xlane.xlu0 %1230 }
 0x25c   : > { %v2243_v38 = vpop.eup %2242  ;;  %v1566_v42 = vmul.f32 %v1534_v9, %v1438_v15  ;;  %v1508_v63 = vmul.f32 0.044715, %v2835_v27  ;;  %v1404_v51 = vmul.f32 %v2810_v59, %v1366_v18  ;;  %v2862_v28 = vmul.f32 0.5, %v1438_v15 }
 0x25d   : > { %v2245_v39 = vpop.eup %2244  ;;  %2250 = vtanh.f32 %v1632_v20  ;;  %v1601_v5 = vadd.f32 %v1569_v29, %v1441_v23  ;;  %v1535_v52 = vmul.f32 %v1503_v32, %v1439_v14  ;;  %v2849_v47 = vadd.f32 %v2816_v49, %v1407_v35  ;;  %v2868_v20 = vpop.xlane.xlu1 %1232 }
 0x25e   : > { %v1598_v48 = vadd.f32 %v1566_v42, %v1438_v15  ;;  %v1540_v46 = vmul.f32 %v1508_v63, %v2835_v27  ;;  %v1367_v31 = vmul.f32 %v2243_v38, %v2679_v8  ;;  %v2853_v50 = vadd.f32 %v2816_v49, %v1404_v51 }
 0x25f   : > { %v1633_v25 = vmul.f32 0.7978846, %v1601_v5  ;;  %v1567_v16 = vmul.f32 %v1535_v52, %v1439_v14  ;;  %v1372_v60 = vmul.f32 %v2245_v39, %v2686_v0  ;;  %v1509_v43 = vmul.f32 0.044715, %v2849_v47 }
 0x260   : > { %v2247_v19 = vpop.eup %2246  ;;  %v1630_v7 = vmul.f32 0.7978846, %v1598_v48  ;;  %v1572_v37 = vmul.f32 %v1540_v46, %v2835_v27  ;;  %v1506_v40 = vmul.f32 0.044715, %v2853_v50  ;;  %v1405_v18 = vmul.f32 %v2810_v59, %v1367_v31  ;;  %v2878_v5 = vpop.xlane.xlu0 %1234 }
 0x261   : > { %2252 = vtanh.f32 %v1633_v25  ;;  %v1599_v8 = vadd.f32 %v1567_v16, %v1439_v14  ;;  %v2249_v9 = vpop.eup %2248  ;;  %v1541_v23 = vmul.f32 %v1509_v43, %v2849_v47  ;;  %v1410_v15 = vmul.f32 %v2810_v59, %v1372_v60 }
 0x262   : > { %2254 = vtanh.f32 %v1630_v7  ;;  %v1604_v0 = vadd.f32 %v1572_v37, %v2835_v27  ;;  %v1538_v32 = vmul.f32 %v1506_v40, %v2853_v50  ;;  %v1373_v38 = vmul.f32 %v2247_v19, %v2689_v12  ;;  %v1237_v40 = vpop.xlane.xlu1 %1236 }
 0x263   : > { %v1631_v29 = vmul.f32 0.7978846, %v1599_v8  ;;  %v1573_v63 = vmul.f32 %v1541_v23, %v2849_v47  ;;  %v2875_v35 = vadd.f32 %v2816_v49, %v1405_v18  ;;  %v1370_v39 = vmul.f32 %v2249_v9, %v2696_v10 }
 0x264   : > { %v1636_v42 = vmul.f32 0.7978846, %v1604_v0  ;;  %v1570_v52 = vmul.f32 %v1538_v32, %v2853_v50  ;;  %v2882_v51 = vadd.f32 %v2816_v49, %v1410_v15  ;;  %v1411_v48 = vmul.f32 %v2810_v59, %v1373_v38 }
 0x265   : > { %2256 = vtanh.f32 %v1631_v29  ;;  %v1605_v12 = vadd.f32 %v1573_v63, %v2849_v47  ;;  %v1507_v46 = vmul.f32 0.044715, %v2875_v35  ;;  %v1275_v31 = vmul.f32 0.0078125, %v2828_v54 }
 0x266   : > { %2258 = vtanh.f32 %v1636_v42  ;;  %v1471_v10 = vmul.f32 0.5, %v1439_v14  ;;  %v1602_v16 = vadd.f32 %v1570_v52, %v2853_v50  ;;  %v1512_v60 = vmul.f32 0.044715, %v2882_v51 }
 0x267   : > { %v2251_v25 = vpop.eup %2250  ;;  %v2892_v19 = vadd.f32 %v2816_v49, %v1411_v48  ;;  %v1637_v37 = vmul.f32 0.7978846, %v1605_v12  ;;  %v1539_v43 = vmul.f32 %v1507_v46, %v2875_v35  ;;  %v1408_v8 = vmul.f32 %v2810_v59, %v1370_v39 }
 0x268   : > { %v1696_v7 = vadd.f32 1.0, %v2251_v25  ;;  %v2896_v9 = vpop.xlane.xlu0 %1238  ;;  %v1476_v54 = vmul.f32 0.5, %v2835_v27  ;;  %v1634_v14 = vmul.f32 0.7978846, %v1602_v16  ;;  %v1544_v0 = vmul.f32 %v1512_v60, %v2882_v51 }
 0x269   : > { %v1513_v23 = vmul.f32 0.044715, %v2892_v19  ;;  %2260 = vtanh.f32 %v1637_v37  ;;  %v1571_v29 = vmul.f32 %v1539_v43, %v2875_v35  ;;  %v2909_v32 = vadd.f32 %v2816_v49, %v1408_v8 }
 0x26a   : > { %v1728_v18 = vmul.f32 %v1696_v7, %v2840_v34  ;;  %2262 = vtanh.f32 %v1634_v14  ;;  %v1576_v38 = vmul.f32 %v1544_v0, %v2882_v51  ;;  %v1307_v27 = vadd.f32 1e-05, %v1275_v31  ;;  %v1241_v12 = vpop.xlane.xlu1 %1240 }
 0x26b   : > { %v2253_v15 = vpop.eup %2252  ;;  %v1545_v42 = vmul.f32 %v1513_v23, %v2892_v19  ;;  %v1477_v52 = vmul.f32 0.5, %v2849_v47  ;;  %v1603_v34 = vadd.f32 %v1571_v29, %v2875_v35  ;;  %v1510_v48 = vmul.f32 0.044715, %v2909_v32 }
 0x26c   : > { %v2255_v63 = vpop.eup %2254  ;;  %1760 = vst [vmem:[%s2901_s28 + $0x10] sm:$0xff] %v1728_v18  ;;  %v1697_v39 = vadd.f32 1.0, %v2253_v15  ;;  %v1608_v25 = vadd.f32 %v1576_v38, %v2882_v51  ;;  %2264 = vrsqrt.f32 %v1307_v27  ;;  %v1278_v47 = vmul.f32 0.0078125, %v2838_v11 }
 0x26d   : > { %v1694_v46 = vadd.f32 1.0, %v2255_v63  ;;  %v1577_v16 = vmul.f32 %v1545_v42, %v2892_v19  ;;  %v1255_v60 = vpop.xlane.xlu0 %1254  ;;  %v1635_v7 = vmul.f32 0.7978846, %v1603_v34  ;;  %v1542_v37 = vmul.f32 %v1510_v48, %v2909_v32 }
 0x26e   : > { %v1729_v31 = vmul.f32 %v1697_v39, %v2856_v4  ;;  %v1640_v14 = vmul.f32 0.7978846, %v1608_v25  ;;  %v1279_v23 = vmul.f32 0.0078125, %v2844_v1  ;;  %v1310_v4 = vadd.f32 1e-05, %v1278_v47 }
 0x26f   : > { %v2257_v43 = vpop.eup %2256  ;;  %v1726_v8 = vmul.f32 %v1694_v46, %v2862_v28  ;;  %v1609_v0 = vadd.f32 %v1577_v16, %v2892_v19  ;;  %2266 = vtanh.f32 %v1635_v7  ;;  %v1574_v15 = vmul.f32 %v1542_v37, %v2909_v32  ;;  %v1257_v63 = vpop.xlane.xlu1 %1256 }
 0x270   : > { %v2259_v18 = vpop.eup %2258  ;;  %1761 = vst [vmem:[%s2901_s28 + $0x18] sm:$0xff] %v1729_v31  ;;  %v1695_v29 = vadd.f32 1.0, %v2257_v43  ;;  %2268 = vtanh.f32 %v1640_v14  ;;  %v1311_v42 = vadd.f32 1e-05, %v1279_v23  ;;  %v1280_v1 = vmul.f32 0.0078125, %v2860_v6 }
 0x271   : > { %1758 = vst [vmem:[%s2901_s28] sm:$0xff] %v1726_v8  ;;  %v1700_v38 = vadd.f32 1.0, %v2259_v18  ;;  %v1641_v11 = vmul.f32 0.7978846, %v1609_v0  ;;  %v1606_v28 = vadd.f32 %v1574_v15, %v2909_v32  ;;  %2270 = vrsqrt.f32 %v1310_v4  ;;  %v1251_v46 = vpop.xlane.xlu0 %1250 }
 0x272   : > { %v1727_v27 = vmul.f32 %v1695_v29, %v1471_v10  ;;  %v1281_v34 = vmul.f32 0.0078125, %v2868_v20  ;;  %v1282_v48 = vmul.f32 0.0078125, %v2878_v5  ;;  %v1312_v31 = vadd.f32 1e-05, %v1280_v1 }
 0x273   : > { %v1732_v39 = vmul.f32 %v1700_v38, %v1476_v54  ;;  %2272 = vtanh.f32 %v1641_v11  ;;  %v2261_v25 = vpop.eup %2260  ;;  %v1638_v16 = vmul.f32 0.7978846, %v1606_v28  ;;  %v1283_v10 = vmul.f32 0.0078125, %v1237_v40  ;;  %v1253_v15 = vpop.xlane.xlu1 %1252 }
 0x274   : > { %1759 = vst [vmem:[%s2901_s28 + $0x8] sm:$0xff] %v1727_v27  ;;  %2274 = vrsqrt.f32 %v1311_v42  ;;  %v2263_v7 = vpop.eup %2262  ;;  %v1701_v37 = vadd.f32 1.0, %v2261_v25  ;;  %v1313_v47 = vadd.f32 1e-05, %v1281_v34  ;;  %v1314_v43 = vadd.f32 1e-05, %v1282_v48 }
 0x275   : > { %1764 = vst [vmem:[%s2901_s28 + $0x30] sm:$0xff] %v1732_v39  ;;  %v1284_v6 = vmul.f32 0.0078125, %v2896_v9  ;;  %v1474_v54 = vmul.f32 0.5, %v2853_v50  ;;  %v1698_v20 = vadd.f32 1.0, %v2263_v7  ;;  %2276 = vtanh.f32 %v1638_v16  ;;  %v1243_v38 = vpop.xlane.xlu0 %1242 }
 0x276   : > { %v1315_v5 = vadd.f32 1e-05, %v1283_v10  ;;  %v2265_v8 = vpop.eup %2264  ;;  %v1733_v14 = vmul.f32 %v1701_v37, %v1477_v52  ;;  %2278 = vrsqrt.f32 %v1312_v31  ;;  %v1285_v23 = vmul.f32 0.0078125, %v1241_v12 }
 0x277   : > { %v1316_v0 = vadd.f32 1e-05, %v1284_v6  ;;  %v1730_v40 = vmul.f32 %v1698_v20, %v1474_v54  ;;  %v1371_v18 = vmul.f32 %v2265_v8, %v2699_v24  ;;  %2280 = vrsqrt.f32 %v1313_v47  ;;  %v1245_v54 = vpop.xlane.xlu1 %1244 }
 0x278   : > { %v1292_v29 = vmul.f32 0.0078125, %v1255_v60  ;;  %1765 = vst [vmem:[%s2901_s28 + $0x38] sm:$0xff] %v1733_v14  ;;  %v1475_v9 = vmul.f32 0.5, %v2875_v35  ;;  %v1480_v50 = vmul.f32 0.5, %v2882_v51  ;;  %2282 = vrsqrt.f32 %v1314_v43 }
 0x279   : > { %v1293_v4 = vmul.f32 0.0078125, %v1257_v63  ;;  %v2267_v11 = vpop.eup %2266  ;;  %1762 = vst [vmem:[%s2901_s28 + $0x20] sm:$0xff] %v1730_v40  ;;  %v1481_v52 = vmul.f32 0.5, %v2892_v19  ;;  %v1409_v12 = vmul.f32 %v2810_v59, %v1371_v18  ;;  %2284 = vrsqrt.f32 %v1315_v5 }
 0x27a   : > { %v1290_v42 = vmul.f32 0.0078125, %v1251_v46  ;;  %v2269_v24 = vpop.eup %2268  ;;  %v1699_v27 = vadd.f32 1.0, %v2267_v11  ;;  %2286 = vrsqrt.f32 %v1316_v0  ;;  %v1317_v60 = vadd.f32 1e-05, %v1285_v23 }
 0x27b   : > { %v1291_v28 = vmul.f32 0.0078125, %v1253_v15  ;;  %v2271_v35 = vpop.eup %2270  ;;  %v1704_v1 = vadd.f32 1.0, %v2269_v24  ;;  %v1447_v51 = vadd.f32 %v2816_v49, %v1409_v12  ;;  %v1324_v63 = vadd.f32 1e-05, %v1292_v29 }
 0x27c   : > { %v1286_v39 = vmul.f32 0.0078125, %v1243_v38  ;;  %v1731_v48 = vmul.f32 %v1699_v27, %v1475_v9  ;;  %v1478_v19 = vmul.f32 0.5, %v2909_v32  ;;  %v1374_v25 = vmul.f32 %v2271_v35, %v2706_v22  ;;  %v1259_v35 = vpop.xlane.xlu0 %1258 }
 0x27d   : > { %v2273_v34 = vpop.eup %2272  ;;  %v1325_v46 = vadd.f32 1e-05, %v1293_v4  ;;  %v1736_v31 = vmul.f32 %v1704_v1, %v1480_v50  ;;  %v1511_v7 = vmul.f32 0.044715, %v1447_v51  ;;  %v1322_v37 = vadd.f32 1e-05, %v1290_v42 }
 0x27e   : > { %v2275_v16 = vpop.eup %2274  ;;  %v1705_v10 = vadd.f32 1.0, %v2273_v34  ;;  %1763 = vst [vmem:[%s2901_s28 + $0x28] sm:$0xff] %v1731_v48  ;;  %v1412_v47 = vmul.f32 %v2810_v59, %v1374_v25  ;;  %2288 = vrsqrt.f32 %v1317_v60  ;;  %v1323_v6 = vadd.f32 1e-05, %v1291_v28 }
 0x27f   : > { %v1375_v43 = vmul.f32 %v2275_v16, %v2711_v58  ;;  %v2277_v20 = vpop.eup %2276  ;;  %1768 = vst [vmem:[%s2901_s28 + $0x50] sm:$0xff] %v1736_v31  ;;  %v1543_v5 = vmul.f32 %v1511_v7, %v1447_v51  ;;  %2290 = vrsqrt.f32 %v1324_v63  ;;  %v1318_v22 = vadd.f32 1e-05, %v1286_v39 }
 0x280   : > { %v1737_v32 = vmul.f32 %v1705_v10, %v1481_v52  ;;  %v2279_v8 = vpop.eup %2278  ;;  %v1702_v14 = vadd.f32 1.0, %v2277_v20  ;;  %v2950_v0 = vmul.f32 0.5, %v1447_v51  ;;  %v1450_v23 = vadd.f32 %v2816_v49, %v1412_v47 }
 0x281   : > { %v1413_v40 = vmul.f32 %v2810_v59, %v1375_v43  ;;  %v2281_v18 = vpop.eup %2280  ;;  %v1575_v58 = vmul.f32 %v1543_v5, %v1447_v51  ;;  %v1376_v29 = vmul.f32 %v2279_v8, %v2716_v36  ;;  %2292 = vrsqrt.f32 %v1325_v46 }
 0x282   : > { %1769 = vst [vmem:[%s2901_s28 + $0x58] sm:$0xff] %v1737_v32  ;;  %v1287_v15 = vmul.f32 0.0078125, %v1245_v54  ;;  %v2283_v9 = vpop.eup %2282  ;;  %v1734_v50 = vmul.f32 %v1702_v14, %v1478_v19  ;;  %v1514_v4 = vmul.f32 0.044715, %v1450_v23  ;;  %2294 = vrsqrt.f32 %v1322_v37 }
 0x283   : > { %v1451_v38 = vadd.f32 %v2816_v49, %v1413_v40  ;;  %v2285_v11 = vpop.eup %2284  ;;  %v1607_v52 = vadd.f32 %v1575_v58, %v1447_v51  ;;  %v1414_v12 = vmul.f32 %v2810_v59, %v1376_v29  ;;  %v1377_v42 = vmul.f32 %v2281_v18, %v2721_v41 }
 0x284   : > { %v1378_v24 = vmul.f32 %v2283_v9, %v2728_v13  ;;  %v2287_v27 = vpop.eup %2286  ;;  %1766 = vst [vmem:[%s2901_s28 + $0x40] sm:$0xff] %v1734_v50  ;;  %v1546_v60 = vmul.f32 %v1514_v4, %v1450_v23  ;;  %v1379_v28 = vmul.f32 %v2285_v11, %v2731_v56  ;;  %2296 = vrsqrt.f32 %v1323_v6 }
 0x285   : > { %v1515_v36 = vmul.f32 0.044715, %v1451_v38  ;;  %v1639_v1 = vmul.f32 0.7978846, %v1607_v52  ;;  %v1452_v63 = vadd.f32 %v2816_v49, %v1414_v12  ;;  %v1415_v39 = vmul.f32 %v2810_v59, %v1377_v42 }
 0x286   : > { %v1416_v51 = vmul.f32 %v2810_v59, %v1378_v24  ;;  %v1578_v34 = vmul.f32 %v1546_v60, %v1450_v23  ;;  %v1417_v41 = vmul.f32 %v2810_v59, %v1379_v28  ;;  %v1380_v13 = vmul.f32 %v2287_v27, %v2738_v21 }
 0x287   : > { %v1547_v48 = vmul.f32 %v1515_v36, %v1451_v38  ;;  %2298 = vtanh.f32 %v1639_v1  ;;  %v1516_v19 = vmul.f32 0.044715, %v1452_v63  ;;  %v2968_v25 = vadd.f32 %v2816_v49, %v1415_v39 }
 0x288   : > { %v2970_v56 = vmul.f32 0.0078125, %v1259_v35  ;;  %v2289_v46 = vpop.eup %2288  ;;  %v1610_v16 = vadd.f32 %v1578_v34, %v1450_v23  ;;  %v2973_v10 = vadd.f32 %v2816_v49, %v1416_v51  ;;  %v2976_v7 = vadd.f32 %v2816_v49, %v1417_v41 }
 0x289   : > { %v1579_v31 = vmul.f32 %v1547_v48, %v1451_v38  ;;  %v2291_v37 = vpop.eup %2290  ;;  %v1548_v47 = vmul.f32 %v1516_v19, %v1452_v63  ;;  %v1517_v21 = vmul.f32 0.044715, %v2968_v25  ;;  %v1418_v43 = vmul.f32 %v2810_v59, %v1380_v13 }
 0x28a   : > { %2300 = vrsqrt.f32 %v1318_v22  ;;  %v1642_v6 = vmul.f32 0.7978846, %v1610_v16  ;;  %v1518_v20 = vmul.f32 0.044715, %v2973_v10  ;;  %v2981_v32 = vadd.f32 1e-05, %v1287_v15 }
 0x28b   : > { %v1611_v54 = vadd.f32 %v1579_v31, %v1451_v38  ;;  %v2293_v5 = vpop.eup %2292  ;;  %v2983_v8 = vmul.f32 0.5, %v1450_v23  ;;  %v1580_v14 = vmul.f32 %v1548_v47, %v1452_v63  ;;  %v1549_v40 = vmul.f32 %v1517_v21, %v2968_v25 }
 0x28c   : > { %v1519_v18 = vmul.f32 0.044715, %v2976_v7  ;;  %v2295_v58 = vpop.eup %2294  ;;  %2302 = vtanh.f32 %v1642_v6  ;;  %v1550_v9 = vmul.f32 %v1518_v20, %v2973_v10  ;;  %v2989_v22 = vadd.f32 %v2816_v49, %v1418_v43 }
 0x28d   : > { %v1643_v29 = vmul.f32 0.7978846, %v1611_v54  ;;  %v1612_v50 = vadd.f32 %v1580_v14, %v1452_v63  ;;  %v1581_v15 = vmul.f32 %v1549_v40, %v2968_v25  ;;  %v1381_v23 = vmul.f32 %v2289_v46, %v2741_v2 }
 0x28e   : > { %v1551_v4 = vmul.f32 %v1519_v18, %v2976_v7  ;;  %v2297_v11 = vpop.eup %2296  ;;  %v1483_v52 = vmul.f32 0.5, %v1451_v38  ;;  %v1582_v12 = vmul.f32 %v1550_v9, %v2973_v10  ;;  %v1520_v42 = vmul.f32 0.044715, %v2989_v22 }
 0x28f   : > { %2304 = vtanh.f32 %v1643_v29  ;;  %v1644_v24 = vmul.f32 0.7978846, %v1612_v50  ;;  %v1613_v27 = vadd.f32 %v1581_v15, %v2968_v25  ;;  %v1419_v36 = vmul.f32 %v2810_v59, %v1381_v23  ;;  %v1261_v50 = vpop.xlane.xlu1 %1260 }
 0x290   : > { %v1583_v60 = vmul.f32 %v1551_v4, %v2976_v7  ;;  %v1614_v28 = vadd.f32 %v1582_v12, %v2973_v10  ;;  %v1552_v35 = vmul.f32 %v1520_v42, %v2989_v22  ;;  %v1388_v2 = vmul.f32 %v2291_v37, %v2748_v33 }
 0x291   : > { %v1389_v38 = vmul.f32 %v2293_v5, %v2751_v17  ;;  %v2299_v1 = vpop.eup %2298  ;;  %2306 = vtanh.f32 %v1644_v24  ;;  %v1645_v39 = vmul.f32 0.7978846, %v1613_v27  ;;  %v3005_v34 = vadd.f32 %v2816_v49, %v1419_v36 }
 0x292   : > { %v1615_v51 = vadd.f32 %v1583_v60, %v2976_v7  ;;  %v1703_v48 = vadd.f32 1.0, %v2299_v1  ;;  %v1646_v41 = vmul.f32 0.7978846, %v1614_v28  ;;  %v1584_v13 = vmul.f32 %v1552_v35, %v2989_v22 }
 0x293   : > { %v1426_v19 = vmul.f32 %v2810_v59, %v1388_v2  ;;  %v1484_v16 = vmul.f32 0.5, %v1452_v63  ;;  %2308 = vtanh.f32 %v1645_v39  ;;  %v1521_v17 = vmul.f32 0.044715, %v3005_v34 }
 0x294   : > { %v2301_v46 = vpop.eup %2300  ;;  %v1647_v33 = vmul.f32 0.7978846, %v1615_v51  ;;  %v1735_v31 = vmul.f32 %v1703_v48, %v2950_v0  ;;  %2310 = vtanh.f32 %v1646_v41  ;;  %v1616_v37 = vadd.f32 %v1584_v13, %v2989_v22  ;;  %v1247_v41 = vpop.xlane.xlu0 %1246 }
 0x295   : > { %v3013_v47 = vadd.f32 %v2816_v49, %v1426_v19  ;;  %v1553_v21 = vmul.f32 %v1521_v17, %v3005_v34  ;;  %v1427_v43 = vmul.f32 %v2810_v59, %v1389_v38  ;;  %v1386_v6 = vmul.f32 %v2295_v58, %v2756_v30  ;;  %v1249_v13 = vpop.xlane.xlu1 %1248 }
 0x296   : > { %2312 = vtanh.f32 %v1647_v33  ;;  %v2303_v63 = vpop.eup %2302  ;;  %1767 = vst [vmem:[%s2901_s28 + $0x48] sm:$0xff] %v1735_v31  ;;  %v1485_v54 = vmul.f32 0.5, %v2968_v25  ;;  %v1648_v20 = vmul.f32 0.7978846, %v1616_v37  ;;  %v1387_v5 = vmul.f32 %v2297_v11, %v2761_v62 }
 0x297   : > { %v1528_v0 = vmul.f32 0.044715, %v3013_v47  ;;  %v1706_v14 = vadd.f32 1.0, %v2303_v63  ;;  %v1585_v40 = vmul.f32 %v1553_v21, %v3005_v34  ;;  %v3024_v18 = vadd.f32 %v2816_v49, %v1427_v43 }
 0x298   : > { %v1424_v29 = vmul.f32 %v2810_v59, %v1386_v6  ;;  %2314 = vtanh.f32 %v1648_v20  ;;  %v1425_v25 = vmul.f32 %v2810_v59, %v1387_v5  ;;  %v1382_v58 = vmul.f32 %v2301_v46, %v2766_v45 }
 0x299   : > { %v2305_v9 = vpop.eup %2304  ;;  %v1560_v30 = vmul.f32 %v1528_v0, %v3013_v47  ;;  %v1738_v62 = vmul.f32 %v1706_v14, %v2983_v8  ;;  %v1486_v4 = vmul.f32 0.5, %v2973_v10  ;;  %v1617_v23 = vadd.f32 %v1585_v40, %v3005_v34 }
 0x29a   : > { %v1707_v15 = vadd.f32 1.0, %v2305_v9  ;;  %v1529_v12 = vmul.f32 0.044715, %v3024_v18  ;;  %v3036_v42 = vadd.f32 %v2816_v49, %v1424_v29  ;;  %v3039_v24 = vadd.f32 %v2816_v49, %v1425_v25 }
 0x29b   : > { %v1592_v11 = vmul.f32 %v1560_v30, %v3013_v47  ;;  %v2307_v45 = vpop.eup %2306  ;;  %1770 = vst [vmem:[%s2901_s28 + $0x60] sm:$0xff] %v1738_v62  ;;  %v1649_v8 = vmul.f32 0.7978846, %v1617_v23  ;;  %v1420_v60 = vmul.f32 %v2810_v59, %v1382_v58  ;;  %2316 = vrsqrt.f32 %v2981_v32  ;;  %v1263_v62 = vpop.xlane.xlu0 %1262 }
 0x29c   : > { %v1739_v27 = vmul.f32 %v1707_v15, %v1483_v52  ;;  %v1708_v10 = vadd.f32 1.0, %v2307_v45  ;;  %v1487_v36 = vmul.f32 0.5, %v2976_v7  ;;  %v1561_v35 = vmul.f32 %v1529_v12, %v3024_v18  ;;  %v1265_v15 = vpop.xlane.xlu1 %1264 }
 0x29d   : > { %v1624_v28 = vadd.f32 %v1592_v11, %v3013_v47  ;;  %v2309_v2 = vpop.eup %2308  ;;  %v1488_v38 = vmul.f32 0.5, %v2989_v22  ;;  %2318 = vtanh.f32 %v1649_v8  ;;  %v1526_v52 = vmul.f32 0.044715, %v3036_v42 }
 0x29e   : > { %1771 = vst [vmem:[%s2901_s28 + $0x68] sm:$0xff] %v1739_v27  ;;  %v1527_v1 = vmul.f32 0.044715, %v3039_v24  ;;  %v2311_v39 = vpop.eup %2310  ;;  %v1740_v51 = vmul.f32 %v1708_v10, %v1484_v16  ;;  %v1709_v32 = vadd.f32 1.0, %v2309_v2  ;;  %v1593_v7 = vmul.f32 %v1561_v35, %v3024_v18 }
 0x29f   : > { %v1656_v48 = vmul.f32 0.7978846, %v1624_v28  ;;  %v1710_v46 = vadd.f32 1.0, %v2311_v39  ;;  %v1558_v33 = vmul.f32 %v1526_v52, %v3036_v42  ;;  %v3055_v17 = vadd.f32 %v2816_v49, %v1420_v60 }
 0x2a0   : > { %v2313_v19 = vpop.eup %2312  ;;  %v1559_v22 = vmul.f32 %v1527_v1, %v3039_v24  ;;  %1772 = vst [vmem:[%s2901_s28 + $0x70] sm:$0xff] %v1740_v51  ;;  %v1741_v31 = vmul.f32 %v1709_v32, %v1485_v54  ;;  %v1625_v37 = vadd.f32 %v1593_v7, %v3024_v18  ;;  %v1489_v43 = vmul.f32 0.5, %v3005_v34 }
 0x2a1   : > { %v1711_v16 = vadd.f32 1.0, %v2313_v19  ;;  %2320 = vtanh.f32 %v1656_v48  ;;  %v1742_v21 = vmul.f32 %v1710_v46, %v1486_v4  ;;  %v1590_v6 = vmul.f32 %v1558_v33, %v3036_v42 }
 0x2a2   : > { %v1591_v63 = vmul.f32 %v1559_v22, %v3039_v24  ;;  %v2315_v20 = vpop.eup %2314  ;;  %1773 = vst [vmem:[%s2901_s28 + $0x78] sm:$0xff] %v1741_v31  ;;  %v1657_v5 = vmul.f32 0.7978846, %v1625_v37  ;;  %v1522_v14 = vmul.f32 0.044715, %v3055_v17  ;;  %v1295_v30 = vmul.f32 0.0078125, %v1261_v50 }
 0x2a3   : > { %v1743_v0 = vmul.f32 %v1711_v16, %v1487_v36  ;;  %v1326_v54 = vadd.f32 1e-05, %v2970_v56  ;;  %1774 = vst [vmem:[%s2901_s28 + $0x80] sm:$0xff] %v1742_v21  ;;  %v1712_v40 = vadd.f32 1.0, %v2315_v20  ;;  %v1622_v29 = vadd.f32 %v1590_v6, %v3036_v42 }
 0x2a4   : > { %v1623_v9 = vadd.f32 %v1591_v63, %v3039_v24  ;;  %2322 = vtanh.f32 %v1657_v5  ;;  %v1554_v34 = vmul.f32 %v1522_v14, %v3055_v17  ;;  %v1288_v25 = vmul.f32 0.0078125, %v1247_v41 }
 0x2a5   : > { %1775 = vst [vmem:[%s2901_s28 + $0x88] sm:$0xff] %v1743_v0  ;;  %v1289_v58 = vmul.f32 0.0078125, %v1249_v13  ;;  %v2317_v4 = vpop.eup %2316  ;;  %v1744_v23 = vmul.f32 %v1712_v40, %v1488_v38  ;;  %v1654_v11 = vmul.f32 0.7978846, %v1622_v29  ;;  %2324 = vrsqrt.f32 %v1326_v54 }
 0x2a6   : > { %v1655_v56 = vmul.f32 0.7978846, %v1623_v9  ;;  %v1586_v12 = vmul.f32 %v1554_v34, %v3055_v17  ;;  %v1383_v45 = vmul.f32 %v2317_v4, %v2771_v44  ;;  %v1327_v27 = vadd.f32 1e-05, %v1295_v30 }
 0x2a7   : > { %v1320_v50 = vadd.f32 1e-05, %v1288_v25  ;;  %v2319_v8 = vpop.eup %2318  ;;  %1776 = vst [vmem:[%s2901_s28 + $0x90] sm:$0xff] %v1744_v23  ;;  %2326 = vtanh.f32 %v1654_v11  ;;  %v1321_v60 = vadd.f32 1e-05, %v1289_v58  ;;  %v1296_v10 = vmul.f32 0.0078125, %v1263_v62 }
 0x2a8   : > { %v1297_v36 = vmul.f32 0.0078125, %v1265_v15  ;;  %v1713_v28 = vadd.f32 1.0, %v2319_v8  ;;  %2328 = vtanh.f32 %v1655_v56  ;;  %v1618_v35 = vadd.f32 %v1586_v12, %v3055_v17 }
 0x2a9   : > { %v1421_v2 = vmul.f32 %v2810_v59, %v1383_v45  ;;  %2330 = vrsqrt.f32 %v1327_v27  ;;  %v1328_v38 = vadd.f32 1e-05, %v1296_v10  ;;  %v1496_v32 = vmul.f32 0.5, %v3013_v47 }
 0x2aa   : > { %v1329_v52 = vadd.f32 1e-05, %v1297_v36  ;;  %v1745_v44 = vmul.f32 %v1713_v28, %v1489_v43  ;;  %v1650_v39 = vmul.f32 0.7978846, %v1618_v35  ;;  %2332 = vrsqrt.f32 %v1320_v50 }
 0x2ab   : > { %v2321_v1 = vpop.eup %2320  ;;  %v3076_v51 = vadd.f32 %v2816_v49, %v1421_v2  ;;  %2334 = vrsqrt.f32 %v1321_v60  ;;  %v1497_v33 = vmul.f32 0.5, %v3024_v18  ;;  %v1494_v43 = vmul.f32 0.5, %v3036_v42 }
 0x2ac   : > { %v1720_v48 = vadd.f32 1.0, %v2321_v1  ;;  %1777 = vst [vmem:[%s2901_s28 + $0x98] sm:$0xff] %v1745_v44  ;;  %2336 = vtanh.f32 %v1650_v39  ;;  %v1495_v18 = vmul.f32 0.5, %v3039_v24  ;;  %v1490_v62 = vmul.f32 0.5, %v3055_v17 }
 0x2ad   : > { %v1523_v7 = vmul.f32 0.044715, %v3076_v51  ;;  %2338 = vrsqrt.f32 %v1328_v38 }
 0x2ae   : > { %v1752_v41 = vmul.f32 %v1720_v48, %v1496_v32  ;;  %v2323_v13 = vpop.eup %2322  ;;  %2340 = vrsqrt.f32 %v1329_v52 }
 0x2af   : > { %v1555_v19 = vmul.f32 %v1523_v7, %v3076_v51  ;;  %v2325_v46 = vpop.eup %2324  ;;  %v1721_v22 = vadd.f32 1.0, %v2323_v13 }
 0x2b0   : > { %1784 = vst [vmem:[%s2901_s28 + $0xd0] sm:$0xff] %v1752_v41  ;;  %v1390_v31 = vmul.f32 %v2325_v46, %v2776_v53  ;;  %v1491_v41 = vmul.f32 0.5, %v3076_v51 }
 0x2b1   : > { %v1587_v47 = vmul.f32 %v1555_v19, %v3076_v51  ;;  %v2327_v16 = vpop.eup %2326  ;;  %v1753_v37 = vmul.f32 %v1721_v22, %v1497_v33 }
 0x2b2   : > { %v2329_v21 = vpop.eup %2328  ;;  %v1718_v6 = vadd.f32 1.0, %v2327_v16  ;;  %v1428_v20 = vmul.f32 %v2810_v59, %v1390_v31 }
 0x2b3   : > { %v1619_v63 = vadd.f32 %v1587_v47, %v3076_v51  ;;  %v2331_v0 = vpop.eup %2330  ;;  %1785 = vst [vmem:[%s2901_s28 + $0xd8] sm:$0xff] %v1753_v37  ;;  %v1719_v5 = vadd.f32 1.0, %v2329_v21 }
 0x2b4   : > { %v2333_v14 = vpop.eup %2332  ;;  %v1750_v54 = vmul.f32 %v1718_v6, %v1494_v43  ;;  %v3092_v40 = vadd.f32 %v2816_v49, %v1428_v20  ;;  %v1391_v42 = vmul.f32 %v2331_v0, %v2781_v57 }
 0x2b5   : > { %v1651_v53 = vmul.f32 0.7978846, %v1619_v63  ;;  %v2335_v29 = vpop.eup %2334  ;;  %v1751_v9 = vmul.f32 %v1719_v5, %v1495_v18  ;;  %v1384_v30 = vmul.f32 %v2333_v14, %v2786_v61 }
 0x2b6   : > { %v2337_v34 = vpop.eup %2336  ;;  %1782 = vst [vmem:[%s2901_s28 + $0xc0] sm:$0xff] %v1750_v54  ;;  %v1530_v25 = vmul.f32 0.044715, %v3092_v40  ;;  %v1429_v24 = vmul.f32 %v2810_v59, %v1391_v42  ;;  %v1385_v57 = vmul.f32 %v2335_v29, %v2791_v3  ;;  %v2356_v3 = vld [vmem:[%s3132_s2] ss:$0 sm:$0xff]  ;;  %v1498_v14 = vmul.f32 0.5, %v3092_v40 }
 0x2b7   : > { %2342 = vtanh.f32 %v1651_v53  ;;  %v2339_v58 = vpop.eup %2338  ;;  %1783 = vst [vmem:[%s2901_s28 + $0xc8] sm:$0xff] %v1751_v9  ;;  %v1714_v15 = vadd.f32 1.0, %v2337_v34  ;;  %v1422_v4 = vmul.f32 %v2810_v59, %v1384_v30 }
 0x2b8   : > { %v2341_v23 = vpop.eup %2340  ;;  %v1562_v61 = vmul.f32 %v1530_v25, %v3092_v40  ;;  %v1467_v11 = vadd.f32 %v2816_v49, %v1429_v24  ;;  %v1392_v56 = vmul.f32 %v2339_v58, %v2796_v55  ;;  %v1423_v27 = vmul.f32 %v2810_v59, %v1385_v57  ;;  %v2357_v55 = vld [vmem:[%s3133_s3] ss:$0 sm:$0xff] }
 0x2b9   : > { %v1746_v12 = vmul.f32 %v1714_v15, %v1490_v62  ;;  %v1460_v45 = vadd.f32 %v2816_v49, %v1422_v4  ;;  %v1393_v17 = vmul.f32 %v2341_v23, %v2801_v26 }
 0x2ba   : > { %v1594_v50 = vmul.f32 %v1562_v61, %v3092_v40  ;;  %v1531_v8 = vmul.f32 0.044715, %v1467_v11  ;;  %v1430_v60 = vmul.f32 %v2356_v3, %v1392_v56  ;;  %v1461_v36 = vadd.f32 %v2357_v55, %v1423_v27 }
 0x2bb   : > { %1778 = vst [vmem:[%s2901_s28 + $0xa0] sm:$0xff] %v1746_v12  ;;  %v1524_v10 = vmul.f32 0.044715, %v1460_v45  ;;  %v1431_v49 = vmul.f32 %v2356_v3, %v1393_v17  ;;  %v1499_v9 = vmul.f32 0.5, %v1467_v11  ;;  %v1492_v34 = vmul.f32 0.5, %v1460_v45 }
 0x2bc   : > { %v1626_v59 = vadd.f32 %v1594_v50, %v3092_v40  ;;  %v1563_v28 = vmul.f32 %v1531_v8, %v1467_v11  ;;  %v1468_v26 = vadd.f32 %v2357_v55, %v1430_v60  ;;  %v1525_v2 = vmul.f32 0.044715, %v1461_v36 }
 0x2bd   : > { %v1556_v35 = vmul.f32 %v1524_v10, %v1460_v45  ;;  %v1469_v38 = vadd.f32 %v2357_v55, %v1431_v49  ;;  %v1493_v4 = vmul.f32 0.5, %v1461_v36 }
 0x2be   : > { %v1658_v52 = vmul.f32 0.7978846, %v1626_v59  ;;  %v1595_v1 = vmul.f32 %v1563_v28, %v1467_v11  ;;  %v1532_v44 = vmul.f32 0.044715, %v1468_v26  ;;  %v1557_v32 = vmul.f32 %v1525_v2, %v1461_v36 }
 0x2bf   : > { %v1588_v39 = vmul.f32 %v1556_v35, %v1460_v45  ;;  %v1533_v48 = vmul.f32 0.044715, %v1469_v38  ;;  %v1500_v23 = vmul.f32 0.5, %v1468_v26  ;;  %v1501_v12 = vmul.f32 0.5, %v1469_v38 }
 0x2c0   : > { %2344 = vtanh.f32 %v1658_v52  ;;  %v1627_v13 = vadd.f32 %v1595_v1, %v1467_v11  ;;  %v1564_v19 = vmul.f32 %v1532_v44, %v1468_v26  ;;  %v1589_v22 = vmul.f32 %v1557_v32, %v1461_v36 }
 0x2c1   : > { %v2343_v7 = vpop.eup %2342  ;;  %v1620_v33 = vadd.f32 %v1588_v39, %v1460_v45  ;;  %v1565_v47 = vmul.f32 %v1533_v48, %v1469_v38 }
 0x2c2   : > { %v1715_v46 = vadd.f32 1.0, %v2343_v7  ;;  %v1659_v31 = vmul.f32 0.7978846, %v1627_v13  ;;  %v1596_v16 = vmul.f32 %v1564_v19, %v1468_v26  ;;  %v1621_v43 = vadd.f32 %v1589_v22, %v1461_v36 }
 0x2c3   : > { %v1652_v21 = vmul.f32 0.7978846, %v1620_v33  ;;  %v1597_v6 = vmul.f32 %v1565_v47, %v1469_v38 }
 0x2c4   : > { %v1747_v37 = vmul.f32 %v1715_v46, %v1491_v41  ;;  %2346 = vtanh.f32 %v1659_v31  ;;  %v1628_v63 = vadd.f32 %v1596_v16, %v1468_v26  ;;  %v1653_v51 = vmul.f32 0.7978846, %v1621_v43 }
 0x2c5   : > { %2348 = vtanh.f32 %v1652_v21  ;;  %v1629_v20 = vadd.f32 %v1597_v6, %v1469_v38 }
 0x2c6   : > { %1779 = vst [vmem:[%s2901_s28 + $0xa8] sm:$0xff] %v1747_v37  ;;  %v1660_v0 = vmul.f32 0.7978846, %v1628_v63  ;;  %2350 = vtanh.f32 %v1653_v51 }
 0x2c7   : > { %v1661_v18 = vmul.f32 0.7978846, %v1629_v20 }
 0x2c8   : > { %2352 = vtanh.f32 %v1660_v0 }
 0x2c9   : > { %2354 = vtanh.f32 %v1661_v18 }
 0x2ca   : > { %v2345_v5 = vpop.eup %2344 }
 0x2cb   : > { %v1722_v54 = vadd.f32 1.0, %v2345_v5 }
 0x2cd   : > { %v1754_v53 = vmul.f32 %v1722_v54, %v1498_v14 }
 0x2ce   : > { %v2347_v42 = vpop.eup %2346 }
 0x2cf   : > { %v2349_v29 = vpop.eup %2348  ;;  %1786 = vst [vmem:[%s2901_s28 + $0xe0] sm:$0xff] %v1754_v53  ;;  %v1723_v30 = vadd.f32 1.0, %v2347_v42 }
 0x2d0   : > { %v1716_v25 = vadd.f32 1.0, %v2349_v29  ;;  %v2351_v24 = vpop.eup %2350 }
 0x2d1   : > { %v1755_v58 = vmul.f32 %v1723_v30, %v1499_v9  ;;  %v1717_v40 = vadd.f32 1.0, %v2351_v24 }
 0x2d2   : > { %v2353_v62 = vpop.eup %2352  ;;  %v1748_v15 = vmul.f32 %v1716_v25, %v1492_v34 }
 0x2d3   : > { %v2355_v57 = vpop.eup %2354  ;;  %1787 = vst [vmem:[%s2901_s28 + $0xe8] sm:$0xff] %v1755_v58  ;;  %v1724_v61 = vadd.f32 1.0, %v2353_v62  ;;  %v1749_v56 = vmul.f32 %v1717_v40, %v1493_v4 }
 0x2d4   : > { %1780 = vst [vmem:[%s2901_s28 + $0xb0] sm:$0xff] %v1748_v15  ;;  %v1725_v11 = vadd.f32 1.0, %v2355_v57 }
 0x2d5   : > { %v1756_v27 = vmul.f32 %v1724_v61, %v1500_v23  ;;  %1781 = vst [vmem:[%s2901_s28 + $0xb8] sm:$0xff] %v1749_v56 }
 0x2d6   : > { %v1757_v45 = vmul.f32 %v1725_v11, %v1501_v12 }
 0x2d7   : > { %1788 = vst [vmem:[%s2901_s28 + $0xf0] sm:$0xff] %v1756_v27 }
 0x2d8   : > { %1789 = vst [vmem:[%s2901_s28 + $0xf8] sm:$0xff] %v1757_v45 }
 0x2d9 PF: > { %s14_s15 = sadd.s32 1, %s2364_s15  }
 0x2da   : > { %p11_p4 = scmp.ge.s32.totalorder %s14_s15, 4  }
 0x2dc   :  { %13 = sbr.rel (!%p11_p4) target bundleno = 1 (0x1), region = 66 }

// kernel: wavlm_extract_features.13
= control target key start
LH: loop header
LB: loop body
LE: loop exit
PB: predicated region body
PF: predicated region fallthrough
CT: control target
= control target key end

     0   :  { %s2048_s1 = inlined_call_operand.vmem [shape: bf16[384,128], index: 1, kind: input, shape index: {}]   ;;  %s2049_s0 = inlined_call_operand.vmem [shape: bf16[160,384], index: 0, kind: input, shape index: {}]   ;;  %s2050_s2 = inlined_call_operand.vmem [shape: f32[1,128], index: 2, kind: input, shape index: {}]   ;;  %s2051_s3 = inlined_call_operand.vmem [shape: f32[1,128], index: 3, kind: input, shape index: {}]   ;;  %s2052_s4 = inlined_call_operand.vmem [shape: f32[160,128], index: 4, kind: output, shape index: {}]  }
   0x1   :  { %v1301_v0 = vld [vmem:[%s2048_s1 + $0x40] sm:$0xff]   ;;  %v1304_v3 = vld [vmem:[%s2048_s1 + $0x48] sm:$0xff]   ;;  %v1307_v6 = vld [vmem:[%s2048_s1 + $0x50] sm:$0xff]  }
   0x2   :  { %v1302_v1 = vld [vmem:[%s2048_s1] sm:$0xff]   ;;  %1171 = vmatprep.subr.bf16.mxu0 %v1301_v0  ;;  %v1305_v4 = vld [vmem:[%s2048_s1 + $0x8] sm:$0xff]   ;;  %v1308_v7 = vld [vmem:[%s2048_s1 + $0x10] sm:$0xff]  }
   0x3   :  { %v1303_v2 = vld [vmem:[%s2048_s1 + $0x80] sm:$0xff]   ;;  %1172 = vmatpush3.bf16.msra.mxu0 %v1302_v1  ;;  %v1306_v5 = vld [vmem:[%s2048_s1 + $0x88] sm:$0xff]   ;;  %v1309_v8 = vld [vmem:[%s2048_s1 + $0x90] sm:$0xff]  }
   0x4   :  { %1265 = vmatprep.subr.bf16.mxu1 %v1303_v2  ;;  %1173 = vmatprep.subr.bf16.mxu0 %v1304_v3  ;;  %v1310_v9 = vld [vmem:[%s2048_s1 + $0x58] sm:$0xff]   ;;  %v1313_v12 = vld [vmem:[%s2048_s1 + $0x60] sm:$0xff]   ;;  %v1316_v15 = vld [vmem:[%s2048_s1 + $0x68] sm:$0xff]  }
   0x5   :  { %1266 = vmatpush3.bf16.msra.mxu1 %v1303_v2  ;;  %v1311_v10 = vld [vmem:[%s2048_s1 + $0x18] sm:$0xff]   ;;  %v1315_v13 = vld [vmem:[%s2048_s1 + $0xa0] sm:$0xff]   ;;  %v1318_v16 = vld [vmem:[%s2048_s1 + $0xa8] sm:$0xff]  }
   0x6   :  { %1267 = vmatprep.subr.bf16.mxu1 %v1306_v5  ;;  %v1312_v11 = vld [vmem:[%s2048_s1 + $0x98] sm:$0xff]   ;;  %v1314_v14 = vld [vmem:[%s2048_s1 + $0x20] sm:$0xff]   ;;  %v1317_v17 = vld [vmem:[%s2048_s1 + $0x28] sm:$0xff]  }
   0x7   :  { %1174 = vmatpush3.bf16.msra.mxu0 %v1305_v4  ;;  %v1319_v18 = vld [vmem:[%s2048_s1 + $0x70] sm:$0xff]   ;;  %v1322_v21 = vld [vmem:[%s2048_s1 + $0x78] sm:$0xff]   ;;  %v1325_v26 = vld [vmem:[%s2049_s0] ss:$12 sps:$4 sm:$0xff]  }
   0x8   :  { %1175 = vmatprep.subr.bf16.mxu0 %v1307_v6  ;;  %v1320_v19 = vld [vmem:[%s2048_s1 + $0x30] sm:$0xff]   ;;  %v1324_v22 = vld [vmem:[%s2048_s1 + $0xb8] sm:$0xff]   ;;  %v1329_v28 = vld [vmem:[%s2049_s0 + $0x20] ss:$12 sps:$4 sm:$0xff]  }
   0x9   :  { %1268 = vmatpush3.bf16.msra.mxu1 %v1306_v5  ;;  %v1321_v20 = vld [vmem:[%s2048_s1 + $0xb0] sm:$0xff]   ;;  %v1323_v25 = vld [vmem:[%s2048_s1 + $0x38] sm:$0xff]   ;;  %v1345_v36 = vld [vmem:[%s2049_s0 + $0x80] ss:$12 sps:$4 sm:$0xff]  }
   0xa   :  { %1269 = vmatprep.subr.bf16.mxu1 %v1309_v8  ;;  %v1327_v23 = vld [vmem:[%s2049_s0 + $0x4] ss:$12 sps:$4 sm:$0xff]   ;;  %v1328_v24 = vld [vmem:[%s2049_s0 + $0x8] ss:$12 sps:$4 sm:$0xff]   ;;  %v1338_v35 = vld [vmem:[%s2049_s0 + $0x4c] ss:$12 sps:$4 sm:$0xff]  }
   0xb   :  { %1176 = vmatpush3.bf16.msra.mxu0 %v1308_v7  ;;  %442 = vmatprep.mubr.bf16.mxu0 %v1327_v23  ;;  %v1330_v27 = vld [vmem:[%s2049_s0 + $0x1c] ss:$12 sps:$4 sm:$0xff]   ;;  %v1336_v29 = vld [vmem:[%s2049_s0 + $0x38] ss:$12 sps:$4 sm:$0xff]   ;;  %v1333_v31 = vld [vmem:[%s2049_s0 + $0x34] ss:$12 sps:$4 sm:$0xff]  }
   0xc   :  { %1177 = vmatprep.subr.bf16.mxu0 %v1310_v9  ;;  %1281 = vmatprep.mubr.bf16.mxu1 %v1328_v24  ;;  %v1332_v30 = vld [vmem:[%s2049_s0 + $0x18] ss:$12 sps:$4 sm:$0xff]   ;;  %v1337_v32 = vld [vmem:[%s2049_s0 + $0x50] ss:$12 sps:$4 sm:$0xff]   ;;  %v1344_v33 = vld [vmem:[%s2049_s0 + $0x68] ss:$12 sps:$4 sm:$0xff]  }
   0xd   :  { %1270 = vmatpush3.bf16.msra.mxu1 %v1309_v8  ;;  %v1335_v34 = vld [vmem:[%s2049_s0 + $0x30] ss:$12 sps:$4 sm:$0xff]   ;;  %v1352_v37 = vld [vmem:[%s2049_s0 + $0x98] ss:$12 sps:$4 sm:$0xff]   ;;  %v1340_v38 = vld [vmem:[%s2049_s0 + $0x48] ss:$12 sps:$4 sm:$0xff]  }
   0xe   :  { %1271 = vmatprep.subr.bf16.mxu1 %v1312_v11  ;;  %v1341_v39 = vld [vmem:[%s2049_s0 + $0x64] ss:$12 sps:$4 sm:$0xff]   ;;  %v1360_v41 = vld [vmem:[%s2049_s0 + $0xc8] ss:$12 sps:$4 sm:$0xff]   ;;  %v1343_v42 = vld [vmem:[%s2049_s0 + $0x60] ss:$12 sps:$4 sm:$0xff]  }
   0xf   :  { %1178 = vmatpush3.bf16.msra.mxu0 %v1311_v10  ;;  %v1353_v40 = vld [vmem:[%s2049_s0 + $0xb0] ss:$12 sps:$4 sm:$0xff]   ;;  %v1361_v44 = vld [vmem:[%s2049_s0 + $0xe0] ss:$12 sps:$4 sm:$0xff]   ;;  %v1348_v45 = vld [vmem:[%s2049_s0 + $0x78] ss:$12 sps:$4 sm:$0xff]  }
  0x10   :  { %1179 = vmatprep.subr.bf16.mxu0 %v1313_v12  ;;  %v1346_v43 = vld [vmem:[%s2049_s0 + $0x7c] ss:$12 sps:$4 sm:$0xff]   ;;  %v1349_v46 = vld [vmem:[%s2049_s0 + $0x94] ss:$12 sps:$4 sm:$0xff]   ;;  %v1354_v48 = vld [vmem:[%s2049_s0 + $0xac] ss:$12 sps:$4 sm:$0xff]  }
  0x11   :  { %1272 = vmatpush3.bf16.msra.mxu1 %v1312_v11  ;;  %v1351_v47 = vld [vmem:[%s2049_s0 + $0x90] ss:$12 sps:$4 sm:$0xff]   ;;  %v1356_v49 = vld [vmem:[%s2049_s0 + $0xa8] ss:$12 sps:$4 sm:$0xff]   ;;  %v1359_v51 = vld [vmem:[%s2049_s0 + $0xc0] ss:$12 sps:$4 sm:$0xff]  }
  0x12   :  { %1273 = vmatprep.subr.bf16.mxu1 %v1315_v13  ;;  %v1357_v50 = vld [vmem:[%s2049_s0 + $0xc4] ss:$12 sps:$4 sm:$0xff]   ;;  %v1362_v52 = vld [vmem:[%s2049_s0 + $0xdc] ss:$12 sps:$4 sm:$0xff]  }
  0x13   :  { %1180 = vmatpush3.bf16.msra.mxu0 %v1314_v14  ;;  %v1364_v53 = vld [vmem:[%s2049_s0 + $0xd8] ss:$12 sps:$4 sm:$0xff]  }
  0x14   :  { %1181 = vmatprep.subr.bf16.mxu0 %v1316_v15 }
  0x15   :  { %1274 = vmatpush3.bf16.msra.mxu1 %v1315_v13 }
  0x16   :  { %1275 = vmatprep.subr.bf16.mxu1 %v1318_v16 }
  0x17   :  { %1182 = vmatpush3.bf16.msra.mxu0 %v1317_v17 }
  0x18   :  { %1183 = vmatprep.subr.bf16.mxu0 %v1319_v18 }
  0x19   :  { %1276 = vmatpush3.bf16.msra.mxu1 %v1318_v16 }
  0x1a   :  { %1277 = vmatprep.subr.bf16.mxu1 %v1321_v20 }
  0x1b   :  { %1184 = vmatpush3.bf16.msra.mxu0 %v1320_v19 }
  0x1c   :  { %1185 = vmatprep.subr.bf16.mxu0 %v1322_v21 }
  0x1d   :  { %1278 = vmatpush3.bf16.msra.mxu1 %v1321_v20 }
  0x1e   :  { %1279 = vmatprep.subr.bf16.mxu1 %v1324_v22 }
  0x1f   :  { %1186 = vmatpush3.bf16.msra.mxu0 %v1323_v25 }
  0x21   :  { %1280 = vmatpush3.bf16.msra.mxu1 %v1324_v22 }
  0x22   :  { %443 = vmatmul.mubr.bf16.vlgmr.msra.gmra.mrb[0].mxu0 %v1325_v26 }
  0x23   :  { %450 = vmatprep.mubr.bf16.mxu0 %v1330_v27 }
  0x24   :  { %1282 = vmatmul.mubr.bf16.vlgmr.msra.gmra.mrb[0].mxu1 %v1329_v28 }
  0x25   :  { %1285 = vmatprep.mubr.bf16.mxu1 %v1336_v29 }
  0x2a   :  { %451 = vmatmul.mubr.bf16.gmra.mrb[4].mxu0 %v1332_v30 }
  0x2b   :  { %458 = vmatprep.mubr.bf16.mxu0 %v1333_v31 }
  0x2c   :  { %1286 = vmatmul.mubr.bf16.gmra.mrb[4].mxu1 %v1337_v32 }
  0x2d   :  { %1289 = vmatprep.mubr.bf16.mxu1 %v1344_v33 }
  0x32   :  { %459 = vmatmul.mubr.bf16.gmra.mrb[8].mxu0 %v1335_v34 }
  0x33   :  { %466 = vmatprep.mubr.bf16.mxu0 %v1338_v35 }
  0x34   :  { %1290 = vmatmul.mubr.bf16.gmra.mrb[8].mxu1 %v1345_v36 }
  0x35   :  { %1293 = vmatprep.mubr.bf16.mxu1 %v1352_v37 }
  0x3a   :  { %467 = vmatmul.mubr.bf16.gmra.mrb[12].mxu0 %v1340_v38 }
  0x3b   :  { %474 = vmatprep.mubr.bf16.mxu0 %v1341_v39 }
  0x3c   :  { %1294 = vmatmul.mubr.bf16.gmra.mrb[12].mxu1 %v1353_v40 }
  0x3d   :  { %1297 = vmatprep.mubr.bf16.mxu1 %v1360_v41 }
  0x42   :  { %475 = vmatmul.mubr.bf16.gmra.mrb[16].mxu0 %v1343_v42 }
  0x43   :  { %482 = vmatprep.mubr.bf16.mxu0 %v1346_v43 }
  0x44   :  { %1298 = vmatmul.mubr.bf16.gmra.mrb[16].mxu1 %v1361_v44 }
  0x4a   :  { %483 = vmatmul.mubr.bf16.gmra.mrb[20].mxu0 %v1348_v45 }
  0x4b   :  { %490 = vmatprep.mubr.bf16.mxu0 %v1349_v46 }
  0x52   :  { %491 = vmatmul.mubr.bf16.gmra.mrb[24].mxu0 %v1351_v47 }
  0x53   :  { %498 = vmatprep.mubr.bf16.mxu0 %v1354_v48 }
  0x5a   :  { %499 = vmatmul.mubr.bf16.gmra.mrb[28].mxu0 %v1356_v49 }
  0x5b   :  { %506 = vmatprep.mubr.bf16.mxu0 %v1357_v50 }
  0x62   :  { %507 = vmatmul.mubr.bf16.gmra.mrb[32].mxu0 %v1359_v51 }
  0x63   :  { %514 = vmatprep.mubr.bf16.mxu0 %v1362_v52 }
  0x6a   :  { %515 = vmatmul.mubr.bf16.gmra.mrb[36].mxu0 %v1364_v53 }
  0xf5   :  { %v1187_v54 = vpop.f32.mrb[0].mxu0 }
  0xf6   :  { %v1188_v55 = vpop.f32.mrb[1].mxu0 }
  0xf7   :  { %v1189_v56 = vadd.f32 %v1188_v55, %v1187_v54  ;;  %v1190_v57 = vpop.f32.mrb[2].mxu0  ;;  %v1283_v58 = vpop.f32.mrb[0].mxu1 }
  0xf8   :  { %v1191_v59 = vpop.f32.mrb[3].mxu0  ;;  %v557_v60 = vpop.f32.mrb[1].mxu1 }
  0xf9   :  { %v1192_v61 = vadd.f32 %v1191_v59, %v1190_v57  ;;  %v1632_v62 = vadd.f32 %v1189_v56, %v557_v60  ;;  %v1284_v63 = vpop.f32.mrb[2].mxu1 }
  0xfa   :  { %v560_v0 = vpop.f32.mrb[3].mxu1 }
  0xfb   :  { %v1634_v1 = vadd.f32 %v1192_v61, %v560_v0  ;;  %638 = vadd.xlane.f32.xlu0 %v1632_v62 }
  0xfd   :  { %v1193_v2 = vpop.f32.mrb[4].mxu0 }
  0xfe   :  { %v1194_v3 = vpop.f32.mrb[5].mxu0 }
  0xff   :  { %v1195_v4 = vadd.f32 %v1194_v3, %v1193_v2  ;;  %v1196_v5 = vpop.f32.mrb[6].mxu0  ;;  %640 = vadd.xlane.f32.xlu0 %v1634_v1  ;;  %v1287_v6 = vpop.f32.mrb[4].mxu1 }
 0x100   :  { %v1197_v7 = vpop.f32.mrb[7].mxu0  ;;  %v573_v8 = vpop.f32.mrb[5].mxu1 }
 0x101   :  { %v1198_v9 = vadd.f32 %v1197_v7, %v1196_v5  ;;  %v1638_v10 = vadd.f32 %v1283_v58, %v1195_v4  ;;  %v1288_v11 = vpop.f32.mrb[6].mxu1 }
 0x102   :  { %v576_v12 = vpop.f32.mrb[7].mxu1 }
 0x103   :  { %642 = vadd.xlane.f32.xlu1 %v1638_v10  ;;  %v1641_v13 = vadd.f32 %v1284_v63, %v1198_v9 }
 0x105   :  { %v1199_v14 = vpop.f32.mrb[8].mxu0 }
 0x106   :  { %v1200_v15 = vpop.f32.mrb[9].mxu0 }
 0x107   :  { %v1201_v16 = vadd.f32 %v1200_v15, %v1199_v14  ;;  %v1202_v17 = vpop.f32.mrb[10].mxu0  ;;  %644 = vadd.xlane.f32.xlu1 %v1641_v13  ;;  %v1291_v18 = vpop.f32.mrb[8].mxu1 }
 0x108   :  { %v1203_v19 = vpop.f32.mrb[11].mxu0  ;;  %v589_v20 = vpop.f32.mrb[9].mxu1 }
 0x109   :  { %v1204_v21 = vadd.f32 %v1203_v19, %v1202_v17  ;;  %v1644_v22 = vadd.f32 %v1201_v16, %v573_v8  ;;  %v1292_v23 = vpop.f32.mrb[10].mxu1 }
 0x10a   :  { %v592_v24 = vpop.f32.mrb[11].mxu1 }
 0x10b   :  { %v1646_v25 = vadd.f32 %v1204_v21, %v576_v12  ;;  %646 = vadd.xlane.f32.xlu0 %v1644_v22 }
 0x10d   :  { %v1205_v26 = vpop.f32.mrb[12].mxu0  ;;  %648 = vadd.xlane.f32.xlu1 %v1646_v25 }
 0x10e   :  { %v1206_v27 = vpop.f32.mrb[13].mxu0 }
 0x10f   :  { %v1207_v28 = vadd.f32 %v1206_v27, %v1205_v26  ;;  %v1208_v29 = vpop.f32.mrb[14].mxu0  ;;  %v1295_v30 = vpop.f32.mrb[12].mxu1 }
 0x110   :  { %v1209_v31 = vpop.f32.mrb[15].mxu0  ;;  %v605_v32 = vpop.f32.mrb[13].mxu1 }
 0x111   :  { %v1210_v33 = vadd.f32 %v1209_v31, %v1208_v29  ;;  %v1650_v34 = vadd.f32 %v1287_v6, %v1207_v28  ;;  %v1296_v35 = vpop.f32.mrb[14].mxu1 }
 0x112   :  { %v608_v36 = vpop.f32.mrb[15].mxu1 }
 0x113   :  { %650 = vadd.xlane.f32.xlu0 %v1650_v34  ;;  %v1653_v37 = vadd.f32 %v1288_v11, %v1210_v33 }
 0x115   :  { %v1211_v38 = vpop.f32.mrb[16].mxu0  ;;  %652 = vadd.xlane.f32.xlu1 %v1653_v37 }
 0x116   :  { %v1212_v39 = vpop.f32.mrb[17].mxu0 }
 0x117   :  { %v1213_v40 = vadd.f32 %v1212_v39, %v1211_v38  ;;  %v1214_v41 = vpop.f32.mrb[18].mxu0  ;;  %v1299_v42 = vpop.f32.mrb[16].mxu1 }
 0x118   :  { %v1215_v43 = vpop.f32.mrb[19].mxu0  ;;  %v621_v44 = vpop.f32.mrb[17].mxu1 }
 0x119   :  { %v1216_v45 = vadd.f32 %v1215_v43, %v1214_v41  ;;  %v1656_v46 = vadd.f32 %v1213_v40, %v589_v20  ;;  %v1300_v47 = vpop.f32.mrb[18].mxu1 }
 0x11a   :  { %v624_v48 = vpop.f32.mrb[19].mxu1 }
 0x11b   :  { %v1658_v49 = vadd.f32 %v1216_v45, %v592_v24  ;;  %654 = vadd.xlane.f32.xlu0 %v1656_v46 }
 0x11d   :  { %v1217_v50 = vpop.f32.mrb[20].mxu0  ;;  %656 = vadd.xlane.f32.xlu1 %v1658_v49 }
 0x11e   :  { %v1218_v51 = vpop.f32.mrb[21].mxu0 }
 0x11f   :  { %v1219_v52 = vadd.f32 %v1218_v51, %v1217_v50  ;;  %v1220_v53 = vpop.f32.mrb[22].mxu0 }
 0x120   :  { %v1221_v54 = vpop.f32.mrb[23].mxu0 }
 0x121   :  { %v1222_v55 = vadd.f32 %v1221_v54, %v1220_v53  ;;  %v1662_v56 = vadd.f32 %v1291_v18, %v1219_v52 }
 0x123   :  { %658 = vadd.xlane.f32.xlu0 %v1662_v56  ;;  %v1665_v57 = vadd.f32 %v1292_v23, %v1222_v55 }
 0x125   :  { %v1223_v58 = vpop.f32.mrb[24].mxu0  ;;  %660 = vadd.xlane.f32.xlu1 %v1665_v57 }
 0x126   :  { %v1224_v59 = vpop.f32.mrb[25].mxu0 }
 0x127   :  { %v1225_v60 = vadd.f32 %v1224_v59, %v1223_v58  ;;  %v1226_v61 = vpop.f32.mrb[26].mxu0 }
 0x128   :  { %v1227_v63 = vpop.f32.mrb[27].mxu0 }
 0x129   :  { %v1228_v0 = vadd.f32 %v1227_v63, %v1226_v61  ;;  %v1668_v2 = vadd.f32 %v1225_v60, %v605_v32 }
 0x12b   :  { %v1670_v3 = vadd.f32 %v1228_v0, %v608_v36  ;;  %662 = vadd.xlane.f32.xlu0 %v1668_v2 }
 0x12d   :  { %v1229_v4 = vpop.f32.mrb[28].mxu0  ;;  %664 = vadd.xlane.f32.xlu1 %v1670_v3 }
 0x12e   :  { %v1230_v5 = vpop.f32.mrb[29].mxu0 }
 0x12f   :  { %v1231_v6 = vadd.f32 %v1230_v5, %v1229_v4  ;;  %v1232_v7 = vpop.f32.mrb[30].mxu0 }
 0x130   :  { %v1233_v8 = vpop.f32.mrb[31].mxu0 }
 0x131   :  { %v1234_v9 = vadd.f32 %v1233_v8, %v1232_v7  ;;  %v1674_v11 = vadd.f32 %v1295_v30, %v1231_v6 }
 0x133   :  { %666 = vadd.xlane.f32.xlu0 %v1674_v11  ;;  %v1677_v12 = vadd.f32 %v1296_v35, %v1234_v9 }
 0x135   :  { %v1235_v14 = vpop.f32.mrb[32].mxu0  ;;  %668 = vadd.xlane.f32.xlu1 %v1677_v12 }
 0x136   :  { %v1236_v15 = vpop.f32.mrb[33].mxu0 }
 0x137   :  { %v1237_v16 = vadd.f32 %v1236_v15, %v1235_v14  ;;  %v1238_v17 = vpop.f32.mrb[34].mxu0 }
 0x138   :  { %v1239_v18 = vpop.f32.mrb[35].mxu0 }
 0x139   :  { %v1240_v19 = vadd.f32 %v1239_v18, %v1238_v17  ;;  %v1680_v20 = vadd.f32 %v1237_v16, %v621_v44 }
 0x13b   :  { %v1682_v21 = vadd.f32 %v1240_v19, %v624_v48  ;;  %670 = vadd.xlane.f32.xlu0 %v1680_v20 }
 0x13d   :  { %v1241_v23 = vpop.f32.mrb[36].mxu0  ;;  %672 = vadd.xlane.f32.xlu1 %v1682_v21 }
 0x13e   :  { %v1242_v24 = vpop.f32.mrb[37].mxu0 }
 0x13f   :  { %v1243_v26 = vadd.f32 %v1242_v24, %v1241_v23  ;;  %v1244_v27 = vpop.f32.mrb[38].mxu0 }
 0x140   :  { %v1245_v28 = vpop.f32.mrb[39].mxu0 }
 0x141   :  { %v1246_v29 = vadd.f32 %v1245_v28, %v1244_v27  ;;  %v1686_v30 = vadd.f32 %v1299_v42, %v1243_v26 }
 0x143   :  { %674 = vadd.xlane.f32.xlu0 %v1686_v30  ;;  %v1689_v31 = vadd.f32 %v1300_v47, %v1246_v29 }
 0x145   :  { %676 = vadd.xlane.f32.xlu1 %v1689_v31 }
 0x188   :  { %v639_v32 = vpop.xlane.xlu0 %638 }
 0x189   :  { %v679_v33 = vmul.f32 0.0078125, %v639_v32 }
 0x18b   :  { %v1693_v35 = vsub.f32 %v1632_v62, %v679_v33 }
 0x18c   :  { %v641_v36 = vpop.xlane.xlu0 %640 }
 0x18d   :  { %v680_v38 = vmul.f32 0.0078125, %v641_v36  ;;  %v719_v39 = vmul.f32 %v1693_v35, %v1693_v35 }
 0x18f   :  { %v1698_v40 = vsub.f32 %v1634_v1, %v680_v38  ;;  %739 = vadd.xlane.f32.xlu0 %v719_v39 }
 0x190   :  { %v643_v41 = vpop.xlane.xlu1 %642 }
 0x191   :  { %v681_v42 = vmul.f32 0.0078125, %v643_v41  ;;  %v720_v43 = vmul.f32 %v1698_v40, %v1698_v40 }
 0x193   :  { %v1703_v44 = vsub.f32 %v1638_v10, %v681_v42  ;;  %741 = vadd.xlane.f32.xlu1 %v720_v43 }
 0x194   :  { %v645_v62 = vpop.xlane.xlu1 %644 }
 0x195   :  { %v682_v45 = vmul.f32 0.0078125, %v645_v62  ;;  %v721_v47 = vmul.f32 %v1703_v44, %v1703_v44 }
 0x197   :  { %v1708_v48 = vsub.f32 %v1641_v13, %v682_v45  ;;  %743 = vadd.xlane.f32.xlu0 %v721_v47 }
 0x198   :  { %v647_v1 = vpop.xlane.xlu0 %646 }
 0x199   :  { %v683_v50 = vmul.f32 0.0078125, %v647_v1  ;;  %v722_v51 = vmul.f32 %v1708_v48, %v1708_v48 }
 0x19a   :  { %v649_v52 = vpop.xlane.xlu1 %648 }
 0x19b   :  { %v1713_v53 = vsub.f32 %v1644_v22, %v683_v50  ;;  %v684_v10 = vmul.f32 0.0078125, %v649_v52  ;;  %745 = vadd.xlane.f32.xlu1 %v722_v51 }
 0x19d   :  { %v1716_v54 = vsub.f32 %v1646_v25, %v684_v10  ;;  %v723_v55 = vmul.f32 %v1713_v53, %v1713_v53 }
 0x19f   :  { %747 = vadd.xlane.f32.xlu0 %v723_v55  ;;  %v724_v13 = vmul.f32 %v1716_v54, %v1716_v54 }
 0x1a0   :  { %v651_v58 = vpop.xlane.xlu0 %650 }
 0x1a1   :  { %v685_v59 = vmul.f32 0.0078125, %v651_v58  ;;  %749 = vadd.xlane.f32.xlu1 %v724_v13 }
 0x1a2   :  { %v653_v60 = vpop.xlane.xlu1 %652 }
 0x1a3   :  { %v1723_v61 = vsub.f32 %v1650_v34, %v685_v59  ;;  %v686_v22 = vmul.f32 0.0078125, %v653_v60 }
 0x1a5   :  { %v1726_v63 = vsub.f32 %v1653_v37, %v686_v22  ;;  %v725_v25 = vmul.f32 %v1723_v61, %v1723_v61 }
 0x1a7   :  { %751 = vadd.xlane.f32.xlu0 %v725_v25  ;;  %v726_v0 = vmul.f32 %v1726_v63, %v1726_v63 }
 0x1a8   :  { %v655_v4 = vpop.xlane.xlu0 %654 }
 0x1a9   :  { %v687_v5 = vmul.f32 0.0078125, %v655_v4  ;;  %753 = vadd.xlane.f32.xlu1 %v726_v0 }
 0x1aa   :  { %v657_v6 = vpop.xlane.xlu1 %656 }
 0x1ab   :  { %v1733_v7 = vsub.f32 %v1656_v46, %v687_v5  ;;  %v688_v34 = vmul.f32 0.0078125, %v657_v6 }
 0x1ad   :  { %v1736_v8 = vsub.f32 %v1658_v49, %v688_v34  ;;  %v727_v37 = vmul.f32 %v1733_v7, %v1733_v7 }
 0x1af   :  { %755 = vadd.xlane.f32.xlu0 %v727_v37  ;;  %v728_v9 = vmul.f32 %v1736_v8, %v1736_v8  ;;  %v1795_v37 = vld [vmem:[%s2050_s2] ss:$0 sm:$0xff] }
 0x1b0   :  { %v659_v14 = vpop.xlane.xlu0 %658 }
 0x1b1   :  { %v689_v15 = vmul.f32 0.0078125, %v659_v14  ;;  %757 = vadd.xlane.f32.xlu1 %v728_v9 }
 0x1b2   :  { %v661_v16 = vpop.xlane.xlu1 %660 }
 0x1b3   :  { %v1743_v17 = vsub.f32 %v1662_v56, %v689_v15  ;;  %v690_v46 = vmul.f32 0.0078125, %v661_v16  ;;  %v1801_v16 = vld [vmem:[%s2051_s3] ss:$0 sm:$0xff] }
 0x1b5   :  { %v1746_v18 = vsub.f32 %v1665_v57, %v690_v46  ;;  %v729_v49 = vmul.f32 %v1743_v17, %v1743_v17 }
 0x1b7   :  { %759 = vadd.xlane.f32.xlu0 %v729_v49  ;;  %v730_v19 = vmul.f32 %v1746_v18, %v1746_v18 }
 0x1b8   :  { %v663_v23 = vpop.xlane.xlu0 %662 }
 0x1b9   :  { %v691_v24 = vmul.f32 0.0078125, %v663_v23  ;;  %761 = vadd.xlane.f32.xlu1 %v730_v19 }
 0x1ba   :  { %v665_v26 = vpop.xlane.xlu1 %664 }
 0x1bb   :  { %v1753_v27 = vsub.f32 %v1668_v2, %v691_v24  ;;  %v692_v56 = vmul.f32 0.0078125, %v665_v26 }
 0x1bd   :  { %v1756_v28 = vsub.f32 %v1670_v3, %v692_v56  ;;  %v731_v57 = vmul.f32 %v1753_v27, %v1753_v27 }
 0x1bf   :  { %763 = vadd.xlane.f32.xlu0 %v731_v57  ;;  %v732_v29 = vmul.f32 %v1756_v28, %v1756_v28 }
 0x1c0   :  { %v667_v32 = vpop.xlane.xlu0 %666 }
 0x1c1   :  { %v693_v33 = vmul.f32 0.0078125, %v667_v32  ;;  %765 = vadd.xlane.f32.xlu1 %v732_v29 }
 0x1c2   :  { %v669_v36 = vpop.xlane.xlu1 %668 }
 0x1c3   :  { %v1763_v38 = vsub.f32 %v1674_v11, %v693_v33  ;;  %v694_v2 = vmul.f32 0.0078125, %v669_v36 }
 0x1c5   :  { %v1766_v39 = vsub.f32 %v1677_v12, %v694_v2  ;;  %v733_v3 = vmul.f32 %v1763_v38, %v1763_v38 }
 0x1c7   :  { %767 = vadd.xlane.f32.xlu0 %v733_v3  ;;  %v734_v41 = vmul.f32 %v1766_v39, %v1766_v39 }
 0x1c8   :  { %v671_v42 = vpop.xlane.xlu0 %670 }
 0x1c9   :  { %v695_v43 = vmul.f32 0.0078125, %v671_v42  ;;  %769 = vadd.xlane.f32.xlu1 %v734_v41 }
 0x1ca   :  { %v673_v62 = vpop.xlane.xlu1 %672 }
 0x1cb   :  { %v1773_v45 = vsub.f32 %v1680_v20, %v695_v43  ;;  %v696_v11 = vmul.f32 0.0078125, %v673_v62 }
 0x1cd   :  { %v1776_v47 = vsub.f32 %v1682_v21, %v696_v11  ;;  %v735_v12 = vmul.f32 %v1773_v45, %v1773_v45 }
 0x1cf   :  { %771 = vadd.xlane.f32.xlu0 %v735_v12  ;;  %v736_v1 = vmul.f32 %v1776_v47, %v1776_v47 }
 0x1d0   :  { %v675_v50 = vpop.xlane.xlu0 %674 }
 0x1d1   :  { %v697_v51 = vmul.f32 0.0078125, %v675_v50  ;;  %773 = vadd.xlane.f32.xlu1 %v736_v1 }
 0x1d2   :  { %v677_v52 = vpop.xlane.xlu1 %676 }
 0x1d3   :  { %v1783_v10 = vsub.f32 %v1686_v30, %v697_v51  ;;  %v698_v20 = vmul.f32 0.0078125, %v677_v52 }
 0x1d5   :  { %v1786_v55 = vsub.f32 %v1689_v31, %v698_v20  ;;  %v737_v21 = vmul.f32 %v1783_v10, %v1783_v10 }
 0x1d7   :  { %775 = vadd.xlane.f32.xlu0 %v737_v21  ;;  %v738_v13 = vmul.f32 %v1786_v55, %v1786_v55 }
 0x1d9   :  { %777 = vadd.xlane.f32.xlu1 %v738_v13 }
 0x21c   :  { %v740_v58 = vpop.xlane.xlu0 %739 }
 0x21d   :  { %v779_v59 = vmul.f32 0.0078125, %v740_v58 }
 0x21f   :  { %v799_v60 = vadd.f32 1e-05, %v779_v59 }
 0x220   :  { %v742_v22 = vpop.xlane.xlu1 %741 }
 0x221   :  { %1365 = vrsqrt.f32 %v799_v60  ;;  %v780_v25 = vmul.f32 0.0078125, %v742_v22 }
 0x223   :  { %v800_v30 = vadd.f32 1e-05, %v780_v25 }
 0x224   :  { %v744_v0 = vpop.xlane.xlu0 %743 }
 0x225   :  { %1367 = vrsqrt.f32 %v800_v30  ;;  %v781_v4 = vmul.f32 0.0078125, %v744_v0 }
 0x227   :  { %v801_v31 = vadd.f32 1e-05, %v781_v4 }
 0x228   :  { %v746_v5 = vpop.xlane.xlu1 %745 }
 0x229   :  { %1369 = vrsqrt.f32 %v801_v31  ;;  %v782_v6 = vmul.f32 0.0078125, %v746_v5 }
 0x22b   :  { %v1366_v34 = vpop.eup %1365  ;;  %v802_v9 = vadd.f32 1e-05, %v782_v6 }
 0x22c   :  { %v839_v14 = vmul.f32 %v1366_v34, %v1693_v35  ;;  %v748_v15 = vpop.xlane.xlu0 %747 }
 0x22d   :  { %1371 = vrsqrt.f32 %v802_v9  ;;  %v783_v46 = vmul.f32 0.0078125, %v748_v15 }
 0x22e   :  { %v865_v49 = vmul.f32 %v1795_v37, %v839_v14  ;;  %v750_v19 = vpop.xlane.xlu1 %749 }
 0x22f   :  { %v1368_v23 = vpop.eup %1367  ;;  %v803_v24 = vadd.f32 1e-05, %v783_v46  ;;  %v784_v26 = vmul.f32 0.0078125, %v750_v19 }
 0x230   :  { %v1805_v56 = vadd.f32 %v1801_v16, %v865_v49  ;;  %v840_v57 = vmul.f32 %v1368_v23, %v1698_v40 }
 0x231   :  { %1373 = vrsqrt.f32 %v803_v24  ;;  %v804_v35 = vadd.f32 1e-05, %v784_v26 }
 0x232   :  { %v931_v29 = vmul.f32 0.044715, %v1805_v56  ;;  %v866_v32 = vmul.f32 %v1795_v37, %v840_v57 }
 0x233   :  { %v1370_v33 = vpop.eup %1369  ;;  %1375 = vrsqrt.f32 %v804_v35 }
 0x234   :  { %v951_v36 = vmul.f32 %v931_v29, %v1805_v56  ;;  %v1812_v2 = vadd.f32 %v1801_v16, %v866_v32  ;;  %v841_v3 = vmul.f32 %v1370_v33, %v1703_v44  ;;  %v752_v41 = vpop.xlane.xlu0 %751 }
 0x235   :  { %v785_v42 = vmul.f32 0.0078125, %v752_v41 }
 0x236   :  { %v971_v43 = vmul.f32 %v951_v36, %v1805_v56  ;;  %v932_v40 = vmul.f32 0.044715, %v1812_v2  ;;  %v867_v62 = vmul.f32 %v1795_v37, %v841_v3  ;;  %v754_v11 = vpop.xlane.xlu1 %753 }
 0x237   :  { %v1372_v12 = vpop.eup %1371  ;;  %v805_v1 = vadd.f32 1e-05, %v785_v42  ;;  %v786_v50 = vmul.f32 0.0078125, %v754_v11 }
 0x238   :  { %v991_v51 = vadd.f32 %v971_v43, %v1805_v56  ;;  %v952_v52 = vmul.f32 %v932_v40, %v1812_v2  ;;  %v1821_v20 = vadd.f32 %v1801_v16, %v867_v62  ;;  %v842_v44 = vmul.f32 %v1372_v12, %v1708_v48 }
 0x239   :  { %1377 = vrsqrt.f32 %v805_v1  ;;  %v806_v21 = vadd.f32 1e-05, %v786_v50  ;;  %v911_v12 = vmul.f32 0.5, %v1805_v56 }
 0x23a   :  { %v1011_v13 = vmul.f32 0.7978846, %v991_v51  ;;  %v972_v58 = vmul.f32 %v952_v52, %v1812_v2  ;;  %v933_v59 = vmul.f32 0.044715, %v1821_v20  ;;  %v868_v22 = vmul.f32 %v1795_v37, %v842_v44 }
 0x23b   :  { %v1374_v60 = vpop.eup %1373  ;;  %1379 = vrsqrt.f32 %v806_v21 }
 0x23c   :  { %1381 = vtanh.f32 %v1011_v13  ;;  %v992_v25 = vadd.f32 %v972_v58, %v1812_v2  ;;  %v953_v30 = vmul.f32 %v933_v59, %v1821_v20  ;;  %v843_v0 = vmul.f32 %v1374_v60, %v1713_v53  ;;  %v756_v4 = vpop.xlane.xlu0 %755 }
 0x23d   :  { %v1376_v48 = vpop.eup %1375  ;;  %v1831_v31 = vadd.f32 %v1801_v16, %v868_v22  ;;  %v787_v5 = vmul.f32 0.0078125, %v756_v4 }
 0x23e   :  { %v1012_v6 = vmul.f32 0.7978846, %v992_v25  ;;  %v973_v34 = vmul.f32 %v953_v30, %v1821_v20  ;;  %v869_v9 = vmul.f32 %v1795_v37, %v843_v0  ;;  %v844_v14 = vmul.f32 %v1376_v48, %v1716_v54  ;;  %v758_v15 = vpop.xlane.xlu1 %757 }
 0x23f   :  { %v934_v46 = vmul.f32 0.044715, %v1831_v31  ;;  %v807_v49 = vadd.f32 1e-05, %v787_v5  ;;  %v788_v19 = vmul.f32 0.0078125, %v758_v15  ;;  %v912_v5 = vmul.f32 0.5, %v1812_v2 }
 0x240   :  { %1383 = vtanh.f32 %v1012_v6  ;;  %v993_v53 = vadd.f32 %v973_v34, %v1821_v20  ;;  %v1839_v23 = vadd.f32 %v1801_v16, %v869_v9  ;;  %v870_v24 = vmul.f32 %v1795_v37, %v844_v14 }
 0x241   :  { %v954_v26 = vmul.f32 %v934_v46, %v1831_v31  ;;  %1385 = vrsqrt.f32 %v807_v49  ;;  %v808_v57 = vadd.f32 1e-05, %v788_v19  ;;  %v913_v14 = vmul.f32 0.5, %v1821_v20 }
 0x242   :  { %v1013_v35 = vmul.f32 0.7978846, %v993_v53  ;;  %v935_v54 = vmul.f32 0.044715, %v1839_v23  ;;  %v1845_v29 = vadd.f32 %v1801_v16, %v870_v24 }
 0x243   :  { %v1378_v32 = vpop.eup %1377  ;;  %v974_v33 = vmul.f32 %v954_v26, %v1831_v31  ;;  %1387 = vrsqrt.f32 %v808_v57 }
 0x244   :  { %1389 = vtanh.f32 %v1013_v35  ;;  %v955_v36 = vmul.f32 %v935_v54, %v1839_v23  ;;  %v936_v3 = vmul.f32 0.044715, %v1845_v29  ;;  %v760_v41 = vpop.xlane.xlu0 %759  ;;  %v845_v40 = vmul.f32 %v1378_v32, %v1723_v61 }
 0x245   :  { %v1380_v42 = vpop.eup %1379  ;;  %v994_v43 = vadd.f32 %v974_v33, %v1831_v31  ;;  %v789_v62 = vmul.f32 0.0078125, %v760_v41 }
 0x246   :  { %v1382_v11 = vpop.eup %1381  ;;  %v975_v1 = vmul.f32 %v955_v36, %v1839_v23  ;;  %v956_v50 = vmul.f32 %v936_v3, %v1845_v29  ;;  %v846_v51 = vmul.f32 %v1380_v42, %v1726_v63  ;;  %v762_v52 = vpop.xlane.xlu1 %761  ;;  %v871_v13 = vmul.f32 %v1795_v37, %v845_v40 }
 0x247   :  { %v1051_v44 = vadd.f32 1.0, %v1382_v11  ;;  %v1014_v21 = vmul.f32 0.7978846, %v994_v43  ;;  %v809_v58 = vadd.f32 1e-05, %v789_v62  ;;  %v790_v22 = vmul.f32 0.0078125, %v762_v52 }
 0x248   :  { %v995_v59 = vadd.f32 %v975_v1, %v1839_v23  ;;  %v976_v61 = vmul.f32 %v956_v50, %v1845_v29  ;;  %v872_v60 = vmul.f32 %v1795_v37, %v846_v51  ;;  %v1861_v25 = vadd.f32 %v1801_v16, %v871_v13 }
 0x249   :  { %v1071_v56 = vmul.f32 %v1051_v44, %v911_v12  ;;  %1391 = vtanh.f32 %v1014_v21  ;;  %v810_v9 = vadd.f32 1e-05, %v790_v22  ;;  %v914_v44 = vmul.f32 0.5, %v1831_v31 }
 0x24a   :  { %v1384_v30 = vpop.eup %1383  ;;  %v1015_v63 = vmul.f32 0.7978846, %v995_v59  ;;  %v996_v0 = vadd.f32 %v976_v61, %v1845_v29  ;;  %v1865_v4 = vadd.f32 %v1801_v16, %v872_v60  ;;  %1393 = vrsqrt.f32 %v809_v58 }
 0x24b   :  { %v1386_v48 = vpop.eup %1385  ;;  %1091 = vst [vmem:[%s2052_s4] sm:$0xff] %v1071_v56  ;;  %v1052_v6 = vadd.f32 1.0, %v1384_v30  ;;  %v937_v34 = vmul.f32 0.044715, %v1861_v25 }
 0x24c   :  { %1395 = vtanh.f32 %v1015_v63  ;;  %v1016_v15 = vmul.f32 0.7978846, %v996_v0  ;;  %v938_v46 = vmul.f32 0.044715, %v1865_v4  ;;  %v764_v49 = vpop.xlane.xlu0 %763  ;;  %v847_v26 = vmul.f32 %v1386_v48, %v1733_v7 }
 0x24d   :  { %v1388_v19 = vpop.eup %1387  ;;  %v1072_v53 = vmul.f32 %v1052_v6, %v912_v5  ;;  %v957_v24 = vmul.f32 %v937_v34, %v1861_v25  ;;  %1397 = vrsqrt.f32 %v810_v9  ;;  %v791_v54 = vmul.f32 0.0078125, %v764_v49 }
 0x24e   :  { %v1390_v57 = vpop.eup %1389  ;;  %1399 = vtanh.f32 %v1016_v15  ;;  %v958_v2 = vmul.f32 %v938_v46, %v1865_v4  ;;  %v848_v35 = vmul.f32 %v1388_v19, %v1736_v8  ;;  %v766_v20 = vpop.xlane.xlu1 %765  ;;  %v873_v36 = vmul.f32 %v1795_v37, %v847_v26 }
 0x24f   :  { %1092 = vst [vmem:[%s2052_s4 + $0x8] sm:$0xff] %v1072_v53  ;;  %v1053_v32 = vadd.f32 1.0, %v1390_v57  ;;  %v977_v33 = vmul.f32 %v957_v24, %v1861_v25  ;;  %v792_v3 = vmul.f32 0.0078125, %v766_v20  ;;  %v811_v42 = vadd.f32 1e-05, %v791_v54 }
 0x250   :  { %v978_v7 = vmul.f32 %v958_v2, %v1865_v4  ;;  %v874_v41 = vmul.f32 %v1795_v37, %v848_v35  ;;  %v1887_v40 = vadd.f32 %v1801_v16, %v873_v36  ;;  %v915_v63 = vmul.f32 0.5, %v1839_v23 }
 0x251   :  { %v1073_v43 = vmul.f32 %v1053_v32, %v913_v14  ;;  %v997_v8 = vadd.f32 %v977_v33, %v1861_v25  ;;  %v812_v62 = vadd.f32 1e-05, %v792_v3  ;;  %1401 = vrsqrt.f32 %v811_v42 }
 0x252   :  { %v998_v11 = vadd.f32 %v978_v7, %v1865_v4  ;;  %v1891_v12 = vadd.f32 %v1801_v16, %v874_v41  ;;  %v939_v51 = vmul.f32 0.044715, %v1887_v40  ;;  %v917_v42 = vmul.f32 0.5, %v1861_v25 }
 0x253   :  { %v1392_v1 = vpop.eup %1391  ;;  %1093 = vst [vmem:[%s2052_s4 + $0x10] sm:$0xff] %v1073_v43  ;;  %v1017_v50 = vmul.f32 0.7978846, %v997_v8  ;;  %1403 = vrsqrt.f32 %v812_v62 }
 0x254   :  { %v1394_v52 = vpop.eup %1393  ;;  %v1054_v21 = vadd.f32 1.0, %v1392_v1  ;;  %v1018_v13 = vmul.f32 0.7978846, %v998_v11  ;;  %v940_v58 = vmul.f32 0.044715, %v1891_v12  ;;  %v768_v59 = vpop.xlane.xlu0 %767  ;;  %v959_v61 = vmul.f32 %v939_v51, %v1887_v40 }
 0x255   :  { %1405 = vtanh.f32 %v1017_v50  ;;  %v849_v60 = vmul.f32 %v1394_v52, %v1743_v17  ;;  %v793_v22 = vmul.f32 0.0078125, %v768_v59  ;;  %v916_v17 = vmul.f32 0.5, %v1845_v29 }
 0x256   :  { %v1396_v56 = vpop.eup %1395  ;;  %v1074_v30 = vmul.f32 %v1054_v21, %v914_v44  ;;  %1407 = vtanh.f32 %v1018_v13  ;;  %v960_v0 = vmul.f32 %v940_v58, %v1891_v12  ;;  %v770_v48 = vpop.xlane.xlu1 %769  ;;  %v979_v6 = vmul.f32 %v959_v61, %v1887_v40 }
 0x257   :  { %v1398_v31 = vpop.eup %1397  ;;  %v1055_v5 = vadd.f32 1.0, %v1396_v56  ;;  %v875_v34 = vmul.f32 %v1795_v37, %v849_v60  ;;  %v813_v9 = vadd.f32 1e-05, %v793_v22  ;;  %v794_v46 = vmul.f32 0.0078125, %v770_v48 }
 0x258   :  { %v1400_v14 = vpop.eup %1399  ;;  %1094 = vst [vmem:[%s2052_s4 + $0x18] sm:$0xff] %v1074_v30  ;;  %v980_v23 = vmul.f32 %v960_v0, %v1891_v12  ;;  %v850_v15 = vmul.f32 %v1398_v31, %v1746_v18  ;;  %v999_v53 = vadd.f32 %v979_v6, %v1887_v40 }
 0x259   :  { %v1075_v49 = vmul.f32 %v1055_v5, %v915_v63  ;;  %v1056_v19 = vadd.f32 1.0, %v1400_v14  ;;  %v1913_v24 = vadd.f32 %v1801_v16, %v875_v34  ;;  %1409 = vrsqrt.f32 %v813_v9 }
 0x25a   :  { %v1000_v26 = vadd.f32 %v980_v23, %v1891_v12  ;;  %v876_v57 = vmul.f32 %v1795_v37, %v850_v15  ;;  %v814_v2 = vadd.f32 1e-05, %v794_v46  ;;  %v1019_v18 = vmul.f32 0.7978846, %v999_v53 }
 0x25b   :  { %1095 = vst [vmem:[%s2052_s4 + $0x20] sm:$0xff] %v1075_v49  ;;  %v1076_v29 = vmul.f32 %v1056_v19, %v916_v17  ;;  %v941_v35 = vmul.f32 0.044715, %v1913_v24  ;;  %v1402_v54 = vpop.eup %1401  ;;  %v919_v17 = vmul.f32 0.5, %v1887_v40  ;;  %v920_v23 = vmul.f32 0.5, %v1891_v12 }
 0x25c   :  { %v1020_v20 = vmul.f32 0.7978846, %v1000_v26  ;;  %v1922_v32 = vadd.f32 %v1801_v16, %v876_v57  ;;  %1411 = vrsqrt.f32 %v814_v2  ;;  %v772_v33 = vpop.xlane.xlu0 %771  ;;  %v851_v7 = vmul.f32 %v1402_v54, %v1753_v27 }
 0x25d   :  { %v1404_v36 = vpop.eup %1403  ;;  %1096 = vst [vmem:[%s2052_s4 + $0x28] sm:$0xff] %v1076_v29  ;;  %1413 = vtanh.f32 %v1019_v18  ;;  %v961_v3 = vmul.f32 %v941_v35, %v1913_v24  ;;  %v795_v41 = vmul.f32 0.0078125, %v772_v33  ;;  %v918_v27 = vmul.f32 0.5, %v1865_v4 }
 0x25e   :  { %1415 = vtanh.f32 %v1020_v20  ;;  %v942_v43 = vmul.f32 0.044715, %v1922_v32  ;;  %v852_v8 = vmul.f32 %v1404_v36, %v1756_v28  ;;  %v774_v62 = vpop.xlane.xlu1 %773  ;;  %v877_v50 = vmul.f32 %v1795_v37, %v851_v7 }
 0x25f   :  { %v1406_v11 = vpop.eup %1405  ;;  %v981_v1 = vmul.f32 %v961_v3, %v1913_v24  ;;  %v815_v51 = vadd.f32 1e-05, %v795_v41  ;;  %v796_v52 = vmul.f32 0.0078125, %v774_v62 }
 0x260   :  { %v1408_v44 = vpop.eup %1407  ;;  %v1057_v21 = vadd.f32 1.0, %v1406_v11  ;;  %v962_v13 = vmul.f32 %v942_v43, %v1922_v32  ;;  %v878_v25 = vmul.f32 %v1795_v37, %v852_v8  ;;  %v1939_v28 = vadd.f32 %v1801_v16, %v877_v50 }
 0x261   :  { %v1058_v58 = vadd.f32 1.0, %v1408_v44  ;;  %v1001_v59 = vadd.f32 %v981_v1, %v1913_v24  ;;  %1417 = vrsqrt.f32 %v815_v51  ;;  %v816_v56 = vadd.f32 1e-05, %v796_v52 }
 0x262   :  { %v1077_v61 = vmul.f32 %v1057_v21, %v917_v42  ;;  %v982_v60 = vmul.f32 %v962_v13, %v1922_v32  ;;  %v1943_v22 = vadd.f32 %v1801_v16, %v878_v25  ;;  %v943_v63 = vmul.f32 0.044715, %v1939_v28 }
 0x263   :  { %v1078_v30 = vmul.f32 %v1058_v58, %v918_v27  ;;  %v1021_v4 = vmul.f32 0.7978846, %v1001_v59  ;;  %v1410_v0 = vpop.eup %1409  ;;  %1419 = vrsqrt.f32 %v816_v56 }
 0x264   :  { %1097 = vst [vmem:[%s2052_s4 + $0x30] sm:$0xff] %v1077_v61  ;;  %v1002_v48 = vadd.f32 %v982_v60, %v1922_v32  ;;  %v944_v31 = vmul.f32 0.044715, %v1943_v22  ;;  %v776_v5 = vpop.xlane.xlu0 %775  ;;  %v963_v6 = vmul.f32 %v943_v63, %v1939_v28  ;;  %v853_v34 = vmul.f32 %v1410_v0, %v1763_v38 }
 0x265   :  { %1098 = vst [vmem:[%s2052_s4 + $0x38] sm:$0xff] %v1078_v30  ;;  %1421 = vtanh.f32 %v1021_v4  ;;  %v797_v9 = vmul.f32 0.0078125, %v776_v5 }
 0x266   :  { %v1412_v14 = vpop.eup %1411  ;;  %v1022_v15 = vmul.f32 0.7978846, %v1002_v48  ;;  %v964_v46 = vmul.f32 %v944_v31, %v1943_v22  ;;  %v778_v49 = vpop.xlane.xlu1 %777  ;;  %v983_v53 = vmul.f32 %v963_v6, %v1939_v28  ;;  %v879_v26 = vmul.f32 %v1795_v37, %v853_v34 }
 0x267   :  { %v1414_v19 = vpop.eup %1413  ;;  %v854_v57 = vmul.f32 %v1412_v14, %v1766_v39  ;;  %v817_v2 = vadd.f32 1e-05, %v797_v9  ;;  %v798_v40 = vmul.f32 0.0078125, %v778_v49 }
 0x268   :  { %v1416_v29 = vpop.eup %1415  ;;  %v1059_v38 = vadd.f32 1.0, %v1414_v19  ;;  %1423 = vtanh.f32 %v1022_v15  ;;  %v984_v18 = vmul.f32 %v964_v46, %v1943_v22  ;;  %v1003_v12 = vadd.f32 %v983_v53, %v1939_v28 }
 0x269   :  { %v1060_v35 = vadd.f32 1.0, %v1416_v29  ;;  %v1965_v54 = vadd.f32 %v1801_v16, %v879_v26  ;;  %v880_v20 = vmul.f32 %v1795_v37, %v854_v57  ;;  %1425 = vrsqrt.f32 %v817_v2 }
 0x26a   :  { %v1079_v33 = vmul.f32 %v1059_v38, %v919_v17  ;;  %v1004_v36 = vadd.f32 %v984_v18, %v1943_v22  ;;  %v818_v39 = vadd.f32 1e-05, %v798_v40  ;;  %v1023_v41 = vmul.f32 0.7978846, %v1003_v12 }
 0x26b   :  { %v1418_v3 = vpop.eup %1417  ;;  %v1080_v7 = vmul.f32 %v1060_v35, %v920_v23  ;;  %v945_v42 = vmul.f32 0.044715, %v1965_v54  ;;  %v1974_v8 = vadd.f32 %v1801_v16, %v880_v20  ;;  %v923_v23 = vmul.f32 0.5, %v1939_v28 }
 0x26c   :  { %1099 = vst [vmem:[%s2052_s4 + $0x40] sm:$0xff] %v1079_v33  ;;  %v1024_v43 = vmul.f32 0.7978846, %v1004_v36  ;;  %v855_v62 = vmul.f32 %v1418_v3, %v1773_v45  ;;  %1427 = vrsqrt.f32 %v818_v39  ;;  %v921_v45 = vmul.f32 0.5, %v1913_v24 }
 0x26d   :  { %1100 = vst [vmem:[%s2052_s4 + $0x48] sm:$0xff] %v1080_v7  ;;  %1429 = vtanh.f32 %v1023_v41  ;;  %v965_v11 = vmul.f32 %v945_v42, %v1965_v54  ;;  %v1420_v1 = vpop.eup %1419  ;;  %v946_v50 = vmul.f32 0.044715, %v1974_v8  ;;  %v925_v39 = vmul.f32 0.5, %v1965_v54 }
 0x26e   :  { %1431 = vtanh.f32 %v1024_v43  ;;  %v881_v51 = vmul.f32 %v1795_v37, %v855_v62  ;;  %v856_v21 = vmul.f32 %v1420_v1, %v1776_v47  ;;  %v922_v47 = vmul.f32 0.5, %v1922_v32 }
 0x26f   :  { %v1422_v52 = vpop.eup %1421  ;;  %v985_v44 = vmul.f32 %v965_v11, %v1965_v54  ;;  %v966_v13 = vmul.f32 %v946_v50, %v1974_v8  ;;  %v926_v62 = vmul.f32 0.5, %v1974_v8 }
 0x270   :  { %v1061_v27 = vadd.f32 1.0, %v1422_v52  ;;  %v1988_v25 = vadd.f32 %v1801_v16, %v881_v51  ;;  %v882_v59 = vmul.f32 %v1795_v37, %v856_v21 }
 0x271   :  { %v1005_v58 = vadd.f32 %v985_v44, %v1965_v54  ;;  %v986_v56 = vmul.f32 %v966_v13, %v1974_v8 }
 0x272   :  { %v1424_v61 = vpop.eup %1423  ;;  %v1081_v60 = vmul.f32 %v1061_v27, %v921_v45  ;;  %v947_v30 = vmul.f32 0.044715, %v1988_v25  ;;  %v1996_v63 = vadd.f32 %v1801_v16, %v882_v59  ;;  %v927_v54 = vmul.f32 0.5, %v1988_v25 }
 0x273   :  { %v1062_v4 = vadd.f32 1.0, %v1424_v61  ;;  %v1025_v24 = vmul.f32 0.7978846, %v1005_v58  ;;  %v1426_v0 = vpop.eup %1425  ;;  %v1006_v48 = vadd.f32 %v986_v56, %v1974_v8 }
 0x274   :  { %1101 = vst [vmem:[%s2052_s4 + $0x50] sm:$0xff] %v1081_v60  ;;  %v967_v31 = vmul.f32 %v947_v30, %v1988_v25  ;;  %v948_v6 = vmul.f32 0.044715, %v1996_v63  ;;  %v857_v14 = vmul.f32 %v1426_v0, %v1783_v10  ;;  %v924_v10 = vmul.f32 0.5, %v1943_v22 }
 0x275   :  { %v1082_v5 = vmul.f32 %v1062_v4, %v922_v47  ;;  %1433 = vtanh.f32 %v1025_v24  ;;  %v1026_v32 = vmul.f32 0.7978846, %v1006_v48  ;;  %v928_v27 = vmul.f32 0.5, %v1996_v63 }
 0x276   :  { %v1428_v34 = vpop.eup %1427  ;;  %v987_v9 = vmul.f32 %v967_v31, %v1988_v25  ;;  %v968_v15 = vmul.f32 %v948_v6, %v1996_v63  ;;  %v883_v26 = vmul.f32 %v1795_v37, %v857_v14 }
 0x277   :  { %v1430_v17 = vpop.eup %1429  ;;  %1102 = vst [vmem:[%s2052_s4 + $0x58] sm:$0xff] %v1082_v5  ;;  %v858_v46 = vmul.f32 %v1428_v34, %v1786_v55  ;;  %1435 = vtanh.f32 %v1026_v32 }
 0x278   :  { %v1432_v49 = vpop.eup %1431  ;;  %v1063_v19 = vadd.f32 1.0, %v1430_v17  ;;  %v1007_v53 = vadd.f32 %v987_v9, %v1988_v25  ;;  %v988_v2 = vmul.f32 %v968_v15, %v1996_v63  ;;  %v909_v18 = vadd.f32 %v1801_v16, %v883_v26 }
 0x279   :  { %v1064_v57 = vadd.f32 1.0, %v1432_v49  ;;  %v884_v29 = vmul.f32 %v1795_v37, %v858_v46 }
 0x27a   :  { %v1083_v38 = vmul.f32 %v1063_v19, %v923_v23  ;;  %v1027_v28 = vmul.f32 0.7978846, %v1007_v53  ;;  %v1008_v55 = vadd.f32 %v988_v2, %v1996_v63  ;;  %v949_v22 = vmul.f32 0.044715, %v909_v18 }
 0x27b   :  { %v1084_v40 = vmul.f32 %v1064_v57, %v924_v10  ;;  %v910_v35 = vadd.f32 %v1801_v16, %v884_v29  ;;  %v929_v60 = vmul.f32 0.5, %v909_v18 }
 0x27c   :  { %1103 = vst [vmem:[%s2052_s4 + $0x60] sm:$0xff] %v1083_v38  ;;  %1437 = vtanh.f32 %v1027_v28  ;;  %v1028_v37 = vmul.f32 0.7978846, %v1008_v55  ;;  %v969_v20 = vmul.f32 %v949_v22, %v909_v18 }
 0x27d   :  { %1104 = vst [vmem:[%s2052_s4 + $0x68] sm:$0xff] %v1084_v40  ;;  %v950_v12 = vmul.f32 0.044715, %v910_v35  ;;  %v930_v56 = vmul.f32 0.5, %v910_v35 }
 0x27e   :  { %1439 = vtanh.f32 %v1028_v37  ;;  %v989_v16 = vmul.f32 %v969_v20, %v909_v18 }
 0x27f   :  { %v1434_v33 = vpop.eup %1433  ;;  %v970_v36 = vmul.f32 %v950_v12, %v910_v35 }
 0x280   :  { %v1065_v3 = vadd.f32 1.0, %v1434_v33  ;;  %v1009_v43 = vadd.f32 %v989_v16, %v909_v18 }
 0x281   :  { %v990_v7 = vmul.f32 %v970_v36, %v910_v35  ;;  %v1436_v41 = vpop.eup %1435 }
 0x282   :  { %v1085_v42 = vmul.f32 %v1065_v3, %v925_v39  ;;  %v1066_v11 = vadd.f32 1.0, %v1436_v41  ;;  %v1029_v50 = vmul.f32 0.7978846, %v1009_v43 }
 0x283   :  { %v1010_v1 = vadd.f32 %v990_v7, %v910_v35 }
 0x284   :  { %1105 = vst [vmem:[%s2052_s4 + $0x70] sm:$0xff] %v1085_v42  ;;  %v1086_v51 = vmul.f32 %v1066_v11, %v926_v62  ;;  %1441 = vtanh.f32 %v1029_v50 }
 0x285   :  { %v1030_v52 = vmul.f32 0.7978846, %v1010_v1 }
 0x286   :  { %v1438_v44 = vpop.eup %1437  ;;  %1106 = vst [vmem:[%s2052_s4 + $0x78] sm:$0xff] %v1086_v51 }
 0x287   :  { %v1067_v21 = vadd.f32 1.0, %v1438_v44  ;;  %1443 = vtanh.f32 %v1030_v52 }
 0x288   :  { %v1440_v8 = vpop.eup %1439 }
 0x289   :  { %v1087_v45 = vmul.f32 %v1067_v21, %v927_v54  ;;  %v1068_v13 = vadd.f32 1.0, %v1440_v8 }
 0x28b   :  { %1107 = vst [vmem:[%s2052_s4 + $0x80] sm:$0xff] %v1087_v45  ;;  %v1088_v58 = vmul.f32 %v1068_v13, %v928_v27 }
 0x28d   :  { %1108 = vst [vmem:[%s2052_s4 + $0x88] sm:$0xff] %v1088_v58 }
 0x28e   :  { %v1442_v59 = vpop.eup %1441 }
 0x28f   :  { %v1069_v25 = vadd.f32 1.0, %v1442_v59 }
 0x291   :  { %v1444_v61 = vpop.eup %1443  ;;  %v1089_v47 = vmul.f32 %v1069_v25, %v929_v60 }
 0x292   :  { %v1070_v30 = vadd.f32 1.0, %v1444_v61 }
 0x293   :  { %1109 = vst [vmem:[%s2052_s4 + $0x90] sm:$0xff] %v1089_v47 }
 0x294   :  { %v1090_v4 = vmul.f32 %v1070_v30, %v930_v56 }
 0x296   :  { %1110 = vst [vmem:[%s2052_s4 + $0x98] sm:$0xff] %v1090_v4 }

// kernel: wavlm_extract_features.14
= control target key start
LH: loop header
LB: loop body
LE: loop exit
PB: predicated region body
PF: predicated region fallthrough
CT: control target
= control target key end

     0   :  { %v927_v1 = vmov 0.0   ;;  %vm928_vm0 = vmmov 0   ;;  %s1259_s1 = inlined_call_operand.vmem [shape: bf16[384,128], index: 1, kind: input, shape index: {}]   ;;  %s1260_s0 = inlined_call_operand.vmem [shape: bf16[80,384], index: 0, kind: input, shape index: {}]   ;;  %s1261_s2 = inlined_call_operand.vmem [shape: f32[1,128], index: 2, kind: input, shape index: {}]   ;;  %s1262_s3 = inlined_call_operand.vmem [shape: f32[1,128], index: 3, kind: input, shape index: {}]   ;;  %s1263_s4 = inlined_call_operand.vmem [shape: f32[80,128], index: 4, kind: output, shape index: {}]  }
   0x1   :  { %v843_v0 = vld [vmem:[%s1259_s1 + $0x40] sm:$0xff]   ;;  %805 = vmatprep.subr.bf16.mxu1 %v927_v1  ;;  %821 = vmatprep.mubr.msk.bf16.mxu1 %vm928_vm0, %v927_v1  ;;  %v846_v4 = vld [vmem:[%s1259_s1 + $0x48] sm:$0xff]   ;;  %v849_v7 = vld [vmem:[%s1259_s1 + $0x50] sm:$0xff]  }
   0x2   :  { %v844_v2 = vld [vmem:[%s1259_s1] sm:$0xff]   ;;  %746 = vmatprep.subr.bf16.mxu0 %v843_v0  ;;  %v847_v5 = vld [vmem:[%s1259_s1 + $0x8] sm:$0xff]   ;;  %v850_v8 = vld [vmem:[%s1259_s1 + $0x10] sm:$0xff]  }
   0x3   :  { %v845_v3 = vld [vmem:[%s1259_s1 + $0x80] sm:$0xff]   ;;  %747 = vmatpush3.bf16.msra.mxu0 %v844_v2  ;;  %v848_v6 = vld [vmem:[%s1259_s1 + $0x88] sm:$0xff]   ;;  %v851_v9 = vld [vmem:[%s1259_s1 + $0x90] sm:$0xff]  }
   0x4   :  { %806 = vmatpush3.bf16.msra.mxu1 %v845_v3  ;;  %748 = vmatprep.subr.bf16.mxu0 %v846_v4  ;;  %v852_v10 = vld [vmem:[%s1259_s1 + $0x58] sm:$0xff]   ;;  %v855_v13 = vld [vmem:[%s1259_s1 + $0x60] sm:$0xff]   ;;  %v858_v16 = vld [vmem:[%s1259_s1 + $0x68] sm:$0xff]  }
   0x5   :  { %807 = vmatprep.subr.bf16.mxu1 %v927_v1  ;;  %v853_v11 = vld [vmem:[%s1259_s1 + $0x18] sm:$0xff]   ;;  %v856_v14 = vld [vmem:[%s1259_s1 + $0x20] sm:$0xff]   ;;  %v859_v17 = vld [vmem:[%s1259_s1 + $0x28] sm:$0xff]  }
   0x6   :  { %v854_v12 = vld [vmem:[%s1259_s1 + $0x98] sm:$0xff]   ;;  %v857_v15 = vld [vmem:[%s1259_s1 + $0xa0] sm:$0xff]   ;;  %v860_v18 = vld [vmem:[%s1259_s1 + $0xa8] sm:$0xff]  }
   0x7   :  { %749 = vmatpush3.bf16.msra.mxu0 %v847_v5  ;;  %v861_v19 = vld [vmem:[%s1259_s1 + $0x70] sm:$0xff]   ;;  %v864_v22 = vld [vmem:[%s1259_s1 + $0x78] sm:$0xff]   ;;  %v867_v26 = vld [vmem:[%s1260_s0] ss:$12 sps:$4 sm:$0xff]  }
   0x8   :  { %808 = vmatpush3.bf16.msra.mxu1 %v848_v6  ;;  %750 = vmatprep.subr.bf16.mxu0 %v849_v7  ;;  %v862_v20 = vld [vmem:[%s1259_s1 + $0x30] sm:$0xff]   ;;  %v865_v24 = vld [vmem:[%s1259_s1 + $0x38] sm:$0xff]   ;;  %v874_v30 = vld [vmem:[%s1260_s0 + $0x20] ss:$12 sps:$4 sm:$0xff]  }
   0x9   :  { %809 = vmatprep.subr.bf16.mxu1 %v927_v1  ;;  %v863_v21 = vld [vmem:[%s1259_s1 + $0xb0] sm:$0xff]   ;;  %v866_v25 = vld [vmem:[%s1259_s1 + $0xb8] sm:$0xff]   ;;  %v885_v38 = vld [vmem:[%s1260_s0 + $0x60] ss:$12 sps:$4 sm:$0xff]  }
   0xa   :  { %v869_v23 = vld [vmem:[%s1260_s0 + $0x4] ss:$12 sps:$4 sm:$0xff]   ;;  %v870_v27 = vld [vmem:[%s1260_s0 + $0x8] ss:$12 sps:$4 sm:$0xff]   ;;  %v879_v34 = vld [vmem:[%s1260_s0 + $0x4c] ss:$12 sps:$4 sm:$0xff]  }
   0xb   :  { %751 = vmatpush3.bf16.msra.mxu0 %v850_v8  ;;  %342 = vmatprep.mubr.bf16.mxu0 %v869_v23  ;;  %v871_v28 = vld [vmem:[%s1260_s0 + $0x1c] ss:$12 sps:$4 sm:$0xff]   ;;  %v873_v29 = vld [vmem:[%s1260_s0 + $0x18] ss:$12 sps:$4 sm:$0xff]   ;;  %v875_v31 = vld [vmem:[%s1260_s0 + $0x34] ss:$12 sps:$4 sm:$0xff]  }
   0xc   :  { %810 = vmatpush3.bf16.msra.mxu1 %v851_v9  ;;  %752 = vmatprep.subr.bf16.mxu0 %v852_v10  ;;  %v877_v32 = vld [vmem:[%s1260_s0 + $0x30] ss:$12 sps:$4 sm:$0xff]   ;;  %v878_v33 = vld [vmem:[%s1260_s0 + $0x38] ss:$12 sps:$4 sm:$0xff]   ;;  %v881_v35 = vld [vmem:[%s1260_s0 + $0x48] ss:$12 sps:$4 sm:$0xff]  }
   0xd   :  { %811 = vmatprep.subr.bf16.mxu1 %v927_v1  ;;  %v882_v36 = vld [vmem:[%s1260_s0 + $0x50] ss:$12 sps:$4 sm:$0xff]   ;;  %v886_v39 = vld [vmem:[%s1260_s0 + $0x68] ss:$12 sps:$4 sm:$0xff]  }
   0xe   :  { %v883_v37 = vld [vmem:[%s1260_s0 + $0x64] ss:$12 sps:$4 sm:$0xff]  }
   0xf   :  { %753 = vmatpush3.bf16.msra.mxu0 %v853_v11 }
  0x10   :  { %812 = vmatpush3.bf16.msra.mxu1 %v854_v12  ;;  %754 = vmatprep.subr.bf16.mxu0 %v855_v13 }
  0x11   :  { %813 = vmatprep.subr.bf16.mxu1 %v927_v1 }
  0x13   :  { %755 = vmatpush3.bf16.msra.mxu0 %v856_v14 }
  0x14   :  { %814 = vmatpush3.bf16.msra.mxu1 %v857_v15  ;;  %756 = vmatprep.subr.bf16.mxu0 %v858_v16 }
  0x15   :  { %815 = vmatprep.subr.bf16.mxu1 %v927_v1 }
  0x17   :  { %757 = vmatpush3.bf16.msra.mxu0 %v859_v17 }
  0x18   :  { %816 = vmatpush3.bf16.msra.mxu1 %v860_v18  ;;  %758 = vmatprep.subr.bf16.mxu0 %v861_v19 }
  0x19   :  { %817 = vmatprep.subr.bf16.mxu1 %v927_v1 }
  0x1b   :  { %759 = vmatpush3.bf16.msra.mxu0 %v862_v20 }
  0x1c   :  { %818 = vmatpush3.bf16.msra.mxu1 %v863_v21  ;;  %760 = vmatprep.subr.bf16.mxu0 %v864_v22 }
  0x1d   :  { %819 = vmatprep.subr.bf16.mxu1 %v927_v1 }
  0x1f   :  { %761 = vmatpush3.bf16.msra.mxu0 %v865_v24 }
  0x20   :  { %820 = vmatpush3.bf16.msra.mxu1 %v866_v25 }
  0x22   :  { %343 = vmatmul.mubr.bf16.vlgmr.msra.gmra.mrb[0].mxu0 %v867_v26 }
  0x23   :  { %822 = vmatmul.mubr.bf16.vlgmr.msra.gmra.mrb[0].mxu1 %v870_v27  ;;  %350 = vmatprep.mubr.bf16.mxu0 %v871_v28 }
  0x24   :  { %825 = vmatprep.mubr.msk.bf16.mxu1 %vm928_vm0, %v927_v1 }
  0x2a   :  { %351 = vmatmul.mubr.bf16.gmra.mrb[4].mxu0 %v873_v29 }
  0x2b   :  { %826 = vmatmul.mubr.bf16.gmra.mrb[4].mxu1 %v874_v30  ;;  %358 = vmatprep.mubr.bf16.mxu0 %v875_v31 }
  0x2c   :  { %829 = vmatprep.mubr.msk.bf16.mxu1 %vm928_vm0, %v927_v1 }
  0x32   :  { %359 = vmatmul.mubr.bf16.gmra.mrb[8].mxu0 %v877_v32 }
  0x33   :  { %830 = vmatmul.mubr.bf16.gmra.mrb[8].mxu1 %v878_v33  ;;  %366 = vmatprep.mubr.bf16.mxu0 %v879_v34 }
  0x34   :  { %833 = vmatprep.mubr.msk.bf16.mxu1 %vm928_vm0, %v927_v1 }
  0x3a   :  { %367 = vmatmul.mubr.bf16.gmra.mrb[12].mxu0 %v881_v35 }
  0x3b   :  { %834 = vmatmul.mubr.bf16.gmra.mrb[12].mxu1 %v882_v36  ;;  %374 = vmatprep.mubr.bf16.mxu0 %v883_v37 }
  0x3c   :  { %837 = vmatprep.mubr.msk.bf16.mxu1 %vm928_vm0, %v927_v1 }
  0x42   :  { %375 = vmatmul.mubr.bf16.gmra.mrb[16].mxu0 %v885_v38 }
  0x43   :  { %838 = vmatmul.mubr.bf16.gmra.mrb[16].mxu1 %v886_v39 }
  0xf5   :  { %v762_v40 = vpop.f32.mrb[0].mxu0 }
  0xf6   :  { %v417_v41 = vpop.f32.mrb[0].mxu1  ;;  %v763_v42 = vpop.f32.mrb[1].mxu0 }
  0xf7   :  { %v764_v43 = vadd.f32 %v763_v42, %v762_v40  ;;  %v823_v44 = vpop.f32.mrb[1].mxu1  ;;  %v765_v45 = vpop.f32.mrb[2].mxu0 }
  0xf8   :  { %v420_v46 = vpop.f32.mrb[2].mxu1  ;;  %v766_v47 = vpop.f32.mrb[3].mxu0 }
  0xf9   :  { %v767_v48 = vadd.f32 %v766_v47, %v765_v45  ;;  %v824_v49 = vpop.f32.mrb[3].mxu1  ;;  %v418_v50 = vadd.f32 %v764_v43, %v417_v41 }
  0xfb   :  { %458 = vadd.xlane.f32.xlu0 %v418_v50  ;;  %v1089_v51 = vadd.f32 %v767_v48, %v420_v46 }
  0xfd   :  { %v768_v52 = vpop.f32.mrb[4].mxu0 }
  0xfe   :  { %v425_v53 = vpop.f32.mrb[4].mxu1  ;;  %v769_v54 = vpop.f32.mrb[5].mxu0 }
  0xff   :  { %v770_v55 = vadd.f32 %v769_v54, %v768_v52  ;;  %v827_v56 = vpop.f32.mrb[5].mxu1  ;;  %v771_v57 = vpop.f32.mrb[6].mxu0  ;;  %460 = vadd.xlane.f32.xlu0 %v1089_v51 }
 0x100   :  { %v428_v58 = vpop.f32.mrb[6].mxu1  ;;  %v772_v59 = vpop.f32.mrb[7].mxu0 }
 0x101   :  { %v773_v60 = vadd.f32 %v772_v59, %v771_v57  ;;  %v828_v61 = vpop.f32.mrb[7].mxu1  ;;  %v426_v62 = vadd.f32 %v770_v55, %v425_v53 }
 0x103   :  { %462 = vadd.xlane.f32.xlu1 %v426_v62  ;;  %v429_v63 = vadd.f32 %v773_v60, %v428_v58 }
 0x105   :  { %v774_v0 = vpop.f32.mrb[8].mxu0 }
 0x106   :  { %v433_v1 = vpop.f32.mrb[8].mxu1  ;;  %v775_v2 = vpop.f32.mrb[9].mxu0 }
 0x107   :  { %v776_v3 = vadd.f32 %v775_v2, %v774_v0  ;;  %v831_v4 = vpop.f32.mrb[9].mxu1  ;;  %v777_v5 = vpop.f32.mrb[10].mxu0  ;;  %464 = vadd.xlane.f32.xlu1 %v429_v63 }
 0x108   :  { %v436_v6 = vpop.f32.mrb[10].mxu1  ;;  %v778_v7 = vpop.f32.mrb[11].mxu0 }
 0x109   :  { %v779_v8 = vadd.f32 %v778_v7, %v777_v5  ;;  %v832_v9 = vpop.f32.mrb[11].mxu1  ;;  %v434_v10 = vadd.f32 %v776_v3, %v433_v1 }
 0x10b   :  { %466 = vadd.xlane.f32.xlu0 %v434_v10  ;;  %v437_v11 = vadd.f32 %v779_v8, %v436_v6 }
 0x10d   :  { %v780_v12 = vpop.f32.mrb[12].mxu0  ;;  %468 = vadd.xlane.f32.xlu1 %v437_v11 }
 0x10e   :  { %v441_v13 = vpop.f32.mrb[12].mxu1  ;;  %v781_v14 = vpop.f32.mrb[13].mxu0 }
 0x10f   :  { %v782_v15 = vadd.f32 %v781_v14, %v780_v12  ;;  %v835_v16 = vpop.f32.mrb[13].mxu1  ;;  %v783_v17 = vpop.f32.mrb[14].mxu0 }
 0x110   :  { %v444_v18 = vpop.f32.mrb[14].mxu1  ;;  %v784_v19 = vpop.f32.mrb[15].mxu0 }
 0x111   :  { %v785_v20 = vadd.f32 %v784_v19, %v783_v17  ;;  %v836_v21 = vpop.f32.mrb[15].mxu1  ;;  %v442_v22 = vadd.f32 %v782_v15, %v441_v13 }
 0x113   :  { %470 = vadd.xlane.f32.xlu0 %v442_v22  ;;  %v445_v23 = vadd.f32 %v785_v20, %v444_v18 }
 0x115   :  { %v786_v24 = vpop.f32.mrb[16].mxu0  ;;  %472 = vadd.xlane.f32.xlu1 %v445_v23 }
 0x116   :  { %v449_v25 = vpop.f32.mrb[16].mxu1  ;;  %v787_v26 = vpop.f32.mrb[17].mxu0 }
 0x117   :  { %v788_v27 = vadd.f32 %v787_v26, %v786_v24  ;;  %v839_v28 = vpop.f32.mrb[17].mxu1  ;;  %v789_v29 = vpop.f32.mrb[18].mxu0  ;;  %v1136_v24 = vld [vmem:[%s1261_s2] ss:$0 sm:$0xff] }
 0x118   :  { %v452_v30 = vpop.f32.mrb[18].mxu1  ;;  %v790_v31 = vpop.f32.mrb[19].mxu0  ;;  %v1142_v28 = vld [vmem:[%s1262_s3] ss:$0 sm:$0xff] }
 0x119   :  { %v791_v32 = vadd.f32 %v790_v31, %v789_v29  ;;  %v840_v33 = vpop.f32.mrb[19].mxu1  ;;  %v450_v34 = vadd.f32 %v788_v27, %v449_v25 }
 0x11b   :  { %474 = vadd.xlane.f32.xlu0 %v450_v34  ;;  %v453_v35 = vadd.f32 %v791_v32, %v452_v30 }
 0x11d   :  { %476 = vadd.xlane.f32.xlu1 %v453_v35 }
 0x188   :  { %v459_v36 = vpop.xlane.xlu0 %458 }
 0x189   :  { %v479_v37 = vmul.f32 0.0078125, %v459_v36 }
 0x18b   :  { %v1092_v38 = vsub.f32 %v418_v50, %v479_v37 }
 0x18c   :  { %v461_v39 = vpop.xlane.xlu0 %460 }
 0x18d   :  { %v480_v40 = vmul.f32 0.0078125, %v461_v39  ;;  %v499_v41 = vmul.f32 %v1092_v38, %v1092_v38 }
 0x18f   :  { %v1097_v42 = vsub.f32 %v1089_v51, %v480_v40  ;;  %509 = vadd.xlane.f32.xlu0 %v499_v41 }
 0x190   :  { %v463_v43 = vpop.xlane.xlu1 %462 }
 0x191   :  { %v481_v44 = vmul.f32 0.0078125, %v463_v43  ;;  %v500_v45 = vmul.f32 %v1097_v42, %v1097_v42 }
 0x193   :  { %v1101_v46 = vsub.f32 %v426_v62, %v481_v44  ;;  %511 = vadd.xlane.f32.xlu1 %v500_v45 }
 0x194   :  { %v465_v47 = vpop.xlane.xlu1 %464 }
 0x195   :  { %v482_v48 = vmul.f32 0.0078125, %v465_v47  ;;  %v501_v49 = vmul.f32 %v1101_v46, %v1101_v46 }
 0x197   :  { %v1105_v50 = vsub.f32 %v429_v63, %v482_v48  ;;  %513 = vadd.xlane.f32.xlu0 %v501_v49 }
 0x198   :  { %v467_v52 = vpop.xlane.xlu0 %466 }
 0x199   :  { %v483_v51 = vmul.f32 0.0078125, %v467_v52  ;;  %v502_v53 = vmul.f32 %v1105_v50, %v1105_v50 }
 0x19a   :  { %v469_v54 = vpop.xlane.xlu1 %468 }
 0x19b   :  { %v1109_v55 = vsub.f32 %v434_v10, %v483_v51  ;;  %v484_v56 = vmul.f32 0.0078125, %v469_v54  ;;  %515 = vadd.xlane.f32.xlu1 %v502_v53 }
 0x19d   :  { %v1111_v57 = vsub.f32 %v437_v11, %v484_v56  ;;  %v503_v58 = vmul.f32 %v1109_v55, %v1109_v55 }
 0x19f   :  { %517 = vadd.xlane.f32.xlu0 %v503_v58  ;;  %v504_v59 = vmul.f32 %v1111_v57, %v1111_v57 }
 0x1a0   :  { %v471_v60 = vpop.xlane.xlu0 %470 }
 0x1a1   :  { %v485_v61 = vmul.f32 0.0078125, %v471_v60  ;;  %519 = vadd.xlane.f32.xlu1 %v504_v59 }
 0x1a2   :  { %v473_v62 = vpop.xlane.xlu1 %472 }
 0x1a3   :  { %v1117_v63 = vsub.f32 %v442_v22, %v485_v61  ;;  %v486_v0 = vmul.f32 0.0078125, %v473_v62 }
 0x1a5   :  { %v1119_v1 = vsub.f32 %v445_v23, %v486_v0  ;;  %v505_v2 = vmul.f32 %v1117_v63, %v1117_v63 }
 0x1a7   :  { %521 = vadd.xlane.f32.xlu0 %v505_v2  ;;  %v506_v3 = vmul.f32 %v1119_v1, %v1119_v1 }
 0x1a8   :  { %v475_v4 = vpop.xlane.xlu0 %474 }
 0x1a9   :  { %v487_v5 = vmul.f32 0.0078125, %v475_v4  ;;  %523 = vadd.xlane.f32.xlu1 %v506_v3 }
 0x1aa   :  { %v477_v6 = vpop.xlane.xlu1 %476 }
 0x1ab   :  { %v1125_v7 = vsub.f32 %v450_v34, %v487_v5  ;;  %v488_v8 = vmul.f32 0.0078125, %v477_v6 }
 0x1ad   :  { %v1127_v9 = vsub.f32 %v453_v35, %v488_v8  ;;  %v507_v10 = vmul.f32 %v1125_v7, %v1125_v7 }
 0x1af   :  { %525 = vadd.xlane.f32.xlu0 %v507_v10  ;;  %v508_v11 = vmul.f32 %v1127_v9, %v1127_v9 }
 0x1b1   :  { %527 = vadd.xlane.f32.xlu1 %v508_v11 }
 0x21c   :  { %v510_v12 = vpop.xlane.xlu0 %509 }
 0x21d   :  { %v529_v13 = vmul.f32 0.0078125, %v510_v12 }
 0x21f   :  { %v539_v14 = vadd.f32 1e-05, %v529_v13 }
 0x220   :  { %v512_v15 = vpop.xlane.xlu1 %511 }
 0x221   :  { %887 = vrsqrt.f32 %v539_v14  ;;  %v530_v16 = vmul.f32 0.0078125, %v512_v15 }
 0x223   :  { %v540_v17 = vadd.f32 1e-05, %v530_v16 }
 0x224   :  { %v514_v18 = vpop.xlane.xlu0 %513 }
 0x225   :  { %889 = vrsqrt.f32 %v540_v17  ;;  %v531_v19 = vmul.f32 0.0078125, %v514_v18 }
 0x227   :  { %v541_v20 = vadd.f32 1e-05, %v531_v19 }
 0x228   :  { %v516_v21 = vpop.xlane.xlu1 %515 }
 0x229   :  { %891 = vrsqrt.f32 %v541_v20  ;;  %v532_v22 = vmul.f32 0.0078125, %v516_v21 }
 0x22b   :  { %v888_v23 = vpop.eup %887  ;;  %v542_v25 = vadd.f32 1e-05, %v532_v22 }
 0x22c   :  { %v559_v26 = vmul.f32 %v888_v23, %v1092_v38  ;;  %v518_v27 = vpop.xlane.xlu0 %517 }
 0x22d   :  { %893 = vrsqrt.f32 %v542_v25  ;;  %v533_v29 = vmul.f32 0.0078125, %v518_v27 }
 0x22e   :  { %v575_v30 = vmul.f32 %v1136_v24, %v559_v26  ;;  %v520_v31 = vpop.xlane.xlu1 %519 }
 0x22f   :  { %v890_v32 = vpop.eup %889  ;;  %v543_v33 = vadd.f32 1e-05, %v533_v29  ;;  %v534_v34 = vmul.f32 0.0078125, %v520_v31 }
 0x230   :  { %v1146_v35 = vadd.f32 %v1142_v28, %v575_v30  ;;  %v560_v36 = vmul.f32 %v890_v32, %v1097_v42 }
 0x231   :  { %895 = vrsqrt.f32 %v543_v33  ;;  %v544_v37 = vadd.f32 1e-05, %v534_v34 }
 0x232   :  { %v611_v38 = vmul.f32 0.044715, %v1146_v35  ;;  %v576_v39 = vmul.f32 %v1136_v24, %v560_v36 }
 0x233   :  { %v892_v40 = vpop.eup %891  ;;  %897 = vrsqrt.f32 %v544_v37 }
 0x234   :  { %v621_v41 = vmul.f32 %v611_v38, %v1146_v35  ;;  %v1153_v43 = vadd.f32 %v1142_v28, %v576_v39  ;;  %v561_v44 = vmul.f32 %v892_v40, %v1101_v46  ;;  %v522_v45 = vpop.xlane.xlu0 %521  ;;  %v601_v40 = vmul.f32 0.5, %v1146_v35 }
 0x235   :  { %v535_v47 = vmul.f32 0.0078125, %v522_v45 }
 0x236   :  { %v631_v48 = vmul.f32 %v621_v41, %v1146_v35  ;;  %v612_v42 = vmul.f32 0.044715, %v1153_v43  ;;  %v577_v49 = vmul.f32 %v1136_v24, %v561_v44  ;;  %v524_v52 = vpop.xlane.xlu1 %523 }
 0x237   :  { %v894_v51 = vpop.eup %893  ;;  %v545_v53 = vadd.f32 1e-05, %v535_v47  ;;  %v536_v54 = vmul.f32 0.0078125, %v524_v52 }
 0x238   :  { %v641_v56 = vadd.f32 %v631_v48, %v1146_v35  ;;  %v622_v58 = vmul.f32 %v612_v42, %v1153_v43  ;;  %v1162_v59 = vadd.f32 %v1142_v28, %v577_v49  ;;  %v562_v46 = vmul.f32 %v894_v51, %v1105_v50 }
 0x239   :  { %899 = vrsqrt.f32 %v545_v53  ;;  %v546_v60 = vadd.f32 1e-05, %v536_v54  ;;  %v602_v54 = vmul.f32 0.5, %v1153_v43 }
 0x23a   :  { %v651_v61 = vmul.f32 0.7978846, %v641_v56  ;;  %v632_v62 = vmul.f32 %v622_v58, %v1153_v43  ;;  %v613_v0 = vmul.f32 0.044715, %v1162_v59  ;;  %v578_v3 = vmul.f32 %v1136_v24, %v562_v46 }
 0x23b   :  { %v896_v2 = vpop.eup %895  ;;  %901 = vrsqrt.f32 %v546_v60 }
 0x23c   :  { %903 = vtanh.f32 %v651_v61  ;;  %v642_v4 = vadd.f32 %v632_v62, %v1153_v43  ;;  %v623_v5 = vmul.f32 %v613_v0, %v1162_v59  ;;  %v563_v6 = vmul.f32 %v896_v2, %v1109_v55  ;;  %v526_v8 = vpop.xlane.xlu0 %525 }
 0x23d   :  { %v898_v50 = vpop.eup %897  ;;  %v1172_v10 = vadd.f32 %v1142_v28, %v578_v3  ;;  %v537_v11 = vmul.f32 0.0078125, %v526_v8  ;;  %v603_v43 = vmul.f32 0.5, %v1162_v59 }
 0x23e   :  { %v652_v12 = vmul.f32 0.7978846, %v642_v4  ;;  %v633_v13 = vmul.f32 %v623_v5, %v1162_v59  ;;  %v579_v14 = vmul.f32 %v1136_v24, %v563_v6  ;;  %v564_v15 = vmul.f32 %v898_v50, %v1111_v57  ;;  %v528_v16 = vpop.xlane.xlu1 %527 }
 0x23f   :  { %v614_v17 = vmul.f32 0.044715, %v1172_v10  ;;  %v547_v18 = vadd.f32 1e-05, %v537_v11  ;;  %v538_v19 = vmul.f32 0.0078125, %v528_v16 }
 0x240   :  { %905 = vtanh.f32 %v652_v12  ;;  %v643_v55 = vadd.f32 %v633_v13, %v1162_v59  ;;  %v1180_v20 = vadd.f32 %v1142_v28, %v579_v14  ;;  %v580_v21 = vmul.f32 %v1136_v24, %v564_v15 }
 0x241   :  { %v624_v22 = vmul.f32 %v614_v17, %v1172_v10  ;;  %907 = vrsqrt.f32 %v547_v18  ;;  %v548_v23 = vadd.f32 1e-05, %v538_v19  ;;  %v604_v18 = vmul.f32 0.5, %v1172_v10 }
 0x242   :  { %v653_v25 = vmul.f32 0.7978846, %v643_v55  ;;  %v615_v57 = vmul.f32 0.044715, %v1180_v20  ;;  %v1186_v26 = vadd.f32 %v1142_v28, %v580_v21 }
 0x243   :  { %v900_v27 = vpop.eup %899  ;;  %v634_v29 = vmul.f32 %v624_v22, %v1172_v10  ;;  %909 = vrsqrt.f32 %v548_v23 }
 0x244   :  { %911 = vtanh.f32 %v653_v25  ;;  %v625_v30 = vmul.f32 %v615_v57, %v1180_v20  ;;  %v616_v31 = vmul.f32 0.044715, %v1186_v26  ;;  %v565_v34 = vmul.f32 %v900_v27, %v1117_v63 }
 0x245   :  { %v902_v32 = vpop.eup %901  ;;  %v644_v33 = vadd.f32 %v634_v29, %v1172_v10 }
 0x246   :  { %v904_v36 = vpop.eup %903  ;;  %v635_v37 = vmul.f32 %v625_v30, %v1180_v20  ;;  %v626_v38 = vmul.f32 %v616_v31, %v1186_v26  ;;  %v566_v39 = vmul.f32 %v902_v32, %v1119_v1  ;;  %v581_v45 = vmul.f32 %v1136_v24, %v565_v34 }
 0x247   :  { %v671_v41 = vadd.f32 1.0, %v904_v36  ;;  %v654_v44 = vmul.f32 0.7978846, %v644_v33  ;;  %v606_v31 = vmul.f32 0.5, %v1186_v26 }
 0x248   :  { %v645_v47 = vadd.f32 %v635_v37, %v1180_v20  ;;  %v636_v48 = vmul.f32 %v626_v38, %v1186_v26  ;;  %v582_v42 = vmul.f32 %v1136_v24, %v566_v39  ;;  %v1202_v49 = vadd.f32 %v1142_v28, %v581_v45 }
 0x249   :  { %v681_v63 = vmul.f32 %v671_v41, %v601_v40  ;;  %913 = vtanh.f32 %v654_v44 }
 0x24a   :  { %v906_v52 = vpop.eup %905  ;;  %v655_v51 = vmul.f32 0.7978846, %v645_v47  ;;  %v646_v1 = vadd.f32 %v636_v48, %v1186_v26  ;;  %v1206_v35 = vadd.f32 %v1142_v28, %v582_v42  ;;  %v617_v58 = vmul.f32 0.044715, %v1202_v49 }
 0x24b   :  { %v908_v53 = vpop.eup %907  ;;  %691 = vst [vmem:[%s1263_s4] sm:$0xff] %v681_v63  ;;  %v672_v56 = vadd.f32 1.0, %v906_v52  ;;  %v607_v26 = vmul.f32 0.5, %v1202_v49 }
 0x24c   :  { %915 = vtanh.f32 %v655_v51  ;;  %v656_v46 = vmul.f32 0.7978846, %v646_v1  ;;  %v618_v60 = vmul.f32 0.044715, %v1206_v35  ;;  %v627_v0 = vmul.f32 %v617_v58, %v1202_v49 }
 0x24d   :  { %v910_v61 = vpop.eup %909  ;;  %v682_v62 = vmul.f32 %v672_v56, %v602_v54  ;;  %v567_v2 = vmul.f32 %v908_v53, %v1125_v7  ;;  %v608_v41 = vmul.f32 0.5, %v1206_v35 }
 0x24e   :  { %v912_v3 = vpop.eup %911  ;;  %917 = vtanh.f32 %v656_v46  ;;  %v628_v4 = vmul.f32 %v618_v60, %v1206_v35  ;;  %v568_v5 = vmul.f32 %v910_v61, %v1127_v9  ;;  %v637_v8 = vmul.f32 %v627_v0, %v1202_v49 }
 0x24f   :  { %692 = vst [vmem:[%s1263_s4 + $0x8] sm:$0xff] %v682_v62  ;;  %v673_v6 = vadd.f32 1.0, %v912_v3  ;;  %v583_v50 = vmul.f32 %v1136_v24, %v567_v2 }
 0x250   :  { %v638_v11 = vmul.f32 %v628_v4, %v1206_v35  ;;  %v584_v7 = vmul.f32 %v1136_v24, %v568_v5  ;;  %v647_v13 = vadd.f32 %v637_v8, %v1202_v49 }
 0x251   :  { %v683_v12 = vmul.f32 %v673_v6, %v603_v43  ;;  %v599_v9 = vadd.f32 %v1142_v28, %v583_v50 }
 0x252   :  { %v648_v14 = vadd.f32 %v638_v11, %v1206_v35  ;;  %v600_v15 = vadd.f32 %v1142_v28, %v584_v7  ;;  %v657_v59 = vmul.f32 0.7978846, %v647_v13  ;;  %v605_v28 = vmul.f32 0.5, %v1180_v20 }
 0x253   :  { %v914_v16 = vpop.eup %913  ;;  %693 = vst [vmem:[%s1263_s4 + $0x10] sm:$0xff] %v683_v12  ;;  %v619_v17 = vmul.f32 0.044715, %v599_v9  ;;  %v609_v63 = vmul.f32 0.5, %v599_v9 }
 0x254   :  { %v674_v19 = vadd.f32 1.0, %v914_v16  ;;  %v658_v24 = vmul.f32 0.7978846, %v648_v14  ;;  %v620_v55 = vmul.f32 0.044715, %v600_v15  ;;  %919 = vtanh.f32 %v657_v59 }
 0x255   :  { %v629_v21 = vmul.f32 %v619_v17, %v599_v9  ;;  %v610_v51 = vmul.f32 0.5, %v600_v15 }
 0x256   :  { %v916_v22 = vpop.eup %915  ;;  %v684_v23 = vmul.f32 %v674_v19, %v604_v18  ;;  %921 = vtanh.f32 %v658_v24  ;;  %v630_v25 = vmul.f32 %v620_v55, %v600_v15 }
 0x257   :  { %v675_v57 = vadd.f32 1.0, %v916_v22  ;;  %v639_v27 = vmul.f32 %v629_v21, %v599_v9 }
 0x258   :  { %v918_v29 = vpop.eup %917  ;;  %694 = vst [vmem:[%s1263_s4 + $0x18] sm:$0xff] %v684_v23  ;;  %v640_v30 = vmul.f32 %v630_v25, %v600_v15 }
 0x259   :  { %v685_v10 = vmul.f32 %v675_v57, %v605_v28  ;;  %v676_v32 = vadd.f32 1.0, %v918_v29  ;;  %v649_v33 = vadd.f32 %v639_v27, %v599_v9 }
 0x25a   :  { %v650_v34 = vadd.f32 %v640_v30, %v600_v15 }
 0x25b   :  { %695 = vst [vmem:[%s1263_s4 + $0x20] sm:$0xff] %v685_v10  ;;  %v686_v36 = vmul.f32 %v676_v32, %v606_v31  ;;  %v659_v20 = vmul.f32 0.7978846, %v649_v33 }
 0x25c   :  { %v660_v37 = vmul.f32 0.7978846, %v650_v34 }
 0x25d   :  { %696 = vst [vmem:[%s1263_s4 + $0x28] sm:$0xff] %v686_v36  ;;  %923 = vtanh.f32 %v659_v20 }
 0x25e   :  { %925 = vtanh.f32 %v660_v37  ;;  %v920_v38 = vpop.eup %919 }
 0x25f   :  { %v677_v40 = vadd.f32 1.0, %v920_v38 }
 0x260   :  { %v922_v39 = vpop.eup %921 }
 0x261   :  { %v678_v44 = vadd.f32 1.0, %v922_v39  ;;  %v687_v45 = vmul.f32 %v677_v40, %v607_v26 }
 0x263   :  { %v688_v47 = vmul.f32 %v678_v44, %v608_v41  ;;  %697 = vst [vmem:[%s1263_s4 + $0x30] sm:$0xff] %v687_v45 }
 0x265   :  { %698 = vst [vmem:[%s1263_s4 + $0x38] sm:$0xff] %v688_v47 }
 0x267   :  { %v924_v48 = vpop.eup %923 }
 0x268   :  { %v926_v42 = vpop.eup %925  ;;  %v679_v52 = vadd.f32 1.0, %v924_v48 }
 0x269   :  { %v680_v49 = vadd.f32 1.0, %v926_v42 }
 0x26a   :  { %v689_v1 = vmul.f32 %v679_v52, %v609_v63 }
 0x26b   :  { %v690_v53 = vmul.f32 %v680_v49, %v610_v51 }
 0x26c   :  { %699 = vst [vmem:[%s1263_s4 + $0x40] sm:$0xff] %v689_v1 }
 0x26d   :  { %700 = vst [vmem:[%s1263_s4 + $0x48] sm:$0xff] %v690_v53 }

// kernel: wavlm_extract_features.15
= control target key start
LH: loop header
LB: loop body
LE: loop exit
PB: predicated region body
PF: predicated region fallthrough
CT: control target
= control target key end

     0   :  { %s634_s1 = inlined_call_operand.vmem [shape: bf16[256,128], index: 1, kind: input, shape index: {}]   ;;  %s635_s0 = inlined_call_operand.vmem [shape: bf16[48,256], index: 0, kind: input, shape index: {}]   ;;  %s636_s2 = inlined_call_operand.vmem [shape: f32[1,128], index: 2, kind: input, shape index: {}]   ;;  %s637_s3 = inlined_call_operand.vmem [shape: f32[1,128], index: 3, kind: input, shape index: {}]   ;;  %s638_s4 = inlined_call_operand.vmem [shape: f32[48,128], index: 4, kind: output, shape index: {}]  }
   0x1   :  { %v470_v0 = vld [vmem:[%s634_s1 + $0x40] sm:$0xff]   ;;  %v472_v2 = vld [vmem:[%s634_s1 + $0x48] sm:$0xff]   ;;  %v474_v4 = vld [vmem:[%s634_s1 + $0x50] sm:$0xff]  }
   0x2   :  { %v471_v1 = vld [vmem:[%s634_s1] sm:$0xff]   ;;  %420 = vmatprep.subr.bf16.mxu0 %v470_v0  ;;  %454 = vmatprep.subr.bf16.mxu1 %v470_v0  ;;  %v473_v3 = vld [vmem:[%s634_s1 + $0x8] sm:$0xff]   ;;  %v475_v5 = vld [vmem:[%s634_s1 + $0x10] sm:$0xff]  }
   0x3   :  { %421 = vmatpush3.bf16.msra.mxu0 %v471_v1  ;;  %462 = vmatpush3.bf16.msra.mxu1 %v471_v1  ;;  %v476_v6 = vld [vmem:[%s634_s1 + $0x58] sm:$0xff]   ;;  %v478_v8 = vld [vmem:[%s634_s1 + $0x60] sm:$0xff]   ;;  %v480_v10 = vld [vmem:[%s634_s1 + $0x68] sm:$0xff]  }
   0x4   :  { %422 = vmatprep.subr.bf16.mxu0 %v472_v2  ;;  %455 = vmatprep.subr.bf16.mxu1 %v472_v2  ;;  %v477_v7 = vld [vmem:[%s634_s1 + $0x18] sm:$0xff]   ;;  %v479_v9 = vld [vmem:[%s634_s1 + $0x20] sm:$0xff]   ;;  %v481_v13 = vld [vmem:[%s634_s1 + $0x28] sm:$0xff]  }
   0x5   :  { %v488_v11 = vld [vmem:[%s635_s0 + $0x4] ss:$8 sps:$4 sm:$0xff]   ;;  %v491_v12 = vld [vmem:[%s635_s0 + $0x14] ss:$8 sps:$4 sm:$0xff]   ;;  %v486_v18 = vld [vmem:[%s635_s0] ss:$8 sps:$4 sm:$0xff]  }
   0x6   :  { %v482_v14 = vld [vmem:[%s634_s1 + $0x70] sm:$0xff]   ;;  %214 = vmatprep.mubr.bf16.mxu0 %v488_v11  ;;  %222 = vmatprep.mubr.bf16.mxu1 %v491_v12  ;;  %v484_v16 = vld [vmem:[%s634_s1 + $0x78] sm:$0xff]   ;;  %v492_v20 = vld [vmem:[%s635_s0 + $0x24] ss:$8 sps:$4 sm:$0xff]  }
   0x7   :  { %423 = vmatpush3.bf16.msra.mxu0 %v473_v3  ;;  %463 = vmatpush3.bf16.msra.mxu1 %v473_v3  ;;  %v483_v15 = vld [vmem:[%s634_s1 + $0x30] sm:$0xff]   ;;  %v485_v17 = vld [vmem:[%s634_s1 + $0x38] sm:$0xff]   ;;  %v494_v21 = vld [vmem:[%s635_s0 + $0x20] ss:$8 sps:$4 sm:$0xff]  }
   0x8   :  { %424 = vmatprep.subr.bf16.mxu0 %v474_v4  ;;  %456 = vmatprep.subr.bf16.mxu1 %v474_v4  ;;  %v489_v19 = vld [vmem:[%s635_s0 + $0x10] ss:$8 sps:$4 sm:$0xff]  }
   0xb   :  { %425 = vmatpush3.bf16.msra.mxu0 %v475_v5  ;;  %464 = vmatpush3.bf16.msra.mxu1 %v475_v5 }
   0xc   :  { %426 = vmatprep.subr.bf16.mxu0 %v476_v6  ;;  %457 = vmatprep.subr.bf16.mxu1 %v476_v6 }
   0xf   :  { %427 = vmatpush3.bf16.msra.mxu0 %v477_v7  ;;  %465 = vmatpush3.bf16.msra.mxu1 %v477_v7 }
  0x10   :  { %428 = vmatprep.subr.bf16.mxu0 %v478_v8  ;;  %458 = vmatprep.subr.bf16.mxu1 %v478_v8 }
  0x13   :  { %429 = vmatpush3.bf16.msra.mxu0 %v479_v9  ;;  %466 = vmatpush3.bf16.msra.mxu1 %v479_v9 }
  0x14   :  { %430 = vmatprep.subr.bf16.mxu0 %v480_v10  ;;  %459 = vmatprep.subr.bf16.mxu1 %v480_v10 }
  0x17   :  { %431 = vmatpush3.bf16.msra.mxu0 %v481_v13  ;;  %467 = vmatpush3.bf16.msra.mxu1 %v481_v13 }
  0x18   :  { %432 = vmatprep.subr.bf16.mxu0 %v482_v14  ;;  %460 = vmatprep.subr.bf16.mxu1 %v482_v14 }
  0x1b   :  { %433 = vmatpush3.bf16.msra.mxu0 %v483_v15  ;;  %468 = vmatpush3.bf16.msra.mxu1 %v483_v15 }
  0x1c   :  { %434 = vmatprep.subr.bf16.mxu0 %v484_v16  ;;  %461 = vmatprep.subr.bf16.mxu1 %v484_v16 }
  0x1f   :  { %435 = vmatpush3.bf16.msra.mxu0 %v485_v17  ;;  %469 = vmatpush3.bf16.msra.mxu1 %v485_v17 }
  0x22   :  { %215 = vmatmul.mubr.bf16.vlgmr.msra.gmra.mrb[0].mxu0 %v486_v18  ;;  %223 = vmatmul.mubr.bf16.vlgmr.msra.gmra.mrb[0].mxu1 %v489_v19  ;;  %v418_v18 = vld [vmem:[%s636_s2] ss:$0 sm:$0xff] }
  0x23   :  { %230 = vmatprep.mubr.bf16.mxu1 %v492_v20 }
  0x2a   :  { %231 = vmatmul.mubr.bf16.gmra.mrb[4].mxu1 %v494_v21  ;;  %v419_v21 = vld [vmem:[%s637_s3] ss:$0 sm:$0xff] }
  0xf5   :  { %v436_v22 = vpop.f32.mrb[0].mxu0  ;;  %v442_v23 = vpop.f32.mrb[0].mxu1 }
  0xf6   :  { %v437_v24 = vpop.f32.mrb[1].mxu0  ;;  %v443_v25 = vpop.f32.mrb[1].mxu1 }
  0xf7   :  { %v438_v26 = vadd.f32 %v437_v24, %v436_v22  ;;  %v444_v27 = vadd.f32 %v443_v25, %v442_v23  ;;  %v439_v28 = vpop.f32.mrb[2].mxu0  ;;  %v445_v29 = vpop.f32.mrb[2].mxu1 }
  0xf8   :  { %v440_v30 = vpop.f32.mrb[3].mxu0  ;;  %v446_v31 = vpop.f32.mrb[3].mxu1 }
  0xf9   :  { %v441_v32 = vadd.f32 %v440_v30, %v439_v28  ;;  %v447_v33 = vadd.f32 %v446_v31, %v445_v29  ;;  %245 = vadd.xlane.f32.xlu1 %v444_v27  ;;  %241 = vadd.xlane.f32.xlu0 %v438_v26 }
  0xfd   :  { %v448_v34 = vpop.f32.mrb[4].mxu1  ;;  %247 = vadd.xlane.f32.xlu1 %v447_v33  ;;  %243 = vadd.xlane.f32.xlu0 %v441_v32 }
  0xfe   :  { %v449_v35 = vpop.f32.mrb[5].mxu1 }
  0xff   :  { %v450_v36 = vadd.f32 %v449_v35, %v448_v34  ;;  %v451_v37 = vpop.f32.mrb[6].mxu1 }
 0x100   :  { %v452_v38 = vpop.f32.mrb[7].mxu1 }
 0x101   :  { %v453_v39 = vadd.f32 %v452_v38, %v451_v37  ;;  %249 = vadd.xlane.f32.xlu0 %v450_v36 }
 0x103   :  { %251 = vadd.xlane.f32.xlu1 %v453_v39 }
 0x186   :  { %v246_v40 = vpop.xlane.xlu1 %245  ;;  %v242_v41 = vpop.xlane.xlu0 %241 }
 0x187   :  { %v256_v42 = vmul.f32 0.0078125, %v246_v40  ;;  %v254_v43 = vmul.f32 0.0078125, %v242_v41 }
 0x189   :  { %v260_v44 = vsub.f32 %v438_v26, %v254_v43  ;;  %v262_v47 = vsub.f32 %v444_v27, %v256_v42 }
 0x18a   :  { %v248_v45 = vpop.xlane.xlu1 %247  ;;  %v244_v46 = vpop.xlane.xlu0 %243 }
 0x18b   :  { %v257_v48 = vmul.f32 0.0078125, %v248_v45  ;;  %v255_v49 = vmul.f32 0.0078125, %v244_v46  ;;  %v266_v50 = vmul.f32 %v260_v44, %v260_v44  ;;  %v268_v55 = vmul.f32 %v262_v47, %v262_v47 }
 0x18d   :  { %v261_v51 = vsub.f32 %v441_v32, %v255_v49  ;;  %272 = vadd.xlane.f32.xlu0 %v266_v50  ;;  %v263_v53 = vsub.f32 %v447_v33, %v257_v48 }
 0x18e   :  { %v250_v52 = vpop.xlane.xlu0 %249 }
 0x18f   :  { %v258_v54 = vmul.f32 0.0078125, %v250_v52  ;;  %v267_v56 = vmul.f32 %v261_v51, %v261_v51  ;;  %v269_v61 = vmul.f32 %v263_v53, %v263_v53 }
 0x190   :  { %v252_v57 = vpop.xlane.xlu1 %251 }
 0x191   :  { %v264_v58 = vsub.f32 %v450_v36, %v258_v54  ;;  %v259_v59 = vmul.f32 0.0078125, %v252_v57  ;;  %276 = vadd.xlane.f32.xlu0 %v268_v55  ;;  %274 = vadd.xlane.f32.xlu1 %v267_v56 }
 0x193   :  { %v265_v60 = vsub.f32 %v453_v39, %v259_v59  ;;  %v270_v62 = vmul.f32 %v264_v58, %v264_v58 }
 0x195   :  { %278 = vadd.xlane.f32.xlu1 %v269_v61  ;;  %280 = vadd.xlane.f32.xlu0 %v270_v62  ;;  %v271_v63 = vmul.f32 %v265_v60, %v265_v60 }
 0x199   :  { %282 = vadd.xlane.f32.xlu1 %v271_v63 }
 0x21a   :  { %v273_v0 = vpop.xlane.xlu0 %272 }
 0x21b   :  { %v284_v1 = vmul.f32 0.0078125, %v273_v0 }
 0x21d   :  { %v290_v2 = vadd.f32 1e-05, %v284_v1 }
 0x21e   :  { %v275_v3 = vpop.xlane.xlu1 %274  ;;  %v277_v4 = vpop.xlane.xlu0 %276 }
 0x21f   :  { %495 = vrsqrt.f32 %v290_v2  ;;  %v285_v5 = vmul.f32 0.0078125, %v275_v3  ;;  %v286_v6 = vmul.f32 0.0078125, %v277_v4 }
 0x221   :  { %v291_v7 = vadd.f32 1e-05, %v285_v5  ;;  %v292_v8 = vadd.f32 1e-05, %v286_v6 }
 0x222   :  { %v279_v9 = vpop.xlane.xlu1 %278  ;;  %v281_v10 = vpop.xlane.xlu0 %280 }
 0x223   :  { %497 = vrsqrt.f32 %v291_v7  ;;  %v287_v11 = vmul.f32 0.0078125, %v279_v9  ;;  %v288_v12 = vmul.f32 0.0078125, %v281_v10 }
 0x224   :  { %499 = vrsqrt.f32 %v292_v8 }
 0x225   :  { %v293_v13 = vadd.f32 1e-05, %v287_v11  ;;  %v294_v14 = vadd.f32 1e-05, %v288_v12 }
 0x226   :  { %v283_v15 = vpop.xlane.xlu1 %282 }
 0x227   :  { %501 = vrsqrt.f32 %v293_v13  ;;  %v289_v16 = vmul.f32 0.0078125, %v283_v15 }
 0x228   :  { %503 = vrsqrt.f32 %v294_v14 }
 0x229   :  { %v496_v17 = vpop.eup %495  ;;  %v295_v19 = vadd.f32 1e-05, %v289_v16 }
 0x22a   :  { %v302_v20 = vmul.f32 %v496_v17, %v260_v44 }
 0x22b   :  { %505 = vrsqrt.f32 %v295_v19 }
 0x22c   :  { %v314_v22 = vmul.f32 %v418_v18, %v302_v20 }
 0x22d   :  { %v498_v23 = vpop.eup %497 }
 0x22e   :  { %v500_v24 = vpop.eup %499  ;;  %v326_v25 = vadd.f32 %v419_v21, %v314_v22  ;;  %v303_v26 = vmul.f32 %v498_v23, %v261_v51 }
 0x22f   :  { %v304_v27 = vmul.f32 %v500_v24, %v262_v47 }
 0x230   :  { %v338_v28 = vmul.f32 0.044715, %v326_v25  ;;  %v315_v29 = vmul.f32 %v418_v18, %v303_v26  ;;  %v332_v10 = vmul.f32 0.5, %v326_v25 }
 0x231   :  { %v502_v30 = vpop.eup %501  ;;  %v316_v31 = vmul.f32 %v418_v18, %v304_v27 }
 0x232   :  { %v504_v32 = vpop.eup %503  ;;  %v344_v33 = vmul.f32 %v338_v28, %v326_v25  ;;  %v327_v34 = vadd.f32 %v419_v21, %v315_v29  ;;  %v305_v35 = vmul.f32 %v502_v30, %v263_v53 }
 0x233   :  { %v328_v36 = vadd.f32 %v419_v21, %v316_v31  ;;  %v306_v37 = vmul.f32 %v504_v32, %v264_v58 }
 0x234   :  { %v350_v38 = vmul.f32 %v344_v33, %v326_v25  ;;  %v339_v39 = vmul.f32 0.044715, %v327_v34  ;;  %v317_v40 = vmul.f32 %v418_v18, %v305_v35  ;;  %v333_v16 = vmul.f32 0.5, %v327_v34 }
 0x235   :  { %v506_v41 = vpop.eup %505  ;;  %v340_v42 = vmul.f32 0.044715, %v328_v36  ;;  %v318_v43 = vmul.f32 %v418_v18, %v306_v37 }
 0x236   :  { %v356_v44 = vadd.f32 %v350_v38, %v326_v25  ;;  %v345_v45 = vmul.f32 %v339_v39, %v327_v34  ;;  %v329_v46 = vadd.f32 %v419_v21, %v317_v40  ;;  %v307_v47 = vmul.f32 %v506_v41, %v265_v60 }
 0x237   :  { %v346_v48 = vmul.f32 %v340_v42, %v328_v36  ;;  %v330_v49 = vadd.f32 %v419_v21, %v318_v43 }
 0x238   :  { %v362_v50 = vmul.f32 0.7978846, %v356_v44  ;;  %v351_v51 = vmul.f32 %v345_v45, %v327_v34  ;;  %v341_v52 = vmul.f32 0.044715, %v329_v46  ;;  %v319_v53 = vmul.f32 %v418_v18, %v307_v47 }
 0x239   :  { %v352_v54 = vmul.f32 %v346_v48, %v328_v36  ;;  %v342_v55 = vmul.f32 0.044715, %v330_v49  ;;  %v334_v18 = vmul.f32 0.5, %v328_v36  ;;  %v335_v24 = vmul.f32 0.5, %v329_v46 }
 0x23a   :  { %507 = vtanh.f32 %v362_v50  ;;  %v357_v56 = vadd.f32 %v351_v51, %v327_v34  ;;  %v347_v57 = vmul.f32 %v341_v52, %v329_v46  ;;  %v331_v61 = vadd.f32 %v419_v21, %v319_v53 }
 0x23b   :  { %v358_v58 = vadd.f32 %v352_v54, %v328_v36  ;;  %v348_v59 = vmul.f32 %v342_v55, %v330_v49  ;;  %v336_v26 = vmul.f32 0.5, %v330_v49 }
 0x23c   :  { %v363_v62 = vmul.f32 0.7978846, %v357_v56  ;;  %v353_v63 = vmul.f32 %v347_v57, %v329_v46  ;;  %v343_v2 = vmul.f32 0.044715, %v331_v61  ;;  %v337_v31 = vmul.f32 0.5, %v331_v61 }
 0x23d   :  { %v364_v0 = vmul.f32 0.7978846, %v358_v58  ;;  %v354_v1 = vmul.f32 %v348_v59, %v330_v49 }
 0x23e   :  { %509 = vtanh.f32 %v363_v62  ;;  %v359_v60 = vadd.f32 %v353_v63, %v329_v46  ;;  %v349_v4 = vmul.f32 %v343_v2, %v331_v61 }
 0x23f   :  { %511 = vtanh.f32 %v364_v0  ;;  %v360_v3 = vadd.f32 %v354_v1, %v330_v49 }
 0x240   :  { %v365_v5 = vmul.f32 0.7978846, %v359_v60  ;;  %v355_v7 = vmul.f32 %v349_v4, %v331_v61 }
 0x241   :  { %v366_v6 = vmul.f32 0.7978846, %v360_v3 }
 0x242   :  { %513 = vtanh.f32 %v365_v5  ;;  %v361_v8 = vadd.f32 %v355_v7, %v331_v61 }
 0x243   :  { %515 = vtanh.f32 %v366_v6 }
 0x244   :  { %v508_v9 = vpop.eup %507  ;;  %v367_v12 = vmul.f32 0.7978846, %v361_v8 }
 0x245   :  { %v374_v11 = vadd.f32 1.0, %v508_v9 }
 0x246   :  { %517 = vtanh.f32 %v367_v12 }
 0x247   :  { %v380_v13 = vmul.f32 %v374_v11, %v332_v10 }
 0x248   :  { %v510_v14 = vpop.eup %509 }
 0x249   :  { %v512_v15 = vpop.eup %511  ;;  %386 = vst [vmem:[%s638_s4] sm:$0xff] %v380_v13  ;;  %v375_v17 = vadd.f32 1.0, %v510_v14 }
 0x24a   :  { %v376_v19 = vadd.f32 1.0, %v512_v15 }
 0x24b   :  { %v381_v20 = vmul.f32 %v375_v17, %v333_v16 }
 0x24c   :  { %v514_v21 = vpop.eup %513  ;;  %v382_v22 = vmul.f32 %v376_v19, %v334_v18 }
 0x24d   :  { %v516_v23 = vpop.eup %515  ;;  %387 = vst [vmem:[%s638_s4 + $0x8] sm:$0xff] %v381_v20  ;;  %v377_v25 = vadd.f32 1.0, %v514_v21 }
 0x24e   :  { %388 = vst [vmem:[%s638_s4 + $0x10] sm:$0xff] %v382_v22  ;;  %v378_v27 = vadd.f32 1.0, %v516_v23 }
 0x24f   :  { %v383_v28 = vmul.f32 %v377_v25, %v335_v24 }
 0x250   :  { %v384_v29 = vmul.f32 %v378_v27, %v336_v26  ;;  %v518_v30 = vpop.eup %517 }
 0x251   :  { %389 = vst [vmem:[%s638_s4 + $0x18] sm:$0xff] %v383_v28  ;;  %v379_v32 = vadd.f32 1.0, %v518_v30 }
 0x252   :  { %390 = vst [vmem:[%s638_s4 + $0x20] sm:$0xff] %v384_v29 }
 0x253   :  { %v385_v33 = vmul.f32 %v379_v32, %v337_v31 }
 0x255   :  { %391 = vst [vmem:[%s638_s4 + $0x28] sm:$0xff] %v385_v33 }

// kernel: wavlm_extract_features.16
= control target key start
LH: loop header
LB: loop body
LE: loop exit
PB: predicated region body
PF: predicated region fallthrough
CT: control target
= control target key end

     0   :  { %s831_s1 = inlined_call_operand.vmem [shape: bf16[256,128], index: 1, kind: input, shape index: {}]   ;;  %s832_s0 = inlined_call_operand.vmem [shape: bf16[32,256], index: 0, kind: input, shape index: {}]   ;;  %s833_s2 = inlined_call_operand.vmem [shape: f32[1,128], index: 2, kind: input, shape index: {}]   ;;  %s834_s3 = inlined_call_operand.vmem [shape: f32[1,128], index: 3, kind: input, shape index: {}]   ;;  %s835_s6 = inlined_call_operand.vmem [shape: bf16[128,128], index: 6, kind: input, shape index: {}]   ;;  %s836_s4 = inlined_call_operand.vmem [shape: f32[1,128], index: 4, kind: input, shape index: {}]   ;;  %s837_s5 = inlined_call_operand.vmem [shape: f32[1,128], index: 5, kind: input, shape index: {}]   ;;  %s838_s7 = inlined_call_operand.vmem [shape: f32[1,128], index: 7, kind: input, shape index: {}]   ;;  %s839_s8 = inlined_call_operand.vmem [shape: f32[32,128], index: 8, kind: output, shape index: {}]  }
   0x1   :  { %v621_v0 = vld [vmem:[%s831_s1 + $0x40] sm:$0xff]   ;;  %v623_v2 = vld [vmem:[%s831_s1 + $0x48] sm:$0xff]   ;;  %v625_v4 = vld [vmem:[%s831_s1 + $0x50] sm:$0xff]  }
   0x2   :  { %v622_v1 = vld [vmem:[%s831_s1] sm:$0xff]   ;;  %563 = vmatprep.subr.bf16.mxu0 %v621_v0  ;;  %v624_v3 = vld [vmem:[%s831_s1 + $0x8] sm:$0xff]   ;;  %v626_v5 = vld [vmem:[%s831_s1 + $0x10] sm:$0xff]  }
   0x3   :  { %564 = vmatpush3.bf16.msra.mxu0 %v622_v1  ;;  %v627_v6 = vld [vmem:[%s831_s1 + $0x58] sm:$0xff]   ;;  %v629_v8 = vld [vmem:[%s831_s1 + $0x60] sm:$0xff]   ;;  %v631_v10 = vld [vmem:[%s831_s1 + $0x68] sm:$0xff]  }
   0x4   :  { %565 = vmatprep.subr.bf16.mxu0 %v623_v2  ;;  %v628_v7 = vld [vmem:[%s831_s1 + $0x18] sm:$0xff]   ;;  %v630_v9 = vld [vmem:[%s831_s1 + $0x20] sm:$0xff]   ;;  %v632_v12 = vld [vmem:[%s831_s1 + $0x28] sm:$0xff]  }
   0x5   :  { %v639_v11 = vld [vmem:[%s832_s0 + $0x4] ss:$8 sps:$4 sm:$0xff]   ;;  %v633_v13 = vld [vmem:[%s831_s1 + $0x70] sm:$0xff]   ;;  %v635_v15 = vld [vmem:[%s831_s1 + $0x78] sm:$0xff]  }
   0x6   :  { %214 = vmatprep.mubr.bf16.mxu0 %v639_v11  ;;  %v634_v14 = vld [vmem:[%s831_s1 + $0x30] sm:$0xff]   ;;  %v636_v16 = vld [vmem:[%s831_s1 + $0x38] sm:$0xff]   ;;  %v637_v17 = vld [vmem:[%s832_s0] ss:$8 sps:$4 sm:$0xff]  }
   0x7   :  { %566 = vmatpush3.bf16.msra.mxu0 %v624_v3  ;;  %v640_v18 = vld [vmem:[%s832_s0 + $0x14] ss:$8 sps:$4 sm:$0xff]   ;;  %v642_v19 = vld [vmem:[%s832_s0 + $0x10] ss:$8 sps:$4 sm:$0xff]   ;;  %v550_v60 = vld [vmem:[%s833_s2] ss:$0 sm:$0xff] }
   0x8   :  { %567 = vmatprep.subr.bf16.mxu0 %v625_v4  ;;  %v551_v63 = vld [vmem:[%s834_s3] ss:$0 sm:$0xff] }
   0xb   :  { %568 = vmatpush3.bf16.msra.mxu0 %v626_v5 }
   0xc   :  { %569 = vmatprep.subr.bf16.mxu0 %v627_v6 }
   0xf   :  { %570 = vmatpush3.bf16.msra.mxu0 %v628_v7 }
  0x10   :  { %571 = vmatprep.subr.bf16.mxu0 %v629_v8 }
  0x13   :  { %572 = vmatpush3.bf16.msra.mxu0 %v630_v9 }
  0x14   :  { %573 = vmatprep.subr.bf16.mxu0 %v631_v10 }
  0x17   :  { %574 = vmatpush3.bf16.msra.mxu0 %v632_v12 }
  0x18   :  { %575 = vmatprep.subr.bf16.mxu0 %v633_v13 }
  0x1b   :  { %576 = vmatpush3.bf16.msra.mxu0 %v634_v14 }
  0x1c   :  { %577 = vmatprep.subr.bf16.mxu0 %v635_v15 }
  0x1f   :  { %578 = vmatpush3.bf16.msra.mxu0 %v636_v16 }
  0x22   :  { %215 = vmatmul.mubr.bf16.vlgmr.msra.gmra.mrb[0].mxu0 %v637_v17 }
  0x23   :  { %222 = vmatprep.mubr.bf16.mxu0 %v640_v18 }
  0x2a   :  { %223 = vmatmul.mubr.bf16.gmra.mrb[4].mxu0 %v642_v19 }
  0xf5   :  { %v579_v20 = vpop.f32.mrb[0].mxu0 }
  0xf6   :  { %v580_v21 = vpop.f32.mrb[1].mxu0 }
  0xf7   :  { %v581_v22 = vadd.f32 %v580_v21, %v579_v20  ;;  %v582_v23 = vpop.f32.mrb[2].mxu0 }
  0xf8   :  { %v583_v24 = vpop.f32.mrb[3].mxu0 }
  0xf9   :  { %v584_v25 = vadd.f32 %v583_v24, %v582_v23  ;;  %233 = vadd.xlane.f32.xlu0 %v581_v22 }
  0xfd   :  { %v585_v26 = vpop.f32.mrb[4].mxu0  ;;  %235 = vadd.xlane.f32.xlu0 %v584_v25 }
  0xfe   :  { %v586_v27 = vpop.f32.mrb[5].mxu0 }
  0xff   :  { %v587_v28 = vadd.f32 %v586_v27, %v585_v26  ;;  %v588_v29 = vpop.f32.mrb[6].mxu0 }
 0x100   :  { %v589_v30 = vpop.f32.mrb[7].mxu0 }
 0x101   :  { %v590_v31 = vadd.f32 %v589_v30, %v588_v29  ;;  %237 = vadd.xlane.f32.xlu1 %v587_v28 }
 0x105   :  { %239 = vadd.xlane.f32.xlu1 %v590_v31 }
 0x186   :  { %v234_v32 = vpop.xlane.xlu0 %233 }
 0x187   :  { %v242_v33 = vmul.f32 0.0078125, %v234_v32 }
 0x189   :  { %v246_v34 = vsub.f32 %v581_v22, %v242_v33 }
 0x18a   :  { %v236_v35 = vpop.xlane.xlu0 %235 }
 0x18b   :  { %v243_v36 = vmul.f32 0.0078125, %v236_v35  ;;  %v250_v37 = vmul.f32 %v246_v34, %v246_v34 }
 0x18d   :  { %v247_v38 = vsub.f32 %v584_v25, %v243_v36  ;;  %254 = vadd.xlane.f32.xlu0 %v250_v37 }
 0x18e   :  { %v238_v39 = vpop.xlane.xlu1 %237 }
 0x18f   :  { %v244_v40 = vmul.f32 0.0078125, %v238_v39  ;;  %v251_v41 = vmul.f32 %v247_v38, %v247_v38 }
 0x191   :  { %v248_v42 = vsub.f32 %v587_v28, %v244_v40  ;;  %256 = vadd.xlane.f32.xlu1 %v251_v41 }
 0x192   :  { %v240_v43 = vpop.xlane.xlu1 %239 }
 0x193   :  { %v245_v44 = vmul.f32 0.0078125, %v240_v43  ;;  %v252_v45 = vmul.f32 %v248_v42, %v248_v42 }
 0x195   :  { %v249_v46 = vsub.f32 %v590_v31, %v245_v44  ;;  %258 = vadd.xlane.f32.xlu0 %v252_v45 }
 0x197   :  { %v253_v47 = vmul.f32 %v249_v46, %v249_v46 }
 0x199   :  { %260 = vadd.xlane.f32.xlu1 %v253_v47 }
 0x21a   :  { %v255_v48 = vpop.xlane.xlu0 %254 }
 0x21b   :  { %v262_v49 = vmul.f32 0.0078125, %v255_v48 }
 0x21d   :  { %v266_v50 = vadd.f32 1e-05, %v262_v49 }
 0x21e   :  { %v257_v51 = vpop.xlane.xlu1 %256 }
 0x21f   :  { %651 = vrsqrt.f32 %v266_v50  ;;  %v263_v52 = vmul.f32 0.0078125, %v257_v51 }
 0x221   :  { %v267_v53 = vadd.f32 1e-05, %v263_v52 }
 0x222   :  { %v259_v54 = vpop.xlane.xlu0 %258 }
 0x223   :  { %653 = vrsqrt.f32 %v267_v53  ;;  %v264_v55 = vmul.f32 0.0078125, %v259_v54 }
 0x225   :  { %v268_v56 = vadd.f32 1e-05, %v264_v55 }
 0x226   :  { %v261_v57 = vpop.xlane.xlu1 %260 }
 0x227   :  { %655 = vrsqrt.f32 %v268_v56  ;;  %v265_v58 = vmul.f32 0.0078125, %v261_v57 }
 0x229   :  { %v652_v59 = vpop.eup %651  ;;  %v269_v61 = vadd.f32 1e-05, %v265_v58 }
 0x22a   :  { %v274_v62 = vmul.f32 %v652_v59, %v246_v34 }
 0x22b   :  { %657 = vrsqrt.f32 %v269_v61 }
 0x22c   :  { %v284_v0 = vmul.f32 %v550_v60, %v274_v62 }
 0x22d   :  { %v654_v1 = vpop.eup %653 }
 0x22e   :  { %v275_v2 = vmul.f32 %v654_v1, %v247_v38  ;;  %v294_v3 = vadd.f32 %v551_v63, %v284_v0 }
 0x230   :  { %v285_v4 = vmul.f32 %v550_v60, %v275_v2  ;;  %v302_v5 = vmul.f32 0.044715, %v294_v3  ;;  %v298_v35 = vmul.f32 0.5, %v294_v3  ;;  %v643_v2 = vld [vmem:[%s835_s6] sm:$0xff]  }
 0x231   :  { %v656_v6 = vpop.eup %655  ;;  %601 = vmatprep.subr.bf16.mxu1 %v643_v2 }
 0x232   :  { %v276_v7 = vmul.f32 %v656_v6, %v248_v42  ;;  %v306_v8 = vmul.f32 %v302_v5, %v294_v3  ;;  %v295_v9 = vadd.f32 %v551_v63, %v285_v4  ;;  %602 = vmatpush3.bf16.msra.mxu1 %v643_v2  ;;  %v645_v4 = vld [vmem:[%s835_s6 + $0x10] sm:$0xff]   ;;  %v646_v5 = vld [vmem:[%s835_s6 + $0x18] sm:$0xff]   ;;  %v647_v6 = vld [vmem:[%s835_s6 + $0x20] sm:$0xff]  }
 0x234   :  { %v286_v10 = vmul.f32 %v550_v60, %v276_v7  ;;  %v310_v11 = vmul.f32 %v306_v8, %v294_v3  ;;  %v303_v12 = vmul.f32 0.044715, %v295_v9  ;;  %v299_v39 = vmul.f32 0.5, %v295_v9  ;;  %v648_v7 = vld [vmem:[%s835_s6 + $0x28] sm:$0xff]   ;;  %v649_v8 = vld [vmem:[%s835_s6 + $0x30] sm:$0xff]  }
 0x235   :  { %v658_v13 = vpop.eup %657 }
 0x236   :  { %v277_v14 = vmul.f32 %v658_v13, %v249_v46  ;;  %v314_v15 = vadd.f32 %v310_v11, %v294_v3  ;;  %v307_v16 = vmul.f32 %v303_v12, %v295_v9  ;;  %v296_v17 = vadd.f32 %v551_v63, %v286_v10  ;;  %v644_v3 = vld [vmem:[%s835_s6 + $0x8] sm:$0xff]  }
 0x237   :  { %603 = vmatprep.subr.bf16.mxu1 %v644_v3 }
 0x238   :  { %v287_v18 = vmul.f32 %v550_v60, %v277_v14  ;;  %v318_v19 = vmul.f32 0.7978846, %v314_v15  ;;  %v311_v20 = vmul.f32 %v307_v16, %v295_v9  ;;  %v304_v21 = vmul.f32 0.044715, %v296_v17  ;;  %604 = vmatpush3.bf16.msra.mxu1 %v644_v3 }
 0x239   :  { %v300_v43 = vmul.f32 0.5, %v296_v17  ;;  %605 = vmatprep.subr.bf16.mxu1 %v645_v4 }
 0x23a   :  { %659 = vtanh.f32 %v318_v19  ;;  %v315_v22 = vadd.f32 %v311_v20, %v295_v9  ;;  %v297_v23 = vadd.f32 %v551_v63, %v287_v18  ;;  %v308_v24 = vmul.f32 %v304_v21, %v296_v17  ;;  %v650_v9 = vld [vmem:[%s835_s6 + $0x38] sm:$0xff]  }
 0x23c   :  { %v319_v25 = vmul.f32 0.7978846, %v315_v22  ;;  %v305_v26 = vmul.f32 0.044715, %v297_v23  ;;  %v312_v27 = vmul.f32 %v308_v24, %v296_v17  ;;  %v301_v47 = vmul.f32 0.5, %v297_v23  ;;  %606 = vmatpush3.bf16.msra.mxu1 %v645_v4 }
 0x23d   :  { %607 = vmatprep.subr.bf16.mxu1 %v646_v5  ;;  %v552_v24 = vld [vmem:[%s836_s4] ss:$0 sm:$0xff] }
 0x23e   :  { %661 = vtanh.f32 %v319_v25  ;;  %v309_v28 = vmul.f32 %v305_v26, %v297_v23  ;;  %v316_v29 = vadd.f32 %v312_v27, %v296_v17 }
 0x240   :  { %v313_v30 = vmul.f32 %v309_v28, %v297_v23  ;;  %v320_v31 = vmul.f32 0.7978846, %v316_v29  ;;  %608 = vmatpush3.bf16.msra.mxu1 %v646_v5  ;;  %v553_v28 = vld [vmem:[%s837_s5] ss:$0 sm:$0xff] }
 0x241   :  { %609 = vmatprep.subr.bf16.mxu1 %v647_v6 }
 0x242   :  { %v317_v32 = vadd.f32 %v313_v30, %v297_v23  ;;  %663 = vtanh.f32 %v320_v31 }
 0x244   :  { %v660_v33 = vpop.eup %659  ;;  %v321_v34 = vmul.f32 0.7978846, %v317_v32  ;;  %610 = vmatpush3.bf16.msra.mxu1 %v647_v6 }
 0x245   :  { %v326_v36 = vadd.f32 1.0, %v660_v33  ;;  %611 = vmatprep.subr.bf16.mxu1 %v648_v7 }
 0x246   :  { %665 = vtanh.f32 %v321_v34 }
 0x247   :  { %v330_v37 = vmul.f32 %v326_v36, %v298_v35 }
 0x248   :  { %v662_v38 = vpop.eup %661  ;;  %612 = vmatpush3.bf16.msra.mxu1 %v648_v7 }
 0x249   :  { %336 = vadd.xlane.f32.xlu0 %v330_v37  ;;  %v327_v40 = vadd.f32 1.0, %v662_v38  ;;  %613 = vmatprep.subr.bf16.mxu1 %v649_v8 }
 0x24b   :  { %v331_v41 = vmul.f32 %v327_v40, %v299_v39 }
 0x24c   :  { %v664_v42 = vpop.eup %663  ;;  %614 = vmatpush3.bf16.msra.mxu1 %v649_v8 }
 0x24d   :  { %338 = vadd.xlane.f32.xlu1 %v331_v41  ;;  %v328_v44 = vadd.f32 1.0, %v664_v42  ;;  %615 = vmatprep.subr.bf16.mxu1 %v650_v9  ;;  %v554_v42 = vld [vmem:[%s838_s7] ss:$0 sm:$0xff] }
 0x24f   :  { %v332_v46 = vmul.f32 %v328_v44, %v300_v43 }
 0x250   :  { %v666_v45 = vpop.eup %665  ;;  %616 = vmatpush3.bf16.msra.mxu1 %v650_v9 }
 0x251   :  { %v329_v48 = vadd.f32 1.0, %v666_v45  ;;  %340 = vadd.xlane.f32.xlu0 %v332_v46 }
 0x253   :  { %v333_v49 = vmul.f32 %v329_v48, %v301_v47 }
 0x255   :  { %342 = vadd.xlane.f32.xlu1 %v333_v49 }
 0x2d6   :  { %v337_v50 = vpop.xlane.xlu0 %336 }
 0x2d7   :  { %v344_v51 = vmul.f32 0.0078125, %v337_v50 }
 0x2d9   :  { %v348_v52 = vsub.f32 %v330_v37, %v344_v51 }
 0x2da   :  { %v339_v53 = vpop.xlane.xlu1 %338 }
 0x2db   :  { %v345_v54 = vmul.f32 0.0078125, %v339_v53  ;;  %v352_v55 = vmul.f32 %v348_v52, %v348_v52 }
 0x2dd   :  { %v349_v56 = vsub.f32 %v331_v41, %v345_v54  ;;  %356 = vadd.xlane.f32.xlu0 %v352_v55 }
 0x2de   :  { %v341_v57 = vpop.xlane.xlu0 %340 }
 0x2df   :  { %v353_v58 = vmul.f32 %v349_v56, %v349_v56  ;;  %v346_v59 = vmul.f32 0.0078125, %v341_v57 }
 0x2e1   :  { %358 = vadd.xlane.f32.xlu1 %v353_v58  ;;  %v350_v60 = vsub.f32 %v332_v46, %v346_v59 }
 0x2e2   :  { %v343_v61 = vpop.xlane.xlu1 %342 }
 0x2e3   :  { %v347_v62 = vmul.f32 0.0078125, %v343_v61  ;;  %v354_v63 = vmul.f32 %v350_v60, %v350_v60 }
 0x2e5   :  { %v351_v0 = vsub.f32 %v333_v49, %v347_v62  ;;  %360 = vadd.xlane.f32.xlu0 %v354_v63 }
 0x2e7   :  { %v355_v1 = vmul.f32 %v351_v0, %v351_v0 }
 0x2e9   :  { %362 = vadd.xlane.f32.xlu1 %v355_v1 }
 0x36a   :  { %v357_v10 = vpop.xlane.xlu0 %356 }
 0x36b   :  { %v364_v11 = vmul.f32 0.0078125, %v357_v10 }
 0x36d   :  { %v368_v12 = vadd.f32 1e-05, %v364_v11 }
 0x36e   :  { %v359_v13 = vpop.xlane.xlu1 %358 }
 0x36f   :  { %667 = vrsqrt.f32 %v368_v12  ;;  %v365_v14 = vmul.f32 0.0078125, %v359_v13 }
 0x371   :  { %v369_v15 = vadd.f32 1e-05, %v365_v14 }
 0x372   :  { %v361_v16 = vpop.xlane.xlu0 %360 }
 0x373   :  { %669 = vrsqrt.f32 %v369_v15  ;;  %v366_v17 = vmul.f32 0.0078125, %v361_v16 }
 0x375   :  { %v370_v18 = vadd.f32 1e-05, %v366_v17 }
 0x376   :  { %v363_v19 = vpop.xlane.xlu1 %362 }
 0x377   :  { %v367_v20 = vmul.f32 0.0078125, %v363_v19  ;;  %671 = vrsqrt.f32 %v370_v18 }
 0x379   :  { %v668_v21 = vpop.eup %667  ;;  %v371_v22 = vadd.f32 1e-05, %v367_v20 }
 0x37a   :  { %v376_v23 = vmul.f32 %v668_v21, %v348_v52 }
 0x37b   :  { %673 = vrsqrt.f32 %v371_v22 }
 0x37c   :  { %v386_v27 = vmul.f32 %v552_v24, %v376_v23 }
 0x37d   :  { %v670_v25 = vpop.eup %669 }
 0x37e   :  { %v377_v26 = vmul.f32 %v670_v25, %v349_v56  ;;  %v396_v31 = vadd.f32 %v553_v28, %v386_v27 }
 0x380   :  { %v387_v29 = vmul.f32 %v552_v24, %v377_v26 }
 0x381   :  { %v672_v30 = vpop.eup %671 }
 0x382   :  { %v397_v32 = vadd.f32 %v553_v28, %v387_v29  ;;  %v378_v33 = vmul.f32 %v672_v30, %v350_v60 }
 0x384   :  { %v400_v34 = vpack.c.bf16 %v397_v32, %v396_v31  ;;  %v388_v37 = vmul.f32 %v552_v24, %v378_v33 }
 0x385   :  { %v674_v35 = vpop.eup %673 }
 0x386   :  { %617 = vmatprep.mubr.bf16.mxu1 %v400_v34  ;;  %v379_v36 = vmul.f32 %v674_v35, %v351_v0  ;;  %v398_v39 = vadd.f32 %v553_v28, %v388_v37 }
 0x388   :  { %v389_v38 = vmul.f32 %v552_v24, %v379_v36 }
 0x38a   :  { %v399_v40 = vadd.f32 %v553_v28, %v389_v38 }
 0x38c   :  { %v401_v41 = vpack.c.bf16 %v399_v40, %v398_v39 }
 0x38e   :  { %618 = vmatmul.mubr.bf16.vlgmr.msra.gmra.mrb[0].mxu1 %v401_v41 }
 0x461   :  { %v619_v43 = vpop.f32.mrb[0].mxu1 }
 0x462   :  { %v516_v44 = vadd.f32 %v619_v43, %v554_v42  ;;  %v507_v45 = vpop.f32.mrb[1].mxu1 }
 0x463   :  { %v508_v46 = vadd.f32 %v554_v42, %v507_v45  ;;  %v620_v47 = vpop.f32.mrb[2].mxu1 }
 0x464   :  { %524 = vst [vmem:[%s839_s8 + $0x10] sm:$0xff] %v516_v44  ;;  %v519_v48 = vadd.f32 %v620_v47, %v554_v42  ;;  %v510_v49 = vpop.f32.mrb[3].mxu1 }
 0x465   :  { %522 = vst [vmem:[%s839_s8] sm:$0xff] %v508_v46  ;;  %v511_v50 = vadd.f32 %v554_v42, %v510_v49 }
 0x466   :  { %525 = vst [vmem:[%s839_s8 + $0x18] sm:$0xff] %v519_v48 }
 0x467   :  { %523 = vst [vmem:[%s839_s8 + $0x8] sm:$0xff] %v511_v50 }

// kernel: wavlm_extract_features.17
= control target key start
LH: loop header
LB: loop body
LE: loop exit
PB: predicated region body
PF: predicated region fallthrough
CT: control target
= control target key end

     0   :  { %s3365_s21 = smov 0   ;;  %s3865_s0 = inlined_call_operand.vmem [shape: f32[2,17,128], index: 0, kind: input, shape index: {}]   ;;  %s3866_s1 = inlined_call_operand.vmem [shape: f32[2,9,128], index: 1, kind: input, shape index: {}]   ;;  %s3867_s2 = inlined_call_operand.vmem [shape: bf16[8,4,32,32], index: 2, kind: input, shape index: {}]   ;;  %s3868_s3 = inlined_call_operand.vmem [shape: f32[1,128], index: 3, kind: input, shape index: {}]   ;;  %s3869_s4 = inlined_call_operand.vmem [shape: f32[1,128], index: 4, kind: input, shape index: {}]   ;;  %s3870_s5 = inlined_call_operand.vmem [shape: f32[1,128], index: 5, kind: input, shape index: {}]   ;;  %s3871_s6 = inlined_call_operand.vmem [shape: f32[2,9,128], index: 6, kind: output, shape index: {}]  }
   0x1 LB: > { %s2527_s22 = sadd.s32 4294967295, %s3323_s21   ;;  %p2531_p0 = scmp.ge.s32.totalorder %s3323_s21, 1  ;;  %s3323_s21 = sphi %s3365_s21, %s16_s21  }
   0x2   : > { %p222_p1 = scmp.lt.s32.totalorder %s3323_s21, 3 }
   0x4   : > { %p223_p2 = pnand %p2531_p0, %p222_p1 }
   0x5   : > { %p257_p3 = scmp.lt.s32.totalorder (!%p223_p2), %s2527_s22, 1  ;;  %v3245_v0 = vld [vmem:[%s3867_s2 + $0x40] sm:$0xff] (!%p223_p2)   ;;  %v3325_v1 = vmov (!%p223_p2), 0.0   ;;  %v3246_v2 = vld [vmem:[%s3867_s2 + $0x48] sm:$0xff] (!%p223_p2)   ;;  %v3247_v3 = vld [vmem:[%s3867_s2 + $0x50] sm:$0xff] (!%p223_p2)   ;;  %vm3326_vm0 = vmmov (!%p223_p2), 0  }
   0x6   : > { %226 = sbr.rel (%p223_p2) target bundleno = 941 (0x3ad), region = 44  ;;  %2848 = vmatprep.subr.bf16.mxu0 (!%p223_p2), %v3325_v1  ;;  %2856 = vmatprep.subr.bf16.mxu1 (!%p223_p2), %v3325_v1  ;;  %v3248_v4 = vld [vmem:[%s3867_s2 + $0x58] sm:$0xff] (!%p223_p2)   ;;  %s3327_s11 = smov (!%p223_p2), 96   ;;  %vm351_vm1 = vcmask (!%p223_p2), 261120   ;;  %v3249_v12 = vld [vmem:[%s3867_s2 + $0x60] sm:$0xff] (!%p223_p2)   ;;  %v3250_v14 = vld [vmem:[%s3867_s2 + $0x68] sm:$0xff] (!%p223_p2)  }
   0x7   : > { %2849 = vmatpush3.bf16.msra.mxu0 (!%p223_p2), %v3245_v0  ;;  %2852 = vmatprep.mubr.msk.bf16.mxu0 (!%p223_p2), %vm3326_vm0, %v3325_v1  ;;  %s3328_s12 = smov (!%p223_p2), 32   ;;  %s3329_s15 = smov (!%p223_p2), 64   ;;  %v3251_v31 = vld [vmem:[%s3867_s2 + $0x70] sm:$0xff] (!%p223_p2)   ;;  %v3253_v37 = vld [vmem:[%s3867_s2] sm:$0xff] (!%p223_p2)   ;;  %v3252_v43 = vld [vmem:[%s3867_s2 + $0x78] sm:$0xff] (!%p223_p2)   ;;  %vm2377_vm2 = vcmask (!%p223_p2), 523264  }
   0x8   : > { %2850 = vmatprep.subr.bf16.mxu0 (!%p223_p2), %v3325_v1  ;;  %2860 = vmatprep.mubr.msk.bf16.mxu1 (!%p223_p2), %vm3326_vm0, %v3325_v1  ;;  %v3254_v52 = vld [vmem:[%s3867_s2 + $0x8] sm:$0xff] (!%p223_p2)   ;;  %v3255_v57 = vld [vmem:[%s3867_s2 + $0x10] sm:$0xff] (!%p223_p2)   ;;  %v3257_v62 = vld [vmem:[%s3867_s2 + $0x20] sm:$0xff] (!%p223_p2)   ;;  %vm2380_vm3 = vcmask (!%p223_p2), 785408   ;;  %vm2418_vm4 = vcmask (!%p223_p2), 1040384  }
   0x9   : > { %2857 = vmatpush3.bf16.msra.mxu1 (!%p223_p2), %v3247_v3  ;;  %v3256_v63 = vld [vmem:[%s3867_s2 + $0x18] sm:$0xff] (!%p223_p2)   ;;  %v3258_v0 = vld [vmem:[%s3867_s2 + $0x28] sm:$0xff] (!%p223_p2)   ;;  %v3261_v3 = vld [vmem:[%s3867_s2 + $0x80] sm:$0xff] (!%p223_p2)  }
   0xa   : > { %2858 = vmatprep.subr.bf16.mxu1 (!%p223_p2), %v3325_v1 }
   0xb   : > { %2851 = vmatpush3.bf16.msra.mxu0 (!%p223_p2), %v3246_v2  ;;  %v3259_v2 = vld [vmem:[%s3867_s2 + $0x30] sm:$0xff] (!%p223_p2)  }
   0xc   : > { %2864 = vmatprep.subr.bf16.mxu0 (!%p223_p2), %v3325_v1 }
   0xd   : > { %s3873_s22 = smov (!%p257_p3, %s2527_s22), 1  ;;  %2859 = vmatpush3.bf16.msra.mxu1 %v3248_v4  ;;  %v3260_v4 = vld [vmem:[%s3867_s2 + $0x38] sm:$0xff]  }
   0xe   : > { %s3216_s29 = smul.u32 24, %s3873_s22  ;;  %2872 = vmatprep.subr.bf16.mxu1 %v3325_v1 }
  0x10   : > { %s261_s10 = scalar_lea.vmem %s3865_s0, %s3216_s29 }
  0x11   : > { %v273_v5 = vld [vmem:[%s261_s10] sm:$0xff]  ;;  %v274_v6 = vld [vmem:[%s261_s10 + $0x8] sm:$0xff] }
  0x12   : > { %v3230_v7 = vpack.i.bf16 %v274_v6, %v273_v5  ;;  %v3400_v8 = vpack.c.bf16 %v274_v6, %v273_v5  ;;  %v3262_v5 = vld [vmem:[%s3867_s2 + $0x88] sm:$0xff]   ;;  %v3263_v6 = vld [vmem:[%s3867_s2 + $0x90] sm:$0xff]  }
  0x14   : > { %3231 = vrot.lane.b32.xlu0 %v3230_v7, %s3327_s11  ;;  %3241 = vrot.lane.b32.xlu1 %v3230_v7, %s3328_s12  ;;  %v3405_v9 = vshrl.u32 %v3400_v8, 16  ;;  %v3408_v10 = vshll.u32 %v3400_v8, 16 }
  0x16   : > { %v337_v11 = vrot.slane %v3408_v10, 1 }
  0x18   : > { %3236 = vrot.lane.b32.xlu0 %v3230_v7, %s3329_s15  ;;  %v338_v13 = vor.u32 %v337_v11, %v3405_v9  ;;  %v823_v7 = vrot.slane %v3400_v8, 1  ;;  %v3265_v11 = vld [vmem:[%s3867_s2 + $0xa0] sm:$0xff]  }
  0x1a   : > { %2853 = vmatmul.mubr.msk.bf16.vlgmr.msra.gmra.mrb[0].mxu0 %vm351_vm1, %v338_v13  ;;  %v3266_v13 = vld [vmem:[%s3867_s2 + $0xa8] sm:$0xff]  }
  0x1b   : > { %2865 = vmatpush3.bf16.msra.mxu0 %v3249_v12  ;;  %2868 = vmatprep.mubr.msk.bf16.mxu0 %vm3326_vm0, %v3325_v1  ;;  %v3264_v12 = vld [vmem:[%s3867_s2 + $0x98] sm:$0xff]  }
  0x1c   : > { %2866 = vmatprep.subr.bf16.mxu0 %v3325_v1 }
  0x1f   : > { %2867 = vmatpush3.bf16.msra.mxu0 %v3250_v14  ;;  %v3267_v14 = vld [vmem:[%s3867_s2 + $0xb0] sm:$0xff]  }
  0x20   : > { %2880 = vmatprep.subr.bf16.mxu0 %v3325_v1 }
  0x86   : > { %v3232_v15 = vpop.permute.xlu0 %3231  ;;  %v3242_v16 = vpop.permute.xlu1 %3241 }
  0x87   : > { %v3234_v17 = vunpack.i.h.bf16 %v3232_v15  ;;  %v3233_v18 = vunpack.i.l.bf16 %v3232_v15  ;;  %v3244_v19 = vunpack.i.h.bf16 %v3242_v16  ;;  %v3243_v20 = vunpack.i.l.bf16 %v3242_v16  ;;  %v3269_v16 = vld [vmem:[%s3867_s2 + $0xc0] sm:$0xff]  }
  0x89   : > { %v3425_v21 = vpack.c.bf16 %v3234_v17, %v3233_v18  ;;  %v3427_v25 = vpack.c.bf16 %v3244_v19, %v3243_v20  ;;  %v3268_v18 = vld [vmem:[%s3867_s2 + $0xb8] sm:$0xff]   ;;  %v1079_v19 = vrot.slane %v3405_v9, 1  ;;  %v1080_v20 = vrot.slane %v3408_v10, 2 }
  0x8a   : > { %v3237_v22 = vpop.permute.xlu0 %3236 }
  0x8b   : > { %v3239_v23 = vunpack.i.h.bf16 %v3237_v22  ;;  %v3238_v24 = vunpack.i.l.bf16 %v3237_v22  ;;  %v3430_v26 = vshll.u32 %v3425_v21, 16  ;;  %v3435_v28 = vshrl.u32 %v3425_v21, 16  ;;  %v3270_v22 = vld [vmem:[%s3867_s2 + $0xc8] sm:$0xff]  }
  0x8c   : > { %v3448_v33 = vshrl.u32 %v3427_v25, 16  ;;  %v3451_v34 = vshll.u32 %v3427_v25, 16  ;;  %v881_v15 = vrot.slane %v3425_v21, 1 }
  0x8d   : > { %v3432_v27 = vpack.c.bf16 %v3239_v23, %v3238_v24  ;;  %v401_v29 = vrot.slane %v3430_v26, 1  ;;  %v1652_v38 = vrot.slane %v3435_v28, 2  ;;  %v1653_v39 = vrot.slane %v3430_v26, 3  ;;  %v3271_v23 = vld [vmem:[%s3867_s2 + $0xd0] sm:$0xff]  }
  0x8e   : > { %v1770_v44 = vrot.slane %v3448_v33, 2  ;;  %v1771_v45 = vrot.slane %v3451_v34, 3  ;;  %v527_v46 = vrot.slane %v3451_v34, 1  ;;  %v2166_v50 = vrot.slane %v3435_v28, 3 }
  0x8f   : > { %v3439_v30 = vshll.u32 %v3432_v27, 16  ;;  %v3445_v32 = vshrl.u32 %v3432_v27, 16  ;;  %v402_v35 = vor.u32 %v401_v29, %v3435_v28  ;;  %v3473_v47 = vor.u32 %v1653_v39, %v1652_v38  ;;  %v3274_v38 = vld [vmem:[%s3867_s2 + $0xe8] sm:$0xff]   ;;  %v3275_v39 = vld [vmem:[%s3867_s2 + $0xf0] sm:$0xff]  }
  0x90   : > { %v3478_v49 = vor.u32 %v1771_v45, %v1770_v44  ;;  %v2167_v51 = vrot.slane %v3430_v26, 4  ;;  %v2284_v55 = vrot.slane %v3448_v33, 3  ;;  %v2285_v56 = vrot.slane %v3451_v34, 4  ;;  %v3278_v44 = vld [vmem:[%s3867_s2 + $0x108] sm:$0xff]   ;;  %v3279_v45 = vld [vmem:[%s3867_s2 + $0x110] sm:$0xff]  }
  0x91   : > { %v464_v36 = vrot.slane %v3439_v30, 1  ;;  %2861 = vmatmul.mubr.msk.bf16.vlgmr.msra.gmra.mrb[0].mxu1 %vm351_vm1, %v402_v35  ;;  %v1711_v40 = vrot.slane %v3445_v32, 2  ;;  %v1712_v41 = vrot.slane %v3439_v30, 3  ;;  %v2225_v53 = vrot.slane %v3445_v32, 3  ;;  %v3272_v35 = vld [vmem:[%s3867_s2 + $0xd8] sm:$0xff]  }
  0x92   : > { %2873 = vmatpush3.bf16.msra.mxu1 %v3251_v31  ;;  %2876 = vmatprep.mubr.msk.bf16.mxu1 %vm3326_vm0, %v3325_v1  ;;  %v2226_v54 = vrot.slane %v3439_v30, 4  ;;  %v3495_v58 = vor.u32 %v2167_v51, %v2166_v50  ;;  %v528_v59 = vor.u32 %v527_v46, %v3448_v33  ;;  %v3501_v61 = vor.u32 %v2285_v56, %v2284_v55  ;;  %v3273_v31 = vld [vmem:[%s3867_s2 + $0xe0] sm:$0xff]   ;;  %v3280_v50 = vld [vmem:[%s3867_s2 + $0x118] sm:$0xff]   ;;  %v3282_v51 = vld [vmem:[%s3867_s2 + $0x128] sm:$0xff]  }
  0x93   : > { %v465_v42 = vor.u32 %v464_v36, %v3445_v32  ;;  %2874 = vmatprep.subr.bf16.mxu1 %v3325_v1  ;;  %v3475_v48 = vor.u32 %v1712_v41, %v1711_v40  ;;  %v939_v17 = vrot.slane %v3432_v27, 1  ;;  %v997_v24 = vrot.slane %v3427_v25, 1  ;;  %v3277_v41 = vld [vmem:[%s3867_s2 + $0x100] sm:$0xff]   ;;  %v3284_v56 = vld [vmem:[%s3867_s2 + $0x138] sm:$0xff]  }
  0x94   : > { %v3499_v60 = vor.u32 %v2226_v54, %v2225_v53  ;;  %v1081_v29 = vor.u32 %v1080_v20, %v1079_v19  ;;  %v1138_v36 = vrot.slane %v3435_v28, 1  ;;  %v1197_v28 = vrot.slane %v3445_v32, 1  ;;  %v3276_v32 = vld [vmem:[%s3867_s2 + $0xf8] sm:$0xff]   ;;  %v3281_v46 = vld [vmem:[%s3867_s2 + $0x120] sm:$0xff]   ;;  %v3303_v20 = vld [vmem:[%s3867_s2 + $0x1d0] sm:$0xff]  }
  0x95   : > { %2869 = vmatmul.mubr.msk.bf16.vlgmr.msra.gmra.mrb[4].mxu0 %vm351_vm1, %v465_v42  ;;  %v1397_v53 = vrot.slane %v3425_v21, 2  ;;  %v3285_v54 = vld [vmem:[%s3867_s2 + $0x140] sm:$0xff]   ;;  %v1454_v55 = vrot.slane %v3432_v27, 2  ;;  %v2108_v19 = vrot.slane %v3408_v10, 4 }
  0x96   : > { %2881 = vmatpush3.bf16.msra.mxu0 %v3253_v37  ;;  %2884 = vmatprep.mubr.msk.bf16.mxu0 %vm3326_vm0, %v3325_v1  ;;  %v1139_v37 = vrot.slane %v3430_v26, 2  ;;  %v1198_v26 = vrot.slane %v3439_v30, 2  ;;  %v1256_v30 = vrot.slane %v3448_v33, 1 }
  0x97   : > { %2875 = vmatpush3.bf16.msra.mxu1 %v3252_v43  ;;  %2882 = vmatprep.subr.bf16.mxu0 %v3325_v1  ;;  %v1257_v43 = vrot.slane %v3451_v34, 2  ;;  %v1340_v34 = vrot.slane %v3400_v8, 2 }
  0x98   : > { %2888 = vmatprep.subr.bf16.mxu1 %v3325_v1  ;;  %v1140_v40 = vor.u32 %v1139_v37, %v1138_v36  ;;  %v1199_v42 = vor.u32 %v1198_v26, %v1197_v28 }
  0x99   : > { %v1258_v33 = vor.u32 %v1257_v43, %v1256_v30 }
  0x9a   : > { %2877 = vmatmul.mubr.msk.bf16.vlgmr.msra.gmra.mrb[4].mxu1 %vm351_vm1, %v528_v59  ;;  %2883 = vmatpush3.bf16.msra.mxu0 %v3254_v52  ;;  %v3283_v52 = vld [vmem:[%s3867_s2 + $0x130] sm:$0xff]   ;;  %v1594_v59 = vrot.slane %v3408_v10, 3 }
  0x9b   : > { %2889 = vmatpush3.bf16.msra.mxu1 %v3255_v57  ;;  %2896 = vmatprep.subr.bf16.mxu0 %v3325_v1  ;;  %v1593_v57 = vrot.slane %v3405_v9, 2 }
  0x9c   : > { %2890 = vmatprep.subr.bf16.mxu1 %v3325_v1  ;;  %2892 = vmatprep.mubr.msk.bf16.mxu1 %vm3326_vm0, %v3325_v1 }
  0x9d   : > { %2885 = vmatmul.mubr.msk.bf16.vlgmr.msra.gmra.mrb[0].mxu0 %vm351_vm1, %v3400_v8 }
  0x9e   : > { %2897 = vmatpush3.bf16.msra.mxu0 %v3257_v62  ;;  %2900 = vmatprep.mubr.msk.bf16.mxu0 %vm3326_vm0, %v3325_v1  ;;  %v3286_v62 = vld [vmem:[%s3867_s2 + $0x148] sm:$0xff]  }
  0x9f   : > { %2891 = vmatpush3.bf16.msra.mxu1 %v3256_v63  ;;  %2898 = vmatprep.subr.bf16.mxu0 %v3325_v1  ;;  %v3287_v63 = vld [vmem:[%s3867_s2 + $0x150] sm:$0xff]  }
  0xa0   : > { %2904 = vmatprep.subr.bf16.mxu1 %v3325_v1 }
  0xa2   : > { %2893 = vmatmul.mubr.msk.bf16.vlgmr.msra.gmra.mrb[0].mxu1 %vm351_vm1, %v3425_v21  ;;  %2899 = vmatpush3.bf16.msra.mxu0 %v3258_v0  ;;  %v1511_v0 = vrot.slane %v3427_v25, 2 }
  0xa3   : > { %2905 = vmatpush3.bf16.msra.mxu1 %v3259_v2  ;;  %2912 = vmatprep.subr.bf16.mxu0 %v3325_v1  ;;  %v1595_v2 = vor.u32 %v1594_v59, %v1593_v57 }
  0xa4   : > { %2906 = vmatprep.subr.bf16.mxu1 %v3325_v1  ;;  %2908 = vmatprep.mubr.msk.bf16.mxu1 %vm3326_vm0, %v3325_v1 }
  0xa5   : > { %2901 = vmatmul.mubr.msk.bf16.vlgmr.msra.gmra.mrb[4].mxu0 %vm351_vm1, %v3432_v27 }
  0xa6   : > { %2913 = vmatpush3.bf16.msra.mxu0 %v3261_v3  ;;  %2916 = vmatprep.mubr.msk.bf16.mxu0 %vm3326_vm0, %v3325_v1  ;;  %v3289_v3 = vld [vmem:[%s3867_s2 + $0x160] sm:$0xff]  }
  0xa7   : > { %2907 = vmatpush3.bf16.msra.mxu1 %v3260_v4  ;;  %2914 = vmatprep.subr.bf16.mxu0 %v3325_v1  ;;  %v3288_v4 = vld [vmem:[%s3867_s2 + $0x158] sm:$0xff]  }
  0xa8   : > { %2920 = vmatprep.subr.bf16.mxu1 %v3325_v1 }
  0xaa   : > { %2909 = vmatmul.mubr.msk.bf16.vlgmr.msra.gmra.mrb[4].mxu1 %vm351_vm1, %v3427_v25  ;;  %2915 = vmatpush3.bf16.msra.mxu0 %v3262_v5  ;;  %v3290_v5 = vld [vmem:[%s3867_s2 + $0x168] sm:$0xff]  }
  0xab   : > { %2921 = vmatpush3.bf16.msra.mxu1 %v3263_v6  ;;  %2928 = vmatprep.subr.bf16.mxu0 %v3325_v1  ;;  %v3291_v6 = vld [vmem:[%s3867_s2 + $0x170] sm:$0xff]  }
  0xac   : > { %2922 = vmatprep.subr.bf16.mxu1 %v3325_v1  ;;  %2924 = vmatprep.mubr.msk.bf16.mxu1 %vm3326_vm0, %v3325_v1 }
  0xad   : > { %2917 = vmatmul.mubr.msk.bf16.vlgmr.msra.gmra.mrb[0].mxu0 %vm351_vm1, %v823_v7  ;;  %v3293_v7 = vld [vmem:[%s3867_s2 + $0x180] sm:$0xff]  }
  0xae   : > { %2929 = vmatpush3.bf16.msra.mxu0 %v3265_v11  ;;  %2932 = vmatprep.mubr.msk.bf16.mxu0 %vm3326_vm0, %v3325_v1  ;;  %v3292_v11 = vld [vmem:[%s3867_s2 + $0x178] sm:$0xff]  }
  0xaf   : > { %2923 = vmatpush3.bf16.msra.mxu1 %v3264_v12  ;;  %2930 = vmatprep.subr.bf16.mxu0 %v3325_v1  ;;  %v3295_v12 = vld [vmem:[%s3867_s2 + $0x190] sm:$0xff]  }
  0xb0   : > { %2936 = vmatprep.subr.bf16.mxu1 %v3325_v1 }
  0xb2   : > { %2925 = vmatmul.mubr.msk.bf16.vlgmr.msra.gmra.mrb[0].mxu1 %vm351_vm1, %v881_v15  ;;  %2931 = vmatpush3.bf16.msra.mxu0 %v3266_v13  ;;  %v1854_v13 = vrot.slane %v3400_v8, 3  ;;  %v3298_v8 = vld [vmem:[%s3867_s2 + $0x1a8] sm:$0xff]   ;;  %v1911_v15 = vrot.slane %v3425_v21, 3  ;;  %v2107_v21 = vrot.slane %v3405_v9, 3  ;;  %v2025_v9 = vrot.slane %v3427_v25, 3 }
  0xb3   : > { %2937 = vmatpush3.bf16.msra.mxu1 %v3267_v14  ;;  %2944 = vmatprep.subr.bf16.mxu0 %v3325_v1  ;;  %v3296_v14 = vld [vmem:[%s3867_s2 + $0x198] sm:$0xff]   ;;  %v3306_v25 = vld [vmem:[%s3867_s2 + $0x1e8] sm:$0xff]  }
  0xb4   : > { %2938 = vmatprep.subr.bf16.mxu1 %v3325_v1  ;;  %2940 = vmatprep.mubr.msk.bf16.mxu1 %vm3326_vm0, %v3325_v1  ;;  %v2109_v10 = vor.u32 %v2108_v19, %v2107_v21 }
  0xb5   : > { %2933 = vmatmul.mubr.msk.bf16.vlgmr.msra.gmra.mrb[4].mxu0 %vm351_vm1, %v939_v17  ;;  %v1968_v17 = vrot.slane %v3432_v27, 3  ;;  %v3302_v27 = vld [vmem:[%s3867_s2 + $0x1c8] sm:$0xff]  }
  0xb6   : > { %2945 = vmatpush3.bf16.msra.mxu0 %v3269_v16  ;;  %2948 = vmatprep.mubr.msk.bf16.mxu0 %vm3326_vm0, %v3325_v1  ;;  %v3301_v16 = vld [vmem:[%s3867_s2 + $0x1c0] sm:$0xff]  }
  0xb7   : > { %2939 = vmatpush3.bf16.msra.mxu1 %v3268_v18  ;;  %2946 = vmatprep.subr.bf16.mxu0 %v3325_v1  ;;  %v3300_v18 = vld [vmem:[%s3867_s2 + $0x1b8] sm:$0xff]  }
  0xb8   : > { %2952 = vmatprep.subr.bf16.mxu1 %v3325_v1 }
  0xba   : > { %2941 = vmatmul.mubr.msk.bf16.vlgmr.msra.gmra.mrb[4].mxu1 %vm351_vm1, %v997_v24  ;;  %2947 = vmatpush3.bf16.msra.mxu0 %v3270_v22  ;;  %v3305_v22 = vld [vmem:[%s3867_s2 + $0x1e0] sm:$0xff]   ;;  %v3307_v24 = vld [vmem:[%s3867_s2 + $0x1f0] sm:$0xff]  }
  0xbb   : > { %2953 = vmatpush3.bf16.msra.mxu1 %v3271_v23  ;;  %2960 = vmatprep.subr.bf16.mxu0 %v3325_v1  ;;  %v3304_v23 = vld [vmem:[%s3867_s2 + $0x1d8] sm:$0xff]  }
  0xbc   : > { %2954 = vmatprep.subr.bf16.mxu1 %v3325_v1  ;;  %2956 = vmatprep.mubr.msk.bf16.mxu1 %vm3326_vm0, %v3325_v1 }
  0xbd   : > { %2949 = vmatmul.mubr.msk.bf16.vlgmr.msra.gmra.mrb[0].mxu0 %vm351_vm1, %v1081_v29  ;;  %v3308_v29 = vld [vmem:[%s3867_s2 + $0x1f8] sm:$0xff]  }
  0xbe   : > { %2961 = vmatpush3.bf16.msra.mxu0 %v3273_v31  ;;  %2964 = vmatprep.mubr.msk.bf16.mxu0 %vm3326_vm0, %v3325_v1 }
  0xbf   : > { %2955 = vmatpush3.bf16.msra.mxu1 %v3272_v35  ;;  %2962 = vmatprep.subr.bf16.mxu0 %v3325_v1 }
  0xc0   : > { %2968 = vmatprep.subr.bf16.mxu1 %v3325_v1 }
  0xc2   : > { %2957 = vmatmul.mubr.msk.bf16.vlgmr.msra.gmra.mrb[0].mxu1 %vm351_vm1, %v1140_v40  ;;  %2963 = vmatpush3.bf16.msra.mxu0 %v3274_v38 }
  0xc3   : > { %2969 = vmatpush3.bf16.msra.mxu1 %v3275_v39  ;;  %2976 = vmatprep.subr.bf16.mxu0 %v3325_v1 }
  0xc4   : > { %2970 = vmatprep.subr.bf16.mxu1 %v3325_v1  ;;  %2972 = vmatprep.mubr.msk.bf16.mxu1 %vm3326_vm0, %v3325_v1 }
  0xc5   : > { %2965 = vmatmul.mubr.msk.bf16.vlgmr.msra.gmra.mrb[4].mxu0 %vm351_vm1, %v1199_v42 }
  0xc6   : > { %2977 = vmatpush3.bf16.msra.mxu0 %v3277_v41  ;;  %2980 = vmatprep.mubr.msk.bf16.mxu0 %vm3326_vm0, %v3325_v1 }
  0xc7   : > { %2971 = vmatpush3.bf16.msra.mxu1 %v3276_v32  ;;  %2978 = vmatprep.subr.bf16.mxu0 %v3325_v1 }
  0xc8   : > { %2984 = vmatprep.subr.bf16.mxu1 %v3325_v1 }
  0xca   : > { %2973 = vmatmul.mubr.msk.bf16.vlgmr.msra.gmra.mrb[4].mxu1 %vm351_vm1, %v1258_v33  ;;  %2979 = vmatpush3.bf16.msra.mxu0 %v3278_v44  ;;  %v2745_v33 = vld [vmem:[%s3868_s3] ss:$0 sm:$0xff] }
  0xcb   : > { %2985 = vmatpush3.bf16.msra.mxu1 %v3279_v45  ;;  %2992 = vmatprep.subr.bf16.mxu0 %v3325_v1 }
  0xcc   : > { %2986 = vmatprep.subr.bf16.mxu1 %v3325_v1  ;;  %2988 = vmatprep.mubr.msk.bf16.mxu1 %vm3326_vm0, %v3325_v1 }
  0xcd   : > { %2981 = vmatmul.mubr.msk.bf16.vlgmr.msra.gmra.mrb[0].mxu0 %vm351_vm1, %v1340_v34 }
  0xce   : > { %2993 = vmatpush3.bf16.msra.mxu0 %v3281_v46  ;;  %2996 = vmatprep.mubr.msk.bf16.mxu0 %vm3326_vm0, %v3325_v1 }
  0xcf   : > { %2987 = vmatpush3.bf16.msra.mxu1 %v3280_v50  ;;  %2994 = vmatprep.subr.bf16.mxu0 %v3325_v1 }
  0xd0   : > { %3000 = vmatprep.subr.bf16.mxu1 %v3325_v1 }
  0xd2   : > { %2989 = vmatmul.mubr.msk.bf16.vlgmr.msra.gmra.mrb[0].mxu1 %vm351_vm1, %v1397_v53  ;;  %2995 = vmatpush3.bf16.msra.mxu0 %v3282_v51 }
  0xd3   : > { %3001 = vmatpush3.bf16.msra.mxu1 %v3283_v52  ;;  %3008 = vmatprep.subr.bf16.mxu0 %v3325_v1 }
  0xd4   : > { %3002 = vmatprep.subr.bf16.mxu1 %v3325_v1  ;;  %3004 = vmatprep.mubr.msk.bf16.mxu1 %vm3326_vm0, %v3325_v1 }
  0xd5   : > { %2997 = vmatmul.mubr.msk.bf16.vlgmr.msra.gmra.mrb[4].mxu0 %vm351_vm1, %v1454_v55 }
  0xd6   : > { %3009 = vmatpush3.bf16.msra.mxu0 %v3285_v54  ;;  %3012 = vmatprep.mubr.msk.bf16.mxu0 %vm3326_vm0, %v3325_v1 }
  0xd7   : > { %3003 = vmatpush3.bf16.msra.mxu1 %v3284_v56  ;;  %3010 = vmatprep.subr.bf16.mxu0 %v3325_v1 }
  0xd8   : > { %3016 = vmatprep.subr.bf16.mxu1 %v3325_v1 }
  0xda   : > { %3005 = vmatmul.mubr.msk.bf16.vlgmr.msra.gmra.mrb[4].mxu1 %vm351_vm1, %v1511_v0  ;;  %3011 = vmatpush3.bf16.msra.mxu0 %v3286_v62 }
  0xdb   : > { %3017 = vmatpush3.bf16.msra.mxu1 %v3287_v63  ;;  %3024 = vmatprep.subr.bf16.mxu0 %v3325_v1 }
  0xdc   : > { %3018 = vmatprep.subr.bf16.mxu1 %v3325_v1  ;;  %3020 = vmatprep.mubr.msk.bf16.mxu1 %vm3326_vm0, %v3325_v1 }
  0xdd   : > { %3013 = vmatmul.mubr.msk.bf16.vlgmr.msra.gmra.mrb[0].mxu0 %vm351_vm1, %v1595_v2 }
  0xde   : > { %3025 = vmatpush3.bf16.msra.mxu0 %v3289_v3  ;;  %3028 = vmatprep.mubr.msk.bf16.mxu0 %vm3326_vm0, %v3325_v1 }
  0xdf   : > { %3019 = vmatpush3.bf16.msra.mxu1 %v3288_v4  ;;  %3026 = vmatprep.subr.bf16.mxu0 %v3325_v1 }
  0xe0   : > { %3032 = vmatprep.subr.bf16.mxu1 %v3325_v1 }
  0xe2   : > { %3021 = vmatmul.mubr.msk.bf16.vlgmr.msra.gmra.mrb[0].mxu1 %vm351_vm1, %v3473_v47  ;;  %3027 = vmatpush3.bf16.msra.mxu0 %v3290_v5  ;;  %v3294_v47 = vld [vmem:[%s3867_s2 + $0x188] sm:$0xff]  }
  0xe3   : > { %3033 = vmatpush3.bf16.msra.mxu1 %v3291_v6  ;;  %3040 = vmatprep.subr.bf16.mxu0 %v3325_v1 }
  0xe4   : > { %3034 = vmatprep.subr.bf16.mxu1 %v3325_v1  ;;  %3036 = vmatprep.mubr.msk.bf16.mxu1 %vm3326_vm0, %v3325_v1 }
  0xe5   : > { %3029 = vmatmul.mubr.msk.bf16.vlgmr.msra.gmra.mrb[4].mxu0 %vm351_vm1, %v3475_v48  ;;  %v3297_v48 = vld [vmem:[%s3867_s2 + $0x1a0] sm:$0xff]  }
  0xe6   : > { %3041 = vmatpush3.bf16.msra.mxu0 %v3293_v7  ;;  %3044 = vmatprep.mubr.msk.bf16.mxu0 %vm3326_vm0, %v3325_v1 }
  0xe7   : > { %3035 = vmatpush3.bf16.msra.mxu1 %v3292_v11  ;;  %3042 = vmatprep.subr.bf16.mxu0 %v3325_v1 }
  0xe8   : > { %3048 = vmatprep.subr.bf16.mxu1 %v3325_v1 }
  0xea   : > { %3037 = vmatmul.mubr.msk.bf16.vlgmr.msra.gmra.mrb[4].mxu1 %vm351_vm1, %v3478_v49  ;;  %3043 = vmatpush3.bf16.msra.mxu0 %v3294_v47  ;;  %v3299_v49 = vld [vmem:[%s3867_s2 + $0x1b0] sm:$0xff]  }
  0xeb   : > { %3049 = vmatpush3.bf16.msra.mxu1 %v3295_v12  ;;  %3056 = vmatprep.subr.bf16.mxu0 %v3325_v1 }
  0xec   : > { %3050 = vmatprep.subr.bf16.mxu1 %v3325_v1  ;;  %3052 = vmatprep.mubr.msk.bf16.mxu1 %vm3326_vm0, %v3325_v1 }
  0xed   : > { %3045 = vmatmul.mubr.msk.bf16.vlgmr.msra.gmra.mrb[0].mxu0 %vm351_vm1, %v1854_v13 }
  0xee   : > { %3057 = vmatpush3.bf16.msra.mxu0 %v3297_v48  ;;  %3060 = vmatprep.mubr.msk.bf16.mxu0 %vm3326_vm0, %v3325_v1 }
  0xef   : > { %3051 = vmatpush3.bf16.msra.mxu1 %v3296_v14  ;;  %3058 = vmatprep.subr.bf16.mxu0 %v3325_v1 }
  0xf0   : > { %3064 = vmatprep.subr.bf16.mxu1 %v3325_v1 }
  0xf2   : > { %3053 = vmatmul.mubr.msk.bf16.vlgmr.msra.gmra.mrb[0].mxu1 %vm351_vm1, %v1911_v15  ;;  %3059 = vmatpush3.bf16.msra.mxu0 %v3298_v8 }
  0xf3   : > { %3065 = vmatpush3.bf16.msra.mxu1 %v3299_v49  ;;  %3072 = vmatprep.subr.bf16.mxu0 %v3325_v1 }
  0xf4   : > { %3066 = vmatprep.subr.bf16.mxu1 %v3325_v1  ;;  %3068 = vmatprep.mubr.msk.bf16.mxu1 %vm3326_vm0, %v3325_v1 }
  0xf5   : > { %3061 = vmatmul.mubr.msk.bf16.vlgmr.msra.gmra.mrb[4].mxu0 %vm351_vm1, %v1968_v17 }
  0xf6   : > { %3073 = vmatpush3.bf16.msra.mxu0 %v3301_v16  ;;  %3076 = vmatprep.mubr.msk.bf16.mxu0 %vm3326_vm0, %v3325_v1 }
  0xf7   : > { %3067 = vmatpush3.bf16.msra.mxu1 %v3300_v18  ;;  %3074 = vmatprep.subr.bf16.mxu0 %v3325_v1 }
  0xf8   : > { %3080 = vmatprep.subr.bf16.mxu1 %v3325_v1 }
  0xfa   : > { %3069 = vmatmul.mubr.msk.bf16.vlgmr.msra.gmra.mrb[4].mxu1 %vm351_vm1, %v2025_v9  ;;  %3075 = vmatpush3.bf16.msra.mxu0 %v3302_v27 }
  0xfb   : > { %3081 = vmatpush3.bf16.msra.mxu1 %v3303_v20  ;;  %3088 = vmatprep.subr.bf16.mxu0 %v3325_v1 }
  0xfc   : > { %3082 = vmatprep.subr.bf16.mxu1 %v3325_v1  ;;  %3084 = vmatprep.mubr.msk.bf16.mxu1 %vm3326_vm0, %v3325_v1 }
  0xfd   : > { %3077 = vmatmul.mubr.msk.bf16.vlgmr.msra.gmra.mrb[0].mxu0 %vm351_vm1, %v2109_v10 }
  0xfe   : > { %3089 = vmatpush3.bf16.msra.mxu0 %v3305_v22  ;;  %3092 = vmatprep.mubr.msk.bf16.mxu0 %vm3326_vm0, %v3325_v1 }
  0xff   : > { %3083 = vmatpush3.bf16.msra.mxu1 %v3304_v23  ;;  %3090 = vmatprep.subr.bf16.mxu0 %v3325_v1 }
 0x100   : > { %3096 = vmatprep.subr.bf16.mxu1 %v3325_v1 }
 0x102   : > { %3085 = vmatmul.mubr.msk.bf16.vlgmr.msra.gmra.mrb[0].mxu1 %vm351_vm1, %v3495_v58  ;;  %3091 = vmatpush3.bf16.msra.mxu0 %v3306_v25 }
 0x103   : > { %3097 = vmatpush3.bf16.msra.mxu1 %v3307_v24  ;;  %3100 = vmatprep.mubr.msk.bf16.mxu1 %vm3326_vm0, %v3325_v1 }
 0x104   : > { %3098 = vmatprep.subr.bf16.mxu1 %v3325_v1 }
 0x105   : > { %3093 = vmatmul.mubr.msk.bf16.vlgmr.msra.gmra.mrb[4].mxu0 %vm351_vm1, %v3499_v60 }
 0x107   : > { %3099 = vmatpush3.bf16.msra.mxu1 %v3308_v29 }
 0x10a   : > { %3101 = vmatmul.mubr.msk.bf16.vlgmr.msra.gmra.mrb[4].mxu1 %vm351_vm1, %v3501_v61 }
 0x1d0   : > { %v2159_v31 = vpop.f32.mrb[0].mxu0 }
 0x1d1   : > { %v3078_v58 = vpop.f32.mrb[1].mxu0 }
 0x1d2   : > { %v2162_v35 = vpop.f32.mrb[2].mxu0 }
 0x1d3   : > { %v3079_v36 = vpop.f32.mrb[3].mxu0 }
 0x1d5   : > { %v2218_v37 = vpop.f32.mrb[0].mxu1 }
 0x1d6   : > { %2353 = vrot.lane.b32.xlu1 %v2218_v37, %s3328_s12  ;;  %v3086_v38 = vpop.f32.mrb[1].mxu1 }
 0x1d7   : > { %v2221_v39 = vpop.f32.mrb[2].mxu1 }
 0x1d8   : > { %v3087_v28 = vpop.f32.mrb[3].mxu1  ;;  %v2277_v26 = vpop.f32.mrb[4].mxu0 }
 0x1d9   : > { %v3094_v40 = vpop.f32.mrb[5].mxu0 }
 0x1da   : > { %2355 = vrot.lane.b32.xlu1 %v2221_v39, %s3328_s12  ;;  %v2280_v1 = vpop.f32.mrb[6].mxu0  ;;  %v2746_v39 = vld [vmem:[%s3869_s4] ss:$0 sm:$0xff] }
 0x1db   : > { %2363 = vrot.lane.b32.xlu0 %v2280_v1, %s3329_s15  ;;  %v3095_v60 = vpop.f32.mrb[7].mxu0  ;;  %v2747_v40 = vld [vmem:[%s3870_s5] ss:$0 sm:$0xff] }
 0x1dd   : > { %v2336_v41 = vpop.f32.mrb[4].mxu1 }
 0x1de   : > { %v3102_v61 = vpop.f32.mrb[5].mxu1  ;;  %2361 = vrot.lane.b32.xlu1 %v2277_v26, %s3329_s15 }
 0x1df   : > { %v2339_v42 = vpop.f32.mrb[6].mxu1 }
 0x1e0   : > { %v3103_v32 = vpop.f32.mrb[7].mxu1  ;;  %2371 = vrot.lane.b32.xlu0 %v2339_v42, %s3327_s11 }
 0x1e4   : > { %2369 = vrot.lane.b32.xlu0 %v2336_v41, %s3327_s11  ;;  %s2750_s11 = sshll.u32 %s3873_s22, 4 }
 0x1e5   : > { %s266_s24 = scalar_lea.vmem %s3866_s1, %s2750_s11  ;;  %s271_s7 = scalar_lea.vmem %s3871_s6, %s2750_s11 }
 0x1e6   : > { %v2411_v13 = vld [vmem:[%s266_s24 + $0x8] sm:$0x1]  ;;  %v2410_v16 = vld [vmem:[%s266_s24] sm:$0xff] }
 0x248   : > { %v2354_v30 = vpop.permute.xlu1 %2353 }
 0x249   : > { %v2375_v53 = vsel %vm351_vm1, %v2159_v31, %v2354_v30 }
 0x24c   : > { %v2356_v43 = vpop.permute.xlu1 %2355 }
 0x24d   : > { %v2364_v44 = vpop.permute.xlu0 %2363  ;;  %v2376_v45 = vsel %vm351_vm1, %v2162_v35, %v2356_v43 }
 0x24e   : > { %v2379_v34 = vsel %vm2377_vm2, %v2376_v45, %v2364_v44 }
 0x250   : > { %v2362_v50 = vpop.permute.xlu1 %2361 }
 0x251   : > { %v2378_v54 = vsel %vm2377_vm2, %v2375_v53, %v2362_v50 }
 0x252   : > { %v2372_v46 = vpop.permute.xlu0 %2371 }
 0x253   : > { %v2382_v51 = vsel %vm2380_vm3, %v2379_v34, %v2372_v46 }
 0x254   : > { %v2391_v52 = vadd.f32 %v2745_v33, %v2382_v51 }
 0x256   : > { %v2395_v55 = vmul.f32 0.044715, %v2391_v52  ;;  %v2370_v56 = vpop.permute.xlu0 %2369  ;;  %v2393_v47 = vmul.f32 0.5, %v2391_v52 }
 0x257   : > { %v2381_v57 = vsel %vm2380_vm3, %v2378_v54, %v2370_v56 }
 0x258   : > { %v2390_v59 = vadd.f32 %v2745_v33, %v2381_v57  ;;  %v2397_v62 = vmul.f32 %v2395_v55, %v2391_v52 }
 0x25a   : > { %v2399_v63 = vmul.f32 %v2397_v62, %v2391_v52  ;;  %v2394_v0 = vmul.f32 0.044715, %v2390_v59  ;;  %v2392_v49 = vmul.f32 0.5, %v2390_v59 }
 0x25c   : > { %v2401_v2 = vadd.f32 %v2399_v63, %v2391_v52  ;;  %v2396_v3 = vmul.f32 %v2394_v0, %v2390_v59 }
 0x25e   : > { %v2403_v4 = vmul.f32 0.7978846, %v2401_v2  ;;  %v2398_v5 = vmul.f32 %v2396_v3, %v2390_v59 }
 0x260   : > { %3309 = vtanh.f32 %v2403_v4  ;;  %v2400_v6 = vadd.f32 %v2398_v5, %v2390_v59 }
 0x262   : > { %v2402_v7 = vmul.f32 0.7978846, %v2400_v6 }
 0x264   : > { %3311 = vtanh.f32 %v2402_v7 }
 0x26a   : > { %v3310_v11 = vpop.eup %3309 }
 0x26b   : > { %v2407_v12 = vadd.f32 1.0, %v3310_v11 }
 0x26d   : > { %v2409_v48 = vmul.f32 %v2407_v12, %v2393_v47 }
 0x26e   : > { %v3312_v14 = vpop.eup %3311 }
 0x26f   : > { %v2413_v8 = vadd.f32 %v2411_v13, %v2409_v48  ;;  %v2406_v15 = vadd.f32 1.0, %v3312_v14 }
 0x271   : > { %v2419_v17 = vsel %vm2418_vm4, %v2413_v8, 0.0  ;;  %v2408_v18 = vmul.f32 %v2406_v15, %v2392_v49 }
 0x272   : > { %2420 = vadd.xlane.f32.xlu1 %v2419_v17 }
 0x273   : > { %v2412_v21 = vadd.f32 %v2410_v16, %v2408_v18 }
 0x275   : > { %2416 = vadd.xlane.f32.xlu0 %v2412_v21 }
 0x2ff   : > { %v2421_v19 = vpop.xlane.xlu1 %2420 }
 0x300   : > { %v2424_v27 = vmul.f32 0.0078125, %v2421_v19 }
 0x302   : > { %v2426_v20 = vsub.f32 %v2413_v8, %v2424_v27  ;;  %v2417_v9 = vpop.xlane.xlu0 %2416 }
 0x303   : > { %v2423_v10 = vmul.f32 0.0078125, %v2417_v9 }
 0x304   : > { %v2428_v22 = vmul.f32 %v2426_v20, %v2426_v20 }
 0x305   : > { %v2425_v23 = vsub.f32 %v2412_v21, %v2423_v10 }
 0x306   : > { %v2431_v25 = vsel %vm2418_vm4, %v2428_v22, 0.0 }
 0x307   : > { %2432 = vadd.xlane.f32.xlu1 %v2431_v25  ;;  %v2427_v24 = vmul.f32 %v2425_v23, %v2425_v23 }
 0x309   : > { %2429 = vadd.xlane.f32.xlu0 %v2427_v24 }
 0x394   : > { %v2433_v29 = vpop.xlane.xlu1 %2432 }
 0x395   : > { %v2435_v31 = vmul.f32 0.0078125, %v2433_v29 }
 0x396   : > { %v2430_v58 = vpop.xlane.xlu0 %2429 }
 0x397   : > { %v2437_v35 = vadd.f32 1e-05, %v2435_v31  ;;  %v2434_v36 = vmul.f32 0.0078125, %v2430_v58 }
 0x399   : > { %3313 = vrsqrt.f32 %v2437_v35  ;;  %v2436_v37 = vadd.f32 1e-05, %v2434_v36 }
 0x39b   : > { %3315 = vrsqrt.f32 %v2436_v37 }
 0x3a3   : > { %v3314_v38 = vpop.eup %3313 }
 0x3a4   : > { %v2441_v28 = vmul.f32 %v3314_v38, %v2426_v20 }
 0x3a5   : > { %v3316_v26 = vpop.eup %3315 }
 0x3a6   : > { %v2449_v1 = vmul.f32 %v2746_v39, %v2441_v28  ;;  %v2440_v60 = vmul.f32 %v3316_v26, %v2425_v23 }
 0x3a8   : > { %v2457_v41 = vadd.f32 %v2747_v40, %v2449_v1  ;;  %v2448_v61 = vmul.f32 %v2746_v39, %v2440_v60 }
 0x3aa   : > { %2459 = vst [vmem:[%s271_s7 + $0x8] sm:$0x1] %v2457_v41  ;;  %v2456_v42 = vadd.f32 %v2747_v40, %v2448_v61 }
 0x3ac   : > { %2458 = vst [vmem:[%s271_s7] sm:$0xff] %v2456_v42 }
 0x3ad PF: > { %s16_s21 = sadd.s32 1, %s3323_s21  }
 0x3ae   : > { %p13_p4 = scmp.ge.s32.totalorder %s16_s21, 4  }
 0x3b0   :  { %15 = sbr.rel (!%p13_p4) target bundleno = 1 (0x1), region = 84 }

// kernel: wavlm_extract_features.18
= control target key start
LH: loop header
LB: loop body
LE: loop exit
PB: predicated region body
PF: predicated region fallthrough
CT: control target
= control target key end

     0   :  { %s2814_s24 = smov 0   ;;  %s3218_s0 = inlined_call_operand.vmem [shape: f32[2,9,128], index: 0, kind: input, shape index: {}]   ;;  %s3219_s1 = inlined_call_operand.vmem [shape: bf16[128,128], index: 1, kind: input, shape index: {}]   ;;  %s3220_s2 = inlined_call_operand.vmem [shape: f32[1,128], index: 2, kind: input, shape index: {}]   ;;  %s3221_s3 = inlined_call_operand.vmem [shape: bf16[128,128], index: 3, kind: input, shape index: {}]   ;;  %s3222_s4 = inlined_call_operand.vmem [shape: f32[1,128], index: 4, kind: input, shape index: {}]   ;;  %s3223_s5 = inlined_call_operand.vmem [shape: bf16[128,128], index: 5, kind: input, shape index: {}]   ;;  %s3224_s6 = inlined_call_operand.vmem [shape: f32[1,128], index: 6, kind: input, shape index: {}]   ;;  %s3225_s7 = inlined_call_operand.vmem [shape: bf16[4,32,128], index: 7, kind: input, shape index: {}]   ;;  %s3226_s8 = inlined_call_operand.vmem [shape: f32[1,128], index: 8, kind: input, shape index: {}]   ;;  %s3227_s9 = inlined_call_operand.vmem [shape: f32[1,128], index: 9, kind: input, shape index: {}]   ;;  %s3228_s10 = inlined_call_operand.vmem [shape: f32[1,128], index: 10, kind: input, shape index: {}]   ;;  %s3229_s11 = inlined_call_operand.vmem [shape: bf16[128,256], index: 11, kind: input, shape index: {}]   ;;  %s3230_s12 = inlined_call_operand.vmem [shape: f32[1,256], index: 12, kind: input, shape index: {}]   ;;  %s3231_s13 = inlined_call_operand.vmem [shape: bf16[256,128], index: 13, kind: input, shape index: {}]   ;;  %s3232_s14 = inlined_call_operand.vmem [shape: f32[1,128], index: 14, kind: input, shape index: {}]   ;;  %s3233_s15 = inlined_call_operand.vmem [shape: f32[1,128], index: 15, kind: input, shape index: {}]   ;;  %s3234_s16 = inlined_call_operand.vmem [shape: f32[1,128], index: 16, kind: input, shape index: {}]   ;;  %s3235_s17 = inlined_call_operand.vmem [shape: f32[2,9,128], index: 17, kind: output, shape index: {}]  }
   0x1   :  { %3237 = sst [smem:[#allocation2_spill]] %s3218_s0 }
   0x2   :  { %3238 = sst [smem:[#allocation3_spill]] %s3219_s1 }
   0x3 LB: > { %s2214_s25 = sadd.s32 4294967295, %s2715_s24   ;;  %p2218_p0 = scmp.ge.s32.totalorder %s2715_s24, 1  ;;  %s2715_s24 = sphi %s2814_s24, %s27_s24  }
   0x4   : > { %p487_p1 = scmp.lt.s32.totalorder %s2715_s24, 3 }
   0x6   : > { %p488_p2 = pnand %p2218_p0, %p487_p1 }
   0x7   : > { %v2589_v0 = vld [vmem:[%s3221_s3] sm:$0xff] (!%p488_p2)   ;;  %v2717_v1 = vmov (!%p488_p2), 0.0   ;;  %s3239_s0 = sld [smem:[#allocation3_spill]] (!%p488_p2)  ;;  %v2591_v3 = vld [vmem:[%s3221_s3 + $0x8] sm:$0xff] (!%p488_p2)   ;;  %vm2718_vm0 = vmmov (!%p488_p2), 0   ;;  %v2593_v5 = vld [vmem:[%s3221_s3 + $0x10] sm:$0xff] (!%p488_p2)  }
   0x8   : > { %491 = sbr.rel (%p488_p2) target bundleno = 2463 (0x99f), region = 88  ;;  %2409 = vmatprep.subr.bf16.mxu1 (!%p488_p2), %v2717_v1  ;;  %2389 = vmatprep.subr.bf16.mxu0 (!%p488_p2), %v2717_v1  ;;  %p539_p3 = scmp.lt.s32.totalorder (!%p488_p2), %s2214_s25, 1  ;;  %v2595_v7 = vld [vmem:[%s3221_s3 + $0x18] sm:$0xff] (!%p488_p2)   ;;  %v2597_v9 = vld [vmem:[%s3221_s3 + $0x20] sm:$0xff] (!%p488_p2)   ;;  %v2599_v11 = vld [vmem:[%s3221_s3 + $0x28] sm:$0xff] (!%p488_p2)   ;;  %vm963_vm1 = vcmask (!%p488_p2), 261120  }
   0x9   : > { %2410 = vmatpush3.bf16.msra.mxu1 (!%p488_p2), %v2589_v0  ;;  %2425 = vmatprep.mubr.msk.bf16.mxu1 (!%p488_p2), %vm2718_vm0, %v2717_v1  ;;  %v2601_v13 = vld [vmem:[%s3221_s3 + $0x30] sm:$0xff] (!%p488_p2)   ;;  %s3240_s1 = sld [smem:[#allocation2_spill]] (!%p488_p2)  ;;  %v2603_v15 = vld [vmem:[%s3221_s3 + $0x38] sm:$0xff] (!%p488_p2)   ;;  %v2223_v20 = vld [vmem:[%s3220_s2] ss:$0 sm:$0xff] (!%p488_p2)  ;;  %s2719_s23 = smov (!%p488_p2), 64  }
   0xa   : > { %2411 = vmatprep.subr.bf16.mxu1 (!%p488_p2), %v2717_v1  ;;  %2405 = vmatprep.mubr.msk.bf16.mxu0 (!%p488_p2), %vm2718_vm0, %v2717_v1  ;;  %v2232_v21 = vld [vmem:[%s3222_s4] ss:$0 sm:$0xff] (!%p488_p2)  ;;  %v2606_v39 = vld [vmem:[%s3223_s5 + $0x8] sm:$0xff] (!%p488_p2)   ;;  %s2720_s26 = smov (!%p488_p2), 96   ;;  %v2607_v43 = vld [vmem:[%s3223_s5 + $0x10] sm:$0xff] (!%p488_p2)   ;;  %s2721_s18 = smov (!%p488_p2), 32  }
   0xb   : > { %v2605_v28 = vld [vmem:[%s3223_s5] sm:$0xff] (!%p488_p2)   ;;  %v2608_v44 = vld [vmem:[%s3223_s5 + $0x18] sm:$0xff] (!%p488_p2)   ;;  %v2610_v46 = vld [vmem:[%s3223_s5 + $0x28] sm:$0xff] (!%p488_p2)   ;;  %vm1152_vm2 = vcmask (!%p488_p2), 72704   ;;  %vm1156_vm3 = vcmask (!%p488_p2), 65536   ;;  %vm1249_vm4 = vcmask (!%p488_p2), 1043456  }
   0xc   : > { %v2609_v45 = vld [vmem:[%s3223_s5 + $0x20] sm:$0xff] (!%p488_p2)   ;;  %v2611_v47 = vld [vmem:[%s3223_s5 + $0x30] sm:$0xff] (!%p488_p2)   ;;  %v2612_v48 = vld [vmem:[%s3223_s5 + $0x38] sm:$0xff] (!%p488_p2)   ;;  %vm1250_vm5 = vcmask (!%p488_p2), 1044480   ;;  %vm1685_vm6 = vcmask (!%p488_p2), 1040384  }
   0xd   : > { %v2590_v2 = vld [vmem:[%s3239_s0] sm:$0xff] (!%p488_p2)   ;;  %v2592_v4 = vld [vmem:[%s3239_s0 + $0x8] sm:$0xff] (!%p488_p2)   ;;  %2412 = vmatpush3.bf16.msra.mxu1 (!%p488_p2), %v2591_v3  ;;  %v2594_v6 = vld [vmem:[%s3239_s0 + $0x10] sm:$0xff] (!%p488_p2)  }
   0xe   : > { %2390 = vmatpush3.bf16.msra.mxu0 (!%p488_p2), %v2590_v2  ;;  %2413 = vmatprep.subr.bf16.mxu1 (!%p488_p2), %v2717_v1  ;;  %v2596_v8 = vld [vmem:[%s3239_s0 + $0x18] sm:$0xff] (!%p488_p2)   ;;  %v2598_v10 = vld [vmem:[%s3239_s0 + $0x20] sm:$0xff] (!%p488_p2)   ;;  %v2600_v12 = vld [vmem:[%s3239_s0 + $0x28] sm:$0xff] (!%p488_p2)  }
   0xf   : > { %2391 = vmatprep.subr.bf16.mxu0 %v2717_v1  ;;  %s3242_s25 = smov (!%p539_p3, %s2214_s25), 1  ;;  %v2602_v14 = vld [vmem:[%s3239_s0 + $0x30] sm:$0xff]   ;;  %v2604_v18 = vld [vmem:[%s3239_s0 + $0x38] sm:$0xff]  }
  0x10   : > { %s2310_s22 = sshll.u32 %s3242_s25, 4 }
  0x11   : > { %2414 = vmatpush3.bf16.msra.mxu1 %v2593_v5  ;;  %s543_s20 = scalar_lea.vmem %s3240_s1, %s2310_s22  ;;  %s548_s30 = scalar_lea.vmem %s3235_s17, %s2310_s22 }
  0x12   : > { %2392 = vmatpush3.bf16.msra.mxu0 %v2592_v4  ;;  %2415 = vmatprep.subr.bf16.mxu1 %v2717_v1  ;;  %v2897_v16 = vld [vmem:[%s543_s20] sm:$0xff]  ;;  %v2899_v17 = vld [vmem:[%s543_s20 + $0x8] sm:$0x1] }
  0x13   : > { %2393 = vmatprep.subr.bf16.mxu0 %v2717_v1  ;;  %v2908_v19 = vpack.c.bf16 %v2899_v17, %v2897_v16 }
  0x15   : > { %2416 = vmatpush3.bf16.msra.mxu1 %v2595_v7 }
  0x16   : > { %2394 = vmatpush3.bf16.msra.mxu0 %v2594_v6  ;;  %2417 = vmatprep.subr.bf16.mxu1 %v2717_v1 }
  0x17   : > { %2395 = vmatprep.subr.bf16.mxu0 %v2717_v1 }
  0x19   : > { %2418 = vmatpush3.bf16.msra.mxu1 %v2597_v9 }
  0x1a   : > { %2396 = vmatpush3.bf16.msra.mxu0 %v2596_v8  ;;  %2419 = vmatprep.subr.bf16.mxu1 %v2717_v1 }
  0x1b   : > { %2397 = vmatprep.subr.bf16.mxu0 %v2717_v1 }
  0x1d   : > { %2420 = vmatpush3.bf16.msra.mxu1 %v2599_v11 }
  0x1e   : > { %2398 = vmatpush3.bf16.msra.mxu0 %v2598_v10  ;;  %2421 = vmatprep.subr.bf16.mxu1 %v2717_v1 }
  0x1f   : > { %2399 = vmatprep.subr.bf16.mxu0 %v2717_v1 }
  0x21   : > { %2422 = vmatpush3.bf16.msra.mxu1 %v2601_v13 }
  0x22   : > { %2400 = vmatpush3.bf16.msra.mxu0 %v2600_v12  ;;  %2423 = vmatprep.subr.bf16.mxu1 %v2717_v1 }
  0x23   : > { %2401 = vmatprep.subr.bf16.mxu0 %v2717_v1 }
  0x25   : > { %2424 = vmatpush3.bf16.msra.mxu1 %v2603_v15 }
  0x26   : > { %2402 = vmatpush3.bf16.msra.mxu0 %v2602_v14  ;;  %2449 = vmatprep.subr.bf16.mxu1 %v2717_v1 }
  0x27   : > { %2403 = vmatprep.subr.bf16.mxu0 %v2717_v1 }
  0x28   : > { %2426 = vmatmul.mubr.bf16.vlgmr.msra.gmra.mrb[0].mxu1 %v2908_v19 }
  0x29   : > { %2451 = vmatprep.mubr.msk.bf16.mxu1 %vm2718_vm0, %v2717_v1 }
  0x2a   : > { %2404 = vmatpush3.bf16.msra.mxu0 %v2604_v18 }
  0x2b   : > { %2429 = vmatprep.subr.bf16.mxu0 %v2717_v1 }
  0x2d   : > { %2406 = vmatmul.mubr.bf16.vlgmr.msra.gmra.mrb[0].mxu0 %v2908_v19 }
  0x2e   : > { %2445 = vmatprep.mubr.msk.bf16.mxu0 %vm2718_vm0, %v2717_v1  ;;  %2430 = vmatpush3.bf16.msra.mxu0 %v2605_v28 }
  0x2f   : > { %2431 = vmatprep.subr.bf16.mxu0 %v2717_v1 }
  0x32   : > { %2432 = vmatpush3.bf16.msra.mxu0 %v2606_v39 }
  0x33   : > { %2433 = vmatprep.subr.bf16.mxu0 %v2717_v1 }
  0x36   : > { %2434 = vmatpush3.bf16.msra.mxu0 %v2607_v43 }
  0x37   : > { %2435 = vmatprep.subr.bf16.mxu0 %v2717_v1 }
  0x3a   : > { %2436 = vmatpush3.bf16.msra.mxu0 %v2608_v44 }
  0x3b   : > { %2437 = vmatprep.subr.bf16.mxu0 %v2717_v1 }
  0x3e   : > { %2438 = vmatpush3.bf16.msra.mxu0 %v2609_v45 }
  0x3f   : > { %2439 = vmatprep.subr.bf16.mxu0 %v2717_v1 }
  0x42   : > { %2440 = vmatpush3.bf16.msra.mxu0 %v2610_v46 }
  0x43   : > { %2441 = vmatprep.subr.bf16.mxu0 %v2717_v1 }
  0x46   : > { %2442 = vmatpush3.bf16.msra.mxu0 %v2611_v47 }
  0x47   : > { %2443 = vmatprep.subr.bf16.mxu0 %v2717_v1 }
  0x4a   : > { %2444 = vmatpush3.bf16.msra.mxu0 %v2612_v48 }
  0x4b   : > { %2473 = vmatprep.subr.bf16.mxu0 %v2717_v1 }
  0x4d   : > { %2446 = vmatmul.mubr.bf16.vlgmr.msra.gmra.mrb[4].mxu0 %v2908_v19 }
  0x4e   : > { %2475 = vmatprep.mubr.msk.bf16.mxu0 %vm2718_vm0, %v2717_v1 }
  0xfb   : > { %v770_v22 = vpop.f32.mrb[0].mxu1 }
  0xfc   : > { %v2427_v23 = vpop.f32.mrb[1].mxu1  ;;  %v771_v29 = vadd.f32 %v2232_v21, %v770_v22 }
  0xfd   : > { %v773_v26 = vpop.f32.mrb[2].mxu1 }
  0xfe   : > { %v774_v30 = vadd.f32 %v2232_v21, %v773_v26  ;;  %v2428_v31 = vpop.f32.mrb[3].mxu1 }
 0x100   : > { %v658_v24 = vpop.f32.mrb[0].mxu0  ;;  %v2554_v36 = vpack.i.bf16 %v774_v30, %v771_v29  ;;  %v935_v37 = vpack.c.bf16 %v774_v30, %v771_v29  ;;  %v2722_v29 = vmov 65535  }
 0x101   : > { %v659_v25 = vadd.f32 %v2223_v20, %v658_v24  ;;  %v2407_v27 = vpop.f32.mrb[1].mxu0  ;;  %v1251_v30 = vsel %vm1249_vm4, 4294967295, %v2722_v29 }
 0x102   : > { %v661_v32 = vpop.f32.mrb[2].mxu0  ;;  %2555 = vrot.lane.b32.xlu1 %v2554_v36, %s2719_s23  ;;  %2545 = vrot.lane.b32.xlu0 %v2554_v36, %s2720_s26  ;;  %v968_v40 = vsel %vm963_vm1, %v935_v37, 0  ;;  %v2990_v31 = vsel %vm1250_vm5, %v1251_v30, 0 }
 0x103   : > { %v889_v33 = vmul.f32 0.17677669, %v659_v25  ;;  %v662_v34 = vadd.f32 %v2223_v20, %v661_v32  ;;  %v2408_v35 = vpop.f32.mrb[3].mxu0  ;;  %2450 = vmatpush3.bf16.xpose.msra.mxu1 %v968_v40  ;;  %v2241_v25 = vld [vmem:[%s3224_s6] ss:$0 sm:$0xff] }
 0x104   : > { %2455 = vmatprep.subr.bf16.mxu1 %v2717_v1 }
 0x105   : > { %v890_v38 = vmul.f32 0.17677669, %v662_v34 }
 0x107   : > { %v911_v41 = vpack.c.bf16 %v890_v38, %v889_v33  ;;  %v2559_v42 = vpack.i.bf16 %v890_v38, %v889_v33 }
 0x109   : > { %2560 = vrot.lane.b32.xlu1 %v2559_v42, %s2719_s23  ;;  %2550 = vrot.lane.b32.xlu0 %v2559_v42, %s2720_s26 }
 0x10a   : > { %2452 = vmatmul.mubr.msk.bf16.vlgmr.msra.gmra.mrb[4].mxu1 %vm963_vm1, %v911_v41 }
 0x10b   : > { %2457 = vmatprep.mubr.msk.bf16.mxu1 %vm2718_vm0, %v2717_v1 }
 0x10d   : > { %2570 = vrot.lane.b32.xlu1 %v2559_v42, %s2721_s18  ;;  %2565 = vrot.lane.b32.xlu0 %v2554_v36, %s2721_s18 }
 0x120   : > { %v882_v21 = vpop.f32.mrb[4].mxu0 }
 0x121   : > { %v2447_v22 = vpop.f32.mrb[5].mxu0  ;;  %v883_v26 = vadd.f32 %v2241_v25, %v882_v21 }
 0x122   : > { %v885_v23 = vpop.f32.mrb[6].mxu0 }
 0x123   : > { %v2448_v24 = vpop.f32.mrb[7].mxu0  ;;  %v886_v27 = vadd.f32 %v2241_v25, %v885_v23 }
 0x125   : > { %v959_v28 = vpack.c.bf16 %v886_v27, %v883_v26 }
 0x127   : > { %v1254_v32 = vand.u32 %v2990_v31, %v959_v28 }
 0x129   : > { %2474 = vmatpush3.bf16.msra.mxu0 %v1254_v32 }
 0x12a   : > { %2485 = vmatprep.subr.bf16.mxu0 %v2717_v1 }
 0x174   : > { %v2546_v49 = vpop.permute.xlu0 %2545  ;;  %v2556_v52 = vpop.permute.xlu1 %2555 }
 0x175   : > { %v2548_v50 = vunpack.i.h.bf16 %v2546_v49  ;;  %v2547_v51 = vunpack.i.l.bf16 %v2546_v49  ;;  %v2558_v55 = vunpack.i.h.bf16 %v2556_v52  ;;  %v2557_v56 = vunpack.i.l.bf16 %v2556_v52 }
 0x177   : > { %v936_v53 = vpack.c.bf16 %v2548_v50, %v2547_v51  ;;  %v937_v60 = vpack.c.bf16 %v2558_v55, %v2557_v56 }
 0x179   : > { %v1015_v57 = vsel %vm963_vm1, %v936_v53, 0  ;;  %v1062_v2 = vsel %vm963_vm1, %v937_v60, 0 }
 0x17a   : > { %2456 = vmatpush3.bf16.xpose.msra.mxu1 %v1015_v57 }
 0x17b   : > { %v2551_v54 = vpop.permute.xlu0 %2550  ;;  %2461 = vmatprep.subr.bf16.mxu1 %v2717_v1  ;;  %v2561_v3 = vpop.permute.xlu1 %2560 }
 0x17c   : > { %v2553_v58 = vunpack.i.h.bf16 %v2551_v54  ;;  %v2552_v59 = vunpack.i.l.bf16 %v2551_v54  ;;  %v2563_v4 = vunpack.i.h.bf16 %v2561_v3  ;;  %v2562_v5 = vunpack.i.l.bf16 %v2561_v3 }
 0x17d   : > { %v2574_v54 = vpack.i.bf16 %v886_v27, %v883_v26 }
 0x17e   : > { %v912_v62 = vpack.c.bf16 %v2553_v58, %v2552_v59  ;;  %v913_v7 = vpack.c.bf16 %v2563_v4, %v2562_v5 }
 0x17f   : > { %v2566_v61 = vpop.permute.xlu0 %2565  ;;  %v2571_v8 = vpop.permute.xlu1 %2570 }
 0x180   : > { %v2568_v63 = vunpack.i.h.bf16 %v2566_v61  ;;  %v2567_v0 = vunpack.i.l.bf16 %v2566_v61  ;;  %v2573_v10 = vunpack.i.h.bf16 %v2571_v8  ;;  %v2572_v11 = vunpack.i.l.bf16 %v2571_v8 }
 0x181   : > { %2458 = vmatmul.mubr.msk.bf16.vlgmr.msra.gmra.mrb[8].mxu1 %vm963_vm1, %v912_v62 }
 0x182   : > { %2462 = vmatpush3.bf16.xpose.msra.mxu1 %v1062_v2  ;;  %2463 = vmatprep.mubr.msk.bf16.mxu1 %vm2718_vm0, %v2717_v1  ;;  %v938_v6 = vpack.c.bf16 %v2568_v63, %v2567_v0  ;;  %v914_v12 = vpack.c.bf16 %v2573_v10, %v2572_v11 }
 0x183   : > { %2467 = vmatprep.subr.bf16.mxu1 %v2717_v1 }
 0x184   : > { %v1109_v9 = vsel %vm963_vm1, %v938_v6, 0 }
 0x189   : > { %2464 = vmatmul.mubr.msk.bf16.vlgmr.msra.gmra.mrb[12].mxu1 %vm963_vm1, %v913_v7 }
 0x18a   : > { %2468 = vmatpush3.bf16.xpose.msra.mxu1 %v1109_v9  ;;  %2469 = vmatprep.mubr.msk.bf16.mxu1 %vm2718_vm0, %v2717_v1 }
 0x18b   : > { %2479 = vmatprep.subr.bf16.mxu1 %v2717_v1 }
 0x191   : > { %2470 = vmatmul.mubr.msk.bf16.vlgmr.msra.gmra.mrb[16].mxu1 %vm963_vm1, %v914_v12 }
 0x192   : > { %2481 = vmatprep.mubr.msk.bf16.mxu1 %vm2718_vm0, %v2717_v1 }
 0x1dd   : > { %v1004_v13 = vpop.f32.mrb[4].mxu1 }
 0x1de   : > { %v2453_v14 = vpop.f32.mrb[5].mxu1  ;;  %v1153_v15 = vsel %vm1152_vm2, %v1004_v13, -inf }
 0x1df   : > { %1154 = vmax.xlane.f32.xlu0 %v1153_v15  ;;  %v1007_v18 = vpop.f32.mrb[6].mxu1 }
 0x1e0   : > { %v2454_v19 = vpop.f32.mrb[7].mxu1  ;;  %v1157_v20 = vsel %vm1156_vm3, %v1007_v18, -inf }
 0x1e1   : > { %1158 = vmax.xlane.f32.xlu1 %v1157_v20 }
 0x254   : > { %v1051_v33 = vpop.f32.mrb[8].mxu1 }
 0x255   : > { %v2459_v34 = vpop.f32.mrb[9].mxu1  ;;  %v1160_v35 = vsel %vm1152_vm2, %v1051_v33, -inf }
 0x256   : > { %1161 = vmax.xlane.f32.xlu0 %v1160_v35  ;;  %v1054_v36 = vpop.f32.mrb[10].mxu1 }
 0x257   : > { %v2460_v37 = vpop.f32.mrb[11].mxu1  ;;  %v1163_v38 = vsel %vm1156_vm3, %v1054_v36, -inf }
 0x25a   : > { %1164 = vmax.xlane.f32.xlu0 %v1163_v38 }
 0x25c   : > { %v1098_v39 = vpop.f32.mrb[12].mxu1 }
 0x25d   : > { %v2465_v40 = vpop.f32.mrb[13].mxu1  ;;  %v1166_v41 = vsel %vm1152_vm2, %v1098_v39, -inf }
 0x25e   : > { %1167 = vmax.xlane.f32.xlu1 %v1166_v41  ;;  %v1101_v42 = vpop.f32.mrb[14].mxu1 }
 0x25f   : > { %v2466_v43 = vpop.f32.mrb[15].mxu1  ;;  %v1169_v44 = vsel %vm1156_vm3, %v1101_v42, -inf }
 0x260   : > { %1170 = vmax.xlane.f32.xlu0 %v1169_v44 }
 0x264   : > { %v1145_v45 = vpop.f32.mrb[16].mxu1 }
 0x265   : > { %v2471_v46 = vpop.f32.mrb[17].mxu1  ;;  %v1172_v47 = vsel %vm1152_vm2, %v1145_v45, -inf }
 0x266   : > { %1173 = vmax.xlane.f32.xlu1 %v1172_v47  ;;  %v1148_v48 = vpop.f32.mrb[18].mxu1 }
 0x267   : > { %v2472_v49 = vpop.f32.mrb[19].mxu1  ;;  %v1175_v50 = vsel %vm1156_vm3, %v1148_v48, -inf }
 0x268   : > { %1176 = vmax.xlane.f32.xlu0 %v1175_v50 }
 0x26c   : > { %v1155_v57 = vpop.xlane.xlu0 %1154 }
 0x26d   : > { %v1178_v58 = vsub.f32 %v1004_v13, %v1155_v57 }
 0x26e   : > { %v1159_v51 = vpop.xlane.xlu1 %1158 }
 0x26f   : > { %v1179_v52 = vsub.f32 %v1007_v18, %v1159_v51  ;;  %v1186_v59 = vmul.f32 1.442695, %v1178_v58 }
 0x271   : > { %v1188_v53 = vmul.f32 1.442695, %v1179_v52 }
 0x273   : > { %2661 = vpow2.f32 %v1188_v53 }
 0x274   : > { %2663 = vpow2.f32 %v1186_v59 }
 0x277   : > { %2575 = vrot.lane.b32.xlu1 %v2574_v54, %s2720_s26 }
 0x27d   : > { %v3001_v55 = vpop.eup %2661 }
 0x27e   : > { %v1205_v56 = vsel %vm1156_vm3, %v3001_v55, 0.0  ;;  %v2664_v60 = vpop.eup %2663 }
 0x27f   : > { %1206 = vadd.xlane.f32.xlu0 %v1205_v56  ;;  %v1202_v61 = vsel %vm1152_vm2, %v2664_v60, 0.0 }
 0x29b   : > { %1203 = vadd.xlane.f32.xlu1 %v1202_v61 }
 0x2e3   : > { %v1162_v62 = vpop.xlane.xlu0 %1161 }
 0x2e4   : > { %v1180_v63 = vsub.f32 %v1051_v33, %v1162_v62 }
 0x2e6   : > { %v1190_v0 = vmul.f32 1.442695, %v1180_v63 }
 0x2e7   : > { %v1165_v2 = vpop.xlane.xlu0 %1164 }
 0x2e8   : > { %2665 = vpow2.f32 %v1190_v0  ;;  %v1181_v3 = vsub.f32 %v1054_v36, %v1165_v2 }
 0x2ea   : > { %v1192_v4 = vmul.f32 1.442695, %v1181_v3 }
 0x2eb   : > { %v1168_v5 = vpop.xlane.xlu1 %1167 }
 0x2ec   : > { %2667 = vpow2.f32 %v1192_v4  ;;  %v1182_v6 = vsub.f32 %v1098_v39, %v1168_v5 }
 0x2ed   : > { %v1171_v7 = vpop.xlane.xlu0 %1170 }
 0x2ee   : > { %v1194_v8 = vmul.f32 1.442695, %v1182_v6  ;;  %v1183_v9 = vsub.f32 %v1101_v42, %v1171_v7 }
 0x2f0   : > { %2669 = vpow2.f32 %v1194_v8  ;;  %v1196_v10 = vmul.f32 1.442695, %v1183_v9  ;;  %v2613_v8 = vld [vmem:[%s3225_s7] sm:$0xff]  }
 0x2f2   : > { %v2666_v11 = vpop.eup %2665  ;;  %2671 = vpow2.f32 %v1196_v10 }
 0x2f3   : > { %v1174_v12 = vpop.xlane.xlu1 %1173  ;;  %v1208_v13 = vsel %vm1152_vm2, %v2666_v11, 0.0 }
 0x2f4   : > { %v1184_v14 = vsub.f32 %v1145_v45, %v1174_v12  ;;  %1209 = vadd.xlane.f32.xlu1 %v1208_v13  ;;  %v2614_v13 = vld [vmem:[%s3225_s7 + $0x8] sm:$0xff]  }
 0x2f5   : > { %v1177_v15 = vpop.xlane.xlu0 %1176 }
 0x2f6   : > { %v2668_v18 = vpop.eup %2667  ;;  %v1198_v19 = vmul.f32 1.442695, %v1184_v14  ;;  %v1185_v20 = vsub.f32 %v1148_v48, %v1177_v15  ;;  %v2616_v14 = vld [vmem:[%s3225_s7 + $0x18] sm:$0xff]  }
 0x2f7   : > { %v1211_v21 = vsel %vm1156_vm3, %v2668_v18, 0.0  ;;  %v2576_v22 = vpop.permute.xlu1 %2575 }
 0x2f8   : > { %2673 = vpow2.f32 %v1198_v19  ;;  %v1200_v23 = vmul.f32 1.442695, %v1185_v20  ;;  %1212 = vadd.xlane.f32.xlu0 %v1211_v21  ;;  %v2578_v24 = vunpack.i.h.bf16 %v2576_v22  ;;  %v2577_v25 = vunpack.i.l.bf16 %v2576_v22  ;;  %v2617_v20 = vld [vmem:[%s3225_s7 + $0x20] sm:$0xff]  }
 0x2fa   : > { %v3008_v26 = vpop.eup %2669  ;;  %2675 = vpow2.f32 %v1200_v23  ;;  %v960_v27 = vpack.c.bf16 %v2578_v24, %v2577_v25  ;;  %v2619_v23 = vld [vmem:[%s3225_s7 + $0x28] sm:$0xff]  }
 0x2fb   : > { %v1214_v28 = vsel %vm1152_vm2, %v3008_v26, 0.0 }
 0x2fc   : > { %v2672_v29 = vpop.eup %2671  ;;  %1215 = vadd.xlane.f32.xlu1 %v1214_v28  ;;  %v1301_v30 = vand.u32 %v2990_v31, %v960_v27  ;;  %v2618_v27 = vld [vmem:[%s3225_s7 + $0x30] sm:$0xff]  }
 0x2fd   : > { %v1217_v32 = vsel %vm1156_vm3, %v2672_v29, 0.0 }
 0x2fe   : > { %1218 = vadd.xlane.f32.xlu0 %v1217_v32  ;;  %2480 = vmatpush3.bf16.msra.mxu1 %v1301_v30  ;;  %v2620_v30 = vld [vmem:[%s3225_s7 + $0x38] sm:$0xff]  }
 0x2ff   : > { %2491 = vmatprep.subr.bf16.mxu1 %v2717_v1 }
 0x302   : > { %v2674_v33 = vpop.eup %2673 }
 0x303   : > { %v1220_v34 = vsel %vm1152_vm2, %v2674_v33, 0.0 }
 0x304   : > { %v2676_v35 = vpop.eup %2675  ;;  %1221 = vadd.xlane.f32.xlu1 %v1220_v34 }
 0x305   : > { %v1223_v36 = vsel %vm1156_vm3, %v2676_v35, 0.0 }
 0x306   : > { %1224 = vadd.xlane.f32.xlu0 %v1223_v36 }
 0x30c   : > { %v1207_v37 = vpop.xlane.xlu0 %1206 }
 0x30d   : > { %2677 = vrcp.f32 %v1207_v37 }
 0x315   : > { %2585 = vrot.lane.b32.xlu1 %v2574_v54, %s2721_s18 }
 0x317   : > { %v2678_v39 = vpop.eup %2677 }
 0x318   : > { %v1235_v41 = vmul.f32 %v2678_v39, %v3001_v55 }
 0x31c   : > { %2580 = vrot.lane.b32.xlu0 %v2574_v54, %s2719_s23 }
 0x328   : > { %v1204_v38 = vpop.xlane.xlu1 %1203 }
 0x329   : > { %2679 = vrcp.f32 %v1204_v38 }
 0x333   : > { %v2680_v40 = vpop.eup %2679 }
 0x334   : > { %v1234_v42 = vmul.f32 %v2680_v40, %v2664_v60 }
 0x336   : > { %v1242_v43 = vpack.c.bf16 %v1235_v41, %v1234_v42 }
 0x338   : > { %2476 = vmatmul.mubr.msk.bf16.vlgmr.msra.gmra.mrb[8].mxu0 %vm1152_vm2, %v1242_v43 }
 0x339   : > { %2487 = vmatprep.mubr.msk.bf16.mxu0 %vm2718_vm0, %v2717_v1 }
 0x381   : > { %v1210_v44 = vpop.xlane.xlu1 %1209 }
 0x382   : > { %2681 = vrcp.f32 %v1210_v44 }
 0x385   : > { %v1213_v45 = vpop.xlane.xlu0 %1212 }
 0x386   : > { %2683 = vrcp.f32 %v1213_v45 }
 0x389   : > { %v1216_v47 = vpop.xlane.xlu1 %1215 }
 0x38b   : > { %v1219_v46 = vpop.xlane.xlu0 %1218 }
 0x38c   : > { %v2682_v48 = vpop.eup %2681  ;;  %2685 = vrcp.f32 %v1219_v46 }
 0x38d   : > { %2687 = vrcp.f32 %v1216_v47  ;;  %v1236_v50 = vmul.f32 %v2682_v48, %v2666_v11 }
 0x390   : > { %v2684_v49 = vpop.eup %2683 }
 0x391   : > { %v1237_v51 = vmul.f32 %v2684_v49, %v2668_v18  ;;  %v1222_v52 = vpop.xlane.xlu1 %1221 }
 0x392   : > { %2689 = vrcp.f32 %v1222_v52 }
 0x393   : > { %v1225_v53 = vpop.xlane.xlu0 %1224  ;;  %v1243_v54 = vpack.c.bf16 %v1237_v51, %v1236_v50 }
 0x394   : > { %2691 = vrcp.f32 %v1225_v53 }
 0x395   : > { %v2586_v55 = vpop.permute.xlu1 %2585  ;;  %2482 = vmatmul.mubr.msk.bf16.vlgmr.msra.gmra.mrb[20].mxu1 %vm1152_vm2, %v1243_v54 }
 0x396   : > { %v2588_v56 = vunpack.i.h.bf16 %v2586_v55  ;;  %v2587_v57 = vunpack.i.l.bf16 %v2586_v55  ;;  %2493 = vmatprep.mubr.msk.bf16.mxu1 %vm2718_vm0, %v2717_v1  ;;  %v2686_v59 = vpop.eup %2685 }
 0x397   : > { %v2581_v58 = vpop.permute.xlu0 %2580  ;;  %v2688_v63 = vpop.eup %2687  ;;  %v1239_v3 = vmul.f32 %v2686_v59, %v2672_v29 }
 0x398   : > { %v962_v60 = vpack.c.bf16 %v2588_v56, %v2587_v57  ;;  %v2583_v61 = vunpack.i.h.bf16 %v2581_v58  ;;  %v2582_v62 = vunpack.i.l.bf16 %v2581_v58  ;;  %v1238_v6 = vmul.f32 %v2688_v63, %v3008_v26  ;;  %v2270_v58 = vld [vmem:[%s3226_s8] ss:$0 sm:$0xff] }
 0x39a   : > { %v1395_v0 = vand.u32 %v2990_v31, %v962_v60  ;;  %v961_v2 = vpack.c.bf16 %v2583_v61, %v2582_v62  ;;  %v1244_v11 = vpack.c.bf16 %v1239_v3, %v1238_v6 }
 0x39c   : > { %v2690_v4 = vpop.eup %2689  ;;  %v1348_v5 = vand.u32 %v2990_v31, %v961_v2  ;;  %2492 = vmatpush3.bf16.msra.mxu1 %v1395_v0  ;;  %v2615_v31 = vld [vmem:[%s3225_s7 + $0x10] sm:$0xff]  }
 0x39d   : > { %2505 = vmatprep.subr.bf16.mxu1 %v2717_v1  ;;  %v1240_v9 = vmul.f32 %v2690_v4, %v2674_v33 }
 0x39e   : > { %v2692_v7 = vpop.eup %2691  ;;  %2486 = vmatpush3.bf16.msra.mxu0 %v1348_v5 }
 0x39f   : > { %v1241_v10 = vmul.f32 %v2692_v7, %v2676_v35  ;;  %2497 = vmatprep.subr.bf16.mxu0 %v2717_v1 }
 0x3a1   : > { %2488 = vmatmul.mubr.msk.bf16.vlgmr.msra.gmra.mrb[12].mxu0 %vm1152_vm2, %v1244_v11  ;;  %v1245_v12 = vpack.c.bf16 %v1241_v10, %v1240_v9  ;;  %v2621_v10 = vld [vmem:[%s3229_s11] ss:$8 sps:$4 sm:$0xff]   ;;  %v2623_v11 = vld [vmem:[%s3229_s11 + $0x4] ss:$8 sps:$4 sm:$0xff]  }
 0x3a2   : > { %2498 = vmatpush3.bf16.msra.mxu0 %v2613_v8  ;;  %2501 = vmatprep.mubr.msk.bf16.mxu0 %vm2718_vm0, %v2717_v1 }
 0x3a3   : > { %2494 = vmatmul.mubr.msk.bf16.vlgmr.msra.gmra.mrb[24].mxu1 %vm1152_vm2, %v1245_v12  ;;  %2499 = vmatprep.subr.bf16.mxu0 %v2717_v1 }
 0x3a4   : > { %2506 = vmatpush3.bf16.msra.mxu1 %v2615_v31  ;;  %2509 = vmatprep.mubr.msk.bf16.mxu1 %vm2718_vm0, %v2717_v1 }
 0x3a5   : > { %2507 = vmatprep.subr.bf16.mxu1 %v2717_v1 }
 0x3a6   : > { %2500 = vmatpush3.bf16.msra.mxu0 %v2614_v13 }
 0x3a7   : > { %2513 = vmatprep.subr.bf16.mxu0 %v2717_v1 }
 0x3a8   : > { %2508 = vmatpush3.bf16.msra.mxu1 %v2616_v14 }
 0x3a9   : > { %2521 = vmatprep.subr.bf16.mxu1 %v2717_v1 }
 0x40b   : > { %v1290_v15 = vpop.f32.mrb[8].mxu0 }
 0x40c   : > { %v2477_v18 = vpop.f32.mrb[9].mxu0 }
 0x40d   : > { %v1293_v19 = vpop.f32.mrb[10].mxu0 }
 0x40e   : > { %v1438_v21 = vpack.c.bf16 %v1293_v19, %v1290_v15  ;;  %v2478_v22 = vpop.f32.mrb[11].mxu0 }
 0x40f   : > { %v2629_v22 = vld [vmem:[%s3229_s11 + $0x24] ss:$8 sps:$4 sm:$0xff]  }
 0x410   : > { %2502 = vmatmul.mubr.msk.bf16.vlgmr.msra.gmra.mrb[16].mxu0 %vm963_vm1, %v1438_v21  ;;  %v2624_v21 = vld [vmem:[%s3229_s11 + $0x10] ss:$8 sps:$4 sm:$0xff]  }
 0x411   : > { %2514 = vmatpush3.bf16.msra.mxu0 %v2617_v20  ;;  %2517 = vmatprep.mubr.msk.bf16.mxu0 %vm2718_vm0, %v2717_v1  ;;  %v2626_v20 = vld [vmem:[%s3229_s11 + $0x14] ss:$8 sps:$4 sm:$0xff]  }
 0x412   : > { %2515 = vmatprep.subr.bf16.mxu0 %v2717_v1 }
 0x415   : > { %2516 = vmatpush3.bf16.msra.mxu0 %v2619_v23  ;;  %v2627_v23 = vld [vmem:[%s3229_s11 + $0x20] ss:$8 sps:$4 sm:$0xff]  }
 0x416   : > { %1856 = vmatprep.subr.bf16.mxu0 %v2623_v11 }
 0x468   : > { %v1337_v24 = vpop.f32.mrb[20].mxu1 }
 0x469   : > { %v2483_v25 = vpop.f32.mrb[21].mxu1 }
 0x46a   : > { %v1340_v26 = vpop.f32.mrb[22].mxu1  ;;  %v2630_v25 = vld [vmem:[%s3229_s11 + $0x30] ss:$8 sps:$4 sm:$0xff]  }
 0x46b   : > { %v1439_v28 = vpack.c.bf16 %v1340_v26, %v1337_v24  ;;  %v2484_v29 = vpop.f32.mrb[23].mxu1  ;;  %v2632_v24 = vld [vmem:[%s3229_s11 + $0x34] ss:$8 sps:$4 sm:$0xff]   ;;  %v2635_v26 = vld [vmem:[%s3229_s11 + $0x44] ss:$8 sps:$4 sm:$0xff]  }
 0x46c   : > { %v2636_v29 = vld [vmem:[%s3229_s11 + $0x50] ss:$8 sps:$4 sm:$0xff]  }
 0x46d   : > { %2510 = vmatmul.mubr.msk.bf16.vlgmr.msra.gmra.mrb[28].mxu1 %vm963_vm1, %v1439_v28  ;;  %v2638_v28 = vld [vmem:[%s3229_s11 + $0x54] ss:$8 sps:$4 sm:$0xff]  }
 0x46e   : > { %2522 = vmatpush3.bf16.msra.mxu1 %v2618_v27  ;;  %2525 = vmatprep.mubr.msk.bf16.mxu1 %vm2718_vm0, %v2717_v1  ;;  %v2633_v27 = vld [vmem:[%s3229_s11 + $0x40] ss:$8 sps:$4 sm:$0xff]  }
 0x46f   : > { %2523 = vmatprep.subr.bf16.mxu1 %v2717_v1 }
 0x472   : > { %2524 = vmatpush3.bf16.msra.mxu1 %v2620_v30  ;;  %v2641_v30 = vld [vmem:[%s3229_s11 + $0x64] ss:$8 sps:$4 sm:$0xff]  }
 0x474   : > { %v1384_v32 = vpop.f32.mrb[12].mxu0 }
 0x475   : > { %v2489_v33 = vpop.f32.mrb[13].mxu0 }
 0x476   : > { %v1387_v34 = vpop.f32.mrb[14].mxu0  ;;  %v1431_v35 = vpop.f32.mrb[24].mxu1  ;;  %v2644_v33 = vld [vmem:[%s3229_s11 + $0x74] ss:$8 sps:$4 sm:$0xff]  }
 0x477   : > { %v1440_v36 = vpack.c.bf16 %v1387_v34, %v1384_v32  ;;  %v2490_v37 = vpop.f32.mrb[15].mxu0  ;;  %v2495_v38 = vpop.f32.mrb[25].mxu1  ;;  %v2639_v32 = vld [vmem:[%s3229_s11 + $0x60] ss:$8 sps:$4 sm:$0xff]   ;;  %v2642_v34 = vld [vmem:[%s3229_s11 + $0x70] ss:$8 sps:$4 sm:$0xff]  }
 0x478   : > { %v1434_v39 = vpop.f32.mrb[26].mxu1 }
 0x479   : > { %v1441_v40 = vpack.c.bf16 %v1434_v39, %v1431_v35  ;;  %v2496_v41 = vpop.f32.mrb[27].mxu1  ;;  %2518 = vmatmul.mubr.msk.bf16.vlgmr.msra.gmra.mrb[20].mxu0 %vm963_vm1, %v1440_v36  ;;  %v2723_v35 = vmov 0  }
 0x47a   : > { %1857 = vmatpush1.bf16.msra.mxu0 %v2621_v10  ;;  %1888 = vmatprep.mubr.bf16.mxu0 %v2723_v35 }
 0x47b   : > { %2526 = vmatmul.mubr.msk.bf16.vlgmr.msra.gmra.mrb[32].mxu1 %vm963_vm1, %v1441_v40  ;;  %1858 = vmatprep.subr.bf16.mxu0 %v2626_v20 }
 0x47e   : > { %1859 = vmatpush1.bf16.msra.mxu0 %v2624_v21 }
 0x47f   : > { %1860 = vmatprep.subr.bf16.mxu0 %v2629_v22 }
 0x482   : > { %1861 = vmatpush1.bf16.msra.mxu0 %v2627_v23 }
 0x483   : > { %1862 = vmatprep.subr.bf16.mxu0 %v2632_v24 }
 0x486   : > { %1863 = vmatpush1.bf16.msra.mxu0 %v2630_v25 }
 0x487   : > { %1864 = vmatprep.subr.bf16.mxu0 %v2635_v26 }
 0x48a   : > { %1865 = vmatpush1.bf16.msra.mxu0 %v2633_v27 }
 0x48b   : > { %1866 = vmatprep.subr.bf16.mxu0 %v2638_v28 }
 0x48e   : > { %1867 = vmatpush1.bf16.msra.mxu0 %v2636_v29 }
 0x48f   : > { %1868 = vmatprep.subr.bf16.mxu0 %v2641_v30 }
 0x492   : > { %1869 = vmatpush1.bf16.msra.mxu0 %v2639_v32 }
 0x493   : > { %1870 = vmatprep.subr.bf16.mxu0 %v2644_v33 }
 0x496   : > { %1871 = vmatpush1.bf16.msra.mxu0 %v2642_v34 }
 0x4e3   : > { %v1507_v42 = vpop.f32.mrb[16].mxu0 }
 0x4e4   : > { %v2503_v43 = vpop.f32.mrb[17].mxu0 }
 0x4e5   : > { %v1510_v44 = vpop.f32.mrb[18].mxu0 }
 0x4e6   : > { %v2504_v45 = vpop.f32.mrb[19].mxu0  ;;  %v1686_v49 = vsel %vm1685_vm6, %v1510_v44, 0.0  ;;  %v2271_v44 = vld [vmem:[%s3227_s9] ss:$0 sm:$0xff] }
 0x540   : > { %v1563_v1 = vpop.f32.mrb[28].mxu1 }
 0x541   : > { %v1682_v46 = vadd.f32 %v1563_v1, %v1507_v42  ;;  %v2511_v47 = vpop.f32.mrb[29].mxu1 }
 0x542   : > { %v1566_v48 = vpop.f32.mrb[30].mxu1  ;;  %v2272_v47 = vld [vmem:[%s3228_s10] ss:$0 sm:$0xff] }
 0x543   : > { %v1687_v50 = vsel %vm1685_vm6, %v1566_v48, 0.0  ;;  %v2512_v51 = vpop.f32.mrb[31].mxu1 }
 0x544   : > { %v1688_v52 = vadd.f32 %v1687_v50, %v1686_v49 }
 0x54c   : > { %v1619_v53 = vpop.f32.mrb[20].mxu0 }
 0x54d   : > { %v1683_v54 = vadd.f32 %v1682_v46, %v1619_v53  ;;  %v2519_v55 = vpop.f32.mrb[21].mxu0  ;;  %v2646_v53 = vld [vmem:[%s3231_s13] sm:$0xff]  }
 0x54e   : > { %v1622_v56 = vpop.f32.mrb[22].mxu0  ;;  %v1675_v57 = vpop.f32.mrb[32].mxu1  ;;  %v2648_v55 = vld [vmem:[%s3231_s13 + $0x8] sm:$0xff]  }
 0x54f   : > { %v1689_v59 = vsel %vm1685_vm6, %v1622_v56, 0.0  ;;  %v1684_v60 = vadd.f32 %v1683_v54, %v1675_v57  ;;  %v2520_v61 = vpop.f32.mrb[23].mxu0  ;;  %v2527_v62 = vpop.f32.mrb[33].mxu1  ;;  %v2647_v54 = vld [vmem:[%s3231_s13 + $0x48] sm:$0xff]   ;;  %v2649_v56 = vld [vmem:[%s3231_s13 + $0x50] sm:$0xff]  }
 0x550   : > { %v1690_v63 = vadd.f32 %v1689_v59, %v1688_v52  ;;  %v1678_v0 = vpop.f32.mrb[34].mxu1  ;;  %v2645_v52 = vld [vmem:[%s3231_s13 + $0x40] sm:$0xff]   ;;  %v2650_v57 = vld [vmem:[%s3231_s13 + $0x10] sm:$0xff]   ;;  %v2652_v59 = vld [vmem:[%s3231_s13 + $0x18] sm:$0xff]  }
 0x551   : > { %v1700_v2 = vadd.f32 %v2270_v58, %v1684_v60  ;;  %v1691_v3 = vsel %vm1685_vm6, %v1678_v0, 0.0  ;;  %v2528_v4 = vpop.f32.mrb[35].mxu1  ;;  %2367 = vmatprep.subr.bf16.mxu1 %v2645_v52  ;;  %v2653_v60 = vld [vmem:[%s3231_s13 + $0x60] sm:$0xff]   ;;  %v2655_v62 = vld [vmem:[%s3231_s13 + $0x68] sm:$0xff]   ;;  %v2657_v0 = vld [vmem:[%s3231_s13 + $0x70] sm:$0xff]  }
 0x552   : > { %v1692_v5 = vadd.f32 %v1691_v3, %v1690_v63  ;;  %2368 = vmatpush3.bf16.msra.mxu1 %v2646_v53  ;;  %v2654_v61 = vld [vmem:[%s3231_s13 + $0x20] sm:$0xff]   ;;  %v2656_v63 = vld [vmem:[%s3231_s13 + $0x28] sm:$0xff]   ;;  %v2659_v3 = vld [vmem:[%s3231_s13 + $0x78] sm:$0xff]  }
 0x553   : > { %v1702_v6 = vadd.f32 %v1700_v2, %v2897_v16  ;;  %2369 = vmatprep.subr.bf16.mxu1 %v2647_v54  ;;  %v2658_v2 = vld [vmem:[%s3231_s13 + $0x30] sm:$0xff]   ;;  %v2660_v4 = vld [vmem:[%s3231_s13 + $0x38] sm:$0xff]  }
 0x554   : > { %v1701_v7 = vadd.f32 %v2270_v58, %v1692_v5  ;;  %v2651_v58 = vld [vmem:[%s3231_s13 + $0x58] sm:$0xff]   ;;  %v1766_v5 = vlaneseq }
 0x555   : > { %1706 = vadd.xlane.f32.xlu0 %v1702_v6 }
 0x556   : > { %v1703_v8 = vadd.f32 %v1701_v7, %v2899_v17  ;;  %2370 = vmatpush3.bf16.msra.mxu1 %v2648_v55 }
 0x557   : > { %2371 = vmatprep.subr.bf16.mxu1 %v2649_v56 }
 0x558   : > { %v1708_v9 = vsel %vm1685_vm6, %v1703_v8, 0.0 }
 0x559   : > { %1709 = vadd.xlane.f32.xlu1 %v1708_v9 }
 0x55a   : > { %2372 = vmatpush3.bf16.msra.mxu1 %v2650_v57 }
 0x55b   : > { %2373 = vmatprep.subr.bf16.mxu1 %v2651_v58 }
 0x55e   : > { %2374 = vmatpush3.bf16.msra.mxu1 %v2652_v59 }
 0x55f   : > { %2375 = vmatprep.subr.bf16.mxu1 %v2653_v60  ;;  %v2289_v60 = vld [vmem:[%s3232_s14] ss:$0 sm:$0xff] }
 0x562   : > { %2376 = vmatpush3.bf16.msra.mxu1 %v2654_v61 }
 0x563   : > { %2377 = vmatprep.subr.bf16.mxu1 %v2655_v62 }
 0x566   : > { %2378 = vmatpush3.bf16.msra.mxu1 %v2656_v63 }
 0x567   : > { %2379 = vmatprep.subr.bf16.mxu1 %v2657_v0 }
 0x56a   : > { %2380 = vmatpush3.bf16.msra.mxu1 %v2658_v2 }
 0x56b   : > { %2381 = vmatprep.subr.bf16.mxu1 %v2659_v3 }
 0x56e   : > { %2382 = vmatpush3.bf16.msra.mxu1 %v2660_v4 }
 0x5e2   : > { %v1707_v31 = vpop.xlane.xlu0 %1706 }
 0x5e3   : > { %v1712_v12 = vmul.f32 0.0078125, %v1707_v31 }
 0x5e5   : > { %v1714_v16 = vsub.f32 %v1702_v6, %v1712_v12  ;;  %v1767_v6 = vshrl.u32 %v1766_v5, 7 }
 0x5e6   : > { %v1710_v13 = vpop.xlane.xlu1 %1709 }
 0x5e7   : > { %v1713_v14 = vmul.f32 0.0078125, %v1710_v13  ;;  %v1716_v15 = vmul.f32 %v1714_v16, %v1714_v16  ;;  %v1768_v7 = vsub.s32 0, %v1767_v6  ;;  %v1772_v9 = vsub.s32 1, %v1767_v6 }
 0x5e9   : > { %v1715_v17 = vsub.f32 %v1703_v8, %v1713_v14  ;;  %1718 = vadd.xlane.f32.xlu0 %v1716_v15  ;;  %v1764_v8 = vld [vmem:[%s3230_s12] sm:$0x3] }
 0x5ea   : > { %v1769_v10 = vrot.slane %v1764_v8, %v1768_v7  ;;  %v1773_v11 = vrot.slane %v1764_v8, %v1772_v9 }
 0x5eb   : > { %v1717_v18 = vmul.f32 %v1715_v17, %v1715_v17 }
 0x5ed   : > { %v1720_v19 = vsel %vm1685_vm6, %v1717_v18, 0.0 }
 0x5ee   : > { %1721 = vadd.xlane.f32.xlu1 %v1720_v19 }
 0x676   : > { %v1719_v36 = vpop.xlane.xlu0 %1718 }
 0x677   : > { %v1723_v37 = vmul.f32 0.0078125, %v1719_v36 }
 0x679   : > { %v1725_v38 = vadd.f32 1e-05, %v1723_v37 }
 0x67b   : > { %2693 = vrsqrt.f32 %v1725_v38  ;;  %v1722_v39 = vpop.xlane.xlu1 %1721 }
 0x67c   : > { %v1724_v40 = vmul.f32 0.0078125, %v1722_v39 }
 0x67e   : > { %v1726_v41 = vadd.f32 1e-05, %v1724_v40 }
 0x680   : > { %2695 = vrsqrt.f32 %v1726_v41 }
 0x685   : > { %v2694_v42 = vpop.eup %2693 }
 0x686   : > { %v1729_v43 = vmul.f32 %v2694_v42, %v1714_v16 }
 0x688   : > { %v1737_v46 = vmul.f32 %v2271_v44, %v1729_v43 }
 0x68a   : > { %v2696_v45 = vpop.eup %2695  ;;  %v3140_v49 = vadd.f32 %v2272_v47, %v1737_v46 }
 0x68b   : > { %v1730_v1 = vmul.f32 %v2696_v45, %v1715_v17 }
 0x68d   : > { %v1738_v48 = vmul.f32 %v2271_v44, %v1730_v1 }
 0x68f   : > { %v3142_v50 = vadd.f32 %v2272_v47, %v1738_v48 }
 0x691   : > { %v1747_v51 = vpack.c.bf16 %v3142_v50, %v3140_v49 }
 0x693   : > { %1889 = vmatmul.mubr.bf16.vlgmr.msra.gmra.mrb[24].mxu0 %v1747_v51 }
 0x766   : > { %v1890_v31 = vpop.f32.mrb[24].mxu0 }
 0x767   : > { %v1891_v12 = vadd.f32 %v1890_v31, %v1769_v10  ;;  %v1892_v16 = vpop.f32.mrb[25].mxu0 }
 0x768   : > { %v1893_v13 = vadd.f32 %v1892_v16, %v1773_v11  ;;  %v1894_v14 = vpop.f32.mrb[26].mxu0 }
 0x769   : > { %v1903_v15 = vmul.f32 0.044715, %v1891_v12  ;;  %v1895_v17 = vadd.f32 %v1894_v14, %v1769_v10  ;;  %v1896_v18 = vpop.f32.mrb[27].mxu0  ;;  %v1899_v1 = vmul.f32 0.5, %v1891_v12 }
 0x76a   : > { %v1904_v19 = vmul.f32 0.044715, %v1893_v13  ;;  %v1897_v20 = vadd.f32 %v1896_v18, %v1773_v11  ;;  %v1900_v48 = vmul.f32 0.5, %v1893_v13 }
 0x76b   : > { %v1907_v21 = vmul.f32 %v1903_v15, %v1891_v12  ;;  %v1905_v22 = vmul.f32 0.044715, %v1895_v17  ;;  %v1901_v46 = vmul.f32 0.5, %v1895_v17 }
 0x76c   : > { %v1908_v23 = vmul.f32 %v1904_v19, %v1893_v13  ;;  %v1906_v24 = vmul.f32 0.044715, %v1897_v20  ;;  %v1902_v51 = vmul.f32 0.5, %v1897_v20 }
 0x76d   : > { %v1911_v25 = vmul.f32 %v1907_v21, %v1891_v12  ;;  %v1909_v26 = vmul.f32 %v1905_v22, %v1895_v17  ;;  %v2306_v21 = vld [vmem:[%s3233_s15] ss:$0 sm:$0xff] }
 0x76e   : > { %v1912_v27 = vmul.f32 %v1908_v23, %v1893_v13  ;;  %v1910_v28 = vmul.f32 %v1906_v24, %v1897_v20  ;;  %v2307_v23 = vld [vmem:[%s3234_s16] ss:$0 sm:$0xff] }
 0x76f   : > { %v1915_v29 = vadd.f32 %v1911_v25, %v1891_v12  ;;  %v1913_v30 = vmul.f32 %v1909_v26, %v1895_v17 }
 0x770   : > { %v1914_v32 = vmul.f32 %v1910_v28, %v1897_v20  ;;  %v1916_v33 = vadd.f32 %v1912_v27, %v1893_v13 }
 0x771   : > { %v1919_v34 = vmul.f32 0.7978846, %v1915_v29  ;;  %v1917_v35 = vadd.f32 %v1913_v30, %v1895_v17 }
 0x772   : > { %v1918_v36 = vadd.f32 %v1914_v32, %v1897_v20  ;;  %v1920_v37 = vmul.f32 0.7978846, %v1916_v33 }
 0x773   : > { %2697 = vtanh.f32 %v1919_v34  ;;  %v1921_v38 = vmul.f32 0.7978846, %v1917_v35 }
 0x774   : > { %v1922_v39 = vmul.f32 0.7978846, %v1918_v36  ;;  %2699 = vtanh.f32 %v1920_v37 }
 0x775   : > { %2701 = vtanh.f32 %v1921_v38 }
 0x776   : > { %2703 = vtanh.f32 %v1922_v39 }
 0x77d   : > { %v2698_v40 = vpop.eup %2697 }
 0x77e   : > { %v2700_v41 = vpop.eup %2699  ;;  %v1927_v42 = vadd.f32 1.0, %v2698_v40 }
 0x77f   : > { %v2702_v43 = vpop.eup %2701  ;;  %v1928_v44 = vadd.f32 1.0, %v2700_v41 }
 0x780   : > { %v2704_v45 = vpop.eup %2703  ;;  %v1929_v47 = vadd.f32 1.0, %v2702_v43  ;;  %v1931_v53 = vmul.f32 %v1927_v42, %v1899_v1 }
 0x781   : > { %v1930_v52 = vadd.f32 1.0, %v2704_v45  ;;  %v1932_v55 = vmul.f32 %v1928_v44, %v1900_v48 }
 0x782   : > { %v1933_v54 = vmul.f32 %v1929_v47, %v1901_v46 }
 0x783   : > { %v1934_v56 = vmul.f32 %v1930_v52, %v1902_v51 }
 0x784   : > { %v1935_v57 = vpack.c.bf16 %v1933_v54, %v1931_v53 }
 0x785   : > { %v1936_v58 = vpack.c.bf16 %v1934_v56, %v1932_v55 }
 0x787   : > { %2104 = vmatprep.mubr.bf16.mxu1 %v1936_v58 }
 0x788   : > { %2105 = vmatmul.mubr.bf16.vlgmr.msra.gmra.mrb[36].mxu1 %v1935_v57 }
 0x85b   : > { %v2383_v59 = vpop.f32.mrb[36].mxu1 }
 0x85c   : > { %v2384_v61 = vpop.f32.mrb[37].mxu1 }
 0x85d   : > { %v2385_v62 = vadd.f32 %v2384_v61, %v2383_v59  ;;  %v2386_v63 = vpop.f32.mrb[38].mxu1 }
 0x85e   : > { %v2387_v0 = vpop.f32.mrb[39].mxu1 }
 0x85f   : > { %v2107_v2 = vadd.f32 %v2385_v62, %v2289_v60  ;;  %v2388_v3 = vadd.f32 %v2387_v0, %v2386_v63 }
 0x861   : > { %v2110_v4 = vadd.f32 %v2388_v3, %v2289_v60  ;;  %v2113_v5 = vadd.f32 %v2107_v2, %v3140_v49 }
 0x863   : > { %2117 = vadd.xlane.f32.xlu1 %v2113_v5  ;;  %v2114_v6 = vadd.f32 %v2110_v4, %v3142_v50 }
 0x865   : > { %v2119_v7 = vsel %vm1685_vm6, %v2114_v6, 0.0 }
 0x866   : > { %2120 = vadd.xlane.f32.xlu0 %v2119_v7 }
 0x8f0   : > { %v2118_v8 = vpop.xlane.xlu1 %2117 }
 0x8f1   : > { %v2122_v9 = vmul.f32 0.0078125, %v2118_v8 }
 0x8f3   : > { %v2124_v10 = vsub.f32 %v2113_v5, %v2122_v9  ;;  %v2121_v11 = vpop.xlane.xlu0 %2120 }
 0x8f4   : > { %v2123_v31 = vmul.f32 0.0078125, %v2121_v11 }
 0x8f5   : > { %v2126_v12 = vmul.f32 %v2124_v10, %v2124_v10 }
 0x8f6   : > { %v2125_v16 = vsub.f32 %v2114_v6, %v2123_v31 }
 0x8f7   : > { %2128 = vadd.xlane.f32.xlu0 %v2126_v12 }
 0x8f8   : > { %v2127_v13 = vmul.f32 %v2125_v16, %v2125_v16 }
 0x8fa   : > { %v2130_v14 = vsel %vm1685_vm6, %v2127_v13, 0.0 }
 0x8fb   : > { %2131 = vadd.xlane.f32.xlu1 %v2130_v14 }
 0x984   : > { %v2129_v49 = vpop.xlane.xlu0 %2128 }
 0x985   : > { %v2133_v15 = vmul.f32 0.0078125, %v2129_v49 }
 0x987   : > { %v2135_v17 = vadd.f32 1e-05, %v2133_v15 }
 0x988   : > { %v2132_v50 = vpop.xlane.xlu1 %2131 }
 0x989   : > { %2705 = vrsqrt.f32 %v2135_v17  ;;  %v2134_v18 = vmul.f32 0.0078125, %v2132_v50 }
 0x98b   : > { %v2136_v19 = vadd.f32 1e-05, %v2134_v18 }
 0x98d   : > { %2707 = vrsqrt.f32 %v2136_v19 }
 0x993   : > { %v2706_v20 = vpop.eup %2705 }
 0x994   : > { %v2139_v22 = vmul.f32 %v2706_v20, %v2124_v10 }
 0x996   : > { %v2147_v24 = vmul.f32 %v2306_v21, %v2139_v22 }
 0x997   : > { %v2708_v25 = vpop.eup %2707 }
 0x998   : > { %v2155_v26 = vadd.f32 %v2307_v23, %v2147_v24  ;;  %v2140_v27 = vmul.f32 %v2708_v25, %v2125_v16 }
 0x99a   : > { %2157 = vst [vmem:[%s548_s30] sm:$0xff] %v2155_v26  ;;  %v2148_v28 = vmul.f32 %v2306_v21, %v2140_v27 }
 0x99c   : > { %v2156_v29 = vadd.f32 %v2307_v23, %v2148_v28 }
 0x99e   : > { %2158 = vst [vmem:[%s548_s30 + $0x8] sm:$0x1] %v2156_v29 }
 0x99f PF: > { %s27_s24 = sadd.s32 1, %s2715_s24  }
 0x9a0   : > { %p24_p4 = scmp.ge.s32.totalorder %s27_s24, 4  }
 0x9a2   :  { %26 = sbr.rel (!%p24_p4) target bundleno = 3 (0x3), region = 118 }

</bundles_post_ra>
